<compile_context>
chip_gen: v5e
topology: v5e:2x2
jax: 0.10.0
libtpu: 0.0.40
codegen_flags: <defaults>
</compile_context>

<pallas_src>
import jax
import jax.numpy as jnp
from jax.experimental import pallas as pl
from jax.experimental.pallas import tpu as pltpu

V_RAW = 6890                        # SMPL vertex count
V_PAD = 6912                        # 54 * 128 (lane aligned)
TILE_V = 1152                       # 9*128 lanes per grid step -> 6 steps (v7x: 3 per TC)
N_JOINTS = 24
N_BETAS = 10
N_POSE = (N_JOINTS - 1) * 9         # 207
CODE_DIM = 2 * (1 + N_BETAS + N_POSE)   # 436  (male block ++ female block)
CODE_PAD = 448                      # padded to a multiple of 16 (bf16 sublane packing)
PARENTS = (0, 0, 0, 0, 1, 2, 3, 4, 5, 6, 7, 8, 9, 9, 9, 12, 13, 14, 16, 17, 18, 19, 20, 21)


# ----------------------------------------------------------------------------
# Fused SMPL kernel: shape blend + pose blend + linear-blend skinning with the
# global rotation pre-folded into the skinning transforms.
#   code  : [BLp, 448]      bf16  gender-masked [1, beta, lrotmin] (male ++ female), zero-padded
#   M     : [12*BLp, 48]    bf16  gender-masked (rotmat @ G_j) columns; row block (c,n) holds
#                                 M[c,n][b,j]  (c = output coord, n = 0..2 matmul col, 3 = trans)
#   Wx/Wy/Wz: [448, Vp]     bf16  packed [v_template; shapedirs; posedirs] per rest coordinate
#   Wskin : [48, Vp]        bf16  skinning weights^T (rows 0..23 male joints, 24..47 female)
#   out   : [3, BLp, Vp]    f32   rotated (un-translated) vertices, channel-major
# ----------------------------------------------------------------------------
def _smpl_lbs_kernel(code_ref, m_ref, wx_ref, wy_ref, wz_ref, wskin_ref, out_ref):
    code = code_ref[...]                                                      # [BLp, 448]
    px = jnp.dot(code, wx_ref[...], preferred_element_type=jnp.float32)       # [BLp, Tv]
    py = jnp.dot(code, wy_ref[...], preferred_element_type=jnp.float32)
    pz = jnp.dot(code, wz_ref[...], preferred_element_type=jnp.float32)
    # one MXU push chain for all 12 gender-masked skinning blocks
    s = jnp.dot(m_ref[...], wskin_ref[...], preferred_element_type=jnp.float32)  # [12*BLp, Tv]
    blp = code.shape[0]
    for c in range(3):                                                        # static unroll
        base = 4 * c * blp
        # v_out[c] = sum_j w_j * ((R G_j)[c,:] @ v_posed + (R (Gt_j - G_j J_j))[c])
        out_ref[c] = (s[base:base + blp] * px
                      + s[base + blp:base + 2 * blp] * py
                      + s[base + 2 * blp:base + 3 * blp] * pz
                      + s[base + 3 * blp:base + 4 * blp])


def smpl_lbs_pallas(code, M, Wx, Wy, Wz, Wskin, tile_v=TILE_V):
    blp, cdim = code.shape
    vpad = Wx.shape[1]
    assert vpad % tile_v == 0
    grid = (vpad // tile_v,)
    return pl.pallas_call(
        _smpl_lbs_kernel,
        out_shape=jax.ShapeDtypeStruct((3, blp, vpad), jnp.float32),
        grid=grid,
        in_specs=[
            pl.BlockSpec((blp, cdim), lambda i: (0, 0)),            # code (resident)
            pl.BlockSpec(M.shape, lambda i: (0, 0)),                # skin transforms (resident)
            pl.BlockSpec((cdim, tile_v), lambda i: (0, i)),         # Wx
            pl.BlockSpec((cdim, tile_v), lambda i: (0, i)),         # Wy
            pl.BlockSpec((cdim, tile_v), lambda i: (0, i)),         # Wz
            pl.BlockSpec((Wskin.shape[0], tile_v), lambda i: (0, i)),
        ],
        out_specs=pl.BlockSpec((3, blp, tile_v), lambda i: (0, 0, i)),
        compiler_params=pltpu.CompilerParams(dimension_semantics=("parallel",)),
    )(code, M, Wx, Wy, Wz, Wskin)


# ----------------------------------------------------------------------------
# Synthetic (deterministic) SMPL parameters, packed into the kernel layout (bf16 weights).
# ----------------------------------------------------------------------------
def init_params(key):
    ks = jax.random.split(key, 12)

    def make_gender(k0, k1, k2, k3, k4, k5):
        v_template = jax.random.normal(k0, (V_RAW, 3), jnp.float32) * 0.3
        shapedirs = jax.random.normal(k1, (V_RAW, 3, N_BETAS), jnp.float32) * 0.03
        posedirs = jax.random.normal(k2, (V_RAW, 3, N_POSE), jnp.float32) * 0.01
        j_regressor = jax.nn.softmax(jax.random.normal(k3, (N_JOINTS, V_RAW), jnp.float32), -1)
        skin_w = jax.nn.softmax(jax.random.normal(k4, (V_RAW, N_JOINTS), jnp.float32) * 2.0, -1)
        joint_reg = jax.nn.softmax(jax.random.normal(k5, (V_RAW, N_JOINTS), jnp.float32), 0)
        return v_template, shapedirs, posedirs, j_regressor, skin_w, joint_reg

    m = make_gender(*ks[0:6])
    f = make_gender(*ks[6:12])
    pad_v = V_PAD - V_RAW
    pad_c = CODE_PAD - CODE_DIM

    def pack_coord(c):
        rows = jnp.concatenate([m[0][None, :, c], m[1][:, c, :].T, m[2][:, c, :].T,
                                f[0][None, :, c], f[1][:, c, :].T, f[2][:, c, :].T], axis=0)
        rows = jnp.pad(rows, ((0, pad_c), (0, pad_v)))               # [448, V_PAD]
        return rows.astype(jnp.bfloat16)

    Wskin = jnp.pad(jnp.concatenate([m[4].T, f[4].T], axis=0),
                    ((0, 0), (0, pad_v))).astype(jnp.bfloat16)       # [48, V_PAD]

    def fold_joints(gp):                                             # J = Jreg @ v_shaped, prefolded
        vt, sd, jreg = gp[0], gp[1], gp[3]
        j_template = jreg @ vt                                       # [24, 3]
        j_dirs = jnp.einsum('jv,vck->kjc', jreg, sd)                 # [10, 24, 3]
        return j_template, j_dirs

    jt_m, jd_m = fold_joints(m)
    jt_f, jd_f = fold_joints(f)
    joint_reg48 = jnp.concatenate([m[5], f[5]], axis=1)              # [V, 48] f32 (fused genders)
    return {"Wx": pack_coord(0), "Wy": pack_coord(1), "Wz": pack_coord(2), "Wskin": Wskin,
            "J_template_m": jt_m, "J_dirs_m": jd_m,
            "J_template_f": jt_f, "J_dirs_f": jd_f,
            "joint_reg48": joint_reg48}


# ----------------------------------------------------------------------------
# SMPLModule forward
# ----------------------------------------------------------------------------
def smpl_module_forward(params, q, t, b, g):
    B, L = q.shape[0], q.shape[1]
    BL = B * L
    BLp = ((BL + 7) // 8) * 8                                        # row pad (sublane multiple)
    q = q.reshape(BL, 9, 3, 3)
    t = t.reshape(BL, 3)
    b = b.reshape(BL, N_BETAS)
    g = g.reshape(BL)

    eye = jnp.eye(3, dtype=jnp.float32)
    blank1 = jnp.broadcast_to(eye, (BL, 1, 3, 3))
    blank10 = jnp.broadcast_to(eye, (BL, 10, 3, 3))
    blank4 = jnp.broadcast_to(eye, (BL, 4, 3, 3))
    pose = jnp.concatenate([blank1, q[:, 1:3], blank1, q[:, 3:5],
                            blank10, q[:, 5:9], blank4], axis=1)      # [BL, 24, 3, 3]
    rotmat = q[:, 0]                                                  # [BL, 3, 3]

    male = (g > 0.5).astype(jnp.float32)
    female = 1.0 - male                                               # one-sided threshold

    # ---- gender-masked blend-shape code (un-repeated: M = BL rows only) ----
    lrotmin = (pose[:, 1:] - eye).reshape(BL, N_POSE)
    code = jnp.concatenate([male[:, None], b * male[:, None], lrotmin * male[:, None],
                            female[:, None], b * female[:, None], lrotmin * female[:, None]],
                           axis=1)                                    # [BL, 436]
    code = jnp.pad(code, ((0, BLp - BL), (0, CODE_PAD - CODE_DIM))).astype(jnp.bfloat16)

    # ---- rest joints from betas (gendered, prefolded regressor) ----
    J_m = params["J_template_m"] + jnp.einsum('bk,kjc->bjc', b, params["J_dirs_m"])
    J_f = params["J_template_f"] + jnp.einsum('bk,kjc->bjc', b, params["J_dirs_f"])
    J = male[:, None, None] * J_m + female[:, None, None] * J_f       # [BL, 24, 3]

    # ---- kinematic chain: tiny sequential 3x4 transforms (XLA glue) ----
    rots = [pose[:, 0]]
    trs = [J[:, 0]]
    for i in range(1, N_JOINTS):
        p = PARENTS[i]
        rots.append(jnp.matmul(rots[p], pose[:, i]))
        trs.append(trs[p] + jnp.einsum('bij,bj->bi', rots[p], J[:, i] - J[:, p]))
    Grot = jnp.stack(rots, axis=1)                                    # [BL, 24, 3, 3]
    Gt = jnp.stack(trs, axis=1)                                       # [BL, 24, 3]
    At = Gt - jnp.einsum('bjik,bjk->bji', Grot, J)                    # remove rest-pose offset

    # ---- fold the global rotation into the skinning transforms (exact) ----
    Rw = jnp.einsum('bxy,bjyz->bjxz', rotmat, Grot)                   # rotmat @ G_j
    tw = jnp.einsum('bxy,bjy->bjx', rotmat, At)                       # rotmat @ (Gt_j - G_j J_j)

    # ---- gender-mask across the 48 concatenated joints and pack for the kernel ----
    Rg = jnp.concatenate([Rw * male[:, None, None, None],
                          Rw * female[:, None, None, None]], axis=1)  # [BL, 48, 3, 3]
    tg = jnp.concatenate([tw * male[:, None, None],
                          tw * female[:, None, None]], axis=1)        # [BL, 48, 3]
    Mrot = jnp.transpose(Rg, (2, 3, 0, 1))                            # [3(c), 3(n), BL, 48]
    Mt = jnp.transpose(tg, (2, 0, 1))[:, None]                        # [3(c), 1,    BL, 48]
    M = jnp.concatenate([Mrot, Mt], axis=1)                           # [3, 4, BL, 48]
    M = jnp.pad(M, ((0, 0), (0, 0), (0, BLp - BL), (0, 0)))
    M = M.reshape(12 * BLp, 2 * N_JOINTS).astype(jnp.bfloat16)        # [12*BLp, 48]

    # ---- fused blend-shapes + LBS + global-rotation Pallas kernel ----
    out = smpl_lbs_pallas(code, M, params["Wx"], params["Wy"], params["Wz"], params["Wskin"])
    verts_cm = out[:, :BL, :V_RAW]                                    # [3, BL, V], rotated, no t

    # ---- skeleton: one fused gendered regression (single read of the vertex array) ----
    skel48 = jnp.einsum('cbv,vk->bck', verts_cm, params["joint_reg48"])   # [BL, 3, 48]
    skel_cm = (male[:, None, None] * skel48[..., :N_JOINTS]
               + female[:, None, None] * skel48[..., N_JOINTS:])          # [BL, 3, 24]

    # ---- translation rides on the (mandatory) output transpose; exact, no extra HBM pass ----
    t_row = t[:, None, :]                                             # [BL, 1, 3]
    smpl_vertice = (jnp.transpose(verts_cm, (1, 2, 0)) + t_row).reshape(B, L, V_RAW, 3)
    smpl_skeleton = (jnp.transpose(skel_cm, (0, 2, 1)) + t_row).reshape(B, L, N_JOINTS, 3)
    return smpl_vertice, smpl_skeleton


# ----------------------------------------------------------------------------
# Demo
# ----------------------------------------------------------------------------
def _rodrigues(rvec):
    angle = jnp.sqrt(jnp.sum(rvec * rvec, axis=-1, keepdims=True) + 1e-12)
    axis = rvec / (angle + 1e-8)
    c = jnp.cos(angle)[..., None]
    s = jnp.sin(angle)[..., None]
    kx, ky, kz = axis[..., 0], axis[..., 1], axis[..., 2]
    z = jnp.zeros_like(kx)
    K = jnp.stack([jnp.stack([z, -kz, ky], -1),
                   jnp.stack([kz, z, -kx], -1),
                   jnp.stack([-ky, kx, z], -1)], -2)
    outer = axis[..., :, None] * axis[..., None, :]
    return jnp.eye(3, dtype=rvec.dtype) * c + s * K + (1.0 - c) * outer


if __name__ == "__main__":
    key = jax.random.PRNGKey(0)
    k_param, k_q, k_t, k_b, k_g = jax.random.split(key, 5)

    batch_size, length_size = 2, 3

    params = init_params(k_param)
    q = _rodrigues(jax.random.normal(k_q, (batch_size, length_size, 9, 3), jnp.float32) * 0.3)
    t = jax.random.normal(k_t, (batch_size, length_size, 1, 3), jnp.float32) * 0.1
    b = jax.random.normal(k_b, (batch_size, length_size, N_BETAS), jnp.float32) * 0.5
    g = (jax.random.uniform(k_g, (batch_size, length_size)) > 0.5).astype(jnp.float32)

    fwd = jax.jit(smpl_module_forward)
    smpl_vertice, smpl_skeleton = fwd(params, q, t, b, g)
    jax.block_until_ready((smpl_vertice, smpl_skeleton))

    assert smpl_vertice.shape == (batch_size, length_size, V_RAW, 3)
    assert smpl_skeleton.shape == (batch_size, length_size, N_JOINTS, 3)
    assert bool(jnp.all(jnp.isfinite(smpl_vertice)))
    assert bool(jnp.all(jnp.isfinite(smpl_skeleton)))
    print("KERNEL_OK")
</pallas_src>

<mosaic_0001>
module attributes {stable_mosaic.version = 11 : i64} {
  func.func @_smpl_lbs_kernel(%arg0: i32, %arg1: memref<8x448xbf16, #tpu.memory_space<vmem>>, %arg2: memref<96x48xbf16, #tpu.memory_space<vmem>>, %arg3: memref<448x1152xbf16, #tpu.memory_space<vmem>>, %arg4: memref<448x1152xbf16, #tpu.memory_space<vmem>>, %arg5: memref<448x1152xbf16, #tpu.memory_space<vmem>>, %arg6: memref<48x1152xbf16, #tpu.memory_space<vmem>>, %arg7: memref<3x8x1152xf32, #tpu.memory_space<vmem>>) attributes {dimension_semantics = [#tpu.dimension_semantics<parallel>], iteration_bounds = array<i64: 6>, scalar_prefetch = 0 : i64, scratch_operands = 0 : i64, tpu.core_type = #tpu.core_type<tc>, window_params = [{pipeline_mode = #tpu.pipeline_mode<synchronous>, transform_indices = @transform_0, window_bounds = array<i64: 8, 448>}, {pipeline_mode = #tpu.pipeline_mode<synchronous>, transform_indices = @transform_1, window_bounds = array<i64: 96, 48>}, {transform_indices = @transform_2, window_bounds = array<i64: 448, 1152>}, {transform_indices = @transform_3, window_bounds = array<i64: 448, 1152>}, {transform_indices = @transform_4, window_bounds = array<i64: 448, 1152>}, {transform_indices = @transform_5, window_bounds = array<i64: 48, 1152>}, {transform_indices = @transform_6, window_bounds = array<i64: 3, 8, 1152>}]} {
    %c0 = arith.constant 0 : index
    %c0_0 = arith.constant 0 : index
    %0 = vector.load %arg1[%c0, %c0_0] : memref<8x448xbf16, #tpu.memory_space<vmem>>, vector<8x448xbf16>
    %c0_1 = arith.constant 0 : index
    %c0_2 = arith.constant 0 : index
    %1 = vector.load %arg3[%c0_1, %c0_2] : memref<448x1152xbf16, #tpu.memory_space<vmem>>, vector<448x1152xbf16>
    %cst = arith.constant dense<0.000000e+00> : vector<8x1152xf32>
    %2 = tpu.matmul %0, %1, %cst {dimension_numbers = #tpu.dot_dimension_numbers<[1], [0], [0], [1], [0, 0, 1, 1], [], []>} : vector<8x448xbf16>, vector<448x1152xbf16>, vector<8x1152xf32> -> vector<8x1152xf32>
    %c0_3 = arith.constant 0 : index
    %c0_4 = arith.constant 0 : index
    %3 = vector.load %arg4[%c0_3, %c0_4] : memref<448x1152xbf16, #tpu.memory_space<vmem>>, vector<448x1152xbf16>
    %cst_5 = arith.constant dense<0.000000e+00> : vector<8x1152xf32>
    %4 = tpu.matmul %0, %3, %cst_5 {dimension_numbers = #tpu.dot_dimension_numbers<[1], [0], [0], [1], [0, 0, 1, 1], [], []>} : vector<8x448xbf16>, vector<448x1152xbf16>, vector<8x1152xf32> -> vector<8x1152xf32>
    %c0_6 = arith.constant 0 : index
    %c0_7 = arith.constant 0 : index
    %5 = vector.load %arg5[%c0_6, %c0_7] : memref<448x1152xbf16, #tpu.memory_space<vmem>>, vector<448x1152xbf16>
    %cst_8 = arith.constant dense<0.000000e+00> : vector<8x1152xf32>
    %6 = tpu.matmul %0, %5, %cst_8 {dimension_numbers = #tpu.dot_dimension_numbers<[1], [0], [0], [1], [0, 0, 1, 1], [], []>} : vector<8x448xbf16>, vector<448x1152xbf16>, vector<8x1152xf32> -> vector<8x1152xf32>
    %c0_9 = arith.constant 0 : index
    %c0_10 = arith.constant 0 : index
    %7 = vector.load %arg2[%c0_9, %c0_10] : memref<96x48xbf16, #tpu.memory_space<vmem>>, vector<96x48xbf16>
    %c0_11 = arith.constant 0 : index
    %c0_12 = arith.constant 0 : index
    %8 = vector.load %arg6[%c0_11, %c0_12] : memref<48x1152xbf16, #tpu.memory_space<vmem>>, vector<48x1152xbf16>
    %cst_13 = arith.constant dense<0.000000e+00> : vector<96x1152xf32>
    %9 = tpu.matmul %7, %8, %cst_13 {dimension_numbers = #tpu.dot_dimension_numbers<[1], [0], [0], [1], [0, 0, 1, 1], [], []>} : vector<96x48xbf16>, vector<48x1152xbf16>, vector<96x1152xf32> -> vector<96x1152xf32>
    %10 = vector.extract_strided_slice %9 {offsets = [0, 0], sizes = [8, 1152], strides = [1, 1]} : vector<96x1152xf32> to vector<8x1152xf32>
    %11 = arith.mulf %10, %2 : vector<8x1152xf32>
    %12 = vector.extract_strided_slice %9 {offsets = [8, 0], sizes = [8, 1152], strides = [1, 1]} : vector<96x1152xf32> to vector<8x1152xf32>
    %13 = arith.mulf %12, %4 : vector<8x1152xf32>
    %14 = arith.addf %11, %13 : vector<8x1152xf32>
    %15 = vector.extract_strided_slice %9 {offsets = [16, 0], sizes = [8, 1152], strides = [1, 1]} : vector<96x1152xf32> to vector<8x1152xf32>
    %16 = arith.mulf %15, %6 : vector<8x1152xf32>
    %17 = arith.addf %14, %16 : vector<8x1152xf32>
    %18 = vector.extract_strided_slice %9 {offsets = [24, 0], sizes = [8, 1152], strides = [1, 1]} : vector<96x1152xf32> to vector<8x1152xf32>
    %19 = arith.addf %17, %18 : vector<8x1152xf32>
    %c0_14 = arith.constant 0 : index
    %c0_15 = arith.constant 0 : index
    %c0_16 = arith.constant 0 : index
    %20 = vector.load %arg7[%c0_14, %c0_15, %c0_16] : memref<3x8x1152xf32, #tpu.memory_space<vmem>>, vector<1x8x1152xf32>
    %21 = vector.shape_cast %20 : vector<1x8x1152xf32> to vector<8x1152xf32>
    %22 = vector.shape_cast %19 : vector<8x1152xf32> to vector<1x8x1152xf32>
    tpu.vector_store %arg7[%c0_14, %c0_15, %c0_16], %22 {strides = array<i32>} : memref<3x8x1152xf32, #tpu.memory_space<vmem>>, vector<1x8x1152xf32>,
    %23 = vector.extract_strided_slice %9 {offsets = [32, 0], sizes = [8, 1152], strides = [1, 1]} : vector<96x1152xf32> to vector<8x1152xf32>
    %24 = arith.mulf %23, %2 : vector<8x1152xf32>
    %25 = vector.extract_strided_slice %9 {offsets = [40, 0], sizes = [8, 1152], strides = [1, 1]} : vector<96x1152xf32> to vector<8x1152xf32>
    %26 = arith.mulf %25, %4 : vector<8x1152xf32>
    %27 = arith.addf %24, %26 : vector<8x1152xf32>
    %28 = vector.extract_strided_slice %9 {offsets = [48, 0], sizes = [8, 1152], strides = [1, 1]} : vector<96x1152xf32> to vector<8x1152xf32>
    %29 = arith.mulf %28, %6 : vector<8x1152xf32>
    %30 = arith.addf %27, %29 : vector<8x1152xf32>
    %31 = vector.extract_strided_slice %9 {offsets = [56, 0], sizes = [8, 1152], strides = [1, 1]} : vector<96x1152xf32> to vector<8x1152xf32>
    %32 = arith.addf %30, %31 : vector<8x1152xf32>
    %c1 = arith.constant 1 : index
    %c0_17 = arith.constant 0 : index
    %c0_18 = arith.constant 0 : index
    %33 = vector.load %arg7[%c1, %c0_17, %c0_18] : memref<3x8x1152xf32, #tpu.memory_space<vmem>>, vector<1x8x1152xf32>
    %34 = vector.shape_cast %33 : vector<1x8x1152xf32> to vector<8x1152xf32>
    %35 = vector.shape_cast %32 : vector<8x1152xf32> to vector<1x8x1152xf32>
    tpu.vector_store %arg7[%c1, %c0_17, %c0_18], %35 {strides = array<i32>} : memref<3x8x1152xf32, #tpu.memory_space<vmem>>, vector<1x8x1152xf32>,
    %36 = vector.extract_strided_slice %9 {offsets = [64, 0], sizes = [8, 1152], strides = [1, 1]} : vector<96x1152xf32> to vector<8x1152xf32>
    %37 = arith.mulf %36, %2 : vector<8x1152xf32>
    %38 = vector.extract_strided_slice %9 {offsets = [72, 0], sizes = [8, 1152], strides = [1, 1]} : vector<96x1152xf32> to vector<8x1152xf32>
    %39 = arith.mulf %38, %4 : vector<8x1152xf32>
    %40 = arith.addf %37, %39 : vector<8x1152xf32>
    %41 = vector.extract_strided_slice %9 {offsets = [80, 0], sizes = [8, 1152], strides = [1, 1]} : vector<96x1152xf32> to vector<8x1152xf32>
    %42 = arith.mulf %41, %6 : vector<8x1152xf32>
    %43 = arith.addf %40, %42 : vector<8x1152xf32>
    %44 = vector.extract_strided_slice %9 {offsets = [88, 0], sizes = [8, 1152], strides = [1, 1]} : vector<96x1152xf32> to vector<8x1152xf32>
    %45 = arith.addf %43, %44 : vector<8x1152xf32>
    %c2 = arith.constant 2 : index
    %c0_19 = arith.constant 0 : index
    %c0_20 = arith.constant 0 : index
    %46 = vector.load %arg7[%c2, %c0_19, %c0_20] : memref<3x8x1152xf32, #tpu.memory_space<vmem>>, vector<1x8x1152xf32>
    %47 = vector.shape_cast %46 : vector<1x8x1152xf32> to vector<8x1152xf32>
    %48 = vector.shape_cast %45 : vector<8x1152xf32> to vector<1x8x1152xf32>
    tpu.vector_store %arg7[%c2, %c0_19, %c0_20], %48 {strides = array<i32>} : memref<3x8x1152xf32, #tpu.memory_space<vmem>>, vector<1x8x1152xf32>,
    return
  }
  func.func @transform_0(%arg0: i32) -> (i32, i32) {
    %c0_i32 = arith.constant 0 : i32
    %c0_i32_0 = arith.constant 0 : i32
    %c0_i32_1 = arith.constant 0 : i32
    return %c0_i32, %c0_i32_0 : i32, i32
  }
  func.func @transform_1(%arg0: i32) -> (i32, i32) {
    %c0_i32 = arith.constant 0 : i32
    %c0_i32_0 = arith.constant 0 : i32
    %c0_i32_1 = arith.constant 0 : i32
    return %c0_i32, %c0_i32_0 : i32, i32
  }
  func.func @transform_2(%arg0: i32) -> (i32, i32) {
    %c0_i32 = arith.constant 0 : i32
    %c0_i32_0 = arith.constant 0 : i32
    return %c0_i32, %arg0 : i32, i32
  }
  func.func @transform_3(%arg0: i32) -> (i32, i32) {
    %c0_i32 = arith.constant 0 : i32
    %c0_i32_0 = arith.constant 0 : i32
    return %c0_i32, %arg0 : i32, i32
  }
  func.func @transform_4(%arg0: i32) -> (i32, i32) {
    %c0_i32 = arith.constant 0 : i32
    %c0_i32_0 = arith.constant 0 : i32
    return %c0_i32, %arg0 : i32, i32
  }
  func.func @transform_5(%arg0: i32) -> (i32, i32) {
    %c0_i32 = arith.constant 0 : i32
    %c0_i32_0 = arith.constant 0 : i32
    return %c0_i32, %arg0 : i32, i32
  }
  func.func @transform_6(%arg0: i32) -> (i32, i32, i32) {
    %c0_i32 = arith.constant 0 : i32
    %c0_i32_0 = arith.constant 0 : i32
    %c0_i32_1 = arith.constant 0 : i32
    return %c0_i32, %c0_i32_0, %arg0 : i32, i32, i32
  }
}

</mosaic_0001>

<bundles_post_ra>
// kernel: sub.57
= control target key start
LH: loop header
LB: loop body
LE: loop exit
PB: predicated region body
PF: predicated region fallthrough
CT: control target
= control target key end

     0   :  { %s219_s0 = inlined_call_operand.vmem [shape: f32[6,24,3], index: 0, kind: input, shape index: {}]   ;;  %s220_s1 = inlined_call_operand.vmem [shape: f32[6,24,3], index: 1, kind: input, shape index: {}]   ;;  %s221_s2 = inlined_call_operand.vmem [shape: bf16[6,24,3], index: 2, kind: output, shape index: {}]  }
   0x1   :  { %v3_v0 = vld [vmem:[%s219_s0] sm:$0xff]  ;;  %v99_v2 = vld [vmem:[%s219_s0 + $0x18] sm:$0xff]  ;;  %v102_v5 = vld [vmem:[%s219_s0 + $0x30] sm:$0xff] }
   0x2   :  { %v4_v1 = vld [vmem:[%s220_s1] sm:$0xff]  ;;  %v100_v4 = vld [vmem:[%s220_s1 + $0x18] sm:$0xff]  ;;  %v103_v6 = vld [vmem:[%s220_s1 + $0x30] sm:$0xff] }
   0x3   :  { %v7_v3 = vsub.f32 %v3_v0, %v4_v1  ;;  %v17_v7 = vsub.f32 %v99_v2, %v100_v4  ;;  %v28_v8 = vsub.f32 %v102_v5, %v103_v6  ;;  %v105_v9 = vld [vmem:[%s219_s0 + $0x8] sm:$0xff]  ;;  %v108_v11 = vld [vmem:[%s219_s0 + $0x20] sm:$0xff]  ;;  %v111_v15 = vld [vmem:[%s219_s0 + $0x38] sm:$0xff] }
   0x4   :  { %v106_v10 = vld [vmem:[%s220_s1 + $0x8] sm:$0xff]  ;;  %v109_v14 = vld [vmem:[%s220_s1 + $0x20] sm:$0xff]  ;;  %v112_v16 = vld [vmem:[%s220_s1 + $0x38] sm:$0xff] }
   0x5   :  { %v9_v12 = vpack.c.bf16 0.0, %v7_v3  ;;  %v39_v13 = vsub.f32 %v105_v9, %v106_v10  ;;  %v20_v17 = vpack.c.bf16 0.0, %v17_v7  ;;  %v31_v18 = vpack.c.bf16 0.0, %v28_v8  ;;  %v114_v21 = vld [vmem:[%s219_s0 + $0x10] sm:$0xff]  ;;  %v117_v23 = vld [vmem:[%s219_s0 + $0x28] sm:$0xff]  ;;  %v120_v27 = vld [vmem:[%s219_s0 + $0x40] sm:$0xff] }
   0x6   :  { %v50_v19 = vsub.f32 %v108_v11, %v109_v14  ;;  %v61_v20 = vsub.f32 %v111_v15, %v112_v16  ;;  %v115_v22 = vld [vmem:[%s220_s1 + $0x10] sm:$0xff]  ;;  %v118_v26 = vld [vmem:[%s220_s1 + $0x28] sm:$0xff]  ;;  %v121_v28 = vld [vmem:[%s220_s1 + $0x40] sm:$0xff] }
   0x7   :  { %10 = vst [vmem:[%s221_s2] sm:$0xf] %v9_v12  ;;  %v42_v24 = vpack.c.bf16 0.0, %v39_v13  ;;  %v72_v25 = vsub.f32 %v114_v21, %v115_v22  ;;  %v83_v31 = vsub.f32 %v117_v23, %v118_v26  ;;  %v94_v32 = vsub.f32 %v120_v27, %v121_v28 }
   0x8   :  { %101 = vst [vmem:[%s221_s2 + $0xc] sm:$0xf] %v20_v17  ;;  %v53_v29 = vpack.c.bf16 0.0, %v50_v19  ;;  %v64_v30 = vpack.c.bf16 0.0, %v61_v20 }
   0x9   :  { %104 = vst [vmem:[%s221_s2 + $0x18] sm:$0xf] %v31_v18  ;;  %v75_v33 = vpack.c.bf16 0.0, %v72_v25  ;;  %v86_v34 = vpack.c.bf16 0.0, %v83_v31  ;;  %v97_v35 = vpack.c.bf16 0.0, %v94_v32 }
   0xa   :  { %107 = vst [vmem:[%s221_s2 + $0x4] sm:$0xf] %v42_v24 }
   0xb   :  { %110 = vst [vmem:[%s221_s2 + $0x10] sm:$0xf] %v53_v29 }
   0xc   :  { %113 = vst [vmem:[%s221_s2 + $0x1c] sm:$0xf] %v64_v30 }
   0xd   :  { %116 = vst [vmem:[%s221_s2 + $0x8] sm:$0xf] %v75_v33 }
   0xe   :  { %119 = vst [vmem:[%s221_s2 + $0x14] sm:$0xf] %v86_v34 }
   0xf   :  { %122 = vst [vmem:[%s221_s2 + $0x20] sm:$0xf] %v97_v35 }

// kernel: smpl_module_forward.1
= control target key start
LH: loop header
LB: loop body
LE: loop exit
PB: predicated region body
PF: predicated region fallthrough
CT: control target
= control target key end

     0   :  { %s14344_s0 = inlined_call_operand.vmem [shape: bf16[8,448], index: 0, kind: input, shape index: {}]   ;;  %s14345_s1 = inlined_call_operand.vmem [shape: bf16[96,48], index: 1, kind: input, shape index: {}]   ;;  %s14346_s2 = inlined_call_operand.hbm [shape: bf16[448,6912], index: 2, kind: input, shape index: {}]   ;;  %s14347_s3 = inlined_call_operand.hbm [shape: bf16[448,6912], index: 3, kind: input, shape index: {}]   ;;  %s14348_s4 = inlined_call_operand.hbm [shape: bf16[448,6912], index: 4, kind: input, shape index: {}]   ;;  %s14349_s5 = inlined_call_operand.vmem [shape: bf16[48,6912], index: 5, kind: input, shape index: {}]   ;;  %s14350_s6 = inlined_call_operand.vmem [shape: f32[3,8,6912], index: 6, kind: output, shape index: {}]  }
   0x1   :  { %14354 = sst [smem:[#allocation14_spill]] %s14347_s3 }
   0x2   :  { %14355 = sst [smem:[#allocation15_spill]] %s14350_s6 }
   0x3   :  { %11 = vsyncpa [#allocation3], 0 }
   0x4   :  { %13 = vsyncpa [#allocation3 + $0x1], 0 }
   0x5   :  { %14 = vsyncpa [#allocation5], 0 }
   0x6   :  { %16 = vsyncpa [#allocation5 + $0x1], 0  ;;  %s11848_s21 = smov 0   ;;  %s11850_s22 = smov 0  }
   0x7   :  { %s11852_s23 = smov 0   ;;  %s11854_s24 = smov 0  }
   0x8 LB: > { %14356 = sst [smem:[#allocation11_spill]] %s11804_s23  ;;  %s11867_s25 = sadd.s32 4294967295, %s11808_s24   ;;  %s11808_s24 = sphi %s11854_s24, %s14364_s24   ;;  %s11804_s23 = sphi %s11852_s23, %s14366_s23   ;;  %s11800_s22 = sphi %s11850_s22, %s14368_s22   ;;  %s11796_s21 = sphi %s11848_s21, %s14367_s21  }
   0x9   : > { %s11870_s26 = sadd.s32 1, %s11808_s24   ;;  %s71_s28 = sadd.s32 1, %s11804_s23 }
   0xa   : > { %14357 = sst [smem:[#allocation12_spill]] %s11870_s26  ;;  %s68_s27 = ssub.s32 %s11808_s24, %s11870_s26 }
   0xb   : > { %p69_p0 = scmp.eq.s32.totalorder %s68_s27, 0  ;;  %p78_p1 = scmp.ne.s32.totalorder %s11804_s23, %s11800_s22 }
   0xc   : > { %p79_p2 = scmp.eq.s32.totalorder %s11808_s24, 0  ;;  %p84_p3 = scmp.ne.s32.totalorder %s11800_s22, %s11796_s21 }
   0xd   : > { %s11880_s29 = scalar_select %p69_p0, %s11804_s23, %s71_s28  }
   0xe   : > { %p11882_p4 = por %p79_p2, %p78_p1  ;;  %p85_p5 = scmp.eq.s32.totalorder %s11867_s25, 0 }
   0xf   : > { %14358 = sst [smem:[#allocation13_spill]] %s11880_s29  ;;  %p186_p6 = scmp.eq.s32.totalorder %s11867_s25, 5 }
  0x10   : > { %p11888_p7 = por %p85_p5, %p84_p3  ;;  %p7569_p9 = scmp.ge.s32.totalorder %s11808_s24, 6 }
  0x11   : > { %p11892_p8 = por %p186_p6, %p78_p1  ;;  %s11898_s9 = sand.u32 (!%p7569_p9), 1, %s11804_s23  }
  0x12   : > { %214 = sbr.rel (%p7569_p9) target bundleno = 103 (0x67), region = 24  ;;  %s240_s12 = sand.u32 (!%p7569_p9), 1, %s11808_s24  }
  0x13   : > { %s11901_s10 = smul.u32 (!%p7569_p9), 36, %s11808_s24  ;;  %s14362_s3 = sld [smem:[#allocation14_spill]] (!%p7569_p9) }
  0x14   : > { %s11904_s11 = smul.u32 (!%p7569_p9), 2016, %s11898_s9  ;;  %s11912_s19 = scalar_lea.sflag (!%p7569_p9), [#allocation5], %s240_s12 }
  0x16   : > { %s244_s17 = scalar_lea.vmem (!%p7569_p9), [#allocation4], %s11904_s11 }
  0x17   : > { %s252_s18 = sshll.u32 %s244_s17, 4  ;;  %s253_s18 = int_to_ptr.vmem [resolvable:$true] %s252_s18 }
  0x19   : > { %s249_s15 = scalar_lea.hbm %s14362_s3, %s11901_s10  ;;  %s11692_s29 = scalar_lea.hbm %s14362_s3, 12096 }
  0x1a   : > { %s250_s16 = sshll.u32 %s249_s15, 4  ;;  %s251_s16 = int_to_ptr.hbm [resolvable:$true] %s250_s16 }
  0x1b   : > { %s11686_s20 = sshra.s32 %s251_s16, 4  ;;  %s11687_s20 = int_to_ptr.hbm [resolvable:$true] %s11686_s20 }
  0x1c   : > { %s11688_s21 = scalar_lea.hbm %s11687_s20, 2016  ;;  %p11693_p13 = scmp.lt.s32.totalorder %s11687_s20, %s14362_s3 }
  0x1d   : > { %p11689_p10 = scmp.ne.s32.totalorder %s11687_s20, %s11688_s21  ;;  %p11694_p0 = scmp.lt.s32.totalorder %s11692_s29, %s11688_s21 }
  0x1f   : > { %p11690_p11 = pnand %p11689_p10, %p11882_p4  ;;  %p11695_p1 = por %p11694_p0, %p11693_p13 }
  0x21   : > { %p11691_p12 = pneg %p11690_p11 }
  0x23   : > { %p11696_p2 = pnand %p11695_p1, %p11691_p12 }
  0x25   : > { %11699 = shalt.err (!%p11696_p2)
}
  0x26   : > { %s11810_s12 = smov 3456   ;;  %s11811_s15 = smov 576  }
  0x27   : > { %s11812_s17 = smov 36   ;;  %s227_s29 = scalar_lea.hbm %s14346_s2, %s11901_s10 }
  0x28   : > { %11646 = dma.hbm_to_vmem [thread:$0]  (%p11882_p4), %s251_s16, 32256, %s253_s18, %s11912_s19, %s11810_s12, %s11811_s15, %s11812_s17  }
  0x29   : > { %s222_s21 = scalar_lea.vmem [#allocation2], %s11904_s11  ;;  %s228_s13 = sshll.u32 %s227_s29, 4  ;;  %s229_s13 = int_to_ptr.hbm [resolvable:$true] %s228_s13 }
  0x2a   : > { %s230_s28 = sshll.u32 %s222_s21, 4  ;;  %s219_s14 = scalar_lea.sflag [#allocation3], %s11898_s9  ;;  %s231_s28 = int_to_ptr.vmem [resolvable:$true] %s230_s28 }
  0x2b   : > { %s11714_s3 = sshra.s32 %s229_s13, 4  ;;  %s11720_s16 = scalar_lea.hbm %s14346_s2, 12096  ;;  %s11715_s3 = int_to_ptr.hbm [resolvable:$true] %s11714_s3 }
  0x2c   : > { %s11716_s23 = scalar_lea.hbm %s11715_s3, 2016  ;;  %p11721_p9 = scmp.lt.s32.totalorder %s11715_s3, %s14346_s2 }
  0x2d   : > { %p11717_p3 = scmp.ne.s32.totalorder %s11715_s3, %s11716_s23  ;;  %p11722_p10 = scmp.lt.s32.totalorder %s11720_s16, %s11716_s23 }
  0x2f   : > { %p11718_p5 = pnand %p11717_p3, %p11882_p4  ;;  %p11723_p11 = por %p11722_p10, %p11721_p9 }
  0x31   : > { %p11719_p6 = pneg %p11718_p5 }
  0x33   : > { %p11724_p12 = pnand %p11723_p11, %p11719_p6 }
  0x35   : > { %11727 = shalt.err (!%p11724_p12)
}
  0x36   : > { %11645 = dma.hbm_to_vmem [thread:$0]  (%p11882_p4), %s229_s13, 32256, %s231_s28, %s219_s14, %s11810_s12, %s11811_s15, %s11812_s17  }
  0x37   : > { %s271_s26 = scalar_lea.hbm %s14348_s4, %s11901_s10  ;;  %s266_s29 = scalar_lea.vmem [#allocation6], %s11904_s11 }
  0x38   : > { %s274_s21 = sshll.u32 %s266_s29, 4  ;;  %s272_s3 = sshll.u32 %s271_s26, 4  ;;  %s275_s21 = int_to_ptr.vmem [resolvable:$true] %s274_s21  ;;  %s273_s3 = int_to_ptr.hbm [resolvable:$true] %s272_s3 }
  0x39   : > { %s11742_s23 = sshra.s32 %s273_s3, 4  ;;  %s11748_s28 = scalar_lea.hbm %s14348_s4, 12096  ;;  %s11743_s23 = int_to_ptr.hbm [resolvable:$true] %s11742_s23 }
  0x3a   : > { %s11744_s16 = scalar_lea.hbm %s11743_s23, 2016  ;;  %p11749_p2 = scmp.lt.s32.totalorder %s11743_s23, %s14348_s4 }
  0x3b   : > { %p11745_p13 = scmp.ne.s32.totalorder %s11743_s23, %s11744_s16  ;;  %p11750_p3 = scmp.lt.s32.totalorder %s11748_s28, %s11744_s16 }
  0x3d   : > { %p11746_p0 = pnand %p11745_p13, %p11882_p4  ;;  %p11751_p5 = por %p11750_p3, %p11749_p2 }
  0x3f   : > { %p11747_p1 = pneg %p11746_p0 }
  0x41   : > { %p11752_p6 = pnand %p11751_p5, %p11747_p1 }
  0x43   : > { %11755 = shalt.err (!%p11752_p6)
}
  0x44   : > { %11647 = dma.hbm_to_vmem [thread:$0]  (%p11882_p4), %s273_s3, 32256, %s275_s21, %s11912_s19, %s11810_s12, %s11811_s15, %s11812_s17  }
  0x45   : > { %283 = sbr.rel (!%p11882_p4) target bundleno = 103 (0x67), region = 40  ;;  %s11973_s26 = scalar_lea.vmem (%p11882_p4), %s14349_s5, %s11901_s10 }
  0x46   : > { %s11642_s11 = smul.u32 (%p11882_p4), 216, %s11898_s9  ;;  %v305_v0 = vld [vmem:[%s11973_s26] sm:$0xff] (%p11882_p4)  ;;  %v307_v1 = vld [vmem:[%s11973_s26 + $0x8] sm:$0xff] (%p11882_p4)  ;;  %v309_v2 = vld [vmem:[%s11973_s26 + $0x10] sm:$0xff] (%p11882_p4) }
  0x47   : > { %v311_v3 = vld [vmem:[%s11973_s26 + $0x18] sm:$0xff] (%p11882_p4)  ;;  %v315_v5 = vld [vmem:[%s11973_s26 + $0xe0] sm:$0xff] (%p11882_p4)  ;;  %v317_v6 = vld [vmem:[%s11973_s26 + $0xe8] sm:$0xff] (%p11882_p4) }
  0x48   : > { %s11978_s30 = scalar_lea.vmem (%p11882_p4), [#allocation7], %s11642_s11  ;;  %v313_v4 = vld [vmem:[%s11973_s26 + $0xd8] sm:$0xff] (%p11882_p4)  ;;  %v319_v7 = vld [vmem:[%s11973_s26 + $0xf0] sm:$0xff] (%p11882_p4)  ;;  %v325_v10 = vld [vmem:[%s11973_s26 + $0x1c0] sm:$0xff] (%p11882_p4) }
  0x49   : > { %306 = vst [vmem:[%s11978_s30] sm:$0xff] (%p11882_p4), %v305_v0  ;;  %v321_v8 = vld [vmem:[%s11973_s26 + $0x1b0] sm:$0xff] (%p11882_p4)  ;;  %v323_v9 = vld [vmem:[%s11973_s26 + $0x1b8] sm:$0xff] (%p11882_p4)  ;;  %v327_v11 = vld [vmem:[%s11973_s26 + $0x1c8] sm:$0xff] (%p11882_p4) }
  0x4a   : > { %308 = vst [vmem:[%s11978_s30 + $0x8] sm:$0xff] %v307_v1  ;;  %v329_v12 = vld [vmem:[%s11973_s26 + $0x288] sm:$0xff]  ;;  %v331_v13 = vld [vmem:[%s11973_s26 + $0x290] sm:$0xff]  ;;  %v333_v14 = vld [vmem:[%s11973_s26 + $0x298] sm:$0xff] }
  0x4b   : > { %310 = vst [vmem:[%s11978_s30 + $0x10] sm:$0xff] %v309_v2  ;;  %v335_v15 = vld [vmem:[%s11973_s26 + $0x2a0] sm:$0xff]  ;;  %v339_v17 = vld [vmem:[%s11973_s26 + $0x368] sm:$0xff]  ;;  %v341_v18 = vld [vmem:[%s11973_s26 + $0x370] sm:$0xff] }
  0x4c   : > { %312 = vst [vmem:[%s11978_s30 + $0x18] sm:$0xff] %v311_v3  ;;  %v337_v16 = vld [vmem:[%s11973_s26 + $0x360] sm:$0xff]  ;;  %v343_v19 = vld [vmem:[%s11973_s26 + $0x378] sm:$0xff]  ;;  %v349_v22 = vld [vmem:[%s11973_s26 + $0x448] sm:$0xff] }
  0x4d   : > { %314 = vst [vmem:[%s11978_s30 + $0x24] sm:$0xff] %v313_v4  ;;  %v345_v20 = vld [vmem:[%s11973_s26 + $0x438] sm:$0xff]  ;;  %v347_v21 = vld [vmem:[%s11973_s26 + $0x440] sm:$0xff]  ;;  %v351_v23 = vld [vmem:[%s11973_s26 + $0x450] sm:$0xff] }
  0x4e   : > { %316 = vst [vmem:[%s11978_s30 + $0x2c] sm:$0xff] %v315_v5  ;;  %v7574_v24 = vld [vmem:[%s11973_s26 + $0x20] sm:$0xf]  ;;  %v7576_v25 = vld [vmem:[%s11973_s26 + $0xf8] sm:$0xf] }
  0x4f   : > { %318 = vst [vmem:[%s11978_s30 + $0x34] sm:$0xff] %v317_v6  ;;  %v7578_v26 = vld [vmem:[%s11973_s26 + $0x1d0] sm:$0xf]  ;;  %v7580_v27 = vld [vmem:[%s11973_s26 + $0x2a8] sm:$0xf] }
  0x50   : > { %320 = vst [vmem:[%s11978_s30 + $0x3c] sm:$0xff] %v319_v7  ;;  %v7582_v28 = vld [vmem:[%s11973_s26 + $0x380] sm:$0xf]  ;;  %v7584_v29 = vld [vmem:[%s11973_s26 + $0x458] sm:$0xf] }
  0x51   : > { %322 = vst [vmem:[%s11978_s30 + $0x48] sm:$0xff] %v321_v8 }
  0x52   : > { %324 = vst [vmem:[%s11978_s30 + $0x50] sm:$0xff] %v323_v9 }
  0x53   : > { %326 = vst [vmem:[%s11978_s30 + $0x58] sm:$0xff] %v325_v10 }
  0x54   : > { %328 = vst [vmem:[%s11978_s30 + $0x60] sm:$0xff] %v327_v11 }
  0x55   : > { %330 = vst [vmem:[%s11978_s30 + $0x6c] sm:$0xff] %v329_v12 }
  0x56   : > { %332 = vst [vmem:[%s11978_s30 + $0x74] sm:$0xff] %v331_v13 }
  0x57   : > { %334 = vst [vmem:[%s11978_s30 + $0x7c] sm:$0xff] %v333_v14 }
  0x58   : > { %336 = vst [vmem:[%s11978_s30 + $0x84] sm:$0xff] %v335_v15 }
  0x59   : > { %338 = vst [vmem:[%s11978_s30 + $0x90] sm:$0xff] %v337_v16 }
  0x5a   : > { %340 = vst [vmem:[%s11978_s30 + $0x98] sm:$0xff] %v339_v17 }
  0x5b   : > { %342 = vst [vmem:[%s11978_s30 + $0xa0] sm:$0xff] %v341_v18 }
  0x5c   : > { %344 = vst [vmem:[%s11978_s30 + $0xa8] sm:$0xff] %v343_v19 }
  0x5d   : > { %346 = vst [vmem:[%s11978_s30 + $0xb4] sm:$0xff] %v345_v20 }
  0x5e   : > { %348 = vst [vmem:[%s11978_s30 + $0xbc] sm:$0xff] %v347_v21 }
  0x5f   : > { %350 = vst [vmem:[%s11978_s30 + $0xc4] sm:$0xff] %v349_v22 }
  0x60   : > { %352 = vst [vmem:[%s11978_s30 + $0xcc] sm:$0xff] %v351_v23 }
  0x61   : > { %7575 = vst [vmem:[%s11978_s30 + $0x20] sm:$0xf] %v7574_v24 }
  0x62   : > { %7577 = vst [vmem:[%s11978_s30 + $0x44] sm:$0xf] %v7576_v25 }
  0x63   : > { %7579 = vst [vmem:[%s11978_s30 + $0x68] sm:$0xf] %v7578_v26 }
  0x64   : > { %7581 = vst [vmem:[%s11978_s30 + $0x8c] sm:$0xf] %v7580_v27 }
  0x65   : > { %7583 = vst [vmem:[%s11978_s30 + $0xb0] sm:$0xf] %v7582_v28 }
  0x66   : > { %7585 = vst [vmem:[%s11978_s30 + $0xd4] sm:$0xf] %v7584_v29 }
  0x67 PF: > { %p7586_p4 = scmp.ge.s32.totalorder %s11808_s24, 1  ;;  %p377_p9 = scmp.lt.s32.totalorder %s11808_s24, 7 }
  0x69   : > { %p378_p10 = pnand %p7586_p4, %p377_p9 }
  0x6a   : > { %s12040_s9 = sand.u32 (!%p378_p10), 1, %s11800_s22  }
  0x6b   : > { %381 = sbr.rel (%p378_p10) target bundleno = 1247 (0x4df), region = 66  ;;  %s384_s19 = scalar_lea.sflag (!%p378_p10), [#allocation3], %s12040_s9 }
  0x6c   : > { %s12043_s10 = smul.u32 (!%p378_p10), 2016, %s12040_s9 }
  0x6e   : > { %s12047_s12 = scalar_lea.vmem (!%p378_p10), [#allocation2], %s12043_s10 }
  0x70   : > { %11787 = dma.done.wait (%p11888_p7), %s384_s19, 32256  }
  0x71   : > { %11789 = vsyncadd (%p11888_p7), %s384_s19, 4294935040  ;;  %s393_s24 = sand.u32 1, %s11867_s25   ;;  %s12055_s17 = scalar_lea.vmem [#allocation4], %s12043_s10 }
  0x72   : > { %s394_s15 = scalar_lea.sflag [#allocation5], %s393_s24 }
  0x73   : > { %11791 = dma.done.wait (%p11888_p7), %s394_s15, 64512  }
  0x74   : > { %11793 = vsyncadd (%p11888_p7), %s394_s15, 4294902784  ;;  %v7841_v30 = vld [vmem:[%s12047_s12 + $0x1f8] sm:$0xf]  ;;  %v10916_v31 = vld [vmem:[%s12047_s12 + $0x218] sm:$0xf0]  ;;  %vm2046_vm0 = vcmask 523264  }
  0x75   : > { %v8129_v32 = vld [vmem:[%s12047_s12 + $0x438] sm:$0xf]  ;;  %v7842_v33 = vor.u32 %v10916_v31, %v7841_v30  ;;  %v10988_v34 = vld [vmem:[%s12047_s12 + $0x458] sm:$0xf0]  ;;  %v8569_v39 = vld [vmem:[%s12047_s12 + $0x7a0] sm:$0xf] }
  0x76   : > { %v8561_v35 = vld [vmem:[%s12047_s12 + $0x798] sm:$0xf]  ;;  %v11096_v36 = vld [vmem:[%s12047_s12 + $0x7b8] sm:$0xf0]  ;;  %v8130_v37 = vor.u32 %v10988_v34, %v8129_v32  ;;  %v11097_v40 = vld [vmem:[%s12047_s12 + $0x7c0] sm:$0xf0] }
  0x77   : > { %v8562_v38 = vor.u32 %v11096_v36, %v8561_v35  ;;  %v7805_v41 = vld [vmem:[%s12047_s12 + $0x1b0] sm:$0xf]  ;;  %2050 = vmatpush.bf16.msra.mxu0 %v7842_v33  ;;  %v8570_v42 = vor.u32 %v11097_v40, %v8569_v39  ;;  %v10907_v43 = vld [vmem:[%s12047_s12 + $0x1d0] sm:$0xf0]  ;;  %v8533_v50 = vld [vmem:[%s12047_s12 + $0x758] sm:$0xf] }
  0x78   : > { %v8093_v44 = vld [vmem:[%s12047_s12 + $0x3f0] sm:$0xf]  ;;  %v10979_v45 = vld [vmem:[%s12047_s12 + $0x410] sm:$0xf0]  ;;  %2063 = vmatpush.bf16.msra.mxu2 %v8130_v37  ;;  %v7806_v46 = vor.u32 %v10907_v43, %v7805_v41  ;;  %v11088_v52 = vld [vmem:[%s12047_s12 + $0x778] sm:$0xf0] }
  0x79   : > { %2093 = vmatpush.bf16.msra.mxu3 %v8562_v38  ;;  %v8094_v47 = vor.u32 %v10979_v45, %v8093_v44  ;;  %v8525_v48 = vld [vmem:[%s12047_s12 + $0x750] sm:$0xf]  ;;  %v11087_v49 = vld [vmem:[%s12047_s12 + $0x770] sm:$0xf0]  ;;  %2197 = vmatpush.bf16.msra.mxu1 %v8570_v42  ;;  %v7769_v53 = vld [vmem:[%s12047_s12 + $0x168] sm:$0xf]  ;;  %v8534_v55 = vor.u32 %v11088_v52, %v8533_v50 }
  0x7a   : > { %v8526_v51 = vor.u32 %v11087_v49, %v8525_v48  ;;  %v10898_v54 = vld [vmem:[%s12047_s12 + $0x188] sm:$0xf0]  ;;  %v8057_v56 = vld [vmem:[%s12047_s12 + $0x3a8] sm:$0xf]  ;;  %v8497_v61 = vld [vmem:[%s12047_s12 + $0x710] sm:$0xf] }
  0x7b   : > { %v10970_v57 = vld [vmem:[%s12047_s12 + $0x3c8] sm:$0xf0]  ;;  %v8489_v58 = vld [vmem:[%s12047_s12 + $0x708] sm:$0xf]  ;;  %2051 = vmatpush.bf16.msra.mxu0 %v7806_v46  ;;  %v7770_v59 = vor.u32 %v10898_v54, %v7769_v53  ;;  %v11079_v62 = vld [vmem:[%s12047_s12 + $0x730] sm:$0xf0] }
  0x7c   : > { %v11078_v60 = vld [vmem:[%s12047_s12 + $0x728] sm:$0xf0]  ;;  %2064 = vmatpush.bf16.msra.mxu2 %v8094_v47  ;;  %v8058_v63 = vor.u32 %v10970_v57, %v8057_v56  ;;  %v7733_v1 = vld [vmem:[%s12047_s12 + $0x120] sm:$0xf]  ;;  %v10889_v2 = vld [vmem:[%s12047_s12 + $0x140] sm:$0xf0]  ;;  %v8498_v4 = vor.u32 %v11079_v62, %v8497_v61 }
  0x7d   : > { %2094 = vmatpush.bf16.msra.mxu3 %v8526_v51  ;;  %v8490_v0 = vor.u32 %v11078_v60, %v8489_v58  ;;  %v8021_v3 = vld [vmem:[%s12047_s12 + $0x360] sm:$0xf]  ;;  %2198 = vmatpush.bf16.msra.mxu1 %v8534_v55  ;;  %v10961_v5 = vld [vmem:[%s12047_s12 + $0x380] sm:$0xf0]  ;;  %v8461_v8 = vld [vmem:[%s12047_s12 + $0x6c8] sm:$0xf]  ;;  %v7734_v11 = vor.u32 %v10889_v2, %v7733_v1 }
  0x7e   : > { %v8453_v6 = vld [vmem:[%s12047_s12 + $0x6c0] sm:$0xf]  ;;  %v11069_v7 = vld [vmem:[%s12047_s12 + $0x6e0] sm:$0xf0]  ;;  %v11070_v9 = vld [vmem:[%s12047_s12 + $0x6e8] sm:$0xf0]  ;;  %v8022_v15 = vor.u32 %v10961_v5, %v8021_v3 }
  0x7f   : > { %v10912_v10 = vld [vmem:[%s12047_s12 + $0x1fc] sm:$0xf]  ;;  %2052 = vmatpush.bf16.msra.mxu0 %v7770_v59  ;;  %v7843_v12 = vld [vmem:[%s12047_s12 + $0x21c] sm:$0xf0]  ;;  %v10913_v13 = vld [vmem:[%s12047_s12 + $0x204] sm:$0xf]  ;;  %v8454_v16 = vor.u32 %v11069_v7, %v8453_v6  ;;  %v8462_v19 = vor.u32 %v11070_v9, %v8461_v8 }
  0x80   : > { %v7851_v14 = vld [vmem:[%s12047_s12 + $0x224] sm:$0xf0]  ;;  %2065 = vmatpush.bf16.msra.mxu2 %v8058_v63  ;;  %v7697_v17 = vld [vmem:[%s12047_s12 + $0xd8] sm:$0xf]  ;;  %v10880_v18 = vld [vmem:[%s12047_s12 + $0xf8] sm:$0xf0]  ;;  %v7846_v20 = vor.u32 %v10912_v10, %v7843_v12 }
  0x81   : > { %2095 = vmatpush.bf16.msra.mxu3 %v8490_v0  ;;  %2199 = vmatpush.bf16.msra.mxu1 %v8498_v4  ;;  %v7985_v21 = vld [vmem:[%s12047_s12 + $0x318] sm:$0xf]  ;;  %v10952_v22 = vld [vmem:[%s12047_s12 + $0x338] sm:$0xf0]  ;;  %v7854_v23 = vor.u32 %v10913_v13, %v7851_v14  ;;  %v10903_v24 = vld [vmem:[%s12047_s12 + $0x1b4] sm:$0xf]  ;;  %v7698_v26 = vor.u32 %v10880_v18, %v7697_v17 }
  0x82   : > { %v7807_v25 = vld [vmem:[%s12047_s12 + $0x1d4] sm:$0xf0]  ;;  %v10904_v27 = vld [vmem:[%s12047_s12 + $0x1bc] sm:$0xf]  ;;  %v7815_v28 = vld [vmem:[%s12047_s12 + $0x1dc] sm:$0xf0]  ;;  %v7986_v29 = vor.u32 %v10952_v22, %v7985_v21 }
  0x83   : > { %2053 = vmatpush.bf16.msra.mxu0 %v7734_v11  ;;  %v7661_v30 = vld [vmem:[%s12047_s12 + $0x90] sm:$0xf]  ;;  %v10871_v31 = vld [vmem:[%s12047_s12 + $0xb0] sm:$0xf0]  ;;  %v7810_v32 = vor.u32 %v10903_v24, %v7807_v25  ;;  %v7818_v35 = vor.u32 %v10904_v27, %v7815_v28  ;;  %v10894_v36 = vld [vmem:[%s12047_s12 + $0x16c] sm:$0xf] }
  0x84   : > { %2066 = vmatpush.bf16.msra.mxu2 %v8022_v15  ;;  %v7949_v33 = vld [vmem:[%s12047_s12 + $0x2d0] sm:$0xf]  ;;  %v10943_v34 = vld [vmem:[%s12047_s12 + $0x2f0] sm:$0xf0]  ;;  %v7662_v38 = vor.u32 %v10871_v31, %v7661_v30  ;;  %v7779_v40 = vld [vmem:[%s12047_s12 + $0x194] sm:$0xf0] }
  0x85   : > { %2096 = vmatpush.bf16.msra.mxu3 %v8454_v16  ;;  %2200 = vmatpush.bf16.msra.mxu1 %v8462_v19  ;;  %v7771_v37 = vld [vmem:[%s12047_s12 + $0x18c] sm:$0xf0]  ;;  %v10895_v39 = vld [vmem:[%s12047_s12 + $0x174] sm:$0xf]  ;;  %v7950_v41 = vor.u32 %v10943_v34, %v7949_v33  ;;  %v7625_v42 = vld [vmem:[%s12047_s12 + $0x48] sm:$0xf] }
  0x86   : > { %v10862_v43 = vld [vmem:[%s12047_s12 + $0x68] sm:$0xf0]  ;;  %v7774_v44 = vor.u32 %v10894_v36, %v7771_v37  ;;  %v7913_v45 = vld [vmem:[%s12047_s12 + $0x288] sm:$0xf]  ;;  %v7782_v47 = vor.u32 %v10895_v39, %v7779_v40  ;;  %v10885_v48 = vld [vmem:[%s12047_s12 + $0x124] sm:$0xf] }
  0x87   : > { %2054 = vmatpush.bf16.msra.mxu0 %v7698_v26  ;;  %v10934_v46 = vld [vmem:[%s12047_s12 + $0x2a8] sm:$0xf0]  ;;  %v7735_v49 = vld [vmem:[%s12047_s12 + $0x144] sm:$0xf0]  ;;  %v7626_v51 = vor.u32 %v10862_v43, %v7625_v42  ;;  %v7743_v52 = vld [vmem:[%s12047_s12 + $0x14c] sm:$0xf0] }
  0x88   : > { %2067 = vmatpush.bf16.msra.mxu2 %v7986_v29  ;;  %v10886_v50 = vld [vmem:[%s12047_s12 + $0x12c] sm:$0xf]  ;;  %v7589_v53 = vld [vmem:[%s12047_s12] sm:$0xf]  ;;  %v10853_v54 = vld [vmem:[%s12047_s12 + $0x20] sm:$0xf0]  ;;  %v7914_v55 = vor.u32 %v10934_v46, %v7913_v45  ;;  %v7738_v59 = vor.u32 %v10885_v48, %v7735_v49 }
  0x89   : > { %2102 = vmatpush.bf16.msrb.mxu3 %v7846_v20  ;;  %2206 = vmatpush.bf16.msrb.mxu1 %v7854_v23  ;;  %v7877_v56 = vld [vmem:[%s12047_s12 + $0x240] sm:$0xf]  ;;  %v10925_v57 = vld [vmem:[%s12047_s12 + $0x260] sm:$0xf0]  ;;  %v8417_v58 = vld [vmem:[%s12047_s12 + $0x678] sm:$0xf]  ;;  %v7746_v63 = vor.u32 %v10886_v50, %v7743_v52  ;;  %v7590_v3 = vor.u32 %v10853_v54, %v7589_v53 }
  0x8a   : > { %v11060_v60 = vld [vmem:[%s12047_s12 + $0x698] sm:$0xf0]  ;;  %v8131_v62 = vld [vmem:[%s12047_s12 + $0x45c] sm:$0xf0]  ;;  %v12134_v2 = vld [vmem:[%s14344_s0 + $0x8] sm:$0xff]  ;;  %v7878_v7 = vor.u32 %v10925_v57, %v7877_v56  ;;  %s13138_s23 = scalar_lea.vmem [#allocation6], %s12043_s10 }
  0x8b   : > { %2055 = vmatpush.bf16.msra.mxu0 %v7662_v38  ;;  %v10984_v61 = vld [vmem:[%s12047_s12 + $0x43c] sm:$0xf]  ;;  %v7699_v1 = vld [vmem:[%s12047_s12 + $0xfc] sm:$0xf0]  ;;  %v10877_v4 = vld [vmem:[%s12047_s12 + $0xe4] sm:$0xf]  ;;  %v750_v6 = vunpack.c.h.b16 %v12134_v2  ;;  %v8418_v9 = vor.u32 %v11060_v60, %v8417_v58 }
  0x8c   : > { %2068 = vmatpush.bf16.msra.mxu2 %v7950_v41  ;;  %v10876_v0 = vld [vmem:[%s12047_s12 + $0xdc] sm:$0xf]  ;;  %v7707_v5 = vld [vmem:[%s12047_s12 + $0x104] sm:$0xf0]  ;;  %v8134_v8 = vor.u32 %v10984_v61, %v8131_v62  ;;  %v8381_v11 = vld [vmem:[%s12047_s12 + $0x630] sm:$0xf] }
  0x8d   : > { %2103 = vmatpush.bf16.msrb.mxu3 %v7810_v32  ;;  %2207 = vmatpush.bf16.msrb.mxu1 %v7818_v35  ;;  %v7702_v10 = vor.u32 %v10876_v0, %v7699_v1  ;;  %v10975_v12 = vld [vmem:[%s12047_s12 + $0x3f4] sm:$0xf]  ;;  %v8095_v13 = vld [vmem:[%s12047_s12 + $0x414] sm:$0xf0]  ;;  %v12142_v14 = vpack.c.b16 %v750_v6, %v750_v6  ;;  %v7710_v15 = vor.u32 %v10877_v4, %v7707_v5  ;;  %v10868_v19 = vld [vmem:[%s12047_s12 + $0x9c] sm:$0xf] }
  0x8e   : > { %v11051_v16 = vld [vmem:[%s12047_s12 + $0x650] sm:$0xf0]  ;;  %v7663_v18 = vld [vmem:[%s12047_s12 + $0xb4] sm:$0xf0]  ;;  %v7671_v20 = vld [vmem:[%s12047_s12 + $0xbc] sm:$0xf0]  ;;  %v8098_v21 = vor.u32 %v10975_v12, %v8095_v13 }
  0x8f   : > { %2056 = vmatpush.bf16.msra.mxu0 %v7626_v51  ;;  %v10867_v17 = vld [vmem:[%s12047_s12 + $0x94] sm:$0xf]  ;;  %8597 = vmatmul.msk.bf16.vlgmr.msra.gmra.mxu1 %vm2046_vm0, %v12142_v14  ;;  %v8345_v22 = vld [vmem:[%s12047_s12 + $0x5e8] sm:$0xf]  ;;  %v8382_v23 = vor.u32 %v11051_v16, %v8381_v11  ;;  %v10966_v25 = vld [vmem:[%s12047_s12 + $0x3ac] sm:$0xf]  ;;  %v7674_v28 = vor.u32 %v10868_v19, %v7671_v20 }
  0x90   : > { %2069 = vmatpush.bf16.msra.mxu2 %v7914_v55  ;;  %v7666_v24 = vor.u32 %v10867_v17, %v7663_v18  ;;  %v8059_v26 = vld [vmem:[%s12047_s12 + $0x3cc] sm:$0xf0]  ;;  %v463_v27 = vld [vmem:[%s14344_s0] sm:$0xff]  ;;  %v11042_v29 = vld [vmem:[%s12047_s12 + $0x608] sm:$0xf0]  ;;  %8595 = vmatmul.msk.bf16.vlgmr.msra.gmra.mxu3 %vm2046_vm0, %v12142_v14  ;;  %s11644_s16 = smul.u32 216, %s12040_s9 }
  0x91   : > { %2104 = vmatpush.bf16.msrb.mxu3 %v7774_v44  ;;  %2208 = vmatpush.bf16.msrb.mxu1 %v7782_v47  ;;  %v10858_v30 = vld [vmem:[%s12047_s12 + $0x4c] sm:$0xf]  ;;  %v7627_v31 = vld [vmem:[%s12047_s12 + $0x6c] sm:$0xf0]  ;;  %v748_v32 = vunpack.c.h.b16 %v463_v27  ;;  %v747_v33 = vunpack.c.l.b16 %v463_v27  ;;  %v10859_v34 = vld [vmem:[%s12047_s12 + $0x54] sm:$0xf]  ;;  %v8062_v36 = vor.u32 %v10966_v25, %v8059_v26  ;;  %v8346_v40 = vor.u32 %v11042_v29, %v8345_v22 }
  0x92   : > { %v7635_v35 = vld [vmem:[%s12047_s12 + $0x74] sm:$0xf0]  ;;  %v8309_v37 = vld [vmem:[%s12047_s12 + $0x5a0] sm:$0xf]  ;;  %v7630_v41 = vor.u32 %v10858_v30, %v7627_v31  ;;  %v11033_v42 = vld [vmem:[%s12047_s12 + $0x5c0] sm:$0xf0] }
  0x93   : > { %2057 = vmatpush.bf16.msra.mxu0 %v7590_v3  ;;  %v12165_v38 = vpack.c.b16 %v748_v32, %v748_v32  ;;  %v12167_v39 = vpack.c.b16 %v747_v33, %v747_v33  ;;  %v10957_v43 = vld [vmem:[%s12047_s12 + $0x364] sm:$0xf]  ;;  %v8023_v44 = vld [vmem:[%s12047_s12 + $0x384] sm:$0xf0]  ;;  %v7638_v45 = vor.u32 %v10859_v34, %v7635_v35  ;;  %v10850_v48 = vld [vmem:[%s12047_s12 + $0xc] sm:$0xf]  ;;  %v8310_v55 = vor.u32 %v11033_v42, %v8309_v37 }
  0x94   : > { %2070 = vmatpush.bf16.msra.mxu2 %v7878_v7  ;;  %v10849_v46 = vld [vmem:[%s12047_s12 + $0x4] sm:$0xf]  ;;  %v7591_v47 = vld [vmem:[%s12047_s12 + $0x24] sm:$0xf0]  ;;  %v7599_v49 = vld [vmem:[%s12047_s12 + $0x2c] sm:$0xf0]  ;;  %v8026_v52 = vor.u32 %v10957_v43, %v8023_v44 }
  0x95   : > { %2105 = vmatpush.bf16.msrb.mxu3 %v7738_v59  ;;  %2209 = vmatpush.bf16.msrb.mxu1 %v7746_v63  ;;  %v11056_v50 = vld [vmem:[%s12047_s12 + $0x67c] sm:$0xf]  ;;  %v8419_v51 = vld [vmem:[%s12047_s12 + $0x69c] sm:$0xf0]  ;;  %v8145_v53 = vld [vmem:[%s12047_s12 + $0x448] sm:$0xf]  ;;  %v7594_v56 = vor.u32 %v10849_v46, %v7591_v47  ;;  %v7602_v59 = vor.u32 %v10850_v48, %v7599_v49  ;;  %v749_v49 = vunpack.c.l.b16 %v12134_v2 }
  0x96   : > { %2058 = vmatmul.bf16.vlgmr.msra.gmra.mxu0 %v12167_v39  ;;  %v10990_v54 = vld [vmem:[%s12047_s12 + $0x468] sm:$0xf0]  ;;  %v10948_v57 = vld [vmem:[%s12047_s12 + $0x31c] sm:$0xf]  ;;  %v7987_v58 = vld [vmem:[%s12047_s12 + $0x33c] sm:$0xf0]  ;;  %v8422_v60 = vor.u32 %v11056_v50, %v8419_v51 }
  0x97   : > { %2115 = vmatpush.bf16.msrb.mxu0 %v8134_v8  ;;  %2071 = vmatmul.bf16.vlgmr.msra.gmra.mxu2 %v12165_v38  ;;  %v8273_v61 = vld [vmem:[%s12047_s12 + $0x558] sm:$0xf]  ;;  %v11024_v62 = vld [vmem:[%s12047_s12 + $0x578] sm:$0xf0]  ;;  %v8146_v63 = vor.u32 %v10990_v54, %v8145_v53  ;;  %v11047_v0 = vld [vmem:[%s12047_s12 + $0x634] sm:$0xf]  ;;  %v7990_v3 = vor.u32 %v10948_v57, %v7987_v58  ;;  %v12227_v2 = vpack.c.b16 %v749_v49, %v749_v49 }
  0x98   : > { %2076 = vmatpush.bf16.msrb.mxu2 %v8418_v9  ;;  %v8383_v1 = vld [vmem:[%s12047_s12 + $0x654] sm:$0xf0]  ;;  %v8109_v4 = vld [vmem:[%s12047_s12 + $0x400] sm:$0xf]  ;;  %v10981_v5 = vld [vmem:[%s12047_s12 + $0x420] sm:$0xf0]  ;;  %v8274_v6 = vor.u32 %v11024_v62, %v8273_v61 }
  0x99   : > { %2106 = vmatpush.bf16.msrb.mxu3 %v7702_v10  ;;  %2210 = vmatpush.bf16.msrb.mxu1 %v7710_v15  ;;  %v10939_v7 = vld [vmem:[%s12047_s12 + $0x2d4] sm:$0xf]  ;;  %v7951_v8 = vld [vmem:[%s12047_s12 + $0x2f4] sm:$0xf0]  ;;  %v8386_v9 = vor.u32 %v11047_v0, %v8383_v1  ;;  %v8237_v10 = vld [vmem:[%s12047_s12 + $0x510] sm:$0xf]  ;;  %v8110_v12 = vor.u32 %v10981_v5, %v8109_v4 }
  0x9a   : > { %v11015_v11 = vld [vmem:[%s12047_s12 + $0x530] sm:$0xf0]  ;;  %v11038_v13 = vld [vmem:[%s12047_s12 + $0x5ec] sm:$0xf]  ;;  %v8347_v15 = vld [vmem:[%s12047_s12 + $0x60c] sm:$0xf0]  ;;  %v7954_v16 = vor.u32 %v10939_v7, %v7951_v8 }
  0x9b   : > { %2116 = vmatpush.bf16.msrb.mxu0 %v8098_v21  ;;  %v8073_v17 = vld [vmem:[%s12047_s12 + $0x3b8] sm:$0xf]  ;;  %v10972_v18 = vld [vmem:[%s12047_s12 + $0x3d8] sm:$0xf0]  ;;  %v8238_v19 = vor.u32 %v11015_v11, %v8237_v10  ;;  %v10930_v20 = vld [vmem:[%s12047_s12 + $0x28c] sm:$0xf]  ;;  %v8350_v22 = vor.u32 %v11038_v13, %v8347_v15 }
  0x9c   : > { %2077 = vmatpush.bf16.msrb.mxu2 %v8382_v23  ;;  %v7915_v21 = vld [vmem:[%s12047_s12 + $0x2ac] sm:$0xf0]  ;;  %v8201_v23 = vld [vmem:[%s12047_s12 + $0x4c8] sm:$0xf]  ;;  %v8074_v25 = vor.u32 %v10972_v18, %v8073_v17  ;;  %v11029_v26 = vld [vmem:[%s12047_s12 + $0x5a4] sm:$0xf] }
  0x9d   : > { %2107 = vmatpush.bf16.msrb.mxu3 %v7666_v24  ;;  %2211 = vmatpush.bf16.msrb.mxu1 %v7674_v28  ;;  %v11006_v24 = vld [vmem:[%s12047_s12 + $0x4e8] sm:$0xf0]  ;;  %v8311_v27 = vld [vmem:[%s12047_s12 + $0x5c4] sm:$0xf0]  ;;  %v7918_v28 = vor.u32 %v10930_v20, %v7915_v21  ;;  %v8037_v29 = vld [vmem:[%s12047_s12 + $0x370] sm:$0xf] }
  0x9e   : > { %v10963_v30 = vld [vmem:[%s12047_s12 + $0x390] sm:$0xf0]  ;;  %v8165_v31 = vld [vmem:[%s12047_s12 + $0x480] sm:$0xf]  ;;  %v8202_v32 = vor.u32 %v11006_v24, %v8201_v23  ;;  %v10997_v33 = vld [vmem:[%s12047_s12 + $0x4a0] sm:$0xf0] }
  0x9f   : > { %2117 = vmatpush.bf16.msrb.mxu0 %v8062_v36  ;;  %v10921_v34 = vld [vmem:[%s12047_s12 + $0x244] sm:$0xf]  ;;  %v7879_v35 = vld [vmem:[%s12047_s12 + $0x264] sm:$0xf0]  ;;  %v8314_v36 = vor.u32 %v11029_v26, %v8311_v27  ;;  %v11020_v37 = vld [vmem:[%s12047_s12 + $0x55c] sm:$0xf]  ;;  %v8038_v42 = vor.u32 %v10963_v30, %v8037_v29  ;;  %v8166_v50 = vor.u32 %v10997_v33, %v8165_v31 }
  0xa0   : > { %2078 = vmatpush.bf16.msrb.mxu2 %v8346_v40  ;;  %v8425_v40 = vld [vmem:[%s12047_s12 + $0x680] sm:$0xf]  ;;  %v11092_v44 = vld [vmem:[%s12047_s12 + $0x79c] sm:$0xf]  ;;  %v7882_v46 = vor.u32 %v10921_v34, %v7879_v35  ;;  %v8001_v47 = vld [vmem:[%s12047_s12 + $0x328] sm:$0xf] }
  0xa1   : > { %2108 = vmatpush.bf16.msrb.mxu3 %v7630_v41  ;;  %2212 = vmatpush.bf16.msrb.mxu1 %v7638_v45  ;;  %v11061_v41 = vld [vmem:[%s12047_s12 + $0x6a0] sm:$0xf0]  ;;  %v8275_v43 = vld [vmem:[%s12047_s12 + $0x57c] sm:$0xf0]  ;;  %v10954_v48 = vld [vmem:[%s12047_s12 + $0x348] sm:$0xf0] }
  0xa2   : > { %v8563_v45 = vld [vmem:[%s12047_s12 + $0x7bc] sm:$0xf0]  ;;  %v8426_v51 = vor.u32 %v11061_v41, %v8425_v40  ;;  %v11011_v54 = vld [vmem:[%s12047_s12 + $0x514] sm:$0xf]  ;;  %v8002_v57 = vor.u32 %v10954_v48, %v8001_v47  ;;  %v8239_v58 = vld [vmem:[%s12047_s12 + $0x534] sm:$0xf0] }
  0xa3   : > { %2118 = vmatpush.bf16.msrb.mxu0 %v8026_v52  ;;  %v8278_v52 = vor.u32 %v11020_v37, %v8275_v43  ;;  %v8566_v53 = vor.u32 %v11092_v44, %v8563_v45  ;;  %v7965_v61 = vld [vmem:[%s12047_s12 + $0x2e0] sm:$0xf]  ;;  %v10945_v62 = vld [vmem:[%s12047_s12 + $0x300] sm:$0xf0]  ;;  %v8242_v0 = vor.u32 %v11011_v54, %v8239_v58  ;;  %v8353_v4 = vld [vmem:[%s12047_s12 + $0x5f0] sm:$0xf] }
  0xa4   : > { %2079 = vmatpush.bf16.msrb.mxu2 %v8310_v55  ;;  %v8389_v55 = vld [vmem:[%s12047_s12 + $0x638] sm:$0xf]  ;;  %v11043_v5 = vld [vmem:[%s12047_s12 + $0x610] sm:$0xf0]  ;;  %v8203_v7 = vld [vmem:[%s12047_s12 + $0x4ec] sm:$0xf0] }
  0xa5   : > { %2109 = vmatpush.bf16.msrb.mxu3 %v7594_v56  ;;  %2213 = vmatpush.bf16.msrb.mxu1 %v7602_v59  ;;  %v11052_v56 = vld [vmem:[%s12047_s12 + $0x658] sm:$0xf0]  ;;  %v11083_v59 = vld [vmem:[%s12047_s12 + $0x754] sm:$0xf]  ;;  %v11074_v8 = vld [vmem:[%s12047_s12 + $0x70c] sm:$0xf] }
  0xa6   : > { %v7929_v10 = vld [vmem:[%s12047_s12 + $0x298] sm:$0xf]  ;;  %v10936_v11 = vld [vmem:[%s12047_s12 + $0x2b8] sm:$0xf0]  ;;  %v10993_v13 = vld [vmem:[%s12047_s12 + $0x484] sm:$0xf] }
  0xa7   : > { %2119 = vmatpush.bf16.msrb.mxu0 %v7990_v3  ;;  %v11002_v3 = vld [vmem:[%s12047_s12 + $0x4cc] sm:$0xf]  ;;  %v8167_v15 = vld [vmem:[%s12047_s12 + $0x4a4] sm:$0xf0]  ;;  %v11065_v18 = vld [vmem:[%s12047_s12 + $0x6c4] sm:$0xf]  ;;  %v7930_v21 = vor.u32 %v10936_v11, %v7929_v10 }
  0xa8   : > { %2080 = vmatpush.bf16.msrb.mxu2 %v8274_v6  ;;  %2214 = vmatmul.bf16.vlgmr.msrb.gmra.mxu1 %v12167_v39  ;;  %v7966_v6 = vor.u32 %v10945_v62, %v7965_v61  ;;  %v11034_v20 = vld [vmem:[%s12047_s12 + $0x5c8] sm:$0xf0]  ;;  %v7893_v23 = vld [vmem:[%s12047_s12 + $0x250] sm:$0xf]  ;;  %v10927_v24 = vld [vmem:[%s12047_s12 + $0x270] sm:$0xf0] }
  0xa9   : > { %2128 = vmatpush.bf16.msra.mxu3 %v8422_v60  ;;  %2271 = vmatpush.bf16.msra.mxu1 %v8146_v63  ;;  %v8527_v60 = vld [vmem:[%s12047_s12 + $0x774] sm:$0xf0]  ;;  %v8390_v63 = vor.u32 %v11052_v56, %v8389_v55  ;;  %v10917_v26 = vld [vmem:[%s12047_s12 + $0x220] sm:$0xf0]  ;;  %v8137_v27 = vld [vmem:[%s12047_s12 + $0x440] sm:$0xf] }
  0xaa   : > { %2110 = vmatmul.bf16.vlgmr.msrb.gmra.mxu3 %v12167_v39  ;;  %v8530_v1 = vor.u32 %v11083_v59, %v8527_v60  ;;  %v10989_v29 = vld [vmem:[%s12047_s12 + $0x460] sm:$0xf0]  ;;  %v11058_v30 = vld [vmem:[%s12047_s12 + $0x68c] sm:$0xf]  ;;  %v8435_v31 = vld [vmem:[%s12047_s12 + $0x6ac] sm:$0xf0] }
  0xab   : > { %2120 = vmatpush.bf16.msrb.mxu0 %v7954_v16  ;;  %v8206_v16 = vor.u32 %v11002_v3, %v8203_v7  ;;  %v8281_v34 = vld [vmem:[%s12047_s12 + $0x560] sm:$0xf]  ;;  %v11025_v35 = vld [vmem:[%s12047_s12 + $0x580] sm:$0xf0]  ;;  %v8138_v40 = vor.u32 %v10989_v29, %v8137_v27  ;;  %v8438_v41 = vor.u32 %v11058_v30, %v8435_v31  ;;  %v10908_v43 = vld [vmem:[%s12047_s12 + $0x1d8] sm:$0xf0] }
  0xac   : > { %2081 = vmatpush.bf16.msrb.mxu2 %v8238_v19  ;;  %v8317_v19 = vld [vmem:[%s12047_s12 + $0x5a8] sm:$0xf]  ;;  %v8101_v44 = vld [vmem:[%s12047_s12 + $0x3f8] sm:$0xf]  ;;  %v8282_v45 = vor.u32 %v11025_v35, %v8281_v34  ;;  %v11049_v47 = vld [vmem:[%s12047_s12 + $0x644] sm:$0xf] }
  0xad   : > { %2129 = vmatpush.bf16.msra.mxu3 %v8386_v9  ;;  %2272 = vmatpush.bf16.msra.mxu1 %v8110_v12  ;;  %v8491_v9 = vld [vmem:[%s12047_s12 + $0x72c] sm:$0xf0]  ;;  %v8354_v12 = vor.u32 %v11043_v5, %v8353_v4  ;;  %v8399_v48 = vld [vmem:[%s12047_s12 + $0x664] sm:$0xf0]  ;;  %v8245_v49 = vld [vmem:[%s12047_s12 + $0x518] sm:$0xf] }
  0xae   : > { %v8494_v17 = vor.u32 %v11074_v8, %v8491_v9  ;;  %v7777_v54 = vld [vmem:[%s12047_s12 + $0x170] sm:$0xf]  ;;  %v10899_v55 = vld [vmem:[%s12047_s12 + $0x190] sm:$0xf0]  ;;  %v11040_v59 = vld [vmem:[%s12047_s12 + $0x5fc] sm:$0xf] }
  0xaf   : > { %2121 = vmatpush.bf16.msrb.mxu0 %v7918_v28  ;;  %v8318_v28 = vor.u32 %v11034_v20, %v8317_v19  ;;  %v8065_v56 = vld [vmem:[%s12047_s12 + $0x3b0] sm:$0xf]  ;;  %v10971_v58 = vld [vmem:[%s12047_s12 + $0x3d0] sm:$0xf0]  ;;  %v8363_v60 = vld [vmem:[%s12047_s12 + $0x61c] sm:$0xf0] }
  0xb0   : > { %2082 = vmatpush.bf16.msrb.mxu2 %v8202_v32  ;;  %v8170_v32 = vor.u32 %v10993_v13, %v8167_v15  ;;  %v8209_v61 = vld [vmem:[%s12047_s12 + $0x4d0] sm:$0xf]  ;;  %v11007_v62 = vld [vmem:[%s12047_s12 + $0x4f0] sm:$0xf0]  ;;  %v7741_v3 = vld [vmem:[%s12047_s12 + $0x128] sm:$0xf] }
  0xb1   : > { %2130 = vmatpush.bf16.msra.mxu3 %v8350_v22  ;;  %2273 = vmatpush.bf16.msra.mxu1 %v8074_v25  ;;  %v8455_v22 = vld [vmem:[%s12047_s12 + $0x6e4] sm:$0xf0]  ;;  %v7849_v25 = vld [vmem:[%s12047_s12 + $0x200] sm:$0xf]  ;;  %v10890_v4 = vld [vmem:[%s12047_s12 + $0x148] sm:$0xf0] }
  0xb2   : > { %v8458_v33 = vor.u32 %v11065_v18, %v8455_v22  ;;  %v7850_v37 = vor.u32 %v10917_v26, %v7849_v25  ;;  %v8029_v5 = vld [vmem:[%s12047_s12 + $0x368] sm:$0xf]  ;;  %v10962_v7 = vld [vmem:[%s12047_s12 + $0x388] sm:$0xf0]  ;;  %v11031_v8 = vld [vmem:[%s12047_s12 + $0x5b4] sm:$0xf] }
  0xb3   : > { %2122 = vmatpush.bf16.msrb.mxu0 %v7882_v46  ;;  %v10980_v46 = vld [vmem:[%s12047_s12 + $0x418] sm:$0xf0]  ;;  %v8327_v9 = vld [vmem:[%s12047_s12 + $0x5d4] sm:$0xf0]  ;;  %v8173_v10 = vld [vmem:[%s12047_s12 + $0x488] sm:$0xf] }
  0xb4   : > { %2083 = vmatpush.bf16.msrb.mxu2 %v8166_v50  ;;  %v11016_v50 = vld [vmem:[%s12047_s12 + $0x538] sm:$0xf0]  ;;  %v10998_v11 = vld [vmem:[%s12047_s12 + $0x4a8] sm:$0xf0]  ;;  %v11093_v13 = vld [vmem:[%s12047_s12 + $0x7a4] sm:$0xf] }
  0xb5   : > { %2131 = vmatpush.bf16.msra.mxu3 %v8314_v36  ;;  %2274 = vmatpush.bf16.msra.mxu1 %v8038_v42  ;;  %v7894_v36 = vor.u32 %v10927_v24, %v7893_v23  ;;  %v7813_v42 = vld [vmem:[%s12047_s12 + $0x1b8] sm:$0xf]  ;;  %v8571_v15 = vld [vmem:[%s12047_s12 + $0x7c4] sm:$0xf0]  ;;  %v7705_v18 = vld [vmem:[%s12047_s12 + $0xe0] sm:$0xf] }
  0xb6   : > { %2123 = vmatmul.bf16.vlgmr.msrb.gmra.mxu0 %v12165_v38  ;;  %v10881_v19 = vld [vmem:[%s12047_s12 + $0x100] sm:$0xf0]  ;;  %v7993_v20 = vld [vmem:[%s12047_s12 + $0x320] sm:$0xf]  ;;  %v11022_v23 = vld [vmem:[%s12047_s12 + $0x56c] sm:$0xf]  ;;  %v8574_v25 = vor.u32 %v11093_v13, %v8571_v15 }
  0xb7   : > { %2180 = vmatpush.bf16.msra.mxu0 %v8426_v51  ;;  %2084 = vmatmul.bf16.vlgmr.msrb.gmra.mxu2 %v12227_v2  ;;  %v7814_v51 = vor.u32 %v10908_v43, %v7813_v42  ;;  %v10953_v22 = vld [vmem:[%s12047_s12 + $0x340] sm:$0xf0]  ;;  %v8291_v24 = vld [vmem:[%s12047_s12 + $0x58c] sm:$0xf0]  ;;  %v7706_v26 = vor.u32 %v10881_v19, %v7705_v18  ;;  %v11084_v27 = vld [vmem:[%s12047_s12 + $0x75c] sm:$0xf] }
  0xb8   : > { %2145 = vmatpush.bf16.msra.mxu2 %v8566_v53  ;;  %v8402_v53 = vor.u32 %v11049_v47, %v8399_v48  ;;  %v7994_v29 = vor.u32 %v10953_v22, %v7993_v20  ;;  %v8294_v30 = vor.u32 %v11022_v23, %v8291_v24  ;;  %v7669_v31 = vld [vmem:[%s12047_s12 + $0x98] sm:$0xf]  ;;  %v10944_v34 = vld [vmem:[%s12047_s12 + $0x2f8] sm:$0xf0]  ;;  %v11013_v35 = vld [vmem:[%s12047_s12 + $0x524] sm:$0xf] }
  0xb9   : > { %2132 = vmatpush.bf16.msra.mxu3 %v8278_v52  ;;  %2275 = vmatpush.bf16.msra.mxu1 %v8002_v57  ;;  %v8102_v52 = vor.u32 %v10980_v46, %v8101_v44  ;;  %v8246_v57 = vor.u32 %v11016_v50, %v8245_v49  ;;  %v8499_v42 = vld [vmem:[%s12047_s12 + $0x734] sm:$0xf0]  ;;  %v10863_v46 = vld [vmem:[%s12047_s12 + $0x70] sm:$0xf0]  ;;  %v7921_v47 = vld [vmem:[%s12047_s12 + $0x290] sm:$0xf] }
  0xba   : > { %v10935_v48 = vld [vmem:[%s12047_s12 + $0x2b0] sm:$0xf0]  ;;  %v11004_v49 = vld [vmem:[%s12047_s12 + $0x4dc] sm:$0xf]  ;;  %v8219_v50 = vld [vmem:[%s12047_s12 + $0x4fc] sm:$0xf0] }
  0xbb   : > { %2181 = vmatpush.bf16.msra.mxu0 %v8390_v63  ;;  %v7778_v63 = vor.u32 %v10899_v55, %v7777_v54  ;;  %v7885_v55 = vld [vmem:[%s12047_s12 + $0x248] sm:$0xf]  ;;  %v7821_v13 = vld [vmem:[%s12047_s12 + $0x1c0] sm:$0xf]  ;;  %v10909_v15 = vld [vmem:[%s12047_s12 + $0x1e0] sm:$0xf0] }
  0xbc   : > { %2146 = vmatpush.bf16.msra.mxu2 %v8530_v1  ;;  %v8366_v1 = vor.u32 %v11040_v59, %v8363_v60  ;;  %v8222_v59 = vor.u32 %v11004_v49, %v8219_v50  ;;  %v10926_v60 = vld [vmem:[%s12047_s12 + $0x268] sm:$0xf0]  ;;  %v10976_v18 = vld [vmem:[%s12047_s12 + $0x3fc] sm:$0xf]  ;;  %v8103_v20 = vld [vmem:[%s12047_s12 + $0x41c] sm:$0xf0]  ;;  %v7822_v23 = vor.u32 %v10909_v15, %v7821_v13 }
  0xbd   : > { %2133 = vmatpush.bf16.msra.mxu3 %v8242_v0  ;;  %2276 = vmatpush.bf16.msra.mxu1 %v7966_v6  ;;  %v8066_v0 = vor.u32 %v10971_v58, %v8065_v56  ;;  %v8210_v6 = vor.u32 %v11007_v62, %v8209_v61  ;;  %v11066_v56 = vld [vmem:[%s12047_s12 + $0x6cc] sm:$0xf]  ;;  %v7922_v58 = vor.u32 %v10935_v48, %v7921_v47  ;;  %v7857_v61 = vld [vmem:[%s12047_s12 + $0x208] sm:$0xf]  ;;  %v8391_v22 = vld [vmem:[%s12047_s12 + $0x65c] sm:$0xf0] }
  0xbe   : > { %v10918_v62 = vld [vmem:[%s12047_s12 + $0x228] sm:$0xf0]  ;;  %v8549_v24 = vld [vmem:[%s12047_s12 + $0x768] sm:$0xf]  ;;  %v8319_v48 = vld [vmem:[%s12047_s12 + $0x5cc] sm:$0xf0] }
  0xbf   : > { %2182 = vmatpush.bf16.msra.mxu0 %v8354_v12  ;;  %v7742_v12 = vor.u32 %v10890_v4, %v7741_v3  ;;  %v8139_v4 = vld [vmem:[%s12047_s12 + $0x464] sm:$0xf0]  ;;  %v11030_v47 = vld [vmem:[%s12047_s12 + $0x5ac] sm:$0xf]  ;;  %v8477_v50 = vld [vmem:[%s12047_s12 + $0x6d8] sm:$0xf] }
  0xc0   : > { %2147 = vmatpush.bf16.msra.mxu2 %v8494_v17  ;;  %v8330_v17 = vor.u32 %v11031_v8, %v8327_v9  ;;  %v7858_v8 = vor.u32 %v10918_v62, %v7857_v61  ;;  %v8585_v9 = vld [vmem:[%s12047_s12 + $0x7b0] sm:$0xf]  ;;  %v11021_v61 = vld [vmem:[%s12047_s12 + $0x564] sm:$0xf]  ;;  %v8283_v62 = vld [vmem:[%s12047_s12 + $0x584] sm:$0xf0] }
  0xc1   : > { %2134 = vmatpush.bf16.msra.mxu3 %v8206_v16  ;;  %2277 = vmatpush.bf16.msra.mxu1 %v7930_v21  ;;  %v8030_v16 = vor.u32 %v10962_v7, %v8029_v5  ;;  %v8174_v21 = vor.u32 %v10998_v11, %v8173_v10  ;;  %v11057_v5 = vld [vmem:[%s12047_s12 + $0x684] sm:$0xf]  ;;  %v11099_v10 = vld [vmem:[%s12047_s12 + $0x7d0] sm:$0xf0]  ;;  %v7886_v11 = vor.u32 %v10926_v60, %v7885_v55  ;;  %v10882_v55 = vld [vmem:[%s12047_s12 + $0x108] sm:$0xf0] }
  0xc2   : > { %v8586_v19 = vor.u32 %v11099_v10, %v8585_v9  ;;  %v7995_v60 = vld [vmem:[%s12047_s12 + $0x344] sm:$0xf0]  ;;  %v7959_v9 = vld [vmem:[%s12047_s12 + $0x2fc] sm:$0xf0]  ;;  %v11012_v10 = vld [vmem:[%s12047_s12 + $0x51c] sm:$0xf] }
  0xc3   : > { %2183 = vmatpush.bf16.msra.mxu0 %v8318_v28  ;;  %v8535_v28 = vld [vmem:[%s12047_s12 + $0x77c] sm:$0xf0]  ;;  %v10897_v15 = vld [vmem:[%s12047_s12 + $0x184] sm:$0xf]  ;;  %s13736_s18 = scalar_lea.vmem [#allocation7], %s11644_s16  ;;  %vm6800_vm1 = vcmask 392192  }
  0xc4   : > { %2148 = vmatpush.bf16.msra.mxu2 %v8458_v33  ;;  %v7957_v33 = vld [vmem:[%s12047_s12 + $0x2d8] sm:$0xf]  ;;  %s14075_s24 = scalar_lea.vmem [#allocation8], %s11644_s16  ;;  %s11638_s9 = smul.u32 (%p11892_p8), 72, %s11867_s25 }
  0xc5   : > { %2135 = vmatpush.bf16.msra.mxu3 %v8170_v32  ;;  %2278 = vmatpush.bf16.msra.mxu1 %v7894_v36  ;;  %v10872_v32 = vld [vmem:[%s12047_s12 + $0xb8] sm:$0xf0]  ;;  %v8255_v36 = vld [vmem:[%s12047_s12 + $0x544] sm:$0xf0]  ;;  %v7958_v43 = vor.u32 %v10944_v34, %v7957_v33  ;;  %v11039_v33 = vld [vmem:[%s12047_s12 + $0x5f4] sm:$0xf] }
  0xc6   : > { %v8258_v44 = vor.u32 %v11013_v35, %v8255_v36  ;;  %v8355_v34 = vld [vmem:[%s12047_s12 + $0x614] sm:$0xf0]  ;;  %v8513_v36 = vld [vmem:[%s12047_s12 + $0x720] sm:$0xf]  ;;  %s14363_s7 = sld [smem:[#allocation15_spill]] (%p11892_p8) }
  0xc7   : > { %2184 = vmatpush.bf16.msra.mxu0 %v8282_v45  ;;  %8596 = vmatmul.msk.bf16.vlgmr.msra.gmra.mxu2 %vm2046_vm0, %v12142_v14  ;;  %v7633_v45 = vld [vmem:[%s12047_s12 + $0x50] sm:$0xf] }
  0xc8   : > { %2154 = vmatpush.bf16.msrb.mxu2 %v7850_v37  ;;  %2136 = vmatmul.bf16.vlgmr.msra.gmra.mxu3 %v12227_v2  ;;  %v8538_v37 = vor.u32 %v11084_v27, %v8535_v28  ;;  %v7634_v54 = vor.u32 %v10863_v46, %v7633_v45  ;;  %v10900_v27 = vld [vmem:[%s12047_s12 + $0x198] sm:$0xf0]  ;;  %v8106_v28 = vor.u32 %v10976_v18, %v8103_v20  ;;  %v8031_v46 = vld [vmem:[%s12047_s12 + $0x38c] sm:$0xf0] }
  0xc9   : > { %2167 = vmatpush.bf16.msrb.mxu3 %v8138_v40  ;;  %2336 = vmatpush.bf16.msrb.mxu1 %v8438_v41  ;;  %v7670_v40 = vor.u32 %v10872_v32, %v7669_v31  ;;  %v11075_v41 = vld [vmem:[%s12047_s12 + $0x714] sm:$0xf]  ;;  %v8067_v32 = vld [vmem:[%s12047_s12 + $0x3d4] sm:$0xf0]  ;;  %v10864_v18 = vld [vmem:[%s12047_s12 + $0x78] sm:$0xf0] }
  0xca   : > { %2279 = vmatmul.bf16.vlgmr.msra.gmra.mxu1 %v12165_v38 }
  0xcb   : > { %2185 = vmatpush.bf16.msra.mxu0 %v8246_v57  ;;  %v8463_v57 = vld [vmem:[%s12047_s12 + $0x6ec] sm:$0xf0] }
  0xcc   : > { %2155 = vmatpush.bf16.msrb.mxu2 %v7814_v51  ;;  %v8502_v51 = vor.u32 %v11075_v41, %v8499_v42  ;;  %v8466_v3 = vor.u32 %v11066_v56, %v8463_v57  ;;  %v10891_v41 = vld [vmem:[%s12047_s12 + $0x150] sm:$0xf0]  ;;  %v8322_v57 = vor.u32 %v11030_v47, %v8319_v48  ;;  %s14277_s29 = scalar_lea.vmem (%p11892_p8), %s14363_s7, %s11638_s9 }
  0xcd   : > { %2168 = vmatpush.bf16.msrb.mxu3 %v8102_v52  ;;  %2337 = vmatpush.bf16.msrb.mxu1 %v8402_v53  ;;  %v7597_v52 = vld [vmem:[%s12047_s12 + $0x8] sm:$0xf]  ;;  %v10854_v53 = vld [vmem:[%s12047_s12 + $0x28] sm:$0xf0]  ;;  %v10879_v48 = vld [vmem:[%s12047_s12 + $0xf4] sm:$0xf] }
  0xce   : > { %v7598_v7 = vor.u32 %v10854_v53, %v7597_v52  ;;  %v10915_v52 = vld [vmem:[%s12047_s12 + $0x214] sm:$0xf]  ;;  %v7867_v53 = vld [vmem:[%s12047_s12 + $0x234] sm:$0xf0] }
  0xcf   : > { %2186 = vmatpush.bf16.msra.mxu0 %v8210_v6  ;;  %v8427_v6 = vld [vmem:[%s12047_s12 + $0x6a4] sm:$0xf0] }
  0xd0   : > { %2156 = vmatpush.bf16.msrb.mxu2 %v7778_v63  ;;  %v10995_v63 = vld [vmem:[%s12047_s12 + $0x494] sm:$0xf] }
  0xd1   : > { %2169 = vmatpush.bf16.msrb.mxu3 %v8066_v0  ;;  %2338 = vmatpush.bf16.msrb.mxu1 %v8366_v1  ;;  %v8183_v0 = vld [vmem:[%s12047_s12 + $0x4b4] sm:$0xf0]  ;;  %v10985_v1 = vld [vmem:[%s12047_s12 + $0x444] sm:$0xf] }
  0xd3   : > { %2187 = vmatpush.bf16.msra.mxu0 %v8174_v21  ;;  %v11048_v21 = vld [vmem:[%s12047_s12 + $0x63c] sm:$0xf] }
  0xd4   : > { %2157 = vmatpush.bf16.msrb.mxu2 %v7742_v12  ;;  %v8186_v12 = vor.u32 %v10995_v63, %v8183_v0  ;;  %v7870_v63 = vor.u32 %v10915_v52, %v7867_v53 }
  0xd5   : > { %2170 = vmatpush.bf16.msrb.mxu3 %v8030_v16  ;;  %2339 = vmatpush.bf16.msrb.mxu1 %v8330_v17  ;;  %v8142_v16 = vor.u32 %v10985_v1, %v8139_v4  ;;  %v8430_v17 = vor.u32 %v11057_v5, %v8427_v6  ;;  %v10906_v1 = vld [vmem:[%s12047_s12 + $0x1cc] sm:$0xf]  ;;  %v7677_v4 = vld [vmem:[%s12047_s12 + $0xa0] sm:$0xf]  ;;  %v10873_v5 = vld [vmem:[%s12047_s12 + $0xc0] sm:$0xf0] }
  0xd6   : > { %2188 = vmatmul.bf16.vlgmr.msra.gmra.mxu0 %v12227_v2  ;;  %v7678_v13 = vor.u32 %v10873_v5, %v7677_v4  ;;  %v10968_v4 = vld [vmem:[%s12047_s12 + $0x3bc] sm:$0xf]  ;;  %v8075_v5 = vld [vmem:[%s12047_s12 + $0x3dc] sm:$0xf0] }
  0xd7   : > { %2249 = vmatpush.bf16.msrb.mxu0 %v8574_v25  ;;  %v11090_v25 = vld [vmem:[%s12047_s12 + $0x788] sm:$0xf0] }
  0xd8   : > { %2158 = vmatpush.bf16.msrb.mxu2 %v7706_v26  ;;  %v7785_v26 = vld [vmem:[%s12047_s12 + $0x178] sm:$0xf]  ;;  %v8550_v31 = vor.u32 %v11090_v25, %v8549_v24 }
  0xd9   : > { %2171 = vmatpush.bf16.msrb.mxu3 %v7994_v29  ;;  %2340 = vmatpush.bf16.msrb.mxu1 %v8294_v30  ;;  %v8394_v29 = vor.u32 %v11048_v21, %v8391_v22  ;;  %v10967_v30 = vld [vmem:[%s12047_s12 + $0x3b4] sm:$0xf]  ;;  %v7786_v35 = vor.u32 %v10900_v27, %v7785_v26  ;;  %v7923_v22 = vld [vmem:[%s12047_s12 + $0x2b4] sm:$0xf0]  ;;  %v10888_v27 = vld [vmem:[%s12047_s12 + $0x13c] sm:$0xf] }
  0xda   : > { %v8070_v42 = vor.u32 %v10967_v30, %v8067_v32  ;;  %v10931_v21 = vld [vmem:[%s12047_s12 + $0x294] sm:$0xf]  ;;  %v8211_v24 = vld [vmem:[%s12047_s12 + $0x4f4] sm:$0xf0]  ;;  %v7605_v30 = vld [vmem:[%s12047_s12 + $0x10] sm:$0xf] }
  0xdb   : > { %2250 = vmatpush.bf16.msrb.mxu0 %v8538_v37  ;;  %v11081_v37 = vld [vmem:[%s12047_s12 + $0x740] sm:$0xf0]  ;;  %v7926_v32 = vor.u32 %v10931_v21, %v7923_v22  ;;  %v8469_v21 = vld [vmem:[%s12047_s12 + $0x6d0] sm:$0xf]  ;;  %v11071_v22 = vld [vmem:[%s12047_s12 + $0x6f0] sm:$0xf0] }
  0xdc   : > { %2159 = vmatpush.bf16.msrb.mxu2 %v7670_v40  ;;  %v7749_v40 = vld [vmem:[%s12047_s12 + $0x130] sm:$0xf]  ;;  %v8514_v45 = vor.u32 %v11081_v37, %v8513_v36  ;;  %v10994_v37 = vld [vmem:[%s12047_s12 + $0x48c] sm:$0xf] }
  0xdd   : > { %2172 = vmatpush.bf16.msrb.mxu3 %v7958_v43  ;;  %2341 = vmatpush.bf16.msrb.mxu1 %v8258_v44  ;;  %v8358_v43 = vor.u32 %v11039_v33, %v8355_v34  ;;  %v10958_v44 = vld [vmem:[%s12047_s12 + $0x36c] sm:$0xf]  ;;  %v7750_v49 = vor.u32 %v10891_v41, %v7749_v40  ;;  %v7887_v34 = vld [vmem:[%s12047_s12 + $0x26c] sm:$0xf0]  ;;  %v8433_v41 = vld [vmem:[%s12047_s12 + $0x688] sm:$0xf] }
  0xde   : > { %v8034_v56 = vor.u32 %v10958_v44, %v8031_v46  ;;  %v8147_v36 = vld [vmem:[%s12047_s12 + $0x46c] sm:$0xf0]  ;;  %v11062_v44 = vld [vmem:[%s12047_s12 + $0x6a8] sm:$0xf0] }
  0xdf   : > { %2251 = vmatpush.bf16.msrb.mxu0 %v8502_v51  ;;  %v11072_v51 = vld [vmem:[%s12047_s12 + $0x6f8] sm:$0xf0]  ;;  %v8175_v40 = vld [vmem:[%s12047_s12 + $0x4ac] sm:$0xf0]  ;;  %v11098_v46 = vld [vmem:[%s12047_s12 + $0x7c8] sm:$0xf0]  ;;  %v8434_v52 = vor.u32 %v11062_v44, %v8433_v41 }
  0xe0   : > { %2160 = vmatpush.bf16.msrb.mxu2 %v7634_v54  ;;  %v7713_v54 = vld [vmem:[%s12047_s12 + $0xe8] sm:$0xf]  ;;  %v10905_v41 = vld [vmem:[%s12047_s12 + $0x1c4] sm:$0xf]  ;;  %v8125_v44 = vld [vmem:[%s12047_s12 + $0x410] sm:$0xf] }
  0xe1   : > { %2173 = vmatpush.bf16.msrb.mxu3 %v7922_v58  ;;  %2342 = vmatpush.bf16.msrb.mxu1 %v8222_v59  ;;  %v10949_v58 = vld [vmem:[%s12047_s12 + $0x324] sm:$0xf]  ;;  %v8478_v59 = vor.u32 %v11072_v51, %v8477_v50  ;;  %v7714_v0 = vor.u32 %v10882_v55, %v7713_v54  ;;  %v8178_v51 = vor.u32 %v10994_v37, %v8175_v40  ;;  %v8397_v54 = vld [vmem:[%s12047_s12 + $0x640] sm:$0xf]  ;;  %v11026_v37 = vld [vmem:[%s12047_s12 + $0x588] sm:$0xf0] }
  0xe2   : > { %v7998_v6 = vor.u32 %v10949_v58, %v7995_v60  ;;  %v10977_v55 = vld [vmem:[%s12047_s12 + $0x404] sm:$0xf] }
  0xe3   : > { %2252 = vmatpush.bf16.msrb.mxu0 %v8466_v3  ;;  %v7831_v3 = vld [vmem:[%s12047_s12 + $0x1ec] sm:$0xf0]  ;;  %v11053_v58 = vld [vmem:[%s12047_s12 + $0x660] sm:$0xf0] }
  0xe4   : > { %2161 = vmatpush.bf16.msrb.mxu2 %v7598_v7  ;;  %v8286_v7 = vor.u32 %v11021_v61, %v8283_v62  ;;  %v11089_v60 = vld [vmem:[%s12047_s12 + $0x780] sm:$0xf0]  ;;  %v10870_v61 = vld [vmem:[%s12047_s12 + $0xac] sm:$0xf]  ;;  %v7687_v62 = vld [vmem:[%s12047_s12 + $0xcc] sm:$0xf0] }
  0xe5   : > { %2174 = vmatpush.bf16.msrb.mxu3 %v7886_v11  ;;  %2343 = vmatpush.bf16.msrb.mxu1 %v8186_v12  ;;  %v8247_v11 = vld [vmem:[%s12047_s12 + $0x53c] sm:$0xf0]  ;;  %v7834_v12 = vor.u32 %v10906_v1, %v7831_v3  ;;  %v8361_v3 = vld [vmem:[%s12047_s12 + $0x5f8] sm:$0xf] }
  0xe6   : > { %8598 = vmatmul.msk.bf16.vlgmr.msrb.gmra.mxu0 %vm2046_vm0, %v12142_v14  ;;  %v8250_v20 = vor.u32 %v11012_v10, %v8247_v11  ;;  %v10861_v10 = vld [vmem:[%s12047_s12 + $0x64] sm:$0xf]  ;;  %v7651_v11 = vld [vmem:[%s12047_s12 + $0x84] sm:$0xf0] }
  0xe7   : > { %2258 = vmatpush.bf16.msra.mxu0 %v7858_v8  ;;  %2162 = vmatmul.bf16.vlgmr.msrb.gmra.mxu2 %v12167_v39  ;;  %v10940_v8 = vld [vmem:[%s12047_s12 + $0x2dc] sm:$0xf] }
  0xe8   : > { %2219 = vmatpush.bf16.msra.mxu2 %v8142_v16  ;;  %2175 = vmatmul.bf16.vlgmr.msrb.gmra.mxu3 %v12165_v38  ;;  %v7795_v16 = vld [vmem:[%s12047_s12 + $0x1a4] sm:$0xf0] }
  0xe9   : > { %2232 = vmatpush.bf16.msra.mxu3 %v8430_v17  ;;  %2405 = vmatpush.bf16.msra.mxu1 %v8586_v19  ;;  %v7641_v17 = vld [vmem:[%s12047_s12 + $0x58] sm:$0xf]  ;;  %v7962_v19 = vor.u32 %v10940_v8, %v7959_v9  ;;  %v7798_v25 = vor.u32 %v10897_v15, %v7795_v16  ;;  %v11080_v9 = vld [vmem:[%s12047_s12 + $0x738] sm:$0xf0] }
  0xea   : > { %2344 = vmatmul.bf16.vlgmr.msrb.gmra.mxu1 %v12227_v2  ;;  %v7642_v26 = vor.u32 %v10864_v18, %v7641_v17  ;;  %v8505_v8 = vld [vmem:[%s12047_s12 + $0x718] sm:$0xf]  ;;  %v11035_v17 = vld [vmem:[%s12047_s12 + $0x5d0] sm:$0xf0] }
  0xeb   : > { %2259 = vmatpush.bf16.msra.mxu0 %v7822_v23  ;;  %v11003_v23 = vld [vmem:[%s12047_s12 + $0x4d4] sm:$0xf]  ;;  %v8506_v16 = vor.u32 %v11080_v9, %v8505_v8 }
  0xec   : > { %2220 = vmatpush.bf16.msra.mxu2 %v8106_v28  ;;  %v7759_v28 = vld [vmem:[%s12047_s12 + $0x15c] sm:$0xf0]  ;;  %v8214_v33 = vor.u32 %v11003_v23, %v8211_v24  ;;  %v10959_v18 = vld [vmem:[%s12047_s12 + $0x374] sm:$0xf]  ;;  %v10852_v23 = vld [vmem:[%s12047_s12 + $0x1c] sm:$0xf] }
  0xed   : > { %2233 = vmatpush.bf16.msra.mxu3 %v8394_v29  ;;  %2406 = vmatpush.bf16.msra.mxu1 %v8550_v31  ;;  %v10922_v29 = vld [vmem:[%s12047_s12 + $0x24c] sm:$0xf]  ;;  %v10855_v31 = vld [vmem:[%s12047_s12 + $0x30] sm:$0xf0]  ;;  %v7615_v24 = vld [vmem:[%s12047_s12 + $0x3c] sm:$0xf0] }
  0xee   : > { %v7890_v50 = vor.u32 %v10922_v29, %v7887_v34  ;;  %v10992_v29 = vld [vmem:[%s12047_s12 + $0x478] sm:$0xf0]  ;;  %v7618_v34 = vor.u32 %v10852_v23, %v7615_v24  ;;  %v10999_v9 = vld [vmem:[%s12047_s12 + $0x4b0] sm:$0xf0]  ;;  %v8017_v23 = vld [vmem:[%s12047_s12 + $0x338] sm:$0xf] }
  0xef   : > { %2260 = vmatpush.bf16.msra.mxu0 %v7786_v35  ;;  %v10986_v35 = vld [vmem:[%s12047_s12 + $0x44c] sm:$0xf]  ;;  %v10956_v24 = vld [vmem:[%s12047_s12 + $0x358] sm:$0xf0] }
  0xf0   : > { %2221 = vmatpush.bf16.msra.mxu2 %v8070_v42  ;;  %v7762_v42 = vor.u32 %v10888_v27, %v7759_v28  ;;  %v8150_v47 = vor.u32 %v10986_v35, %v8147_v36  ;;  %v8161_v28 = vld [vmem:[%s12047_s12 + $0x458] sm:$0xf]  ;;  %v8289_v36 = vld [vmem:[%s12047_s12 + $0x568] sm:$0xf] }
  0xf1   : > { %2234 = vmatpush.bf16.msra.mxu3 %v8358_v43  ;;  %2407 = vmatpush.bf16.msra.mxu1 %v8514_v45  ;;  %v7606_v43 = vor.u32 %v10855_v31, %v7605_v30  ;;  %v8577_v45 = vld [vmem:[%s12047_s12 + $0x7a8] sm:$0xf]  ;;  %v8470_v31 = vor.u32 %v11071_v22, %v8469_v21  ;;  %v8162_v40 = vor.u32 %v10992_v29, %v8161_v28  ;;  %v10869_v29 = vld [vmem:[%s12047_s12 + $0xa4] sm:$0xf] }
  0xf2   : > { %v8578_v53 = vor.u32 %v11098_v46, %v8577_v45  ;;  %v10983_v45 = vld [vmem:[%s12047_s12 + $0x430] sm:$0xf0]  ;;  %v8290_v46 = vor.u32 %v11026_v37, %v8289_v36  ;;  %v7981_v36 = vld [vmem:[%s12047_s12 + $0x2f0] sm:$0xf] }
  0xf3   : > { %2261 = vmatpush.bf16.msra.mxu0 %v7750_v49  ;;  %v7723_v49 = vld [vmem:[%s12047_s12 + $0x114] sm:$0xf0]  ;;  %v10947_v37 = vld [vmem:[%s12047_s12 + $0x310] sm:$0xf0] }
  0xf4   : > { %2222 = vmatpush.bf16.msra.mxu2 %v8034_v56  ;;  %v8111_v56 = vld [vmem:[%s12047_s12 + $0x424] sm:$0xf0] }
  0xf5   : > { %2235 = vmatpush.bf16.msra.mxu3 %v8322_v57  ;;  %2408 = vmatpush.bf16.msra.mxu1 %v8478_v59  ;;  %v7726_v57 = vor.u32 %v10879_v48, %v7723_v49  ;;  %v8541_v59 = vld [vmem:[%s12047_s12 + $0x760] sm:$0xf]  ;;  %v7967_v48 = vld [vmem:[%s12047_s12 + $0x304] sm:$0xf0] }
  0xf6   : > { %v8542_v1 = vor.u32 %v11089_v60, %v8541_v59  ;;  %v10932_v59 = vld [vmem:[%s12047_s12 + $0x29c] sm:$0xf]  ;;  %v7931_v60 = vld [vmem:[%s12047_s12 + $0x2bc] sm:$0xf0] }
  0xf7   : > { %2262 = vmatpush.bf16.msra.mxu0 %v7714_v0  ;;  %v8398_v0 = vor.u32 %v11053_v58, %v8397_v54  ;;  %v7787_v54 = vld [vmem:[%s12047_s12 + $0x19c] sm:$0xf0] }
  0xf8   : > { %2223 = vmatpush.bf16.msra.mxu2 %v7998_v6  ;;  %v7690_v6 = vor.u32 %v10870_v61, %v7687_v62  ;;  %v8217_v62 = vld [vmem:[%s12047_s12 + $0x4d8] sm:$0xf] }
  0xf9   : > { %2414 = vmatpush.bf16.msrb.mxu1 %v7870_v63  ;;  %2236 = vmatpush.bf16.msra.mxu3 %v8286_v7  ;;  %v8114_v63 = vor.u32 %v10977_v55, %v8111_v56  ;;  %v11044_v7 = vld [vmem:[%s12047_s12 + $0x618] sm:$0xf0]  ;;  %v8089_v56 = vld [vmem:[%s12047_s12 + $0x3c8] sm:$0xf] }
  0xfa   : > { %8601 = vmatmul.msk.bf16.vlgmr.msra.gmra.mxu1 %vm2046_vm0, %v12142_v14  ;;  %v8362_v15 = vor.u32 %v11044_v7, %v8361_v3  ;;  %v7751_v3 = vld [vmem:[%s12047_s12 + $0x154] sm:$0xf0]  ;;  %v8181_v7 = vld [vmem:[%s12047_s12 + $0x490] sm:$0xf] }
  0xfb   : > { %2263 = vmatpush.bf16.msra.mxu0 %v7678_v13  ;;  %v8325_v13 = vld [vmem:[%s12047_s12 + $0x5b0] sm:$0xf] }
  0xfc   : > { %2224 = vmatpush.bf16.msra.mxu2 %v7962_v19  ;;  %v8039_v19 = vld [vmem:[%s12047_s12 + $0x394] sm:$0xf0]  ;;  %v8326_v30 = vor.u32 %v11035_v17, %v8325_v13  ;;  %v10878_v13 = vld [vmem:[%s12047_s12 + $0xec] sm:$0xf] }
  0xfd   : > { %2415 = vmatpush.bf16.msrb.mxu1 %v7834_v12  ;;  %2237 = vmatpush.bf16.msra.mxu3 %v8250_v20  ;;  %v8078_v12 = vor.u32 %v10968_v4, %v8075_v5  ;;  %v7654_v20 = vor.u32 %v10861_v10, %v7651_v11  ;;  %v8042_v27 = vor.u32 %v10959_v18, %v8039_v19  ;;  %v8053_v5 = vld [vmem:[%s12047_s12 + $0x380] sm:$0xf]  ;;  %v10923_v10 = vld [vmem:[%s12047_s12 + $0x254] sm:$0xf]  ;;  %v7895_v11 = vld [vmem:[%s12047_s12 + $0x274] sm:$0xf0] }
  0xfe   : > { %v7934_v4 = vor.u32 %v10932_v59, %v7931_v60  ;;  %v7715_v18 = vld [vmem:[%s12047_s12 + $0x10c] sm:$0xf0]  ;;  %v11094_v19 = vld [vmem:[%s12047_s12 + $0x7ac] sm:$0xf]  ;;  %v7898_v22 = vor.u32 %v10923_v10, %v7895_v11  ;;  %v11067_v60 = vld [vmem:[%s12047_s12 + $0x6d4] sm:$0xf] }
  0xff   : > { %2264 = vmatpush.bf16.msra.mxu0 %v7642_v26  ;;  %v7859_v26 = vld [vmem:[%s12047_s12 + $0x22c] sm:$0xf0]  ;;  %v9434_v10 = vld [vmem:[%s12055_s17 + $0x678] sm:$0xf]  ;;  %v11312_v11 = vld [vmem:[%s12055_s17 + $0x698] sm:$0xf0] }
 0x100   : > { %2225 = vmatpush.bf16.msra.mxu2 %v7926_v32  ;;  %v10950_v32 = vld [vmem:[%s12047_s12 + $0x32c] sm:$0xf] }
 0x101   : > { %2416 = vmatpush.bf16.msrb.mxu1 %v7798_v25  ;;  %2238 = vmatpush.bf16.msra.mxu3 %v8214_v33  ;;  %v10914_v25 = vld [vmem:[%s12047_s12 + $0x20c] sm:$0xf]  ;;  %v8003_v33 = vld [vmem:[%s12047_s12 + $0x34c] sm:$0xf0] }
 0x102   : > { %v7862_v35 = vor.u32 %v10914_v25, %v7859_v26  ;;  %v8182_v25 = vor.u32 %v10999_v9, %v8181_v7  ;;  %v10991_v9 = vld [vmem:[%s12047_s12 + $0x470] sm:$0xf0] }
 0x103   : > { %2265 = vmatpush.bf16.msra.mxu0 %v7606_v43  ;;  %v8006_v43 = vor.u32 %v10950_v32, %v8003_v33  ;;  %v8018_v32 = vor.u32 %v10956_v24, %v8017_v23  ;;  %v7679_v33 = vld [vmem:[%s12047_s12 + $0xc4] sm:$0xf0]  ;;  %v9435_v23 = vor.u32 %v11312_v11, %v9434_v10  ;;  %v10955_v11 = vld [vmem:[%s12047_s12 + $0x350] sm:$0xf0] }
 0x104   : > { %2226 = vmatpush.bf16.msra.mxu2 %v7890_v50  ;;  %v8253_v50 = vld [vmem:[%s12047_s12 + $0x520] sm:$0xf]  ;;  %v7829_v24 = vld [vmem:[%s12047_s12 + $0x1c8] sm:$0xf] }
 0x105   : > { %2417 = vmatpush.bf16.msrb.mxu1 %v7762_v42  ;;  %2239 = vmatpush.bf16.msra.mxu3 %v8178_v51  ;;  %v7823_v42 = vld [vmem:[%s12047_s12 + $0x1e4] sm:$0xf0]  ;;  %v11017_v51 = vld [vmem:[%s12047_s12 + $0x540] sm:$0xf0] }
 0x106   : > { %2266 = vmatmul.bf16.vlgmr.msra.gmra.mxu0 %v12167_v39  ;;  %v7826_v49 = vor.u32 %v10905_v41, %v7823_v42  ;;  %v8254_v58 = vor.u32 %v11017_v51, %v8253_v50  ;;  %v7682_v41 = vor.u32 %v10869_v29, %v7679_v33  ;;  %v10982_v29 = vld [vmem:[%s12047_s12 + $0x428] sm:$0xf0]  ;;  %v8261_v33 = vld [vmem:[%s12047_s12 + $0x528] sm:$0xf] }
 0x107   : > { %2323 = vmatpush.bf16.msrb.mxu0 %v8150_v47  ;;  %2227 = vmatmul.bf16.vlgmr.msra.gmra.mxu2 %v12165_v38  ;;  %v10941_v47 = vld [vmem:[%s12047_s12 + $0x2e4] sm:$0xf] }
 0x108   : > { %2284 = vmatpush.bf16.msrb.mxu2 %v8434_v52  ;;  %2240 = vmatmul.bf16.vlgmr.msra.gmra.mxu3 %v12227_v2  ;;  %v8126_v52 = vor.u32 %v10983_v45, %v8125_v44  ;;  %v7970_v55 = vor.u32 %v10941_v47, %v7967_v48  ;;  %v8369_v44 = vld [vmem:[%s12047_s12 + $0x600] sm:$0xf]  ;;  %v11045_v45 = vld [vmem:[%s12047_s12 + $0x620] sm:$0xf0]  ;;  %v11076_v48 = vld [vmem:[%s12047_s12 + $0x71c] sm:$0xf] }
 0x109   : > { %2301 = vmatpush.bf16.msrb.mxu3 %v8578_v53  ;;  %2418 = vmatpush.bf16.msrb.mxu1 %v7726_v57  ;;  %v10896_v53 = vld [vmem:[%s12047_s12 + $0x17c] sm:$0xf]  ;;  %v10974_v57 = vld [vmem:[%s12047_s12 + $0x3e8] sm:$0xf0]  ;;  %v7643_v47 = vld [vmem:[%s12047_s12 + $0x7c] sm:$0xf0] }
 0x10a   : > { %v7790_v61 = vor.u32 %v10896_v53, %v7787_v54  ;;  %v10938_v53 = vld [vmem:[%s12047_s12 + $0x2c8] sm:$0xf0] }
 0x10b   : > { %2324 = vmatpush.bf16.msrb.mxu0 %v8114_v63  ;;  %v11008_v63 = vld [vmem:[%s12047_s12 + $0x4f8] sm:$0xf0] }
 0x10c   : > { %2285 = vmatpush.bf16.msrb.mxu2 %v8398_v0  ;;  %v8090_v0 = vor.u32 %v10974_v57, %v8089_v56  ;;  %v8218_v8 = vor.u32 %v11008_v63, %v8217_v62  ;;  %v12465_v21 = vpop.f32.mrf.mxu1  ;;  %v10851_v56 = vld [vmem:[%s12047_s12 + $0x14] sm:$0xf]  ;;  %v7607_v57 = vld [vmem:[%s12047_s12 + $0x34] sm:$0xf0]  ;;  %v11036_v62 = vld [vmem:[%s12047_s12 + $0x5d8] sm:$0xf0] }
 0x10d   : > { %2302 = vmatpush.bf16.msrb.mxu3 %v8542_v1  ;;  %2419 = vmatpush.bf16.msrb.mxu1 %v7690_v6  ;;  %v10887_v1 = vld [vmem:[%s12047_s12 + $0x134] sm:$0xf]  ;;  %v10965_v6 = vld [vmem:[%s12047_s12 + $0x3a0] sm:$0xf0] }
 0x10e   : > { %v8054_v17 = vor.u32 %v10965_v6, %v8053_v5  ;;  %v10919_v5 = vld [vmem:[%s12047_s12 + $0x230] sm:$0xf0]  ;;  %v8153_v6 = vld [vmem:[%s12047_s12 + $0x450] sm:$0xf] }
 0x10f   : > { %2325 = vmatpush.bf16.msrb.mxu0 %v8078_v12  ;;  %v7754_v12 = vor.u32 %v10887_v1, %v7751_v3  ;;  %v7909_v1 = vld [vmem:[%s12047_s12 + $0x260] sm:$0xf]  ;;  %v10929_v3 = vld [vmem:[%s12047_s12 + $0x280] sm:$0xf0] }
 0x110   : > { %2286 = vmatpush.bf16.msrb.mxu2 %v8362_v15  ;;  %v8441_v15 = vld [vmem:[%s12047_s12 + $0x690] sm:$0xf] }
 0x111   : > { %2303 = vmatpush.bf16.msrb.mxu3 %v8506_v16  ;;  %2420 = vmatpush.bf16.msrb.mxu1 %v7654_v20  ;;  %v11063_v16 = vld [vmem:[%s12047_s12 + $0x6b0] sm:$0xf0]  ;;  %v8579_v20 = vld [vmem:[%s12047_s12 + $0x7cc] sm:$0xf0] }
 0x112   : > { %v8442_v26 = vor.u32 %v11063_v16, %v8441_v15  ;;  %v8582_v28 = vor.u32 %v11094_v19, %v8579_v20  ;;  %v8297_v16 = vld [vmem:[%s12047_s12 + $0x570] sm:$0xf] }
 0x113   : > { %2326 = vmatpush.bf16.msrb.mxu0 %v8042_v27  ;;  %v7718_v27 = vor.u32 %v10878_v13, %v7715_v18  ;;  %v2059_v51 = vpop.f32.mrf.mxu0  ;;  %v12487_v54 = vpop.f32.mrf.mxu3  ;;  %v7610_v13 = vor.u32 %v10851_v56, %v7607_v57  ;;  %v7910_v18 = vor.u32 %v10929_v3, %v7909_v1  ;;  %v8045_v56 = vld [vmem:[%s12047_s12 + $0x378] sm:$0xf]  ;;  %v11095_v3 = vld [vmem:[%s12047_s12 + $0x7b4] sm:$0xf] }
 0x114   : > { %2287 = vmatpush.bf16.msrb.mxu2 %v8326_v30  ;;  %v8405_v30 = vld [vmem:[%s12047_s12 + $0x648] sm:$0xf]  ;;  %v2204_v50 = vpop.f32.mrf.mxu1 }
 0x115   : > { %2304 = vmatpush.bf16.msrb.mxu3 %v8470_v31  ;;  %2421 = vmatpush.bf16.msrb.mxu1 %v7618_v34  ;;  %v11054_v31 = vld [vmem:[%s12047_s12 + $0x668] sm:$0xf0]  ;;  %v11085_v34 = vld [vmem:[%s12047_s12 + $0x764] sm:$0xf] }
 0x117   : > { %2327 = vmatpush.bf16.msrb.mxu0 %v8006_v43  ;;  %v10860_v43 = vld [vmem:[%s12047_s12 + $0x5c] sm:$0xf] }
 0x118   : > { %2288 = vmatpush.bf16.msrb.mxu2 %v8290_v46  ;;  %2422 = vmatmul.bf16.vlgmr.msrb.gmra.mxu1 %v12167_v39  ;;  %v7982_v46 = vor.u32 %v10947_v37, %v7981_v36 }
 0x119   : > { %2310 = vmatpush.bf16.msra.mxu3 %v7862_v35  ;;  %2479 = vmatpush.bf16.msra.mxu1 %v8162_v40  ;;  %v8543_v35 = vld [vmem:[%s12047_s12 + $0x784] sm:$0xf0]  ;;  %v8406_v40 = vor.u32 %v11054_v31, %v8405_v30  ;;  %v9398_v30 = vld [vmem:[%s12055_s17 + $0x630] sm:$0xf]  ;;  %v11303_v31 = vld [vmem:[%s12055_s17 + $0x650] sm:$0xf0] }
 0x11a   : > { %8599 = vmatmul.msk.bf16.vlgmr.msrb.gmra.mxu3 %vm2046_vm0, %v12142_v14  ;;  %v8546_v42 = vor.u32 %v11085_v34, %v8543_v35  ;;  %v2072_v7 = vpop.f32.mrf.mxu2  ;;  %v11018_v34 = vld [vmem:[%s12047_s12 + $0x548] sm:$0xf0]  ;;  %v9399_v37 = vor.u32 %v11303_v31, %v9398_v30  ;;  %v11267_v30 = vld [vmem:[%s12055_s17 + $0x530] sm:$0xf0] }
 0x11b   : > { %2328 = vmatpush.bf16.msrb.mxu0 %v7970_v55  ;;  %v8370_v55 = vor.u32 %v11045_v45, %v8369_v44  ;;  %v2061_v20 = vpop.f32.mrf.mxu0  ;;  %v8262_v44 = vor.u32 %v11018_v34, %v8261_v33  ;;  %v10973_v45 = vld [vmem:[%s12047_s12 + $0x3e0] sm:$0xf0] }
 0x11c   : > { %2289 = vmatpush.bf16.msrb.mxu2 %v8254_v58  ;;  %v7646_v58 = vor.u32 %v10860_v43, %v7643_v47  ;;  %v11294_v47 = vld [vmem:[%s12055_s17 + $0x608] sm:$0xf0] }
 0x11d   : > { %2311 = vmatpush.bf16.msra.mxu3 %v7826_v49  ;;  %2480 = vmatpush.bf16.msra.mxu1 %v8126_v52  ;;  %v8507_v49 = vld [vmem:[%s12047_s12 + $0x73c] sm:$0xf0]  ;;  %v7945_v52 = vld [vmem:[%s12047_s12 + $0x2a8] sm:$0xf] }
 0x11e   : > { %v8510_v59 = vor.u32 %v11076_v48, %v8507_v49  ;;  %v7946_v63 = vor.u32 %v10938_v53, %v7945_v52  ;;  %v8225_v48 = vld [vmem:[%s12047_s12 + $0x4e0] sm:$0xf]  ;;  %v11009_v49 = vld [vmem:[%s12047_s12 + $0x500] sm:$0xf0]  ;;  %v7757_v53 = vld [vmem:[%s12047_s12 + $0x138] sm:$0xf] }
 0x11f   : > { %2329 = vmatpush.bf16.msrb.mxu0 %v7934_v4  ;;  %v7865_v4 = vld [vmem:[%s12047_s12 + $0x210] sm:$0xf]  ;;  %v8226_v57 = vor.u32 %v11009_v49, %v8225_v48  ;;  %v7613_v49 = vld [vmem:[%s12047_s12 + $0x18] sm:$0xf] }
 0x120   : > { %2290 = vmatpush.bf16.msrb.mxu2 %v8218_v8  ;;  %v7866_v19 = vor.u32 %v10919_v5, %v7865_v4  ;;  %v8587_v4 = vld [vmem:[%s12047_s12 + $0x7d4] sm:$0xf0] }
 0x121   : > { %2312 = vmatpush.bf16.msra.mxu3 %v7790_v61  ;;  %2481 = vmatpush.bf16.msra.mxu1 %v8090_v0  ;;  %v8333_v61 = vld [vmem:[%s12047_s12 + $0x5b8] sm:$0xf] }
 0x122   : > { %v8471_v0 = vld [vmem:[%s12047_s12 + $0x6f4] sm:$0xf0]  ;;  %v8334_v8 = vor.u32 %v11036_v62, %v8333_v61  ;;  %v2074_v43 = vpop.f32.mrf.mxu2 }
 0x123   : > { %2330 = vmatpush.bf16.msrb.mxu0 %v7898_v22  ;;  %v8474_v15 = vor.u32 %v11067_v60, %v8471_v0  ;;  %v8154_v22 = vor.u32 %v10991_v9, %v8153_v6  ;;  %v11285_v60 = vld [vmem:[%s12055_s17 + $0x5c0] sm:$0xf0]  ;;  %v11000_v0 = vld [vmem:[%s12047_s12 + $0x4b8] sm:$0xf0]  ;;  %v8009_v9 = vld [vmem:[%s12047_s12 + $0x330] sm:$0xf] }
 0x124   : > { %2291 = vmatpush.bf16.msrb.mxu2 %v8182_v25  ;;  %v10910_v25 = vld [vmem:[%s12047_s12 + $0x1e8] sm:$0xf0]  ;;  %v7937_v43 = vld [vmem:[%s12047_s12 + $0x2a0] sm:$0xf] }
 0x125   : > { %2313 = vmatpush.bf16.msra.mxu3 %v7754_v12  ;;  %2482 = vmatpush.bf16.msra.mxu1 %v8054_v17  ;;  %v12503_v12 = vadd.f32 %v2072_v7, %v2059_v51  ;;  %v11027_v17 = vld [vmem:[%s12047_s12 + $0x590] sm:$0xf0]  ;;  %v7830_v35 = vor.u32 %v10910_v25, %v7829_v24  ;;  %v7721_v7 = vld [vmem:[%s12047_s12 + $0xf0] sm:$0xf]  ;;  %v7685_v24 = vld [vmem:[%s12047_s12 + $0xa8] sm:$0xf] }
 0x126   : > { %2331 = vmatmul.bf16.vlgmr.msrb.gmra.mxu0 %v12165_v38  ;;  %v10874_v25 = vld [vmem:[%s12047_s12 + $0xc8] sm:$0xf0] }
 0x127   : > { %2388 = vmatpush.bf16.msra.mxu0 %v8442_v26  ;;  %2292 = vmatmul.bf16.vlgmr.msrb.gmra.mxu2 %v12227_v2  ;;  %v8117_v26 = vld [vmem:[%s12047_s12 + $0x408] sm:$0xf]  ;;  %v7686_v34 = vor.u32 %v10874_v25, %v7685_v24  ;;  %v8407_v24 = vld [vmem:[%s12047_s12 + $0x66c] sm:$0xf0] }
 0x128   : > { %2353 = vmatpush.bf16.msra.mxu2 %v8582_v28  ;;  %v8298_v28 = vor.u32 %v11027_v17, %v8297_v16  ;;  %v8118_v36 = vor.u32 %v10982_v29, %v8117_v26  ;;  %v8590_v16 = vor.u32 %v11095_v3, %v8587_v4  ;;  %v7973_v26 = vld [vmem:[%s12047_s12 + $0x2e8] sm:$0xf]  ;;  %v9254_v29 = vld [vmem:[%s12055_s17 + $0x510] sm:$0xf]  ;;  %v8155_v4 = vld [vmem:[%s12047_s12 + $0x474] sm:$0xf0] }
 0x129   : > { %2314 = vmatpush.bf16.msra.mxu3 %v7718_v27  ;;  %2483 = vmatpush.bf16.msra.mxu1 %v8018_v32  ;;  %v2100_v27 = vpop.f32.mrf.mxu3  ;;  %v12513_v32 = vpop.f32.mrf.mxu1 }
 0x12b   : > { %2389 = vmatpush.bf16.msra.mxu0 %v8406_v40  ;;  %v7793_v40 = vld [vmem:[%s12047_s12 + $0x180] sm:$0xf] }
 0x12c   : > { %2354 = vmatpush.bf16.msra.mxu2 %v8546_v42  ;;  %v8081_v42 = vld [vmem:[%s12047_s12 + $0x3c0] sm:$0xf] }
 0x12d   : > { %2315 = vmatpush.bf16.msra.mxu3 %v7682_v41  ;;  %2484 = vmatpush.bf16.msra.mxu1 %v7982_v46  ;;  %v10901_v41 = vld [vmem:[%s12047_s12 + $0x1a0] sm:$0xf0]  ;;  %v9362_v46 = vld [vmem:[%s12055_s17 + $0x5e8] sm:$0xf]  ;;  %v8082_v51 = vor.u32 %v10973_v45, %v8081_v42 }
 0x12e   : > { %v7794_v50 = vor.u32 %v10901_v41, %v7793_v40  ;;  %v9363_v52 = vor.u32 %v11294_v47, %v9362_v46  ;;  %v9255_v40 = vor.u32 %v11267_v30, %v9254_v29  ;;  %v7649_v41 = vld [vmem:[%s12047_s12 + $0x60] sm:$0xf]  ;;  %v10865_v42 = vld [vmem:[%s12047_s12 + $0x80] sm:$0xf0]  ;;  %v9218_v45 = vld [vmem:[%s12055_s17 + $0x4c8] sm:$0xf] }
 0x12f   : > { %2390 = vmatpush.bf16.msra.mxu0 %v8370_v55  ;;  %v10892_v55 = vld [vmem:[%s12047_s12 + $0x158] sm:$0xf0]  ;;  %v11258_v46 = vld [vmem:[%s12055_s17 + $0x4e8] sm:$0xf0]  ;;  %v9544_v29 = vld [vmem:[%s12055_s17 + $0x774] sm:$0xf0] }
 0x130   : > { %2355 = vmatpush.bf16.msra.mxu2 %v8510_v59  ;;  %v9326_v59 = vld [vmem:[%s12055_s17 + $0x5a0] sm:$0xf]  ;;  %v7758_v1 = vor.u32 %v10892_v55, %v7757_v53  ;;  %v7901_v53 = vld [vmem:[%s12047_s12 + $0x258] sm:$0xf]  ;;  %v11068_v55 = vld [vmem:[%s12047_s12 + $0x6dc] sm:$0xf] }
 0x131   : > { %2316 = vmatpush.bf16.msra.mxu3 %v7646_v58  ;;  %2485 = vmatpush.bf16.msra.mxu1 %v7946_v63  ;;  %v10964_v58 = vld [vmem:[%s12047_s12 + $0x398] sm:$0xf0]  ;;  %v2111_v61 = vpop.f32.mrf.mxu3  ;;  %v2217_v62 = vpop.f32.mrf.mxu1  ;;  %v8189_v63 = vld [vmem:[%s12047_s12 + $0x498] sm:$0xf]  ;;  %v9327_v6 = vor.u32 %v11285_v60, %v9326_v59  ;;  %v9219_v59 = vor.u32 %v11258_v46, %v9218_v45  ;;  %v7801_v30 = vld [vmem:[%s12047_s12 + $0x188] sm:$0xf] }
 0x132   : > { %v8046_v5 = vor.u32 %v10964_v58, %v8045_v56  ;;  %v8190_v10 = vor.u32 %v11000_v0, %v8189_v63  ;;  %v8479_v56 = vld [vmem:[%s12047_s12 + $0x6fc] sm:$0xf0]  ;;  %v10928_v60 = vld [vmem:[%s12047_s12 + $0x278] sm:$0xf0]  ;;  %v11249_v0 = vld [vmem:[%s12055_s17 + $0x4a0] sm:$0xf0] }
 0x133   : > { %2391 = vmatpush.bf16.msra.mxu0 %v8334_v8  ;;  %v10883_v8 = vld [vmem:[%s12047_s12 + $0x110] sm:$0xf0]  ;;  %v2124_v20 = vpop.f32.mrf.mxu0  ;;  %v9182_v63 = vld [vmem:[%s12055_s17 + $0x480] sm:$0xf]  ;;  %v8482_v3 = vor.u32 %v11068_v55, %v8479_v56  ;;  %v11032_v55 = vld [vmem:[%s12047_s12 + $0x5bc] sm:$0xf] }
 0x134   : > { %2356 = vmatpush.bf16.msra.mxu2 %v8474_v15  ;;  %v11276_v15 = vld [vmem:[%s12055_s17 + $0x578] sm:$0xf0]  ;;  %v7722_v17 = vor.u32 %v10883_v8, %v7721_v7  ;;  %v12550_v27 = vadd.f32 %v2124_v20, %v2111_v61  ;;  %v7873_v61 = vld [vmem:[%s12047_s12 + $0x218] sm:$0xf]  ;;  %v8335_v56 = vld [vmem:[%s12047_s12 + $0x5dc] sm:$0xf0] }
 0x135   : > { %2317 = vmatpush.bf16.msra.mxu3 %v7610_v13  ;;  %2486 = vmatpush.bf16.msra.mxu1 %v7910_v18  ;;  %v9290_v13 = vld [vmem:[%s12055_s17 + $0x558] sm:$0xf]  ;;  %v11086_v18 = vld [vmem:[%s12047_s12 + $0x76c] sm:$0xf] }
 0x137   : > { %2392 = vmatpush.bf16.msra.mxu0 %v8298_v28  ;;  %8600 = vmatmul.msk.bf16.vlgmr.msra.gmra.mxu2 %vm2046_vm0, %v12142_v14  ;;  %v10946_v28 = vld [vmem:[%s12047_s12 + $0x308] sm:$0xf0] }
 0x138   : > { %2362 = vmatpush.bf16.msrb.mxu2 %v7866_v19  ;;  %2318 = vmatmul.bf16.vlgmr.msra.gmra.mxu3 %v12167_v39  ;;  %v8551_v19 = vld [vmem:[%s12047_s12 + $0x78c] sm:$0xf0] }
 0x139   : > { %2375 = vmatpush.bf16.msrb.mxu3 %v8154_v22  ;;  %4112 = vmatpush.bf16.msrb.mxu1 %v9435_v23  ;;  %v8010_v22 = vor.u32 %v10955_v11, %v8009_v9  ;;  %v9291_v23 = vor.u32 %v11276_v15, %v9290_v13  ;;  %v2113_v31 = vpop.f32.mrf.mxu3  ;;  %v8554_v33 = vor.u32 %v11086_v18, %v8551_v19  ;;  %v11344_v9 = vld [vmem:[%s12055_s17 + $0x79c] sm:$0xf]  ;;  %v7837_v13 = vld [vmem:[%s12047_s12 + $0x1d0] sm:$0xf]  ;;  %v10911_v15 = vld [vmem:[%s12047_s12 + $0x1f0] sm:$0xf0] }
 0x13a   : > { %2487 = vmatmul.bf16.vlgmr.msra.gmra.mxu1 %v12165_v38  ;;  %v2085_v47 = vpop.f32.mrf.mxu2  ;;  %v9183_v11 = vor.u32 %v11249_v0, %v9182_v63  ;;  %v10978_v18 = vld [vmem:[%s12047_s12 + $0x40c] sm:$0xf]  ;;  %v11169_v63 = vld [vmem:[%s12055_s17 + $0x220] sm:$0xf0]  ;;  %v7729_v0 = vld [vmem:[%s12047_s12 + $0xf8] sm:$0xf] }
 0x13b   : > { %2393 = vmatpush.bf16.msra.mxu0 %v8262_v44  ;;  %v10937_v44 = vld [vmem:[%s12047_s12 + $0x2c0] sm:$0xf0]  ;;  %v10902_v31 = vld [vmem:[%s12047_s12 + $0x1a8] sm:$0xf0] }
 0x13c   : > { %2363 = vmatpush.bf16.msrb.mxu2 %v7830_v35  ;;  %v11077_v35 = vld [vmem:[%s12047_s12 + $0x724] sm:$0xf]  ;;  %v7938_v58 = vor.u32 %v10937_v44, %v7937_v43  ;;  %v11326_v43 = vld [vmem:[%s12055_s17 + $0x70c] sm:$0xf]  ;;  %v9508_v44 = vld [vmem:[%s12055_s17 + $0x72c] sm:$0xf0] }
 0x13d   : > { %2376 = vmatpush.bf16.msrb.mxu3 %v8118_v36  ;;  %4113 = vmatpush.bf16.msrb.mxu1 %v9399_v37  ;;  %v8515_v36 = vld [vmem:[%s12047_s12 + $0x744] sm:$0xf0]  ;;  %v7974_v37 = vor.u32 %v10946_v28, %v7973_v26  ;;  %v7838_v26 = vor.u32 %v10911_v15, %v7837_v13  ;;  %v11335_v28 = vld [vmem:[%s12055_s17 + $0x754] sm:$0xf]  ;;  %v11160_v15 = vld [vmem:[%s12055_s17 + $0x1d8] sm:$0xf0] }
 0x13e   : > { %v8518_v48 = vor.u32 %v11077_v35, %v8515_v36  ;;  %v10969_v35 = vld [vmem:[%s12047_s12 + $0x3c4] sm:$0xf]  ;;  %v9547_v36 = vor.u32 %v11335_v28, %v9544_v29 }
 0x13f   : > { %2394 = vmatpush.bf16.msra.mxu0 %v8226_v57  ;;  %v2126_v57 = vpop.f32.mrf.mxu0 }
 0x140   : > { %2364 = vmatpush.bf16.msrb.mxu2 %v7794_v50  ;;  %v10856_v50 = vld [vmem:[%s12047_s12 + $0x38] sm:$0xf0] }
 0x141   : > { %2377 = vmatpush.bf16.msrb.mxu3 %v8082_v51  ;;  %4114 = vmatpush.bf16.msrb.mxu1 %v9363_v52  ;;  %v2086_v51 = vadd.f32 %v2085_v47, %v12503_v12  ;;  %v7650_v52 = vor.u32 %v10865_v42, %v7649_v41  ;;  %v10920_v12 = vld [vmem:[%s12047_s12 + $0x238] sm:$0xf0]  ;;  %v7614_v7 = vor.u32 %v10856_v50, %v7613_v49  ;;  %v8371_v41 = vld [vmem:[%s12047_s12 + $0x624] sm:$0xf0]  ;;  %v7765_v47 = vld [vmem:[%s12047_s12 + $0x140] sm:$0xf] }
 0x142   : > { %v7874_v8 = vor.u32 %v10920_v12, %v7873_v61  ;;  %v2087_v20 = vpop.f32.mrf.mxu2  ;;  %v7802_v42 = vor.u32 %v10902_v31, %v7801_v30  ;;  %v8866_v61 = vld [vmem:[%s12055_s17 + $0x200] sm:$0xf]  ;;  %v8794_v30 = vld [vmem:[%s12055_s17 + $0x170] sm:$0xf] }
 0x143   : > { %2395 = vmatpush.bf16.msra.mxu0 %v8190_v10  ;;  %v12574_v62 = vadd.f32 %v12487_v54, %v2086_v51  ;;  %v9580_v54 = vld [vmem:[%s12055_s17 + $0x7bc] sm:$0xf0]  ;;  %v7902_v10 = vor.u32 %v10928_v60, %v7901_v53  ;;  %v10960_v51 = vld [vmem:[%s12047_s12 + $0x37c] sm:$0xf]  ;;  %v9472_v60 = vld [vmem:[%s12055_s17 + $0x6e4] sm:$0xf0] }
 0x144   : > { %2365 = vmatpush.bf16.msrb.mxu2 %v7758_v1  ;;  %v10987_v1 = vld [vmem:[%s12047_s12 + $0x454] sm:$0xf]  ;;  %v9583_v19 = vor.u32 %v11344_v9, %v9580_v54  ;;  %v8047_v53 = vld [vmem:[%s12047_s12 + $0x39c] sm:$0xf0]  ;;  %v8299_v9 = vld [vmem:[%s12047_s12 + $0x594] sm:$0xf0]  ;;  %v8867_v54 = vor.u32 %v11169_v63, %v8866_v61 }
 0x145   : > { %2378 = vmatpush.bf16.msrb.mxu3 %v8046_v5  ;;  %4115 = vmatpush.bf16.msrb.mxu1 %v9327_v6  ;;  %v11059_v5 = vld [vmem:[%s12047_s12 + $0x694] sm:$0xf]  ;;  %v8443_v6 = vld [vmem:[%s12047_s12 + $0x6b4] sm:$0xf0]  ;;  %v10942_v20 = vld [vmem:[%s12047_s12 + $0x2ec] sm:$0xf] }
 0x146   : > { %2396 = vmatmul.bf16.vlgmr.msra.gmra.mxu0 %v12227_v2  ;;  %v11064_v63 = vld [vmem:[%s12047_s12 + $0x6b8] sm:$0xf0] }
 0x147   : > { %2457 = vmatpush.bf16.msrb.mxu0 %v8590_v16  ;;  %v8158_v16 = vor.u32 %v10987_v1, %v8155_v4  ;;  %v12590_v25 = vpop.f32.mrf.mxu1  ;;  %v10884_v1 = vld [vmem:[%s12047_s12 + $0x118] sm:$0xf0]  ;;  %v8338_v4 = vor.u32 %v11032_v55, %v8335_v56  ;;  %v9146_v55 = vld [vmem:[%s12055_s17 + $0x438] sm:$0xf] }
 0x148   : > { %2366 = vmatpush.bf16.msrb.mxu2 %v7722_v17  ;;  %v8446_v17 = vor.u32 %v11059_v5, %v8443_v6  ;;  %v10951_v5 = vld [vmem:[%s12047_s12 + $0x334] sm:$0xf]  ;;  %v11240_v56 = vld [vmem:[%s12055_s17 + $0x458] sm:$0xf0] }
 0x149   : > { %2379 = vmatpush.bf16.msrb.mxu3 %v8010_v22  ;;  %4116 = vmatpush.bf16.msrb.mxu1 %v9291_v23  ;;  %v8119_v22 = vld [vmem:[%s12047_s12 + $0x42c] sm:$0xf0]  ;;  %v11050_v23 = vld [vmem:[%s12047_s12 + $0x64c] sm:$0xf] }
 0x14a   : > { %v2150_v57 = vpop.f32.mrf.mxu2 }
 0x14b   : > { %2458 = vmatpush.bf16.msrb.mxu0 %v8554_v33  ;;  %v8122_v33 = vor.u32 %v10978_v18, %v8119_v22  ;;  %v2137_v45 = vpop.f32.mrf.mxu3 }
 0x14c   : > { %2367 = vmatpush.bf16.msrb.mxu2 %v7686_v34  ;;  %v8410_v34 = vor.u32 %v11050_v23, %v8407_v24  ;;  %v2138_v46 = vadd.f32 %v2137_v45, %v12550_v27  ;;  %v7975_v23 = vld [vmem:[%s12047_s12 + $0x30c] sm:$0xf0]  ;;  %v11014_v24 = vld [vmem:[%s12047_s12 + $0x52c] sm:$0xf] }
 0x14d   : > { %2380 = vmatpush.bf16.msrb.mxu3 %v7974_v37  ;;  %4117 = vmatpush.bf16.msrb.mxu1 %v9255_v40  ;;  %v8083_v37 = vld [vmem:[%s12047_s12 + $0x3e4] sm:$0xf0]  ;;  %v11041_v40 = vld [vmem:[%s12047_s12 + $0x604] sm:$0xf] }
 0x14e   : > { %v8086_v49 = vor.u32 %v10969_v35, %v8083_v37  ;;  %v8374_v50 = vor.u32 %v11041_v40, %v8371_v41  ;;  %v12617_v12 = vadd.f32 %v2150_v57, %v2138_v46  ;;  %v10866_v35 = vld [vmem:[%s12047_s12 + $0x88] sm:$0xf0]  ;;  %v10933_v40 = vld [vmem:[%s12047_s12 + $0x2a4] sm:$0xf]  ;;  %v7939_v41 = vld [vmem:[%s12047_s12 + $0x2c4] sm:$0xf0] }
 0x14f   : > { %2459 = vmatpush.bf16.msrb.mxu0 %v8518_v48  ;;  %v10893_v48 = vld [vmem:[%s12047_s12 + $0x160] sm:$0xf0]  ;;  %v2282_v27 = vpop.f32.mrf.mxu1  ;;  %v8758_v46 = vld [vmem:[%s12055_s17 + $0x128] sm:$0xf]  ;;  %v10996_v57 = vld [vmem:[%s12047_s12 + $0x49c] sm:$0xf] }
 0x150   : > { %2368 = vmatpush.bf16.msrb.mxu2 %v7650_v52  ;;  %v9511_v52 = vor.u32 %v11326_v43, %v9508_v44  ;;  %v8227_v43 = vld [vmem:[%s12047_s12 + $0x504] sm:$0xf0] }
 0x151   : > { %2381 = vmatpush.bf16.msrb.mxu3 %v7938_v58  ;;  %4118 = vmatpush.bf16.msrb.mxu1 %v9219_v59  ;;  %v7766_v58 = vor.u32 %v10893_v48, %v7765_v47  ;;  %v11317_v59 = vld [vmem:[%s12055_s17 + $0x6c4] sm:$0xf]  ;;  %v11142_v47 = vld [vmem:[%s12055_s17 + $0x148] sm:$0xf0]  ;;  %v10924_v48 = vld [vmem:[%s12047_s12 + $0x25c] sm:$0xf] }
 0x152   : > { %v9475_v6 = vor.u32 %v11317_v59, %v9472_v60  ;;  %v2152_v31 = vpop.f32.mrf.mxu2  ;;  %v8449_v59 = vld [vmem:[%s12047_s12 + $0x698] sm:$0xf]  ;;  %v8759_v60 = vor.u32 %v11142_v47, %v8758_v46 }
 0x153   : > { %2460 = vmatpush.bf16.msrb.mxu0 %v8482_v3  ;;  %v8050_v3 = vor.u32 %v10960_v51, %v8047_v53  ;;  %v2139_v13 = vpop.f32.mrf.mxu3  ;;  %v12631_v22 = vpop.f32.mrf.mxu0  ;;  %v7942_v51 = vor.u32 %v10933_v40, %v7939_v41  ;;  %v7903_v53 = vld [vmem:[%s12047_s12 + $0x27c] sm:$0xf0]  ;;  %v8650_v40 = vld [vmem:[%s12055_s17 + $0x50] sm:$0xf]  ;;  %v11115_v41 = vld [vmem:[%s12055_s17 + $0x70] sm:$0xf0] }
 0x154   : > { %2369 = vmatpush.bf16.msrb.mxu2 %v7614_v7  ;;  %v8011_v7 = vld [vmem:[%s12047_s12 + $0x354] sm:$0xf0] }
 0x155   : > { %2382 = vmatpush.bf16.msrb.mxu3 %v7902_v10  ;;  %4119 = vmatpush.bf16.msrb.mxu1 %v9183_v11  ;;  %v7730_v10 = vor.u32 %v10884_v1, %v7729_v0  ;;  %v8830_v11 = vld [vmem:[%s12055_s17 + $0x1b8] sm:$0xf]  ;;  %v8014_v18 = vor.u32 %v10951_v5, %v8011_v7  ;;  %v11100_v1 = vld [vmem:[%s12047_s12 + $0x7d8] sm:$0xf0]  ;;  %v11133_v5 = vld [vmem:[%s12055_s17 + $0x100] sm:$0xf0] }
 0x156   : > { %8602 = vmatmul.msk.bf16.vlgmr.msrb.gmra.mxu0 %vm2046_vm0, %v12142_v14  ;;  %v8831_v28 = vor.u32 %v11160_v15, %v8830_v11  ;;  %v8593_v0 = vld [vmem:[%s12047_s12 + $0x7b8] sm:$0xf]  ;;  %v11231_v11 = vld [vmem:[%s12055_s17 + $0x410] sm:$0xf0] }
 0x157   : > { %2466 = vmatpush.bf16.msra.mxu0 %v7874_v8  ;;  %2370 = vmatmul.bf16.vlgmr.msrb.gmra.mxu2 %v12167_v39  ;;  %v11023_v8 = vld [vmem:[%s12047_s12 + $0x574] sm:$0xf] }
 0x158   : > { %2427 = vmatpush.bf16.msra.mxu2 %v8158_v16  ;;  %2383 = vmatmul.bf16.vlgmr.msrb.gmra.mxu3 %v12165_v38  ;;  %v7693_v16 = vld [vmem:[%s12047_s12 + $0xb0] sm:$0xf]  ;;  %v11055_v15 = vld [vmem:[%s12047_s12 + $0x670] sm:$0xf0] }
 0x159   : > { %2440 = vmatpush.bf16.msra.mxu3 %v8446_v17  ;;  %4181 = vmatpush.bf16.msra.mxu1 %v9583_v19  ;;  %v10875_v17 = vld [vmem:[%s12047_s12 + $0xd0] sm:$0xf0]  ;;  %v8302_v19 = vor.u32 %v11023_v8, %v8299_v9  ;;  %v8450_v8 = vor.u32 %v11064_v63, %v8449_v59  ;;  %v8594_v9 = vor.u32 %v11100_v1, %v8593_v0  ;;  %v11168_v59 = vld [vmem:[%s12055_s17 + $0x218] sm:$0xf0]  ;;  %v9156_v63 = vld [vmem:[%s12055_s17 + $0x464] sm:$0xf0] }
 0x15a   : > { %4120 = vmatmul.bf16.vlgmr.msrb.gmra.mxu1 %v12227_v2  ;;  %v7694_v29 = vor.u32 %v10875_v17, %v7693_v16  ;;  %v8557_v16 = vld [vmem:[%s12047_s12 + $0x770] sm:$0xf]  ;;  %v11091_v17 = vld [vmem:[%s12047_s12 + $0x790] sm:$0xf0] }
 0x15b   : > { %2467 = vmatpush.bf16.msra.mxu0 %v7838_v26  ;;  %v8263_v26 = vld [vmem:[%s12047_s12 + $0x54c] sm:$0xf0]  ;;  %v2191_v27 = vpop.f32.mrf.mxu0 }
 0x15c   : > { %2428 = vmatpush.bf16.msra.mxu2 %v8122_v33  ;;  %v11151_v33 = vld [vmem:[%s12055_s17 + $0x190] sm:$0xf0]  ;;  %v8266_v37 = vor.u32 %v11014_v24, %v8263_v26  ;;  %v8558_v26 = vor.u32 %v11091_v17, %v8557_v16  ;;  %v9120_v16 = vld [vmem:[%s12055_s17 + $0x41c] sm:$0xf0] }
 0x15d   : > { %2441 = vmatpush.bf16.msra.mxu3 %v8410_v34  ;;  %4182 = vmatpush.bf16.msra.mxu1 %v9547_v36  ;;  %v7657_v34 = vld [vmem:[%s12047_s12 + $0x68] sm:$0xf]  ;;  %v7978_v36 = vor.u32 %v10942_v20, %v7975_v23  ;;  %v8795_v44 = vor.u32 %v11151_v33, %v8794_v30  ;;  %v11124_v20 = vld [vmem:[%s12055_s17 + $0xb8] sm:$0xf0]  ;;  %v11222_v30 = vld [vmem:[%s12055_s17 + $0x3c8] sm:$0xf0] }
 0x15e   : > { %v7658_v45 = vor.u32 %v10866_v35, %v7657_v34  ;;  %v11046_v34 = vld [vmem:[%s12047_s12 + $0x628] sm:$0xf0]  ;;  %v8521_v35 = vld [vmem:[%s12047_s12 + $0x728] sm:$0xf] }
 0x15f   : > { %2468 = vmatpush.bf16.msra.mxu0 %v7802_v42  ;;  %v11005_v42 = vld [vmem:[%s12047_s12 + $0x4e4] sm:$0xf] }
 0x160   : > { %2429 = vmatpush.bf16.msra.mxu2 %v8086_v49  ;;  %v7621_v49 = vld [vmem:[%s12047_s12 + $0x20] sm:$0xf] }
 0x161   : > { %2442 = vmatpush.bf16.msra.mxu3 %v8374_v50  ;;  %4183 = vmatpush.bf16.msra.mxu1 %v9511_v52  ;;  %v10857_v50 = vld [vmem:[%s12047_s12 + $0x40] sm:$0xf0]  ;;  %v8230_v52 = vor.u32 %v11005_v42, %v8227_v43 }
 0x162   : > { %v7622_v61 = vor.u32 %v10857_v50, %v7621_v49  ;;  %v9038_v49 = vld [vmem:[%s12055_s17 + $0x360] sm:$0xf]  ;;  %v11213_v50 = vld [vmem:[%s12055_s17 + $0x380] sm:$0xf0] }
 0x163   : > { %2469 = vmatpush.bf16.msra.mxu0 %v7766_v58  ;;  %v8191_v58 = vld [vmem:[%s12047_s12 + $0x4bc] sm:$0xf0]  ;;  %v12675_v31 = vpop.f32.mrf.mxu0 }
 0x164   : > { %2430 = vmatpush.bf16.msra.mxu2 %v8050_v3  ;;  %v9147_v3 = vor.u32 %v11240_v56, %v9146_v55  ;;  %v8194_v7 = vor.u32 %v10996_v57, %v8191_v58  ;;  %v8614_v55 = vld [vmem:[%s12055_s17 + $0x8] sm:$0xf]  ;;  %v11106_v57 = vld [vmem:[%s12055_s17 + $0x28] sm:$0xf0]  ;;  %v8858_v58 = vld [vmem:[%s12055_s17 + $0x1f8] sm:$0xf] }
 0x165   : > { %2443 = vmatpush.bf16.msra.mxu3 %v8338_v4  ;;  %4184 = vmatpush.bf16.msra.mxu1 %v9475_v6  ;;  %v8722_v4 = vld [vmem:[%s12055_s17 + $0xe0] sm:$0xf]  ;;  %v7906_v6 = vor.u32 %v10924_v48, %v7903_v53  ;;  %v11037_v48 = vld [vmem:[%s12047_s12 + $0x5e0] sm:$0xf0] }
 0x166   : > { %v8723_v13 = vor.u32 %v11133_v5, %v8722_v4  ;;  %v11073_v53 = vld [vmem:[%s12047_s12 + $0x700] sm:$0xf0]  ;;  %v8615_v5 = vor.u32 %v11106_v57, %v8614_v55 }
 0x167   : > { %2470 = vmatpush.bf16.msra.mxu0 %v7730_v10  ;;  %v9110_v10 = vld [vmem:[%s12055_s17 + $0x3f0] sm:$0xf]  ;;  %v11001_v55 = vld [vmem:[%s12047_s12 + $0x4c0] sm:$0xf0] }
 0x168   : > { %2431 = vmatpush.bf16.msra.mxu2 %v8014_v18  ;;  %v12668_v18 = vpop.f32.mrf.mxu1  ;;  %v9111_v23 = vor.u32 %v11231_v11, %v9110_v10  ;;  %v11159_v10 = vld [vmem:[%s12055_s17 + $0x1d0] sm:$0xf0]  ;;  %v11177_v57 = vld [vmem:[%s12055_s17 + $0x260] sm:$0xf0] }
 0x169   : > { %4190 = vmatpush.bf16.msrb.mxu1 %v8867_v54  ;;  %2444 = vmatpush.bf16.msra.mxu3 %v8302_v19  ;;  %v8413_v54 = vld [vmem:[%s12047_s12 + $0x650] sm:$0xf]  ;;  %v8686_v19 = vld [vmem:[%s12055_s17 + $0x98] sm:$0xf] }
 0x16a   : > { %9613 = vmatmul.msk.bf16.vlgmr.msra.gmra.mxu1 %vm2046_vm0, %v12142_v14  ;;  %v8414_v24 = vor.u32 %v11055_v15, %v8413_v54  ;;  %v8687_v33 = vor.u32 %v11124_v20, %v8686_v19  ;;  %v8822_v54 = vld [vmem:[%s12055_s17 + $0x1b0] sm:$0xf]  ;;  %v11228_v15 = vld [vmem:[%s12055_s17 + $0x3fc] sm:$0xf] }
 0x16b   : > { %2471 = vmatpush.bf16.msra.mxu0 %v7694_v29  ;;  %v9074_v29 = vld [vmem:[%s12055_s17 + $0x3a8] sm:$0xf]  ;;  %v2176_v42 = vpop.f32.mrf.mxu3  ;;  %v2256_v4 = vpop.f32.mrf.mxu0  ;;  %v8966_v20 = vld [vmem:[%s12055_s17 + $0x2d0] sm:$0xf] }
 0x16c   : > { %2432 = vmatpush.bf16.msra.mxu2 %v7978_v36  ;;  %v11082_v36 = vld [vmem:[%s12047_s12 + $0x748] sm:$0xf0]  ;;  %v9075_v43 = vor.u32 %v11222_v30, %v9074_v29  ;;  %v9123_v29 = vor.u32 %v11228_v15, %v9120_v16  ;;  %v8786_v30 = vld [vmem:[%s12055_s17 + $0x168] sm:$0xf]  ;;  %v9400_v15 = vld [vmem:[%s12055_s17 + $0x654] sm:$0xf0] }
 0x16d   : > { %4191 = vmatpush.bf16.msrb.mxu1 %v8831_v28  ;;  %2445 = vmatpush.bf16.msra.mxu3 %v8266_v37  ;;  %v8377_v28 = vld [vmem:[%s12047_s12 + $0x608] sm:$0xf]  ;;  %v2163_v37 = vpop.f32.mrf.mxu2  ;;  %v8522_v47 = vor.u32 %v11082_v36, %v8521_v35  ;;  %v11219_v36 = vld [vmem:[%s12055_s17 + $0x3b4] sm:$0xf] }
 0x16e   : > { %v8378_v46 = vor.u32 %v11046_v34, %v8377_v28  ;;  %v11019_v28 = vld [vmem:[%s12047_s12 + $0x550] sm:$0xf0] }
 0x16f   : > { %2472 = vmatpush.bf16.msra.mxu0 %v7658_v45  ;;  %v2177_v45 = vadd.f32 %v2176_v42, %v2163_v37  ;;  %v9084_v37 = vld [vmem:[%s12055_s17 + $0x3d4] sm:$0xf0]  ;;  %v11186_v42 = vld [vmem:[%s12055_s17 + $0x2a8] sm:$0xf0] }
 0x170   : > { %2433 = vmatpush.bf16.msra.mxu2 %v7942_v51  ;;  %v8651_v51 = vor.u32 %v11115_v41, %v8650_v40  ;;  %v2347_v27 = vpop.f32.mrf.mxu1  ;;  %v8930_v41 = vld [vmem:[%s12055_s17 + $0x288] sm:$0xf] }
 0x171   : > { %4192 = vmatpush.bf16.msrb.mxu1 %v8795_v44  ;;  %2446 = vmatpush.bf16.msra.mxu3 %v8230_v52  ;;  %v8341_v44 = vld [vmem:[%s12047_s12 + $0x5c0] sm:$0xf]  ;;  %v12693_v56 = vadd.f32 %v12631_v22, %v2177_v45  ;;  %v9002_v22 = vld [vmem:[%s12055_s17 + $0x318] sm:$0xf]  ;;  %v11010_v45 = vld [vmem:[%s12047_s12 + $0x508] sm:$0xf0] }
 0x172   : > { %v8485_v52 = vld [vmem:[%s12047_s12 + $0x6e0] sm:$0xf]  ;;  %v8342_v0 = vor.u32 %v11037_v48, %v8341_v44  ;;  %v8233_v44 = vld [vmem:[%s12047_s12 + $0x4e8] sm:$0xf]  ;;  %v11141_v48 = vld [vmem:[%s12055_s17 + $0x140] sm:$0xf0] }
 0x173   : > { %2473 = vmatpush.bf16.msra.mxu0 %v7622_v61  ;;  %v11237_v61 = vld [vmem:[%s12055_s17 + $0x444] sm:$0xf]  ;;  %v8486_v1 = vor.u32 %v11073_v53, %v8485_v52  ;;  %v2178_v17 = vpop.f32.mrf.mxu3  ;;  %v8197_v52 = vld [vmem:[%s12047_s12 + $0x4a0] sm:$0xf]  ;;  %v8234_v53 = vor.u32 %v11010_v45, %v8233_v44 }
 0x174   : > { %2434 = vmatpush.bf16.msra.mxu2 %v7906_v6  ;;  %v8859_v6 = vor.u32 %v11168_v59, %v8858_v58  ;;  %v8894_v27 = vld [vmem:[%s12055_s17 + $0x240] sm:$0xf]  ;;  %v8714_v59 = vld [vmem:[%s12055_s17 + $0xd8] sm:$0xf] }
 0x175   : > { %4193 = vmatpush.bf16.msrb.mxu1 %v8759_v60  ;;  %2447 = vmatpush.bf16.msra.mxu3 %v8194_v7  ;;  %v9039_v60 = vor.u32 %v11213_v50, %v9038_v49  ;;  %v8305_v7 = vld [vmem:[%s12047_s12 + $0x578] sm:$0xf]  ;;  %v2165_v11 = vpop.f32.mrf.mxu2  ;;  %v8931_v49 = vor.u32 %v11186_v42, %v8930_v41  ;;  %v11210_v50 = vld [vmem:[%s12055_s17 + $0x36c] sm:$0xf]  ;;  %v8895_v4 = vor.u32 %v11177_v57, %v8894_v27  ;;  %v11183_v42 = vld [vmem:[%s12055_s17 + $0x294] sm:$0xf] }
 0x176   : > { %2474 = vmatmul.bf16.vlgmr.msra.gmra.mxu0 %v12167_v39  ;;  %v8678_v11 = vld [vmem:[%s12055_s17 + $0x90] sm:$0xf]  ;;  %v11330_v41 = vld [vmem:[%s12055_s17 + $0x728] sm:$0xf0] }
 0x177   : > { %4099 = vmatpush.bf16.msrb.mxu0 %v9147_v3  ;;  %2435 = vmatmul.bf16.vlgmr.msra.gmra.mxu2 %v12165_v38  ;;  %v11204_v3 = vld [vmem:[%s12055_s17 + $0x338] sm:$0xf0] }
 0x178   : > { %2492 = vmatpush.bf16.msrb.mxu2 %v8450_v8  ;;  %2448 = vmatmul.bf16.vlgmr.msra.gmra.mxu3 %v12227_v2  ;;  %v11028_v8 = vld [vmem:[%s12047_s12 + $0x598] sm:$0xf0]  ;;  %v12714_v34 = vpop.f32.mrf.mxu1 }
 0x179   : > { %2509 = vmatpush.bf16.msrb.mxu3 %v8594_v9  ;;  %4194 = vmatpush.bf16.msrb.mxu1 %v8723_v13  ;;  %v9159_v9 = vor.u32 %v11237_v61, %v9156_v63  ;;  %v9003_v13 = vor.u32 %v11204_v3, %v9002_v22  ;;  %v8306_v19 = vor.u32 %v11028_v8, %v8305_v7  ;;  %v9436_v61 = vld [vmem:[%s12055_s17 + $0x69c] sm:$0xf0]  ;;  %v11348_v22 = vld [vmem:[%s12055_s17 + $0x7b8] sm:$0xf0] }
 0x17a   : > { %v8198_v7 = vor.u32 %v11001_v55, %v8197_v52  ;;  %v9470_v52 = vld [vmem:[%s12055_s17 + $0x6c0] sm:$0xf]  ;;  %v9328_v55 = vld [vmem:[%s12055_s17 + $0x5c4] sm:$0xf0] }
 0x17b   : > { %4100 = vmatpush.bf16.msrb.mxu0 %v9111_v23  ;;  %v11195_v23 = vld [vmem:[%s12055_s17 + $0x2f0] sm:$0xf0] }
 0x17c   : > { %2493 = vmatpush.bf16.msrb.mxu2 %v8414_v24  ;;  %v8823_v24 = vor.u32 %v11159_v10, %v8822_v54  ;;  %v8967_v35 = vor.u32 %v11195_v23, %v8966_v20  ;;  %v9542_v20 = vld [vmem:[%s12055_s17 + $0x750] sm:$0xf]  ;;  %v11339_v23 = vld [vmem:[%s12055_s17 + $0x770] sm:$0xf0] }
 0x17d   : > { %2510 = vmatpush.bf16.msrb.mxu3 %v8558_v26  ;;  %4195 = vmatpush.bf16.msrb.mxu1 %v8687_v33  ;;  %v8269_v26 = vld [vmem:[%s12047_s12 + $0x530] sm:$0xf]  ;;  %v11150_v33 = vld [vmem:[%s12055_s17 + $0x188] sm:$0xf0] }
 0x17e   : > { %v8270_v40 = vor.u32 %v11019_v28, %v8269_v26  ;;  %v8976_v26 = vld [vmem:[%s12055_s17 + $0x2fc] sm:$0xf0] }
 0x17f   : > { %4101 = vmatpush.bf16.msrb.mxu0 %v9075_v43  ;;  %v8787_v43 = vor.u32 %v11150_v33, %v8786_v30  ;;  %v8642_v30 = vld [vmem:[%s12055_s17 + $0x48] sm:$0xf]  ;;  %v11290_v33 = vld [vmem:[%s12055_s17 + $0x5ec] sm:$0xf] }
 0x180   : > { %2494 = vmatpush.bf16.msrb.mxu2 %v8378_v46  ;;  %v9087_v46 = vor.u32 %v11219_v36, %v9084_v37  ;;  %v2412_v3 = vpop.f32.mrf.mxu1  ;;  %v11114_v37 = vld [vmem:[%s12055_s17 + $0x68] sm:$0xf0] }
 0x181   : > { %2511 = vmatpush.bf16.msrb.mxu3 %v8522_v47  ;;  %4196 = vmatpush.bf16.msrb.mxu1 %v8651_v51  ;;  %v8750_v47 = vld [vmem:[%s12055_s17 + $0x120] sm:$0xf]  ;;  %v9048_v51 = vld [vmem:[%s12055_s17 + $0x38c] sm:$0xf0]  ;;  %v9450_v3 = vld [vmem:[%s12055_s17 + $0x688] sm:$0xf] }
 0x182   : > { %v8751_v58 = vor.u32 %v11141_v48, %v8750_v47  ;;  %v9051_v63 = vor.u32 %v11210_v50, %v9048_v51  ;;  %v8606_v47 = vld [vmem:[%s12055_s17] sm:$0xf]  ;;  %v11105_v48 = vld [vmem:[%s12055_s17 + $0x20] sm:$0xf0]  ;;  %v8643_v50 = vor.u32 %v11114_v37, %v8642_v30  ;;  %v11146_v37 = vld [vmem:[%s12055_s17 + $0x16c] sm:$0xf] }
 0x183   : > { %4102 = vmatpush.bf16.msrb.mxu0 %v9039_v60  ;;  %v11308_v60 = vld [vmem:[%s12055_s17 + $0x67c] sm:$0xf] }
 0x184   : > { %2495 = vmatpush.bf16.msrb.mxu2 %v8342_v0  ;;  %v11132_v0 = vld [vmem:[%s12055_s17 + $0xf8] sm:$0xf0]  ;;  %v9439_v8 = vor.u32 %v11308_v60, %v9436_v61  ;;  %v8904_v60 = vld [vmem:[%s12055_s17 + $0x26c] sm:$0xf0] }
 0x185   : > { %2512 = vmatpush.bf16.msrb.mxu3 %v8486_v1  ;;  %4197 = vmatpush.bf16.msrb.mxu1 %v8615_v5  ;;  %v9578_v1 = vld [vmem:[%s12055_s17 + $0x798] sm:$0xf]  ;;  %v11201_v5 = vld [vmem:[%s12055_s17 + $0x324] sm:$0xf]  ;;  %v8715_v54 = vor.u32 %v11132_v0, %v8714_v59  ;;  %v11174_v59 = vld [vmem:[%s12055_s17 + $0x24c] sm:$0xf] }
 0x186   : > { %v9579_v10 = vor.u32 %v11348_v22, %v9578_v1  ;;  %v11164_v61 = vld [vmem:[%s12055_s17 + $0x1fc] sm:$0xf]  ;;  %v9148_v22 = vld [vmem:[%s12055_s17 + $0x45c] sm:$0xf0] }
 0x187   : > { %4103 = vmatpush.bf16.msrb.mxu0 %v9003_v13  ;;  %v11299_v13 = vld [vmem:[%s12055_s17 + $0x634] sm:$0xf]  ;;  %v11236_v0 = vld [vmem:[%s12055_s17 + $0x43c] sm:$0xf] }
 0x188   : > { %2496 = vmatpush.bf16.msrb.mxu2 %v8306_v19  ;;  %4198 = vmatmul.bf16.vlgmr.msrb.gmra.mxu1 %v12167_v39  ;;  %v11123_v19 = vld [vmem:[%s12055_s17 + $0xb0] sm:$0xf0]  ;;  %v9403_v28 = vor.u32 %v11299_v13, %v9400_v15 }
 0x189   : > { %4086 = vmatpush.bf16.msra.mxu3 %v8859_v6  ;;  %4255 = vmatpush.bf16.msra.mxu1 %v9159_v9  ;;  %v9012_v6 = vld [vmem:[%s12055_s17 + $0x344] sm:$0xf0]  ;;  %v2267_v9 = vpop.f32.mrf.mxu0  ;;  %v11155_v15 = vld [vmem:[%s12055_s17 + $0x1b4] sm:$0xf] }
 0x18a   : > { %8603 = vmatmul.msk.bf16.vlgmr.msrb.gmra.mxu3 %vm2046_vm0, %v12142_v14  ;;  %v12745_v16 = vadd.f32 %v12590_v25, %v2267_v9  ;;  %v9015_v17 = vor.u32 %v11201_v5, %v9012_v6  ;;  %v8679_v25 = vor.u32 %v11123_v19, %v8678_v11  ;;  %v2228_v44 = vpop.f32.mrf.mxu2  ;;  %v8607_v6 = vor.u32 %v11105_v48, %v8606_v47  ;;  %v9292_v9 = vld [vmem:[%s12055_s17 + $0x57c] sm:$0xf0]  ;;  %v9220_v47 = vld [vmem:[%s12055_s17 + $0x4ec] sm:$0xf0] }
 0x18b   : > { %4104 = vmatpush.bf16.msrb.mxu0 %v8967_v35  ;;  %v9364_v35 = vld [vmem:[%s12055_s17 + $0x60c] sm:$0xf0]  ;;  %v2241_v45 = vpop.f32.mrf.mxu3  ;;  %v9151_v11 = vor.u32 %v11236_v0, %v9148_v22  ;;  %v9586_v0 = vld [vmem:[%s12055_s17 + $0x7a0] sm:$0xf] }
 0x18c   : > { %2497 = vmatpush.bf16.msrb.mxu2 %v8270_v40  ;;  %v9506_v40 = vld [vmem:[%s12055_s17 + $0x708] sm:$0xf] }
 0x18d   : > { %4087 = vmatpush.bf16.msra.mxu3 %v8823_v24  ;;  %4256 = vmatpush.bf16.msra.mxu1 %v9123_v29  ;;  %v11192_v24 = vld [vmem:[%s12055_s17 + $0x2dc] sm:$0xf]  ;;  %v9543_v29 = vor.u32 %v11339_v23, %v9542_v20  ;;  %v9507_v51 = vor.u32 %v11330_v41, %v9506_v40  ;;  %v9112_v20 = vld [vmem:[%s12055_s17 + $0x414] sm:$0xf0]  ;;  %v9414_v23 = vld [vmem:[%s12055_s17 + $0x640] sm:$0xf] }
 0x18e   : > { %v8979_v36 = vor.u32 %v11192_v24, %v8976_v26  ;;  %v11305_v24 = vld [vmem:[%s12055_s17 + $0x660] sm:$0xf0]  ;;  %v8788_v40 = vld [vmem:[%s12055_s17 + $0x18c] sm:$0xf0]  ;;  %v11218_v41 = vld [vmem:[%s12055_s17 + $0x3ac] sm:$0xf] }
 0x18f   : > { %4105 = vmatpush.bf16.msrb.mxu0 %v8931_v49  ;;  %v2229_v49 = vadd.f32 %v2228_v44, %v12513_v32  ;;  %v9378_v44 = vld [vmem:[%s12055_s17 + $0x5f8] sm:$0xf]  ;;  %v8791_v48 = vor.u32 %v11146_v37, %v8788_v40  ;;  %v9514_v37 = vld [vmem:[%s12055_s17 + $0x710] sm:$0xf]  ;;  %v11331_v40 = vld [vmem:[%s12055_s17 + $0x730] sm:$0xf0] }
 0x190   : > { %2498 = vmatpush.bf16.msrb.mxu2 %v8234_v53  ;;  %v11281_v53 = vld [vmem:[%s12055_s17 + $0x5a4] sm:$0xf] }
 0x191   : > { %4088 = vmatpush.bf16.msra.mxu3 %v8787_v43  ;;  %4257 = vmatpush.bf16.msra.mxu1 %v9087_v46  ;;  %v8940_v43 = vld [vmem:[%s12055_s17 + $0x2b4] sm:$0xf0]  ;;  %v9367_v46 = vor.u32 %v11290_v33, %v9364_v35  ;;  %v2269_v27 = vpop.f32.mrf.mxu0  ;;  %v2242_v32 = vadd.f32 %v2241_v45, %v2229_v49  ;;  %v9331_v1 = vor.u32 %v11281_v53, %v9328_v55  ;;  %v11296_v45 = vld [vmem:[%s12055_s17 + $0x618] sm:$0xf0]  ;;  %v11209_v53 = vld [vmem:[%s12055_s17 + $0x364] sm:$0xf] }
 0x192   : > { %v8943_v57 = vor.u32 %v11183_v42, %v8940_v43  ;;  %v9076_v43 = vld [vmem:[%s12055_s17 + $0x3cc] sm:$0xf0]  ;;  %v9040_v27 = vld [vmem:[%s12055_s17 + $0x384] sm:$0xf0] }
 0x193   : > { %4106 = vmatpush.bf16.msrb.mxu0 %v8895_v4  ;;  %v11314_v4 = vld [vmem:[%s12055_s17 + $0x6a8] sm:$0xf0]  ;;  %v12778_v5 = vadd.f32 %v12675_v31, %v2242_v32  ;;  %v11227_v31 = vld [vmem:[%s12055_s17 + $0x3f4] sm:$0xf]  ;;  %v2243_v26 = vpop.f32.mrf.mxu3  ;;  %v9079_v49 = vor.u32 %v11218_v41, %v9076_v43  ;;  %v9184_v32 = vld [vmem:[%s12055_s17 + $0x4a4] sm:$0xf0]  ;;  %v9043_v22 = vor.u32 %v11209_v53, %v9040_v27 }
 0x194   : > { %2499 = vmatpush.bf16.msrb.mxu2 %v8198_v7  ;;  %v9451_v13 = vor.u32 %v11314_v4, %v9450_v3  ;;  %v9115_v35 = vor.u32 %v11227_v31, %v9112_v20  ;;  %v11128_v4 = vld [vmem:[%s12055_s17 + $0xdc] sm:$0xf]  ;;  %v11191_v26 = vld [vmem:[%s12055_s17 + $0x2d4] sm:$0xf]  ;;  %v11110_v43 = vld [vmem:[%s12055_s17 + $0x4c] sm:$0xf] }
 0x195   : > { %4089 = vmatpush.bf16.msra.mxu3 %v8751_v58  ;;  %4258 = vmatpush.bf16.msra.mxu1 %v9051_v63  ;;  %v11321_v58 = vld [vmem:[%s12055_s17 + $0x6e0] sm:$0xf0]  ;;  %v8860_v63 = vld [vmem:[%s12055_s17 + $0x21c] sm:$0xf0]  ;;  %v12790_v30 = vpop.f32.mrf.mxu1 }
 0x196   : > { %4107 = vmatmul.bf16.vlgmr.msrb.gmra.mxu0 %v12165_v38  ;;  %v9471_v7 = vor.u32 %v11321_v58, %v9470_v52  ;;  %v8752_v52 = vld [vmem:[%s12055_s17 + $0x144] sm:$0xf0]  ;;  %v11287_v58 = vld [vmem:[%s12055_s17 + $0x5d0] sm:$0xf0]  ;;  %v11173_v27 = vld [vmem:[%s12055_s17 + $0x244] sm:$0xf] }
 0x197   : > { %4164 = vmatpush.bf16.msra.mxu0 %v9439_v8  ;;  %2500 = vmatmul.bf16.vlgmr.msrb.gmra.mxu2 %v12227_v2  ;;  %v11272_v8 = vld [vmem:[%s12055_s17 + $0x55c] sm:$0xf] }
 0x198   : > { %4129 = vmatpush.bf16.msra.mxu2 %v9579_v10  ;;  %v8863_v10 = vor.u32 %v11164_v61, %v8860_v63  ;;  %v9295_v19 = vor.u32 %v11272_v8, %v9292_v9  ;;  %v9004_v9 = vld [vmem:[%s12055_s17 + $0x33c] sm:$0xf0] }
 0x199   : > { %4090 = vmatpush.bf16.msra.mxu3 %v8715_v54  ;;  %4259 = vmatpush.bf16.msra.mxu1 %v9015_v17  ;;  %v8907_v54 = vor.u32 %v11174_v59, %v8904_v60  ;;  %v8824_v17 = vld [vmem:[%s12055_s17 + $0x1d4] sm:$0xf0]  ;;  %v11245_v60 = vld [vmem:[%s12055_s17 + $0x484] sm:$0xf] }
 0x19a   : > { %v8827_v33 = vor.u32 %v11155_v15, %v8824_v17  ;;  %v9187_v8 = vor.u32 %v11245_v60, %v9184_v32  ;;  %v9550_v15 = vld [vmem:[%s12055_s17 + $0x758] sm:$0xf]  ;;  %v11340_v17 = vld [vmem:[%s12055_s17 + $0x778] sm:$0xf0] }
 0x19b   : > { %4165 = vmatpush.bf16.msra.mxu0 %v9403_v28  ;;  %v2230_v28 = vpop.f32.mrf.mxu2 }
 0x19c   : > { %4130 = vmatpush.bf16.msra.mxu2 %v9543_v29  ;;  %v9256_v29 = vld [vmem:[%s12055_s17 + $0x534] sm:$0xf0] }
 0x19d   : > { %4091 = vmatpush.bf16.msra.mxu3 %v8679_v25  ;;  %4260 = vmatpush.bf16.msra.mxu1 %v8979_v36  ;;  %v11263_v25 = vld [vmem:[%s12055_s17 + $0x514] sm:$0xf]  ;;  %v9415_v36 = vor.u32 %v11305_v24, %v9414_v23  ;;  %v12810_v59 = vpop.f32.mrf.mxu3  ;;  %v2425_v61 = vpop.f32.mrf.mxu1  ;;  %v8680_v24 = vld [vmem:[%s12055_s17 + $0xb4] sm:$0xf0] }
 0x19e   : > { %v9259_v42 = vor.u32 %v11263_v25, %v9256_v29  ;;  %v11119_v23 = vld [vmem:[%s12055_s17 + $0x94] sm:$0xf]  ;;  %v8968_v28 = vld [vmem:[%s12055_s17 + $0x2f4] sm:$0xf0]  ;;  %v9270_v25 = vld [vmem:[%s12055_s17 + $0x520] sm:$0xf] }
 0x19f   : > { %4166 = vmatpush.bf16.msra.mxu0 %v9367_v46  ;;  %v11254_v46 = vld [vmem:[%s12055_s17 + $0x4cc] sm:$0xf]  ;;  %v11269_v29 = vld [vmem:[%s12055_s17 + $0x540] sm:$0xf0]  ;;  %v8971_v41 = vor.u32 %v11191_v26, %v8968_v28 }
 0x1a0   : > { %4131 = vmatpush.bf16.msra.mxu2 %v9507_v51  ;;  %v11137_v51 = vld [vmem:[%s12055_s17 + $0x124] sm:$0xf]  ;;  %v9223_v55 = vor.u32 %v11254_v46, %v9220_v47  ;;  %v8932_v46 = vld [vmem:[%s12055_s17 + $0x2ac] sm:$0xf0]  ;;  %v9234_v47 = vld [vmem:[%s12055_s17 + $0x4d8] sm:$0xf] }
 0x1a1   : > { %4092 = vmatpush.bf16.msra.mxu3 %v8643_v50  ;;  %4261 = vmatpush.bf16.msra.mxu1 %v8943_v57  ;;  %v9379_v50 = vor.u32 %v11296_v45, %v9378_v44  ;;  %v9342_v57 = vld [vmem:[%s12055_s17 + $0x5b0] sm:$0xf]  ;;  %v8755_v63 = vor.u32 %v11137_v51, %v8752_v52  ;;  %v11182_v45 = vld [vmem:[%s12055_s17 + $0x28c] sm:$0xf]  ;;  %v11101_v51 = vld [vmem:[%s12055_s17 + $0x4] sm:$0xf] }
 0x1a2   : > { %v9343_v3 = vor.u32 %v11287_v58, %v9342_v57  ;;  %v8644_v44 = vld [vmem:[%s12055_s17 + $0x6c] sm:$0xf0]  ;;  %v8608_v52 = vld [vmem:[%s12055_s17 + $0x24] sm:$0xf0]  ;;  %v11322_v58 = vld [vmem:[%s12055_s17 + $0x6e8] sm:$0xf0]  ;;  %v8935_v32 = vor.u32 %v11182_v45, %v8932_v46 }
 0x1a3   : > { %4167 = vmatpush.bf16.msra.mxu0 %v9331_v1  ;;  %v11349_v1 = vld [vmem:[%s12055_s17 + $0x7c0] sm:$0xf0]  ;;  %v12824_v31 = vpop.f32.mrf.mxu0  ;;  %v9478_v57 = vld [vmem:[%s12055_s17 + $0x6c8] sm:$0xf]  ;;  %v9082_v45 = vld [vmem:[%s12055_s17 + $0x3b0] sm:$0xf] }
 0x1a4   : > { %4132 = vmatpush.bf16.msra.mxu2 %v9471_v7  ;;  %v11200_v7 = vld [vmem:[%s12055_s17 + $0x31c] sm:$0xf] }
 0x1a5   : > { %4093 = vmatpush.bf16.msra.mxu3 %v8607_v6  ;;  %4262 = vmatpush.bf16.msra.mxu1 %v8907_v54  ;;  %v8716_v6 = vld [vmem:[%s12055_s17 + $0xfc] sm:$0xf0]  ;;  %v9306_v54 = vld [vmem:[%s12055_s17 + $0x568] sm:$0xf] }
 0x1a7   : > { %4168 = vmatpush.bf16.msra.mxu0 %v9295_v19  ;;  %9612 = vmatmul.msk.bf16.vlgmr.msra.gmra.mxu2 %vm2046_vm0, %v12142_v14  ;;  %v9007_v19 = vor.u32 %v11200_v7, %v9004_v9  ;;  %v11241_v7 = vld [vmem:[%s12055_s17 + $0x460] sm:$0xf0] }
 0x1a8   : > { %4138 = vmatpush.bf16.msrb.mxu2 %v8863_v10  ;;  %4094 = vmatmul.bf16.vlgmr.msra.gmra.mxu3 %v12167_v39  ;;  %v11278_v10 = vld [vmem:[%s12055_s17 + $0x588] sm:$0xf0]  ;;  %v11313_v9 = vld [vmem:[%s12055_s17 + $0x6a0] sm:$0xf0] }
 0x1a9   : > { %4151 = vmatpush.bf16.msrb.mxu3 %v9151_v11  ;;  %4320 = vmatpush.bf16.msrb.mxu1 %v9451_v13  ;;  %v9587_v11 = vor.u32 %v11349_v1, %v9586_v0  ;;  %v8719_v13 = vor.u32 %v11128_v4, %v8716_v6  ;;  %v9307_v20 = vor.u32 %v11278_v10, %v9306_v54  ;;  %v11165_v0 = vld [vmem:[%s12055_s17 + $0x204] sm:$0xf]  ;;  %v9154_v4 = vld [vmem:[%s12055_s17 + $0x440] sm:$0xf] }
 0x1aa   : > { %4263 = vmatmul.bf16.vlgmr.msra.gmra.mxu1 %v12165_v38  ;;  %v9479_v6 = vor.u32 %v11322_v58, %v9478_v57  ;;  %v8611_v54 = vor.u32 %v11101_v51, %v8608_v52  ;;  %v11328_v52 = vld [vmem:[%s12055_s17 + $0x71c] sm:$0xf]  ;;  %v8760_v57 = vld [vmem:[%s12055_s17 + $0x14c] sm:$0xf0] }
 0x1ab   : > { %4169 = vmatpush.bf16.msra.mxu0 %v9259_v42  ;;  %v9271_v42 = vor.u32 %v11269_v29, %v9270_v25  ;;  %v2334_v60 = vpop.f32.mrf.mxu0  ;;  %v11232_v25 = vld [vmem:[%s12055_s17 + $0x418] sm:$0xf0]  ;;  %v9406_v29 = vld [vmem:[%s12055_s17 + $0x638] sm:$0xf] }
 0x1ac   : > { %4139 = vmatpush.bf16.msrb.mxu2 %v8827_v33  ;;  %v2308_v33 = vpop.f32.mrf.mxu3 }
 0x1ad   : > { %4152 = vmatpush.bf16.msrb.mxu3 %v9115_v35  ;;  %4321 = vmatpush.bf16.msrb.mxu1 %v9415_v36  ;;  %v9551_v35 = vor.u32 %v11340_v17, %v9550_v15  ;;  %v8683_v36 = vor.u32 %v11119_v23, %v8680_v24  ;;  %v11156_v17 = vld [vmem:[%s12055_s17 + $0x1bc] sm:$0xf]  ;;  %v9118_v24 = vld [vmem:[%s12055_s17 + $0x3f8] sm:$0xf] }
 0x1ae   : > { %v11304_v33 = vld [vmem:[%s12055_s17 + $0x658] sm:$0xf0] }
 0x1af   : > { %4170 = vmatpush.bf16.msra.mxu0 %v9223_v55  ;;  %v8647_v55 = vor.u32 %v11110_v43, %v8644_v44  ;;  %v9119_v43 = vor.u32 %v11232_v25, %v9118_v24  ;;  %v9407_v44 = vor.u32 %v11304_v33, %v9406_v29  ;;  %v11162_v25 = vld [vmem:[%s12055_s17 + $0x1e8] sm:$0xf0]  ;;  %v11120_v29 = vld [vmem:[%s12055_s17 + $0x9c] sm:$0xf]  ;;  %v8688_v33 = vld [vmem:[%s12055_s17 + $0xbc] sm:$0xf0] }
 0x1b0   : > { %4140 = vmatpush.bf16.msrb.mxu2 %v8791_v48  ;;  %v11260_v48 = vld [vmem:[%s12055_s17 + $0x4f8] sm:$0xf0] }
 0x1b1   : > { %4153 = vmatpush.bf16.msrb.mxu3 %v9079_v49  ;;  %4322 = vmatpush.bf16.msrb.mxu1 %v9379_v50  ;;  %v2293_v49 = vpop.f32.mrf.mxu2  ;;  %v9515_v50 = vor.u32 %v11331_v40, %v9514_v37  ;;  %v9235_v61 = vor.u32 %v11260_v48, %v9234_v47  ;;  %v11337_v37 = vld [vmem:[%s12055_s17 + $0x764] sm:$0xf]  ;;  %v9560_v40 = vld [vmem:[%s12055_s17 + $0x784] sm:$0xf0]  ;;  %v11223_v47 = vld [vmem:[%s12055_s17 + $0x3d0] sm:$0xf0] }
 0x1b2   : > { %v2294_v53 = vadd.f32 %v2293_v49, %v12745_v16  ;;  %v8868_v16 = vld [vmem:[%s12055_s17 + $0x224] sm:$0xf0]  ;;  %v9563_v46 = vor.u32 %v11337_v37, %v9560_v40  ;;  %v9370_v48 = vld [vmem:[%s12055_s17 + $0x5f0] sm:$0xf]  ;;  %v11295_v49 = vld [vmem:[%s12055_s17 + $0x610] sm:$0xf0]  ;;  %v9083_v58 = vor.u32 %v11223_v47, %v9082_v45 }
 0x1b3   : > { %4171 = vmatpush.bf16.msra.mxu0 %v9187_v8  ;;  %v9442_v8 = vld [vmem:[%s12055_s17 + $0x680] sm:$0xf]  ;;  %v8871_v10 = vor.u32 %v11165_v0, %v8868_v16  ;;  %v9371_v60 = vor.u32 %v11295_v49, %v9370_v48  ;;  %v9334_v0 = vld [vmem:[%s12055_s17 + $0x5a8] sm:$0xf]  ;;  %v11286_v16 = vld [vmem:[%s12055_s17 + $0x5c8] sm:$0xf0] }
 0x1b4   : > { %4141 = vmatpush.bf16.msrb.mxu2 %v8755_v63  ;;  %v8896_v63 = vld [vmem:[%s12055_s17 + $0x264] sm:$0xf0]  ;;  %v12851_v1 = vadd.f32 %v12810_v59, %v2294_v53  ;;  %v9596_v59 = vld [vmem:[%s12055_s17 + $0x7cc] sm:$0xf0]  ;;  %v9443_v23 = vor.u32 %v11313_v9, %v9442_v8  ;;  %v9524_v53 = vld [vmem:[%s12055_s17 + $0x73c] sm:$0xf0] }
 0x1b5   : > { %4154 = vmatpush.bf16.msrb.mxu3 %v9043_v22  ;;  %4323 = vmatpush.bf16.msrb.mxu1 %v9343_v3  ;;  %v9198_v22 = vld [vmem:[%s12055_s17 + $0x490] sm:$0xf]  ;;  %v11251_v3 = vld [vmem:[%s12055_s17 + $0x4b0] sm:$0xf0]  ;;  %v8974_v40 = vld [vmem:[%s12055_s17 + $0x2d8] sm:$0xf] }
 0x1b6   : > { %4172 = vmatmul.bf16.vlgmr.msra.gmra.mxu0 %v12227_v2  ;;  %v9199_v15 = vor.u32 %v11251_v3, %v9198_v22  ;;  %v8882_v8 = vld [vmem:[%s12055_s17 + $0x210] sm:$0xf]  ;;  %v11171_v9 = vld [vmem:[%s12055_s17 + $0x230] sm:$0xf0]  ;;  %v8810_v47 = vld [vmem:[%s12055_s17 + $0x180] sm:$0xf] }
 0x1b7   : > { %4233 = vmatpush.bf16.msrb.mxu0 %v9587_v11  ;;  %v11346_v11 = vld [vmem:[%s12055_s17 + $0x7ac] sm:$0xf]  ;;  %v11153_v49 = vld [vmem:[%s12055_s17 + $0x1a0] sm:$0xf0] }
 0x1b8   : > { %4142 = vmatpush.bf16.msrb.mxu2 %v8719_v13  ;;  %v8899_v13 = vor.u32 %v11173_v27, %v8896_v63  ;;  %v9599_v28 = vor.u32 %v11346_v11, %v9596_v59  ;;  %v11138_v27 = vld [vmem:[%s12055_s17 + $0x12c] sm:$0xf]  ;;  %v9527_v63 = vor.u32 %v11328_v52, %v9524_v53  ;;  %v9335_v59 = vor.u32 %v11286_v16, %v9334_v0  ;;  %v8616_v16 = vld [vmem:[%s12055_s17 + $0x2c] sm:$0xf0] }
 0x1b9   : > { %4155 = vmatpush.bf16.msrb.mxu3 %v9007_v19  ;;  %4324 = vmatpush.bf16.msrb.mxu1 %v9307_v20  ;;  %v8832_v19 = vld [vmem:[%s12055_s17 + $0x1dc] sm:$0xf0]  ;;  %v9155_v20 = vor.u32 %v11241_v7, %v9154_v4  ;;  %v2295_v26 = vpop.f32.mrf.mxu2  ;;  %v8763_v4 = vor.u32 %v11138_v27, %v8760_v57  ;;  %v9488_v7 = vld [vmem:[%s12055_s17 + $0x6f4] sm:$0xf0]  ;;  %v11187_v27 = vld [vmem:[%s12055_s17 + $0x2b0] sm:$0xf0] }
 0x1ba   : > { %v8846_v26 = vld [vmem:[%s12055_s17 + $0x1c8] sm:$0xf]  ;;  %v9226_v57 = vld [vmem:[%s12055_s17 + $0x4d0] sm:$0xf]  ;;  %v11102_v0 = vld [vmem:[%s12055_s17 + $0xc] sm:$0xf] }
 0x1bb   : > { %4234 = vmatpush.bf16.msrb.mxu0 %v9551_v35  ;;  %v12867_v35 = vpop.f32.mrf.mxu1  ;;  %v8847_v45 = vor.u32 %v11162_v25, %v8846_v26 }
 0x1bc   : > { %4143 = vmatpush.bf16.msrb.mxu2 %v8683_v36  ;;  %v8835_v36 = vor.u32 %v11156_v17, %v8832_v19  ;;  %v11205_v17 = vld [vmem:[%s12055_s17 + $0x340] sm:$0xf0]  ;;  %v9298_v19 = vld [vmem:[%s12055_s17 + $0x560] sm:$0xf] }
 0x1bd   : > { %4156 = vmatpush.bf16.msrb.mxu3 %v8971_v41  ;;  %4325 = vmatpush.bf16.msrb.mxu1 %v9271_v42  ;;  %v11147_v41 = vld [vmem:[%s12055_s17 + $0x174] sm:$0xf]  ;;  %v8796_v42 = vld [vmem:[%s12055_s17 + $0x194] sm:$0xf0] }
 0x1be   : > { %v8799_v51 = vor.u32 %v11147_v41, %v8796_v42  ;;  %v11196_v42 = vld [vmem:[%s12055_s17 + $0x2f8] sm:$0xf0] }
 0x1bf   : > { %4235 = vmatpush.bf16.msrb.mxu0 %v9515_v50  ;;  %v2319_v50 = vpop.f32.mrf.mxu3  ;;  %v8975_v52 = vor.u32 %v11196_v42, %v8974_v40  ;;  %v9408_v40 = vld [vmem:[%s12055_s17 + $0x65c] sm:$0xf0]  ;;  %v11336_v42 = vld [vmem:[%s12055_s17 + $0x75c] sm:$0xf] }
 0x1c0   : > { %4144 = vmatpush.bf16.msrb.mxu2 %v8647_v55  ;;  %v2333_v55 = vadd.f32 %v12824_v31, %v2319_v50  ;;  %v11214_v31 = vld [vmem:[%s12055_s17 + $0x388] sm:$0xf0]  ;;  %v11111_v50 = vld [vmem:[%s12055_s17 + $0x54] sm:$0xf] }
 0x1c1   : > { %4157 = vmatpush.bf16.msrb.mxu3 %v8935_v32  ;;  %4326 = vmatpush.bf16.msrb.mxu1 %v9235_v61  ;;  %v9046_v32 = vld [vmem:[%s12055_s17 + $0x368] sm:$0xf]  ;;  %v2358_v3 = vpop.f32.mrf.mxu2 }
 0x1c2   : > { %v2346_v61 = vadd.f32 %v12668_v18, %v2333_v55  ;;  %v9047_v11 = vor.u32 %v11214_v31, %v9046_v32  ;;  %v8938_v55 = vld [vmem:[%s12055_s17 + $0x290] sm:$0xf]  ;;  %v8902_v31 = vld [vmem:[%s12055_s17 + $0x248] sm:$0xf] }
 0x1c3   : > { %4236 = vmatpush.bf16.msrb.mxu0 %v9479_v6  ;;  %v2490_v22 = vpop.f32.mrf.mxu1  ;;  %v11319_v6 = vld [vmem:[%s12055_s17 + $0x6d4] sm:$0xf]  ;;  %v12909_v41 = vpop.f32.mrf.mxu0 }
 0x1c4   : > { %4145 = vmatpush.bf16.msrb.mxu2 %v8611_v54  ;;  %v12895_v18 = vadd.f32 %v2358_v3, %v2346_v61  ;;  %v11129_v54 = vld [vmem:[%s12055_s17 + $0xe4] sm:$0xf]  ;;  %v8774_v61 = vld [vmem:[%s12055_s17 + $0x138] sm:$0xf]  ;;  %v8939_v22 = vor.u32 %v11187_v27, %v8938_v55 }
 0x1c5   : > { %4158 = vmatpush.bf16.msrb.mxu3 %v8899_v13  ;;  %4327 = vmatpush.bf16.msrb.mxu1 %v9199_v15  ;;  %v9010_v13 = vld [vmem:[%s12055_s17 + $0x320] sm:$0xf]  ;;  %v9491_v15 = vor.u32 %v11319_v6, %v9488_v7  ;;  %v9162_v6 = vld [vmem:[%s12055_s17 + $0x448] sm:$0xf]  ;;  %v11242_v7 = vld [vmem:[%s12055_s17 + $0x468] sm:$0xf0] }
 0x1c6   : > { %9614 = vmatmul.msk.bf16.vlgmr.msrb.gmra.mxu0 %vm2046_vm0, %v12142_v14  ;;  %v9372_v27 = vld [vmem:[%s12055_s17 + $0x614] sm:$0xf0] }
 0x1c7   : > { %4242 = vmatpush.bf16.msra.mxu0 %v8871_v10  ;;  %4146 = vmatmul.bf16.vlgmr.msrb.gmra.mxu2 %v12167_v39  ;;  %v8724_v10 = vld [vmem:[%s12055_s17 + $0x104] sm:$0xf0] }
 0x1c8   : > { %4203 = vmatpush.bf16.msra.mxu2 %v9155_v20  ;;  %4159 = vmatmul.bf16.vlgmr.msrb.gmra.mxu3 %v12165_v38  ;;  %v11277_v20 = vld [vmem:[%s12055_s17 + $0x580] sm:$0xf0]  ;;  %v8727_v24 = vor.u32 %v11129_v54, %v8724_v10  ;;  %v11250_v54 = vld [vmem:[%s12055_s17 + $0x4a8] sm:$0xf0] }
 0x1c9   : > { %4216 = vmatpush.bf16.msra.mxu3 %v9443_v23  ;;  %4389 = vmatpush.bf16.msra.mxu1 %v9599_v28  ;;  %v8883_v23 = vor.u32 %v11171_v9, %v8882_v8  ;;  %v2321_v28 = vpop.f32.mrf.mxu3  ;;  %v9299_v37 = vor.u32 %v11277_v20, %v9298_v19  ;;  %v2360_v48 = vpop.f32.mrf.mxu2  ;;  %v9190_v9 = vld [vmem:[%s12055_s17 + $0x488] sm:$0xf]  ;;  %v11309_v10 = vld [vmem:[%s12055_s17 + $0x684] sm:$0xf]  ;;  %v9163_v19 = vor.u32 %v11242_v7, %v9162_v6  ;;  %v8738_v20 = vld [vmem:[%s12055_s17 + $0xf0] sm:$0xf] }
 0x1ca   : > { %4328 = vmatmul.bf16.vlgmr.msrb.gmra.mxu1 %v12227_v2  ;;  %v9191_v26 = vor.u32 %v11250_v54, %v9190_v9  ;;  %v9054_v6 = vld [vmem:[%s12055_s17 + $0x370] sm:$0xf]  ;;  %v11215_v7 = vld [vmem:[%s12055_s17 + $0x390] sm:$0xf0]  ;;  %v11318_v9 = vld [vmem:[%s12055_s17 + $0x6cc] sm:$0xf] }
 0x1cb   : > { %4243 = vmatpush.bf16.msra.mxu0 %v8835_v36  ;;  %v9011_v36 = vor.u32 %v11205_v17, %v9010_v13  ;;  %v2399_v8 = vpop.f32.mrf.mxu0  ;;  %v9444_v13 = vld [vmem:[%s12055_s17 + $0x6a4] sm:$0xf0]  ;;  %v9480_v54 = vld [vmem:[%s12055_s17 + $0x6ec] sm:$0xf0] }
 0x1cc   : > { %4204 = vmatpush.bf16.msra.mxu2 %v9119_v43  ;;  %v9262_v43 = vld [vmem:[%s12055_s17 + $0x518] sm:$0xf]  ;;  %v9588_v17 = vld [vmem:[%s12055_s17 + $0x7c4] sm:$0xf0]  ;;  %v9447_v28 = vor.u32 %v11309_v10, %v9444_v13  ;;  %v11108_v13 = vld [vmem:[%s12055_s17 + $0x38] sm:$0xf0] }
 0x1cd   : > { %4217 = vmatpush.bf16.msra.mxu3 %v9407_v44  ;;  %4390 = vmatpush.bf16.msra.mxu1 %v9563_v46  ;;  %v11268_v44 = vld [vmem:[%s12055_s17 + $0x538] sm:$0xf0]  ;;  %v8691_v46 = vor.u32 %v11120_v29, %v8688_v33  ;;  %v9126_v33 = vld [vmem:[%s12055_s17 + $0x400] sm:$0xf]  ;;  %v8630_v10 = vld [vmem:[%s12055_s17 + $0x18] sm:$0xf] }
 0x1ce   : > { %v9263_v53 = vor.u32 %v11268_v44, %v9262_v43  ;;  %v11300_v29 = vld [vmem:[%s12055_s17 + $0x63c] sm:$0xf]  ;;  %v9552_v43 = vld [vmem:[%s12055_s17 + $0x77c] sm:$0xf0] }
 0x1cf   : > { %4244 = vmatpush.bf16.msra.mxu0 %v8799_v51  ;;  %v8652_v51 = vld [vmem:[%s12055_s17 + $0x74] sm:$0xf0]  ;;  %v9411_v48 = vor.u32 %v11300_v29, %v9408_v40  ;;  %v8631_v29 = vor.u32 %v11108_v13, %v8630_v10  ;;  %v9064_v13 = vld [vmem:[%s12055_s17 + $0x39c] sm:$0xf0] }
 0x1d0   : > { %4205 = vmatpush.bf16.msra.mxu2 %v9083_v58  ;;  %v11259_v58 = vld [vmem:[%s12055_s17 + $0x4f0] sm:$0xf0]  ;;  %v8655_v32 = vor.u32 %v11111_v50, %v8652_v51  ;;  %v9090_v51 = vld [vmem:[%s12055_s17 + $0x3b8] sm:$0xf] }
 0x1d1   : > { %4218 = vmatpush.bf16.msra.mxu3 %v9371_v60  ;;  %4391 = vmatpush.bf16.msra.mxu1 %v9527_v63  ;;  %v8811_v60 = vor.u32 %v11153_v49, %v8810_v47  ;;  %v11144_v63 = vld [vmem:[%s12055_s17 + $0x158] sm:$0xf0]  ;;  %v9227_v3 = vor.u32 %v11259_v58, %v9226_v57  ;;  %v9555_v49 = vor.u32 %v11336_v42, %v9552_v43  ;;  %v11291_v50 = vld [vmem:[%s12055_s17 + $0x5f4] sm:$0xf]  ;;  %v9516_v58 = vld [vmem:[%s12055_s17 + $0x734] sm:$0xf0] }
 0x1d2   : > { %v11327_v57 = vld [vmem:[%s12055_s17 + $0x714] sm:$0xf]  ;;  %v8838_v42 = vld [vmem:[%s12055_s17 + $0x1c0] sm:$0xf]  ;;  %v11161_v43 = vld [vmem:[%s12055_s17 + $0x1e0] sm:$0xf0] }
 0x1d3   : > { %4245 = vmatpush.bf16.msra.mxu0 %v8763_v4  ;;  %v11178_v4 = vld [vmem:[%s12055_s17 + $0x268] sm:$0xf0] }
 0x1d4   : > { %4206 = vmatpush.bf16.msra.mxu2 %v9047_v11  ;;  %v8775_v11 = vor.u32 %v11144_v63, %v8774_v61  ;;  %v11117_v61 = vld [vmem:[%s12055_s17 + $0x80] sm:$0xf0] }
 0x1d5   : > { %4219 = vmatpush.bf16.msra.mxu3 %v9335_v59  ;;  %4392 = vmatpush.bf16.msra.mxu1 %v9491_v15  ;;  %v8619_v59 = vor.u32 %v11102_v0, %v8616_v16  ;;  %v11345_v15 = vld [vmem:[%s12055_s17 + $0x7a4] sm:$0xf]  ;;  %v11282_v0 = vld [vmem:[%s12055_s17 + $0x5ac] sm:$0xf] }
 0x1d6   : > { %v9591_v25 = vor.u32 %v11345_v15, %v9588_v17  ;;  %v8874_v15 = vld [vmem:[%s12055_s17 + $0x208] sm:$0xf]  ;;  %v11170_v17 = vld [vmem:[%s12055_s17 + $0x228] sm:$0xf0] }
 0x1d7   : > { %4246 = vmatpush.bf16.msra.mxu0 %v8727_v24  ;;  %v8903_v24 = vor.u32 %v11178_v4, %v8902_v31  ;;  %v12946_v44 = vpop.f32.mrf.mxu1  ;;  %v9336_v4 = vld [vmem:[%s12055_s17 + $0x5cc] sm:$0xf0] }
 0x1d8   : > { %4207 = vmatpush.bf16.msra.mxu2 %v9011_v36  ;;  %v11233_v36 = vld [vmem:[%s12055_s17 + $0x420] sm:$0xf0] }
 0x1d9   : > { %4398 = vmatpush.bf16.msrb.mxu1 %v8883_v23  ;;  %4220 = vmatpush.bf16.msra.mxu3 %v9299_v37  ;;  %v11135_v23 = vld [vmem:[%s12055_s17 + $0x110] sm:$0xf0]  ;;  %v9127_v47 = vor.u32 %v11233_v36, %v9126_v33  ;;  %v8875_v33 = vor.u32 %v11170_v17, %v8874_v15  ;;  %v11273_v36 = vld [vmem:[%s12055_s17 + $0x564] sm:$0xf]  ;;  %v11246_v15 = vld [vmem:[%s12055_s17 + $0x48c] sm:$0xf] }
 0x1da   : > { %9617 = vmatmul.msk.bf16.vlgmr.msra.gmra.mxu1 %vm2046_vm0, %v12142_v14  ;;  %v8739_v37 = vor.u32 %v11135_v23, %v8738_v20  ;;  %v11239_v20 = vld [vmem:[%s12055_s17 + $0x454] sm:$0xf]  ;;  %v9172_v23 = vld [vmem:[%s12055_s17 + $0x474] sm:$0xf0] }
 0x1db   : > { %4247 = vmatpush.bf16.msra.mxu0 %v8691_v46  ;;  %v11126_v46 = vld [vmem:[%s12055_s17 + $0xc8] sm:$0xf0]  ;;  %v2384_v63 = vpop.f32.mrf.mxu3  ;;  %v9175_v40 = vor.u32 %v11239_v20, %v9172_v23  ;;  %v8910_v20 = vld [vmem:[%s12055_s17 + $0x250] sm:$0xf]  ;;  %v11179_v23 = vld [vmem:[%s12055_s17 + $0x270] sm:$0xf0] }
 0x1dc   : > { %4208 = vmatpush.bf16.msra.mxu2 %v8975_v52  ;;  %v11224_v52 = vld [vmem:[%s12055_s17 + $0x3d8] sm:$0xf0] }
 0x1dd   : > { %4399 = vmatpush.bf16.msrb.mxu1 %v8847_v45  ;;  %4221 = vmatpush.bf16.msra.mxu3 %v9263_v53  ;;  %v8702_v45 = vld [vmem:[%s12055_s17 + $0xa8] sm:$0xf]  ;;  %v12953_v53 = vpop.f32.mrf.mxu0  ;;  %v9091_v31 = vor.u32 %v11224_v52, %v9090_v51  ;;  %v8982_v51 = vld [vmem:[%s12055_s17 + $0x2e0] sm:$0xf]  ;;  %v11197_v52 = vld [vmem:[%s12055_s17 + $0x300] sm:$0xf0] }
 0x1de   : > { %v8703_v55 = vor.u32 %v11126_v46, %v8702_v45 }
 0x1df   : > { %4248 = vmatpush.bf16.msra.mxu0 %v8655_v32  ;;  %v8666_v32 = vld [vmem:[%s12055_s17 + $0x60] sm:$0xf] }
 0x1e0   : > { %4209 = vmatpush.bf16.msra.mxu2 %v8939_v22  ;;  %v9375_v22 = vor.u32 %v11291_v50, %v9372_v27  ;;  %v8667_v8 = vor.u32 %v11117_v61, %v8666_v32  ;;  %v11264_v27 = vld [vmem:[%s12055_s17 + $0x51c] sm:$0xf] }
 0x1e1   : > { %4400 = vmatpush.bf16.msrb.mxu1 %v8811_v60  ;;  %4222 = vmatpush.bf16.msra.mxu3 %v9227_v3  ;;  %v2371_v60 = vpop.f32.mrf.mxu2  ;;  %v9519_v3 = vor.u32 %v11327_v57, %v9516_v58  ;;  %v9264_v57 = vld [vmem:[%s12055_s17 + $0x53c] sm:$0xf0]  ;;  %v11152_v32 = vld [vmem:[%s12055_s17 + $0x198] sm:$0xf0] }
 0x1e2   : > { %v2385_v16 = vadd.f32 %v2384_v63, %v2371_v60  ;;  %v8802_v60 = vld [vmem:[%s12055_s17 + $0x178] sm:$0xf]  ;;  %v8983_v63 = vor.u32 %v11197_v52, %v8982_v51  ;;  %v11301_v51 = vld [vmem:[%s12055_s17 + $0x644] sm:$0xf]  ;;  %v9416_v52 = vld [vmem:[%s12055_s17 + $0x664] sm:$0xf0] }
 0x1e3   : > { %4249 = vmatpush.bf16.msra.mxu0 %v8619_v59  ;;  %v4123_v59 = vpop.f32.mrf.mxu1 }
 0x1e4   : > { %4210 = vmatpush.bf16.msra.mxu2 %v8903_v24  ;;  %v9339_v24 = vor.u32 %v11282_v0, %v9336_v4  ;;  %v9100_v0 = vld [vmem:[%s12055_s17 + $0x3e4] sm:$0xf0]  ;;  %v8803_v4 = vor.u32 %v11152_v32, %v8802_v60  ;;  %v11212_v59 = vld [vmem:[%s12055_s17 + $0x37c] sm:$0xf]  ;;  %v11341_v60 = vld [vmem:[%s12055_s17 + $0x780] sm:$0xf0] }
 0x1e5   : > { %4401 = vmatpush.bf16.msrb.mxu1 %v8775_v11  ;;  %4223 = vmatpush.bf16.msra.mxu3 %v9191_v26  ;;  %v12971_v11 = vadd.f32 %v12909_v41, %v2385_v16  ;;  %v9483_v26 = vor.u32 %v11318_v9, %v9480_v54  ;;  %v9018_v41 = vld [vmem:[%s12055_s17 + $0x328] sm:$0xf]  ;;  %v9267_v16 = vor.u32 %v11264_v27, %v9264_v57  ;;  %v8766_v9 = vld [vmem:[%s12055_s17 + $0x130] sm:$0xf]  ;;  %v11143_v54 = vld [vmem:[%s12055_s17 + $0x150] sm:$0xf0] }
 0x1e6   : > { %4250 = vmatmul.bf16.vlgmr.msra.gmra.mxu0 %v12167_v39  ;;  %v11125_v57 = vld [vmem:[%s12055_s17 + $0xc0] sm:$0xf0]  ;;  %v11194_v32 = vld [vmem:[%s12055_s17 + $0x2ec] sm:$0xf] }
 0x1e7   : > { %4307 = vmatpush.bf16.msrb.mxu0 %v9163_v19  ;;  %4211 = vmatmul.bf16.vlgmr.msra.gmra.mxu2 %v12165_v38  ;;  %v9055_v19 = vor.u32 %v11215_v7, %v9054_v6  ;;  %v11255_v6 = vld [vmem:[%s12055_s17 + $0x4d4] sm:$0xf]  ;;  %v9228_v7 = vld [vmem:[%s12055_s17 + $0x4f4] sm:$0xf0] }
 0x1e8   : > { %4268 = vmatpush.bf16.msrb.mxu2 %v9447_v28  ;;  %4224 = vmatmul.bf16.vlgmr.msra.gmra.mxu3 %v12227_v2  ;;  %v11206_v28 = vld [vmem:[%s12055_s17 + $0x348] sm:$0xf0]  ;;  %v9231_v17 = vor.u32 %v11255_v6, %v9228_v7  ;;  %v11116_v6 = vld [vmem:[%s12055_s17 + $0x78] sm:$0xf0]  ;;  %v9522_v7 = vld [vmem:[%s12055_s17 + $0x718] sm:$0xf] }
 0x1e9   : > { %4285 = vmatpush.bf16.msrb.mxu3 %v9591_v25  ;;  %4402 = vmatpush.bf16.msrb.mxu1 %v8739_v37  ;;  %v2464_v25 = vpop.f32.mrf.mxu0  ;;  %v9300_v37 = vld [vmem:[%s12055_s17 + $0x584] sm:$0xf0]  ;;  %v2373_v45 = vpop.f32.mrf.mxu2  ;;  %v9019_v46 = vor.u32 %v11206_v28, %v9018_v41  ;;  %v11310_v41 = vld [vmem:[%s12055_s17 + $0x68c] sm:$0xf]  ;;  %v9452_v28 = vld [vmem:[%s12055_s17 + $0x6ac] sm:$0xf0] }
 0x1ea   : > { %v9303_v50 = vor.u32 %v11273_v36, %v9300_v37  ;;  %v9067_v25 = vor.u32 %v11212_v59, %v9064_v13  ;;  %v11350_v36 = vld [vmem:[%s12055_s17 + $0x7c8] sm:$0xf0] }
 0x1eb   : > { %4308 = vmatpush.bf16.msrb.mxu0 %v9127_v47  ;;  %v11230_v47 = vld [vmem:[%s12055_s17 + $0x40c] sm:$0xf]  ;;  %v12992_v61 = vpop.f32.mrf.mxu1 }
 0x1ec   : > { %4269 = vmatpush.bf16.msrb.mxu2 %v9411_v48  ;;  %v9136_v48 = vld [vmem:[%s12055_s17 + $0x42c] sm:$0xf0] }
 0x1ed   : > { %4286 = vmatpush.bf16.msrb.mxu3 %v9555_v49  ;;  %4403 = vmatpush.bf16.msrb.mxu1 %v8703_v55  ;;  %v2386_v49 = vpop.f32.mrf.mxu3  ;;  %v8839_v55 = vor.u32 %v11161_v43, %v8838_v42  ;;  %v9139_v58 = vor.u32 %v11230_v47, %v9136_v48  ;;  %v11203_v42 = vld [vmem:[%s12055_s17 + $0x334] sm:$0xf]  ;;  %v9028_v43 = vld [vmem:[%s12055_s17 + $0x354] sm:$0xf0] }
 0x1ee   : > { %v9031_v27 = vor.u32 %v11203_v42, %v9028_v43  ;;  %v11238_v42 = vld [vmem:[%s12055_s17 + $0x44c] sm:$0xf] }
 0x1ef   : > { %4309 = vmatpush.bf16.msrb.mxu0 %v9091_v31  ;;  %v11221_v31 = vld [vmem:[%s12055_s17 + $0x3c4] sm:$0xf] }
 0x1f0   : > { %4270 = vmatpush.bf16.msrb.mxu2 %v9375_v22  ;;  %v8946_v22 = vld [vmem:[%s12055_s17 + $0x298] sm:$0xf] }
 0x1f1   : > { %4287 = vmatpush.bf16.msrb.mxu3 %v9519_v3  ;;  %4404 = vmatpush.bf16.msrb.mxu1 %v8667_v8  ;;  %v11188_v3 = vld [vmem:[%s12055_s17 + $0x2b8] sm:$0xf0]  ;;  %v9103_v8 = vor.u32 %v11221_v31, %v9100_v0  ;;  %v9419_v31 = vor.u32 %v11301_v51, %v9416_v52  ;;  %v11274_v51 = vld [vmem:[%s12055_s17 + $0x56c] sm:$0xf]  ;;  %v9308_v52 = vld [vmem:[%s12055_s17 + $0x58c] sm:$0xf0] }
 0x1f2   : > { %v8947_v10 = vor.u32 %v11188_v3, %v8946_v22  ;;  %v11292_v22 = vld [vmem:[%s12055_s17 + $0x5fc] sm:$0xf]  ;;  %v9380_v3 = vld [vmem:[%s12055_s17 + $0x61c] sm:$0xf0] }
 0x1f3   : > { %4310 = vmatpush.bf16.msrb.mxu0 %v9055_v19  ;;  %v9192_v19 = vld [vmem:[%s12055_s17 + $0x4ac] sm:$0xf0]  ;;  %v4188_v37 = vpop.f32.mrf.mxu1  ;;  %v2475_v47 = vpop.f32.mrf.mxu0  ;;  %v9383_v13 = vor.u32 %v11292_v22, %v9380_v3 }
 0x1f4   : > { %4271 = vmatpush.bf16.msrb.mxu2 %v9339_v24  ;;  %v8767_v24 = vor.u32 %v11143_v54, %v8766_v9  ;;  %v9195_v45 = vor.u32 %v11246_v15, %v9192_v19  ;;  %v11185_v9 = vld [vmem:[%s12055_s17 + $0x2a4] sm:$0xf]  ;;  %v8956_v54 = vld [vmem:[%s12055_s17 + $0x2c4] sm:$0xf0]  ;;  %v8622_v15 = vld [vmem:[%s12055_s17 + $0x10] sm:$0xf] }
 0x1f5   : > { %4288 = vmatpush.bf16.msrb.mxu3 %v9483_v26  ;;  %4405 = vmatpush.bf16.msrb.mxu1 %v8631_v29  ;;  %v8730_v26 = vld [vmem:[%s12055_s17 + $0xe8] sm:$0xf]  ;;  %v11134_v29 = vld [vmem:[%s12055_s17 + $0x108] sm:$0xf0] }
 0x1f6   : > { %v8731_v48 = vor.u32 %v11134_v29, %v8730_v26  ;;  %v11283_v26 = vld [vmem:[%s12055_s17 + $0x5b4] sm:$0xf]  ;;  %v11166_v37 = vld [vmem:[%s12055_s17 + $0x20c] sm:$0xf] }
 0x1f7   : > { %4311 = vmatpush.bf16.msrb.mxu0 %v9019_v46  ;;  %v9455_v46 = vor.u32 %v11310_v41, %v9452_v28  ;;  %v9344_v41 = vld [vmem:[%s12055_s17 + $0x5d4] sm:$0xf0]  ;;  %v11323_v29 = vld [vmem:[%s12055_s17 + $0x6f0] sm:$0xf0] }
 0x1f8   : > { %4272 = vmatpush.bf16.msrb.mxu2 %v9303_v50  ;;  %4406 = vmatmul.bf16.vlgmr.msrb.gmra.mxu1 %v12167_v39  ;;  %v8694_v50 = vld [vmem:[%s12055_s17 + $0xa0] sm:$0xf]  ;;  %v9347_v43 = vor.u32 %v11283_v26, %v9344_v41 }
 0x1f9   : > { %4294 = vmatpush.bf16.msra.mxu3 %v8875_v33  ;;  %4463 = vmatpush.bf16.msra.mxu1 %v9175_v40  ;;  %v9594_v33 = vld [vmem:[%s12055_s17 + $0x7a8] sm:$0xf]  ;;  %v8911_v40 = vor.u32 %v11179_v23, %v8910_v20 }
 0x1fa   : > { %9615 = vmatmul.msk.bf16.vlgmr.msrb.gmra.mxu3 %vm2046_vm0, %v12142_v14  ;;  %v9595_v49 = vor.u32 %v11350_v36, %v9594_v33  ;;  %v11176_v33 = vld [vmem:[%s12055_s17 + $0x25c] sm:$0xf]  ;;  %v8920_v36 = vld [vmem:[%s12055_s17 + $0x27c] sm:$0xf0] }
 0x1fb   : > { %4312 = vmatpush.bf16.msrb.mxu0 %v8983_v63  ;;  %v8992_v63 = vld [vmem:[%s12055_s17 + $0x30c] sm:$0xf0]  ;;  %v2449_v59 = vpop.f32.mrf.mxu3  ;;  %v2477_v28 = vpop.f32.mrf.mxu0 }
 0x1fc   : > { %4273 = vmatpush.bf16.msrb.mxu2 %v9267_v16  ;;  %v8658_v16 = vld [vmem:[%s12055_s17 + $0x58] sm:$0xf] }
 0x1fd   : > { %4295 = vmatpush.bf16.msra.mxu3 %v8839_v55  ;;  %4464 = vmatpush.bf16.msra.mxu1 %v9139_v58  ;;  %v13023_v55 = vadd.f32 %v12867_v35, %v2475_v47  ;;  %v9558_v58 = vld [vmem:[%s12055_s17 + $0x760] sm:$0xf]  ;;  %v8695_v35 = vor.u32 %v11125_v57, %v8694_v50  ;;  %v8659_v20 = vor.u32 %v11116_v6, %v8658_v16  ;;  %v11316_v47 = vld [vmem:[%s12055_s17 + $0x6b8] sm:$0xf0]  ;;  %v11307_v16 = vld [vmem:[%s12055_s17 + $0x670] sm:$0xf0] }
 0x1fe   : > { %v9559_v0 = vor.u32 %v11341_v60, %v9558_v58  ;;  %v9272_v6 = vld [vmem:[%s12055_s17 + $0x544] sm:$0xf0] }
 0x1ff   : > { %4313 = vmatpush.bf16.msrb.mxu0 %v8947_v10  ;;  %v2436_v10 = vpop.f32.mrf.mxu2 }
 0x200   : > { %4274 = vmatpush.bf16.msrb.mxu2 %v9231_v17  ;;  %v11107_v17 = vld [vmem:[%s12055_s17 + $0x30] sm:$0xf0]  ;;  %v2437_v19 = vadd.f32 %v2436_v10, %v12790_v30  ;;  %v11148_v10 = vld [vmem:[%s12055_s17 + $0x17c] sm:$0xf] }
 0x201   : > { %4296 = vmatpush.bf16.msra.mxu3 %v8803_v4  ;;  %4465 = vmatpush.bf16.msra.mxu1 %v9103_v8  ;;  %v8995_v4 = vor.u32 %v11194_v32, %v8992_v63  ;;  %v11332_v8 = vld [vmem:[%s12055_s17 + $0x738] sm:$0xf0]  ;;  %v11157_v32 = vld [vmem:[%s12055_s17 + $0x1c4] sm:$0xf]  ;;  %v8840_v63 = vld [vmem:[%s12055_s17 + $0x1e4] sm:$0xf0] }
 0x202   : > { %v9523_v23 = vor.u32 %v11332_v8, %v9522_v7  ;;  %v2450_v30 = vadd.f32 %v2449_v59, %v2437_v19  ;;  %v8843_v8 = vor.u32 %v11157_v32, %v8840_v63  ;;  %v8804_v59 = vld [vmem:[%s12055_s17 + $0x19c] sm:$0xf0]  ;;  %v9394_v19 = vld [vmem:[%s12055_s17 + $0x608] sm:$0xf]  ;;  %v9020_v32 = vld [vmem:[%s12055_s17 + $0x34c] sm:$0xf0] }
 0x203   : > { %4314 = vmatpush.bf16.msrb.mxu0 %v8911_v40  ;;  %v8876_v40 = vld [vmem:[%s12055_s17 + $0x22c] sm:$0xf0]  ;;  %v2451_v22 = vpop.f32.mrf.mxu3  ;;  %v8807_v26 = vor.u32 %v11148_v10, %v8804_v59  ;;  %v9322_v63 = vld [vmem:[%s12055_s17 + $0x578] sm:$0xf]  ;;  %v11271_v59 = vld [vmem:[%s12055_s17 + $0x550] sm:$0xf0] }
 0x204   : > { %4275 = vmatpush.bf16.msrb.mxu2 %v9195_v45  ;;  %v9164_v45 = vld [vmem:[%s12055_s17 + $0x46c] sm:$0xf0]  ;;  %v8879_v57 = vor.u32 %v11166_v37, %v8876_v40  ;;  %v9358_v37 = vld [vmem:[%s12055_s17 + $0x5c0] sm:$0xf]  ;;  %v11289_v40 = vld [vmem:[%s12055_s17 + $0x5e0] sm:$0xf0] }
 0x205   : > { %4297 = vmatpush.bf16.msra.mxu3 %v8767_v24  ;;  %4466 = vmatpush.bf16.msra.mxu1 %v9067_v25  ;;  %v9486_v24 = vld [vmem:[%s12055_s17 + $0x6d0] sm:$0xf]  ;;  %v8959_v25 = vor.u32 %v11185_v9, %v8956_v54  ;;  %v9167_v58 = vor.u32 %v11238_v42, %v9164_v45  ;;  %v13068_v7 = vpop.f32.mrf.mxu1  ;;  %v9200_v45 = vld [vmem:[%s12055_s17 + $0x4b4] sm:$0xf0] }
 0x206   : > { %4315 = vmatmul.bf16.vlgmr.msrb.gmra.mxu0 %v12165_v38  ;;  %v9487_v50 = vor.u32 %v11323_v29, %v9486_v24  ;;  %v9236_v24 = vld [vmem:[%s12055_s17 + $0x4fc] sm:$0xf0]  ;;  %v8768_v29 = vld [vmem:[%s12055_s17 + $0x154] sm:$0xf0]  ;;  %v9286_v10 = vld [vmem:[%s12055_s17 + $0x530] sm:$0xf] }
 0x207   : > { %4372 = vmatpush.bf16.msra.mxu0 %v9455_v46  ;;  %4276 = vmatmul.bf16.vlgmr.msrb.gmra.mxu2 %v12227_v2  ;;  %v9466_v46 = vld [vmem:[%s12055_s17 + $0x698] sm:$0xf]  ;;  %v2438_v3 = vpop.f32.mrf.mxu2 }
 0x208   : > { %4337 = vmatpush.bf16.msra.mxu2 %v9595_v49  ;;  %v8623_v49 = vor.u32 %v11107_v17, %v8622_v15  ;;  %v9467_v60 = vor.u32 %v11316_v47, %v9466_v46  ;;  %v9092_v17 = vld [vmem:[%s12055_s17 + $0x3dc] sm:$0xf0] }
 0x209   : > { %4298 = vmatpush.bf16.msra.mxu3 %v8731_v48  ;;  %4467 = vmatpush.bf16.msra.mxu1 %v9031_v27  ;;  %v13056_v48 = vadd.f32 %v12953_v53, %v2450_v30  ;;  %v8923_v27 = vor.u32 %v11176_v33, %v8920_v36  ;;  %v11229_v53 = vld [vmem:[%s12055_s17 + $0x404] sm:$0xf]  ;;  %v11211_v33 = vld [vmem:[%s12055_s17 + $0x374] sm:$0xf]  ;;  %v9056_v30 = vld [vmem:[%s12055_s17 + $0x394] sm:$0xf0] }
 0x20b   : > { %4373 = vmatpush.bf16.msra.mxu0 %v9419_v31  ;;  %v9311_v31 = vor.u32 %v11274_v51, %v9308_v52  ;;  %v9059_v51 = vor.u32 %v11211_v33, %v9056_v30  ;;  %v9359_v52 = vor.u32 %v11289_v40, %v9358_v37  ;;  %v11262_v33 = vld [vmem:[%s12055_s17 + $0x508] sm:$0xf0]  ;;  %v11103_v37 = vld [vmem:[%s12055_s17 + $0x14] sm:$0xf]  ;;  %v8624_v40 = vld [vmem:[%s12055_s17 + $0x34] sm:$0xf0] }
 0x20c   : > { %4338 = vmatpush.bf16.msra.mxu2 %v9559_v0  ;;  %v9430_v0 = vld [vmem:[%s12055_s17 + $0x650] sm:$0xf] }
 0x20d   : > { %4299 = vmatpush.bf16.msra.mxu3 %v8695_v35  ;;  %4468 = vmatpush.bf16.msra.mxu1 %v8995_v4  ;;  %v9128_v35 = vld [vmem:[%s12055_s17 + $0x424] sm:$0xf0]  ;;  %v11265_v4 = vld [vmem:[%s12055_s17 + $0x524] sm:$0xf]  ;;  %v9431_v54 = vor.u32 %v11307_v16, %v9430_v0  ;;  %v13088_v42 = vpop.f32.mrf.mxu3  ;;  %v4201_v46 = vpop.f32.mrf.mxu1  ;;  %v11342_v16 = vld [vmem:[%s12055_s17 + $0x788] sm:$0xf0] }
 0x20e   : > { %v9131_v9 = vor.u32 %v11229_v53, %v9128_v35  ;;  %v9275_v15 = vor.u32 %v11265_v4, %v9272_v6  ;;  %v11280_v53 = vld [vmem:[%s12055_s17 + $0x598] sm:$0xf0]  ;;  %v9566_v0 = vld [vmem:[%s12055_s17 + $0x768] sm:$0xf]  ;;  %v11121_v6 = vld [vmem:[%s12055_s17 + $0xa4] sm:$0xf] }
 0x20f   : > { %4374 = vmatpush.bf16.msra.mxu0 %v9383_v13  ;;  %v11220_v13 = vld [vmem:[%s12055_s17 + $0x3bc] sm:$0xf]  ;;  %v9323_v4 = vor.u32 %v11280_v53, %v9322_v63  ;;  %v11175_v46 = vld [vmem:[%s12055_s17 + $0x254] sm:$0xf]  ;;  %v9170_v63 = vld [vmem:[%s12055_s17 + $0x450] sm:$0xf] }
 0x210   : > { %4339 = vmatpush.bf16.msra.mxu2 %v9523_v23  ;;  %v11256_v23 = vld [vmem:[%s12055_s17 + $0x4dc] sm:$0xf]  ;;  %v9095_v41 = vor.u32 %v11220_v13, %v9092_v17 }
 0x211   : > { %4300 = vmatpush.bf16.msra.mxu3 %v8659_v20  ;;  %4469 = vmatpush.bf16.msra.mxu1 %v8959_v25  ;;  %v11298_v20 = vld [vmem:[%s12055_s17 + $0x628] sm:$0xf0]  ;;  %v11139_v25 = vld [vmem:[%s12055_s17 + $0x134] sm:$0xf]  ;;  %v9239_v36 = vor.u32 %v11256_v23, %v9236_v24  ;;  %v9287_v24 = vor.u32 %v11271_v59, %v9286_v10 }
 0x212   : > { %v9395_v28 = vor.u32 %v11298_v20, %v9394_v19  ;;  %v8771_v47 = vor.u32 %v11139_v25, %v8768_v29  ;;  %v9530_v19 = vld [vmem:[%s12055_s17 + $0x720] sm:$0xf]  ;;  %v11333_v20 = vld [vmem:[%s12055_s17 + $0x740] sm:$0xf0]  ;;  %v9250_v29 = vld [vmem:[%s12055_s17 + $0x4e8] sm:$0xf] }
 0x213   : > { %4375 = vmatpush.bf16.msra.mxu0 %v9347_v43  ;;  %v11247_v43 = vld [vmem:[%s12055_s17 + $0x494] sm:$0xf]  ;;  %v13102_v22 = vpop.f32.mrf.mxu0  ;;  %v8948_v25 = vld [vmem:[%s12055_s17 + $0x2bc] sm:$0xf0]  ;;  %v9531_v30 = vor.u32 %v11333_v20, %v9530_v19  ;;  %v11234_v19 = vld [vmem:[%s12055_s17 + $0x428] sm:$0xf0] }
 0x214   : > { %4340 = vmatpush.bf16.msra.mxu2 %v9487_v50  ;;  %v11351_v50 = vld [vmem:[%s12055_s17 + $0x7d0] sm:$0xf0]  ;;  %v9422_v20 = vld [vmem:[%s12055_s17 + $0x648] sm:$0xf] }
 0x215   : > { %4301 = vmatpush.bf16.msra.mxu3 %v8623_v49  ;;  %4470 = vmatpush.bf16.msra.mxu1 %v8923_v27  ;;  %v9602_v49 = vld [vmem:[%s12055_s17 + $0x7b0] sm:$0xf]  ;;  %v11130_v27 = vld [vmem:[%s12055_s17 + $0xec] sm:$0xf]  ;;  %v2516_v13 = vpop.f32.mrf.mxu3 }
 0x216   : > { %v9134_v13 = vld [vmem:[%s12055_s17 + $0x408] sm:$0xf] }
 0x217   : > { %4376 = vmatpush.bf16.msra.mxu0 %v9311_v31  ;;  %9616 = vmatmul.msk.bf16.vlgmr.msra.gmra.mxu2 %vm2046_vm0, %v12142_v14  ;;  %v9603_v31 = vor.u32 %v11351_v50, %v9602_v49  ;;  %v11324_v49 = vld [vmem:[%s12055_s17 + $0x6f8] sm:$0xf0] }
 0x218   : > { %4346 = vmatpush.bf16.msrb.mxu2 %v8879_v57  ;;  %4302 = vmatmul.bf16.vlgmr.msra.gmra.mxu3 %v12167_v39  ;;  %v8732_v57 = vld [vmem:[%s12055_s17 + $0x10c] sm:$0xf0] }
 0x219   : > { %4359 = vmatpush.bf16.msrb.mxu3 %v9167_v58  ;;  %4528 = vmatpush.bf16.msrb.mxu1 %v9467_v60  ;;  %v11202_v58 = vld [vmem:[%s12055_s17 + $0x32c] sm:$0xf]  ;;  %v9203_v60 = vor.u32 %v11247_v43, %v9200_v45  ;;  %v8735_v35 = vor.u32 %v11130_v27, %v8732_v57  ;;  %v8912_v27 = vld [vmem:[%s12055_s17 + $0x274] sm:$0xf0]  ;;  %v11167_v57 = vld [vmem:[%s12055_s17 + $0x214] sm:$0xf] }
 0x21a   : > { %4471 = vmatmul.bf16.vlgmr.msra.gmra.mxu1 %v12165_v38  ;;  %v9023_v3 = vor.u32 %v11202_v58, %v9020_v32  ;;  %v8884_v58 = vld [vmem:[%s12055_s17 + $0x234] sm:$0xf0]  ;;  %v11253_v32 = vld [vmem:[%s12055_s17 + $0x4c0] sm:$0xf0] }
 0x21b   : > { %4377 = vmatpush.bf16.msra.mxu0 %v9275_v15  ;;  %v9567_v15 = vor.u32 %v11342_v16, %v9566_v0  ;;  %v4110_v50 = vpop.f32.mrf.mxu0  ;;  %v11315_v0 = vld [vmem:[%s12055_s17 + $0x6b0] sm:$0xf0]  ;;  %v8627_v16 = vor.u32 %v11103_v37, %v8624_v40  ;;  %v11225_v40 = vld [vmem:[%s12055_s17 + $0x3e0] sm:$0xf0] }
 0x21c   : > { %4347 = vmatpush.bf16.msrb.mxu2 %v8843_v8  ;;  %v8696_v8 = vld [vmem:[%s12055_s17 + $0xc4] sm:$0xf0]  ;;  %v11582_v50 = vld [vmem:[%s13138_s23 + $0x728] sm:$0xf0] }
 0x21d   : > { %4360 = vmatpush.bf16.msrb.mxu3 %v9131_v9  ;;  %4529 = vmatpush.bf16.msrb.mxu1 %v9431_v54  ;;  %v11193_v9 = vld [vmem:[%s12055_s17 + $0x2e4] sm:$0xf]  ;;  %v8984_v54 = vld [vmem:[%s12055_s17 + $0x304] sm:$0xf0]  ;;  %v8699_v17 = vor.u32 %v11121_v6, %v8696_v8  ;;  %v8915_v6 = vor.u32 %v11175_v46, %v8912_v27  ;;  %v8776_v27 = vld [vmem:[%s12055_s17 + $0x15c] sm:$0xf0] }
 0x21e   : > { %v8987_v23 = vor.u32 %v11193_v9, %v8984_v54  ;;  %v11158_v9 = vld [vmem:[%s12055_s17 + $0x1cc] sm:$0xf]  ;;  %v8848_v54 = vld [vmem:[%s12055_s17 + $0x1ec] sm:$0xf0] }
 0x21f   : > { %4378 = vmatpush.bf16.msra.mxu0 %v9239_v36  ;;  %v2501_v36 = vpop.f32.mrf.mxu2 }
 0x220   : > { %4348 = vmatpush.bf16.msrb.mxu2 %v8807_v26  ;;  %v11112_v26 = vld [vmem:[%s12055_s17 + $0x5c] sm:$0xf]  ;;  %v2502_v43 = vadd.f32 %v2501_v36, %v13023_v55 }
 0x221   : > { %4361 = vmatpush.bf16.msrb.mxu3 %v9095_v41  ;;  %4530 = vmatpush.bf16.msrb.mxu1 %v9395_v28  ;;  %v8660_v41 = vld [vmem:[%s12055_s17 + $0x7c] sm:$0xf0]  ;;  %v11184_v28 = vld [vmem:[%s12055_s17 + $0x29c] sm:$0xf] }
 0x222   : > { %v8663_v45 = vor.u32 %v11112_v26, %v8660_v41  ;;  %v13129_v55 = vadd.f32 %v13088_v42, %v2502_v43  ;;  %v10595_v42 = vld [vmem:[%s13138_s23 + $0x798] sm:$0xf]  ;;  %v8851_v26 = vor.u32 %v11158_v9, %v8848_v54  ;;  %v10559_v41 = vld [vmem:[%s13138_s23 + $0x750] sm:$0xf]  ;;  %v9386_v43 = vld [vmem:[%s12055_s17 + $0x600] sm:$0xf] }
 0x223   : > { %4379 = vmatpush.bf16.msra.mxu0 %v9203_v60  ;;  %v9214_v60 = vld [vmem:[%s12055_s17 + $0x4a0] sm:$0xf]  ;;  %v8740_v9 = vld [vmem:[%s12055_s17 + $0x114] sm:$0xf0] }
 0x224   : > { %4349 = vmatpush.bf16.msrb.mxu2 %v8771_v47  ;;  %v9494_v47 = vld [vmem:[%s12055_s17 + $0x6d8] sm:$0xf]  ;;  %v9215_v8 = vor.u32 %v11253_v32, %v9214_v60 }
 0x225   : > { %4362 = vmatpush.bf16.msrb.mxu3 %v9059_v51  ;;  %4531 = vmatpush.bf16.msrb.mxu1 %v9359_v52  ;;  %v8951_v51 = vor.u32 %v11184_v28, %v8948_v25  ;;  %v9251_v52 = vor.u32 %v11262_v33, %v9250_v29  ;;  %v9495_v53 = vor.u32 %v11324_v49, %v9494_v47  ;;  %v11591_v28 = vld [vmem:[%s13138_s23 + $0x770] sm:$0xf0]  ;;  %v11149_v25 = vld [vmem:[%s12055_s17 + $0x184] sm:$0xf]  ;;  %v8812_v29 = vld [vmem:[%s12055_s17 + $0x1a4] sm:$0xf0] }
 0x226   : > { %4380 = vmatmul.bf16.vlgmr.msra.gmra.mxu0 %v12227_v2  ;;  %v9135_v33 = vor.u32 %v11234_v19, %v9134_v13  ;;  %v10560_v37 = vor.u32 %v11591_v28, %v10559_v41  ;;  %v8815_v47 = vor.u32 %v11149_v25, %v8812_v29  ;;  %v10523_v49 = vld [vmem:[%s13138_s23 + $0x708] sm:$0xf]  ;;  %v9062_v60 = vld [vmem:[%s12055_s17 + $0x378] sm:$0xf]  ;;  %v11279_v19 = vld [vmem:[%s12055_s17 + $0x590] sm:$0xf0] }
 0x227   : > { %4441 = vmatpush.bf16.msrb.mxu0 %v9603_v31  ;;  %v11243_v31 = vld [vmem:[%s12055_s17 + $0x470] sm:$0xf0]  ;;  %v9841_v28 = vld [vmem:[%s13138_s23 + $0x1d4] sm:$0xf0]  ;;  %v11122_v25 = vld [vmem:[%s12055_s17 + $0xac] sm:$0xf] }
 0x228   : > { %4350 = vmatpush.bf16.msrb.mxu2 %v8735_v35  ;;  %v9458_v35 = vld [vmem:[%s12055_s17 + $0x690] sm:$0xf]  ;;  %v9171_v10 = vor.u32 %v11243_v31, %v9170_v63  ;;  %v10524_v63 = vor.u32 %v11582_v50, %v10523_v49  ;;  %v11288_v31 = vld [vmem:[%s12055_s17 + $0x5d8] sm:$0xf0]  ;;  %v11398_v49 = vld [vmem:[%s13138_s23 + $0x16c] sm:$0xf] }
 0x229   : > { %4363 = vmatpush.bf16.msrb.mxu3 %v9023_v3  ;;  %4532 = vmatpush.bf16.msrb.mxu1 %v9323_v4  ;;  %v8887_v3 = vor.u32 %v11167_v57, %v8884_v58  ;;  %v11600_v4 = vld [vmem:[%s13138_s23 + $0x7b8] sm:$0xf0]  ;;  %v9459_v59 = vor.u32 %v11315_v0, %v9458_v35  ;;  %v8704_v29 = vld [vmem:[%s12055_s17 + $0xcc] sm:$0xf0] }
 0x22b   : > { %4442 = vmatpush.bf16.msrb.mxu0 %v9567_v15  ;;  %v2503_v15 = vpop.f32.mrf.mxu2  ;;  %v4095_v46 = vpop.f32.mrf.mxu3 }
 0x22c   : > { %4351 = vmatpush.bf16.msrb.mxu2 %v8699_v17  ;;  %v10596_v17 = vor.u32 %v11600_v4, %v10595_v42  ;;  %v11573_v42 = vld [vmem:[%s13138_s23 + $0x6e0] sm:$0xf0]  ;;  %v11416_v4 = vld [vmem:[%s13138_s23 + $0x1fc] sm:$0xf]  ;;  %v11207_v15 = vld [vmem:[%s12055_s17 + $0x350] sm:$0xf0] }
 0x22d   : > { %4364 = vmatpush.bf16.msrb.mxu3 %v8987_v23  ;;  %4533 = vmatpush.bf16.msrb.mxu1 %v9287_v24  ;;  %v11306_v23 = vld [vmem:[%s12055_s17 + $0x668] sm:$0xf0]  ;;  %v13148_v24 = vpop.f32.mrf.mxu1 }
 0x22e   : > { %v9423_v36 = vor.u32 %v11306_v23, %v9422_v20 }
 0x22f   : > { %4443 = vmatpush.bf16.msrb.mxu0 %v9531_v30  ;;  %v9098_v30 = vld [vmem:[%s12055_s17 + $0x3c0] sm:$0xf] }
 0x230   : > { %4352 = vmatpush.bf16.msrb.mxu2 %v8663_v45  ;;  %v11297_v45 = vld [vmem:[%s12055_s17 + $0x620] sm:$0xf0]  ;;  %v9099_v57 = vor.u32 %v11225_v40, %v9098_v30  ;;  %v8990_v30 = vld [vmem:[%s12055_s17 + $0x2e8] sm:$0xf]  ;;  %v11198_v40 = vld [vmem:[%s12055_s17 + $0x308] sm:$0xf0] }
 0x231   : > { %4365 = vmatpush.bf16.msrb.mxu3 %v8951_v51  ;;  %4534 = vmatpush.bf16.msrb.mxu1 %v9251_v52  ;;  %v4109_v51 = vadd.f32 %v13102_v22, %v4095_v46  ;;  %v11140_v52 = vld [vmem:[%s12055_s17 + $0x13c] sm:$0xf]  ;;  %v9387_v58 = vor.u32 %v11297_v45, %v9386_v43  ;;  %v9278_v43 = vld [vmem:[%s12055_s17 + $0x528] sm:$0xf]  ;;  %v11270_v45 = vld [vmem:[%s12055_s17 + $0x548] sm:$0xf0] }
 0x232   : > { %v11216_v22 = vld [vmem:[%s12055_s17 + $0x398] sm:$0xf0] }
 0x233   : > { %4444 = vmatpush.bf16.msrb.mxu0 %v9495_v53  ;;  %v4122_v32 = vadd.f32 %v12946_v44, %v4109_v51  ;;  %v9350_v53 = vld [vmem:[%s12055_s17 + $0x5b8] sm:$0xf]  ;;  %v4134_v0 = vpop.f32.mrf.mxu2  ;;  %v9063_v54 = vor.u32 %v11216_v22, %v9062_v60  ;;  %v4097_v41 = vpop.f32.mrf.mxu3  ;;  %v9805_v51 = vld [vmem:[%s13138_s23 + $0x18c] sm:$0xf0]  ;;  %v8954_v60 = vld [vmem:[%s12055_s17 + $0x2a0] sm:$0xf] }
 0x234   : > { %4353 = vmatpush.bf16.msrb.mxu2 %v8627_v16  ;;  %v8779_v16 = vor.u32 %v11140_v52, %v8776_v27  ;;  %v11113_v52 = vld [vmem:[%s12055_s17 + $0x64] sm:$0xf]  ;;  %v8668_v27 = vld [vmem:[%s12055_s17 + $0x84] sm:$0xf0] }
 0x235   : > { %4366 = vmatpush.bf16.msrb.mxu3 %v8915_v6  ;;  %4535 = vmatpush.bf16.msrb.mxu1 %v9215_v8  ;;  %v4266_v35 = vpop.f32.mrf.mxu1  ;;  %v13176_v44 = vadd.f32 %v4134_v0, %v4122_v32  ;;  %v9877_v6 = vld [vmem:[%s13138_s23 + $0x21c] sm:$0xf0]  ;;  %v11131_v8 = vld [vmem:[%s12055_s17 + $0xf4] sm:$0xf]  ;;  %v11189_v32 = vld [vmem:[%s12055_s17 + $0x2c0] sm:$0xf0] }
 0x236   : > { %9618 = vmatmul.msk.bf16.vlgmr.msrb.gmra.mxu0 %vm2046_vm0, %v12142_v14  ;;  %v9880_v20 = vor.u32 %v11416_v4, %v9877_v6  ;;  %v8743_v23 = vor.u32 %v11131_v8, %v8740_v9  ;;  %v11261_v22 = vld [vmem:[%s12055_s17 + $0x500] sm:$0xf0]  ;;  %v9769_v0 = vld [vmem:[%s13138_s23 + $0x144] sm:$0xf0]  ;;  %v8955_v4 = vor.u32 %v11189_v32, %v8954_v60  ;;  %v11180_v8 = vld [vmem:[%s12055_s17 + $0x278] sm:$0xf0] }
 0x237   : > { %4450 = vmatpush.bf16.msra.mxu0 %v8887_v3  ;;  %4354 = vmatmul.bf16.vlgmr.msrb.gmra.mxu2 %v12167_v39  ;;  %v10487_v3 = vld [vmem:[%s13138_s23 + $0x6c0] sm:$0xf]  ;;  %v11389_v35 = vld [vmem:[%s13138_s23 + $0x124] sm:$0xf]  ;;  %v9178_v9 = vld [vmem:[%s12055_s17 + $0x458] sm:$0xf] }
 0x238   : > { %4411 = vmatpush.bf16.msra.mxu2 %v9171_v10  ;;  %4367 = vmatmul.bf16.vlgmr.msrb.gmra.mxu3 %v12165_v38  ;;  %v9351_v10 = vor.u32 %v11288_v31, %v9350_v53  ;;  %v10488_v13 = vor.u32 %v11573_v42, %v10487_v3  ;;  %v9808_v53 = vor.u32 %v11398_v49, %v9805_v51  ;;  %v11104_v3 = vld [vmem:[%s12055_s17 + $0x1c] sm:$0xf]  ;;  %v8632_v42 = vld [vmem:[%s12055_s17 + $0x3c] sm:$0xf0]  ;;  %v11338_v49 = vld [vmem:[%s12055_s17 + $0x76c] sm:$0xf] }
 0x239   : > { %4424 = vmatpush.bf16.msra.mxu3 %v9459_v59  ;;  %6165 = vmatpush.bf16.msra.mxu1 %v10596_v17  ;;  %v9026_v59 = vld [vmem:[%s12055_s17 + $0x330] sm:$0xf]  ;;  %v8671_v31 = vor.u32 %v11113_v52, %v8668_v27  ;;  %v11371_v52 = vld [vmem:[%s13138_s23 + $0x94] sm:$0xf]  ;;  %v9697_v27 = vld [vmem:[%s13138_s23 + $0xb4] sm:$0xf0] }
 0x23a   : > { %4536 = vmatmul.bf16.vlgmr.msrb.gmra.mxu1 %v12227_v2  ;;  %v9314_v17 = vld [vmem:[%s12055_s17 + $0x570] sm:$0xf]  ;;  %v11293_v32 = vld [vmem:[%s12055_s17 + $0x604] sm:$0xf] }
 0x23b   : > { %4451 = vmatpush.bf16.msra.mxu0 %v8851_v26  ;;  %v11407_v26 = vld [vmem:[%s13138_s23 + $0x1b4] sm:$0xf]  ;;  %v4136_v50 = vpop.f32.mrf.mxu2 }
 0x23c   : > { %4412 = vmatpush.bf16.msra.mxu2 %v9135_v33  ;;  %v9027_v33 = vor.u32 %v11207_v15, %v9026_v59  ;;  %v9844_v46 = vor.u32 %v11407_v26, %v9841_v28  ;;  %v9206_v59 = vld [vmem:[%s12055_s17 + $0x498] sm:$0xf]  ;;  %v11311_v15 = vld [vmem:[%s12055_s17 + $0x694] sm:$0xf]  ;;  %v11380_v28 = vld [vmem:[%s13138_s23 + $0xdc] sm:$0xf] }
 0x23d   : > { %4425 = vmatpush.bf16.msra.mxu3 %v9423_v36  ;;  %6166 = vmatpush.bf16.msra.mxu1 %v10560_v37  ;;  %v9315_v36 = vor.u32 %v11279_v19, %v9314_v17  ;;  %v13190_v37 = vpop.f32.mrf.mxu0  ;;  %v9772_v17 = vor.u32 %v11389_v35, %v9769_v0  ;;  %v8635_v19 = vor.u32 %v11104_v3, %v8632_v42  ;;  %v9604_v26 = vld [vmem:[%s12055_s17 + $0x7d4] sm:$0xf0]  ;;  %v9568_v50 = vld [vmem:[%s12055_s17 + $0x78c] sm:$0xf0]  ;;  %v9388_v35 = vld [vmem:[%s12055_s17 + $0x624] sm:$0xf0] }
 0x23e   : > { %v9571_v60 = vor.u32 %v11338_v49, %v9568_v50  ;;  %v11329_v0 = vld [vmem:[%s12055_s17 + $0x724] sm:$0xf]  ;;  %v11362_v42 = vld [vmem:[%s13138_s23 + $0x4c] sm:$0xf] }
 0x23f   : > { %4452 = vmatpush.bf16.msra.mxu0 %v8815_v47  ;;  %v8707_v47 = vor.u32 %v11122_v25, %v8704_v29  ;;  %v9733_v25 = vld [vmem:[%s13138_s23 + $0xfc] sm:$0xf0] }
 0x240   : > { %4413 = vmatpush.bf16.msra.mxu2 %v9099_v57  ;;  %v8991_v57 = vor.u32 %v11198_v40, %v8990_v30  ;;  %v11302_v40 = vld [vmem:[%s12055_s17 + $0x64c] sm:$0xf] }
 0x241   : > { %4426 = vmatpush.bf16.msra.mxu3 %v9387_v58  ;;  %6167 = vmatpush.bf16.msra.mxu1 %v10524_v63  ;;  %v9279_v58 = vor.u32 %v11270_v45, %v9278_v43  ;;  %v9242_v63 = vld [vmem:[%s12055_s17 + $0x4e0] sm:$0xf]  ;;  %v9142_v43 = vld [vmem:[%s12055_s17 + $0x410] sm:$0xf]  ;;  %v11235_v45 = vld [vmem:[%s12055_s17 + $0x430] sm:$0xf0] }
 0x242   : > { %v9243_v6 = vor.u32 %v11261_v22, %v9242_v63  ;;  %v9106_v63 = vld [vmem:[%s12055_s17 + $0x3c8] sm:$0xf]  ;;  %v11226_v22 = vld [vmem:[%s12055_s17 + $0x3e8] sm:$0xf0] }
 0x243   : > { %4453 = vmatpush.bf16.msra.mxu0 %v8779_v16  ;;  %v8918_v16 = vld [vmem:[%s12055_s17 + $0x258] sm:$0xf] }
 0x244   : > { %4414 = vmatpush.bf16.msra.mxu2 %v9063_v54  ;;  %v11244_v54 = vld [vmem:[%s12055_s17 + $0x478] sm:$0xf0]  ;;  %v8919_v29 = vor.u32 %v11180_v8, %v8918_v16  ;;  %v9532_v16 = vld [vmem:[%s12055_s17 + $0x744] sm:$0xf0]  ;;  %v9107_v8 = vor.u32 %v11226_v22, %v9106_v63  ;;  %v10135_v22 = vld [vmem:[%s13138_s23 + $0x3f8] sm:$0xf] }
 0x245   : > { %4427 = vmatpush.bf16.msra.mxu3 %v9351_v10  ;;  %6168 = vmatpush.bf16.msra.mxu1 %v10488_v13  ;;  %v4175_v10 = vpop.f32.mrf.mxu0  ;;  %v11252_v13 = vld [vmem:[%s12055_s17 + $0x4b8] sm:$0xf0]  ;;  %v9179_v41 = vor.u32 %v11244_v54, %v9178_v9 }
 0x246   : > { %v11284_v9 = vld [vmem:[%s12055_s17 + $0x5bc] sm:$0xf]  ;;  %v9391_v10 = vor.u32 %v11293_v32, %v9388_v35 }
 0x247   : > { %4454 = vmatpush.bf16.msra.mxu0 %v8743_v23  ;;  %v11347_v23 = vld [vmem:[%s12055_s17 + $0x7b4] sm:$0xf]  ;;  %v13227_v51 = vpop.f32.mrf.mxu1 }
 0x248   : > { %4415 = vmatpush.bf16.msra.mxu2 %v9027_v33  ;;  %v9207_v33 = vor.u32 %v11252_v13, %v9206_v59  ;;  %v9607_v30 = vor.u32 %v11347_v23, %v9604_v26  ;;  %v9535_v59 = vor.u32 %v11329_v0, %v9532_v16  ;;  %v9352_v13 = vld [vmem:[%s12055_s17 + $0x5dc] sm:$0xf0]  ;;  %v11353_v26 = vld [vmem:[%s13138_s23 + $0x4] sm:$0xf]  ;;  %v8998_v16 = vld [vmem:[%s12055_s17 + $0x2f0] sm:$0xf] }
 0x249   : > { %6174 = vmatpush.bf16.msrb.mxu1 %v9880_v20  ;;  %4428 = vmatpush.bf16.msra.mxu3 %v9315_v36  ;;  %v9460_v20 = vld [vmem:[%s12055_s17 + $0x6b4] sm:$0xf0]  ;;  %v9496_v23 = vld [vmem:[%s12055_s17 + $0x6fc] sm:$0xf0] }
 0x24a   : > { %10629 = vmatmul.msk.bf16.vlgmr.msra.gmra.mxu1 %vm2046_vm0, %v12142_v14  ;;  %v9463_v36 = vor.u32 %v11311_v15, %v9460_v20  ;;  %v4147_v3 = vpop.f32.mrf.mxu2  ;;  %v9070_v15 = vld [vmem:[%s12055_s17 + $0x380] sm:$0xf]  ;;  %v11320_v20 = vld [vmem:[%s12055_s17 + $0x6dc] sm:$0xf] }
 0x24b   : > { %4455 = vmatpush.bf16.msra.mxu0 %v8707_v47  ;;  %v9424_v47 = vld [vmem:[%s12055_s17 + $0x66c] sm:$0xf0] }
 0x24c   : > { %4416 = vmatpush.bf16.msra.mxu2 %v8991_v57  ;;  %v9143_v57 = vor.u32 %v11235_v45, %v9142_v43  ;;  %v9355_v43 = vor.u32 %v11284_v9, %v9352_v13  ;;  %v9499_v45 = vor.u32 %v11320_v20, %v9496_v23  ;;  %v8818_v9 = vld [vmem:[%s12055_s17 + $0x188] sm:$0xf]  ;;  %v10099_v13 = vld [vmem:[%s13138_s23 + $0x3b0] sm:$0xf]  ;;  %v11190_v20 = vld [vmem:[%s12055_s17 + $0x2c8] sm:$0xf0] }
 0x24d   : > { %6175 = vmatpush.bf16.msrb.mxu1 %v9844_v46  ;;  %4429 = vmatpush.bf16.msra.mxu3 %v9279_v58  ;;  %v9736_v46 = vor.u32 %v11380_v28, %v9733_v25  ;;  %v9427_v58 = vor.u32 %v11302_v40, %v9424_v47  ;;  %v9625_v25 = vld [vmem:[%s13138_s23 + $0x24] sm:$0xf0]  ;;  %v11493_v40 = vld [vmem:[%s13138_s23 + $0x460] sm:$0xf0] }
 0x24e   : > { %v9628_v49 = vor.u32 %v11353_v26, %v9625_v25  ;;  %v11257_v26 = vld [vmem:[%s12055_s17 + $0x4e4] sm:$0xf] }
 0x24f   : > { %4456 = vmatpush.bf16.msra.mxu0 %v8671_v31  ;;  %v9700_v31 = vor.u32 %v11371_v52, %v9697_v27  ;;  %v4331_v28 = vpop.f32.mrf.mxu1  ;;  %v11275_v52 = vld [vmem:[%s12055_s17 + $0x574] sm:$0xf]  ;;  %v9316_v27 = vld [vmem:[%s12055_s17 + $0x594] sm:$0xf0] }
 0x250   : > { %4417 = vmatpush.bf16.msra.mxu2 %v8955_v4  ;;  %v9661_v4 = vld [vmem:[%s13138_s23 + $0x6c] sm:$0xf0]  ;;  %v9319_v0 = vor.u32 %v11275_v52, %v9316_v27  ;;  %v9244_v28 = vld [vmem:[%s12055_s17 + $0x504] sm:$0xf0]  ;;  %v10451_v52 = vld [vmem:[%s13138_s23 + $0x678] sm:$0xf] }
 0x251   : > { %6176 = vmatpush.bf16.msrb.mxu1 %v9808_v53  ;;  %4430 = vmatpush.bf16.msra.mxu3 %v9243_v6  ;;  %v13234_v53 = vpop.f32.mrf.mxu0  ;;  %v4160_v6 = vpop.f32.mrf.mxu3  ;;  %v11564_v27 = vld [vmem:[%s13138_s23 + $0x698] sm:$0xf0] }
 0x252   : > { %v4161_v54 = vadd.f32 %v4160_v6, %v4147_v3  ;;  %v4149_v32 = vpop.f32.mrf.mxu2  ;;  %v11199_v3 = vld [vmem:[%s12055_s17 + $0x310] sm:$0xf0]  ;;  %v9280_v6 = vld [vmem:[%s12055_s17 + $0x54c] sm:$0xf0] }
 0x253   : > { %4457 = vmatpush.bf16.msra.mxu0 %v8635_v19  ;;  %v9664_v19 = vor.u32 %v11362_v42, %v9661_v4  ;;  %v11266_v4 = vld [vmem:[%s12055_s17 + $0x52c] sm:$0xf]  ;;  %v11352_v32 = vld [vmem:[%s12055_s17 + $0x7d8] sm:$0xf0] }
 0x254   : > { %4418 = vmatpush.bf16.msra.mxu2 %v8919_v29  ;;  %v8890_v29 = vld [vmem:[%s12055_s17 + $0x218] sm:$0xf] }
 0x255   : > { %6177 = vmatpush.bf16.msrb.mxu1 %v9772_v17  ;;  %4431 = vmatpush.bf16.msra.mxu3 %v9207_v33  ;;  %v11217_v17 = vld [vmem:[%s12055_s17 + $0x3a0] sm:$0xf0]  ;;  %v11172_v33 = vld [vmem:[%s12055_s17 + $0x238] sm:$0xf0] }
 0x256   : > { %4458 = vmatmul.bf16.vlgmr.msra.gmra.mxu0 %v12167_v39  ;;  %v8891_v50 = vor.u32 %v11172_v33, %v8890_v29  ;;  %v8782_v29 = vld [vmem:[%s12055_s17 + $0x140] sm:$0xf]  ;;  %v11145_v33 = vld [vmem:[%s12055_s17 + $0x160] sm:$0xf0] }
 0x257   : > { %4515 = vmatpush.bf16.msrb.mxu0 %v9179_v41  ;;  %4419 = vmatmul.bf16.vlgmr.msra.gmra.mxu2 %v12165_v38  ;;  %v13252_v41 = vadd.f32 %v13190_v37, %v4161_v54  ;;  %v9034_v37 = vld [vmem:[%s12055_s17 + $0x338] sm:$0xf]  ;;  %v11154_v54 = vld [vmem:[%s12055_s17 + $0x1a8] sm:$0xf0] }
 0x258   : > { %4476 = vmatpush.bf16.msrb.mxu2 %v9463_v36  ;;  %4432 = vmatmul.bf16.vlgmr.msra.gmra.mxu3 %v12227_v2  ;;  %v9071_v36 = vor.u32 %v11217_v17, %v9070_v15  ;;  %v11475_v15 = vld [vmem:[%s13138_s23 + $0x3d0] sm:$0xf0]  ;;  %v9283_v17 = vor.u32 %v11266_v4, %v9280_v6  ;;  %v8819_v23 = vor.u32 %v11154_v54, %v8818_v9  ;;  %v8710_v6 = vld [vmem:[%s12055_s17 + $0xb0] sm:$0xf] }
 0x259   : > { %4493 = vmatpush.bf16.msrb.mxu3 %v9607_v30  ;;  %6178 = vmatpush.bf16.msrb.mxu1 %v9736_v46  ;;  %v10171_v30 = vld [vmem:[%s13138_s23 + $0x440] sm:$0xf]  ;;  %v11208_v46 = vld [vmem:[%s12055_s17 + $0x358] sm:$0xf0]  ;;  %v4240_v47 = vpop.f32.mrf.mxu0  ;;  %v4162_v35 = vpop.f32.mrf.mxu3  ;;  %v10100_v25 = vor.u32 %v11475_v15, %v10099_v13  ;;  %v11555_v9 = vld [vmem:[%s13138_s23 + $0x650] sm:$0xf0] }
 0x25a   : > { %v9035_v63 = vor.u32 %v11208_v46, %v9034_v37  ;;  %v9208_v37 = vld [vmem:[%s12055_s17 + $0x4bc] sm:$0xf0]  ;;  %v11181_v47 = vld [vmem:[%s12055_s17 + $0x280] sm:$0xf0]  ;;  %v11127_v13 = vld [vmem:[%s12055_s17 + $0xd0] sm:$0xf0] }
 0x25b   : > { %4516 = vmatpush.bf16.msrb.mxu0 %v9143_v57  ;;  %v10172_v57 = vor.u32 %v11493_v40, %v10171_v30  ;;  %v10063_v30 = vld [vmem:[%s13138_s23 + $0x368] sm:$0xf]  ;;  %v11466_v40 = vld [vmem:[%s13138_s23 + $0x388] sm:$0xf0]  ;;  %v8926_v46 = vld [vmem:[%s12055_s17 + $0x260] sm:$0xf] }
 0x25c   : > { %4477 = vmatpush.bf16.msrb.mxu2 %v9427_v58  ;;  %v8854_v58 = vld [vmem:[%s12055_s17 + $0x1d0] sm:$0xf]  ;;  %v11457_v35 = vld [vmem:[%s13138_s23 + $0x340] sm:$0xf0] }
 0x25d   : > { %4494 = vmatpush.bf16.msrb.mxu3 %v9571_v60  ;;  %6179 = vmatpush.bf16.msrb.mxu1 %v9700_v31  ;;  %v11163_v60 = vld [vmem:[%s12055_s17 + $0x1f0] sm:$0xf0]  ;;  %v11484_v31 = vld [vmem:[%s13138_s23 + $0x418] sm:$0xf0]  ;;  %v9574_v15 = vld [vmem:[%s12055_s17 + $0x770] sm:$0xf] }
 0x25e   : > { %v8855_v42 = vor.u32 %v11163_v60, %v8854_v58  ;;  %v11136_v58 = vld [vmem:[%s12055_s17 + $0x118] sm:$0xf0]  ;;  %v9610_v60 = vld [vmem:[%s12055_s17 + $0x7b8] sm:$0xf] }
 0x25f   : > { %4517 = vmatpush.bf16.msrb.mxu0 %v9107_v8  ;;  %v10136_v8 = vor.u32 %v11484_v31, %v10135_v22  ;;  %v8927_v22 = vor.u32 %v11181_v47, %v8926_v46  ;;  %v10027_v31 = vld [vmem:[%s13138_s23 + $0x320] sm:$0xf]  ;;  %v9611_v4 = vor.u32 %v11352_v32, %v9610_v60  ;;  %v11537_v32 = vld [vmem:[%s13138_s23 + $0x5c0] sm:$0xf0] }
 0x260   : > { %4478 = vmatpush.bf16.msrb.mxu2 %v9391_v10  ;;  %v13273_v10 = vpop.f32.mrf.mxu1  ;;  %v10343_v60 = vld [vmem:[%s13138_s23 + $0x5a0] sm:$0xf] }
 0x261   : > { %4495 = vmatpush.bf16.msrb.mxu3 %v9535_v59  ;;  %6180 = vmatpush.bf16.msrb.mxu1 %v9664_v19  ;;  %v8999_v59 = vor.u32 %v11199_v3, %v8998_v16  ;;  %v8962_v19 = vld [vmem:[%s12055_s17 + $0x2a8] sm:$0xf]  ;;  %v10452_v16 = vor.u32 %v11564_v27, %v10451_v52 }
 0x263   : > { %4518 = vmatpush.bf16.msrb.mxu0 %v9071_v36  ;;  %v8963_v36 = vor.u32 %v11190_v20, %v8962_v19  ;;  %v4251_v3 = vpop.f32.mrf.mxu0  ;;  %v9991_v19 = vld [vmem:[%s13138_s23 + $0x2d8] sm:$0xf]  ;;  %v11448_v20 = vld [vmem:[%s13138_s23 + $0x2f8] sm:$0xf0] }
 0x264   : > { %4479 = vmatpush.bf16.msrb.mxu2 %v9355_v43  ;;  %v11248_v43 = vld [vmem:[%s12055_s17 + $0x49c] sm:$0xf]  ;;  %v13304_v54 = vadd.f32 %v13148_v24, %v4251_v3  ;;  %v8711_v24 = vor.u32 %v11127_v13, %v8710_v6 }
 0x265   : > { %4496 = vmatpush.bf16.msrb.mxu3 %v9499_v45  ;;  %6181 = vmatpush.bf16.msrb.mxu1 %v9628_v49  ;;  %v9247_v45 = vor.u32 %v11257_v26, %v9244_v28  ;;  %v8783_v49 = vor.u32 %v11145_v33, %v8782_v29  ;;  %v8674_v28 = vld [vmem:[%s12055_s17 + $0x68] sm:$0xf]  ;;  %v11546_v29 = vld [vmem:[%s13138_s23 + $0x608] sm:$0xf0]  ;;  %v9992_v33 = vor.u32 %v11448_v20, %v9991_v19  ;;  %v11420_v3 = vld [vmem:[%s13138_s23 + $0x218] sm:$0xf0] }
 0x266   : > { %v11492_v6 = vld [vmem:[%s13138_s23 + $0x458] sm:$0xf0] }
 0x267   : > { %4519 = vmatpush.bf16.msrb.mxu0 %v9035_v63  ;;  %v11528_v19 = vld [vmem:[%s13138_s23 + $0x578] sm:$0xf0] }
 0x268   : > { %4480 = vmatpush.bf16.msrb.mxu2 %v9319_v0  ;;  %6182 = vmatmul.bf16.vlgmr.msrb.gmra.mxu1 %v12167_v39  ;;  %v4396_v63 = vpop.f32.mrf.mxu1  ;;  %v9211_v0 = vor.u32 %v11248_v43, %v9208_v37  ;;  %v9955_v43 = vld [vmem:[%s13138_s23 + $0x290] sm:$0xf] }
 0x269   : > { %4502 = vmatpush.bf16.msra.mxu3 %v8891_v50  ;;  %6239 = vmatpush.bf16.msra.mxu1 %v10172_v57  ;;  %v8746_v50 = vld [vmem:[%s12055_s17 + $0xf8] sm:$0xf]  ;;  %v10064_v57 = vor.u32 %v11466_v40, %v10063_v30  ;;  %v9538_v30 = vld [vmem:[%s12055_s17 + $0x728] sm:$0xf]  ;;  %v11334_v40 = vld [vmem:[%s12055_s17 + $0x748] sm:$0xf0] }
 0x26a   : > { %9619 = vmatmul.msk.bf16.vlgmr.msrb.gmra.mxu3 %vm2046_vm0, %v12142_v14  ;;  %v4212_v37 = vpop.f32.mrf.mxu2 }
 0x26b   : > { %4520 = vmatpush.bf16.msrb.mxu0 %v8999_v59  ;;  %v10028_v59 = vor.u32 %v11457_v35, %v10027_v31  ;;  %v4225_v46 = vpop.f32.mrf.mxu3  ;;  %v4213_v52 = vadd.f32 %v4212_v37, %v13068_v7  ;;  %v4253_v63 = vpop.f32.mrf.mxu0  ;;  %v11325_v31 = vld [vmem:[%s12055_s17 + $0x700] sm:$0xf0]  ;;  %v9919_v35 = vld [vmem:[%s13138_s23 + $0x248] sm:$0xf]  ;;  %v11519_v37 = vld [vmem:[%s13138_s23 + $0x530] sm:$0xf0] }
 0x26c   : > { %4481 = vmatpush.bf16.msrb.mxu2 %v9283_v17  ;;  %v11343_v17 = vld [vmem:[%s12055_s17 + $0x790] sm:$0xf0]  ;;  %v10389_v63 = vld [vmem:[%s13138_s23 + $0x614] sm:$0xf0] }
 0x26d   : > { %4503 = vmatpush.bf16.msra.mxu3 %v8855_v42  ;;  %6240 = vmatpush.bf16.msra.mxu1 %v10136_v8  ;;  %v8747_v42 = vor.u32 %v11136_v58, %v8746_v50  ;;  %v10415_v8 = vld [vmem:[%s13138_s23 + $0x630] sm:$0xf]  ;;  %v9575_v26 = vor.u32 %v11343_v17, %v9574_v15  ;;  %v11109_v50 = vld [vmem:[%s12055_s17 + $0x40] sm:$0xf0]  ;;  %v9502_v58 = vld [vmem:[%s12055_s17 + $0x6e0] sm:$0xf]  ;;  %v4226_v7 = vadd.f32 %v4225_v46, %v4213_v52 }
 0x26e   : > { %v9503_v15 = vor.u32 %v11325_v31, %v9502_v58  ;;  %v10307_v17 = vld [vmem:[%s13138_s23 + $0x558] sm:$0xf]  ;;  %v9803_v52 = vld [vmem:[%s13138_s23 + $0x168] sm:$0xf]  ;;  %v11510_v31 = vld [vmem:[%s13138_s23 + $0x4e8] sm:$0xf0] }
 0x26f   : > { %4521 = vmatpush.bf16.msrb.mxu0 %v8963_v36  ;;  %v11118_v36 = vld [vmem:[%s12055_s17 + $0x88] sm:$0xf0] }
 0x270   : > { %4482 = vmatpush.bf16.msrb.mxu2 %v9247_v45  ;;  %v11439_v45 = vld [vmem:[%s13138_s23 + $0x2b0] sm:$0xf0]  ;;  %v8675_v27 = vor.u32 %v11118_v36, %v8674_v28  ;;  %v9839_v28 = vld [vmem:[%s13138_s23 + $0x1b0] sm:$0xf]  ;;  %v11552_v36 = vld [vmem:[%s13138_s23 + $0x63c] sm:$0xf] }
 0x271   : > { %4504 = vmatpush.bf16.msra.mxu3 %v8819_v23  ;;  %6241 = vmatpush.bf16.msra.mxu1 %v10100_v25  ;;  %v10416_v23 = vor.u32 %v11555_v9, %v10415_v8  ;;  %v10379_v25 = vld [vmem:[%s13138_s23 + $0x5e8] sm:$0xf]  ;;  %v11561_v8 = vld [vmem:[%s13138_s23 + $0x684] sm:$0xf] }
 0x272   : > { %v10380_v47 = vor.u32 %v11546_v29, %v10379_v25  ;;  %v10461_v9 = vld [vmem:[%s13138_s23 + $0x6a4] sm:$0xf0]  ;;  %v11411_v25 = vld [vmem:[%s13138_s23 + $0x1d0] sm:$0xf0]  ;;  %v10308_v29 = vor.u32 %v11528_v19, %v10307_v17  ;;  %v11501_v17 = vld [vmem:[%s13138_s23 + $0x4a0] sm:$0xf0] }
 0x273   : > { %4522 = vmatpush.bf16.msrb.mxu0 %v8927_v22  ;;  %v9956_v22 = vor.u32 %v11439_v45, %v9955_v43  ;;  %v4214_v43 = vpop.f32.mrf.mxu2  ;;  %v10271_v45 = vld [vmem:[%s13138_s23 + $0x510] sm:$0xf] }
 0x274   : > { %4483 = vmatpush.bf16.msrb.mxu2 %v9211_v0  ;;  %v11430_v0 = vld [vmem:[%s13138_s23 + $0x268] sm:$0xf0]  ;;  %v10272_v58 = vor.u32 %v11519_v37, %v10271_v45  ;;  %v11587_v37 = vld [vmem:[%s13138_s23 + $0x754] sm:$0xf] }
 0x275   : > { %4505 = vmatpush.bf16.msra.mxu3 %v8783_v49  ;;  %6242 = vmatpush.bf16.msra.mxu1 %v10064_v57  ;;  %v8638_v49 = vld [vmem:[%s12055_s17 + $0x20] sm:$0xf]  ;;  %v9539_v57 = vor.u32 %v11334_v40, %v9538_v30  ;;  %v9920_v20 = vor.u32 %v11430_v0, %v9919_v35  ;;  %v4227_v40 = vpop.f32.mrf.mxu3  ;;  %v13349_v46 = vpop.f32.mrf.mxu1 }
 0x276   : > { %4523 = vmatmul.bf16.vlgmr.msrb.gmra.mxu0 %v12165_v38  ;;  %v8639_v13 = vor.u32 %v11109_v50, %v8638_v49  ;;  %v10425_v30 = vld [vmem:[%s13138_s23 + $0x65c] sm:$0xf0]  ;;  %v10317_v40 = vld [vmem:[%s13138_s23 + $0x584] sm:$0xf0] }
 0x277   : > { %6148 = vmatpush.bf16.msra.mxu0 %v10452_v16  ;;  %4484 = vmatmul.bf16.vlgmr.msrb.gmra.mxu2 %v12227_v2  ;;  %v9875_v16 = vld [vmem:[%s13138_s23 + $0x1f8] sm:$0xf]  ;;  %v10428_v50 = vor.u32 %v11552_v36, %v10425_v30  ;;  %v11456_v36 = vld [vmem:[%s13138_s23 + $0x338] sm:$0xf0]  ;;  %v11525_v30 = vld [vmem:[%s13138_s23 + $0x564] sm:$0xf] }
 0x278   : > { %4545 = vmatpush.bf16.msra.mxu2 %v9611_v4  ;;  %v10344_v4 = vor.u32 %v11537_v32, %v10343_v60  ;;  %v11474_v60 = vld [vmem:[%s13138_s23 + $0x3c8] sm:$0xf0]  ;;  %v11543_v32 = vld [vmem:[%s13138_s23 + $0x5f4] sm:$0xf] }
 0x279   : > { %4506 = vmatpush.bf16.msra.mxu3 %v8747_v42  ;;  %6243 = vmatpush.bf16.msra.mxu1 %v10028_v59  ;;  %v10163_v42 = vld [vmem:[%s13138_s23 + $0x438] sm:$0xf]  ;;  %v13337_v59 = vadd.f32 %v13234_v53, %v4226_v7  ;;  %v10127_v53 = vld [vmem:[%s13138_s23 + $0x3f0] sm:$0xf]  ;;  %v10392_v7 = vor.u32 %v11543_v32, %v10389_v63  ;;  %v11516_v32 = vld [vmem:[%s13138_s23 + $0x51c] sm:$0xf] }
 0x27a   : > { %v10281_v63 = vld [vmem:[%s13138_s23 + $0x53c] sm:$0xf0] }
 0x27b   : > { %6149 = vmatpush.bf16.msra.mxu0 %v10416_v23  ;;  %v9876_v23 = vor.u32 %v11420_v3, %v9875_v16  ;;  %v9767_v16 = vld [vmem:[%s13138_s23 + $0x120] sm:$0xf]  ;;  %v11393_v3 = vld [vmem:[%s13138_s23 + $0x140] sm:$0xf0] }
 0x27c   : > { %4546 = vmatpush.bf16.msra.mxu2 %v9575_v26  ;;  %v10464_v26 = vor.u32 %v11561_v8, %v10461_v9  ;;  %v11534_v8 = vld [vmem:[%s13138_s23 + $0x5ac] sm:$0xf]  ;;  %v10353_v9 = vld [vmem:[%s13138_s23 + $0x5cc] sm:$0xf0] }
 0x27d   : > { %4507 = vmatpush.bf16.msra.mxu3 %v8711_v24  ;;  %6244 = vmatpush.bf16.msra.mxu1 %v9992_v33  ;;  %v10164_v24 = vor.u32 %v11492_v6, %v10163_v42  ;;  %v11483_v33 = vld [vmem:[%s13138_s23 + $0x410] sm:$0xf0]  ;;  %v10055_v42 = vld [vmem:[%s13138_s23 + $0x360] sm:$0xf]  ;;  %v11465_v6 = vld [vmem:[%s13138_s23 + $0x380] sm:$0xf0]  ;;  %v4409_v19 = vpop.f32.mrf.mxu1 }
 0x27e   : > { %v10128_v49 = vor.u32 %v11483_v33, %v10127_v53  ;;  %v11384_v53 = vld [vmem:[%s13138_s23 + $0xf8] sm:$0xf0] }
 0x27f   : > { %6150 = vmatpush.bf16.msra.mxu0 %v10380_v47  ;;  %v9840_v47 = vor.u32 %v11411_v25, %v9839_v28  ;;  %v10356_v28 = vor.u32 %v11534_v8, %v10353_v9  ;;  %v9731_v25 = vld [vmem:[%s13138_s23 + $0xd8] sm:$0xf]  ;;  %v11438_v8 = vld [vmem:[%s13138_s23 + $0x2a8] sm:$0xf0]  ;;  %v11507_v9 = vld [vmem:[%s13138_s23 + $0x4d4] sm:$0xf] }
 0x280   : > { %4547 = vmatpush.bf16.msra.mxu2 %v9539_v57  ;;  %v10091_v57 = vld [vmem:[%s13138_s23 + $0x3a8] sm:$0xf]  ;;  %v9732_v45 = vor.u32 %v11384_v53, %v9731_v25  ;;  %v11569_v25 = vld [vmem:[%s13138_s23 + $0x6c4] sm:$0xf] }
 0x281   : > { %4508 = vmatpush.bf16.msra.mxu3 %v8675_v27  ;;  %6245 = vmatpush.bf16.msra.mxu1 %v9956_v22  ;;  %v11402_v27 = vld [vmem:[%s13138_s23 + $0x188] sm:$0xf0]  ;;  %v10235_v22 = vld [vmem:[%s13138_s23 + $0x4c8] sm:$0xf]  ;;  %v10092_v0 = vor.u32 %v11474_v60, %v10091_v57  ;;  %v11375_v57 = vld [vmem:[%s13138_s23 + $0xb0] sm:$0xf0] }
 0x282   : > { %v9804_v35 = vor.u32 %v11402_v27, %v9803_v52  ;;  %v10320_v52 = vor.u32 %v11525_v30, %v10317_v40  ;;  %v9695_v27 = vld [vmem:[%s13138_s23 + $0x90] sm:$0xf]  ;;  %v11447_v60 = vld [vmem:[%s13138_s23 + $0x2f0] sm:$0xf0]  ;;  %v10489_v53 = vld [vmem:[%s13138_s23 + $0x6e4] sm:$0xf0] }
 0x283   : > { %6151 = vmatpush.bf16.msra.mxu0 %v10344_v4  ;;  %v10236_v4 = vor.u32 %v11510_v31, %v10235_v22  ;;  %v11429_v30 = vld [vmem:[%s13138_s23 + $0x260] sm:$0xf0]  ;;  %v9883_v40 = vld [vmem:[%s13138_s23 + $0x200] sm:$0xf] }
 0x284   : > { %4548 = vmatpush.bf16.msra.mxu2 %v9503_v15  ;;  %v10199_v15 = vld [vmem:[%s13138_s23 + $0x480] sm:$0xf] }
 0x285   : > { %4509 = vmatpush.bf16.msra.mxu3 %v8639_v13  ;;  %6246 = vmatpush.bf16.msra.mxu1 %v9920_v20  ;;  %v13369_v13 = vpop.f32.mrf.mxu3  ;;  %v9768_v20 = vor.u32 %v11393_v3, %v9767_v16  ;;  %v10200_v33 = vor.u32 %v11501_v17, %v10199_v15  ;;  %v10284_v3 = vor.u32 %v11516_v32, %v10281_v63  ;;  %v10245_v15 = vld [vmem:[%s13138_s23 + $0x4f4] sm:$0xf0]  ;;  %v10611_v32 = vld [vmem:[%s13138_s23 + $0x7a8] sm:$0xf] }
 0x287   : > { %6152 = vmatpush.bf16.msra.mxu0 %v10308_v29  ;;  %9620 = vmatmul.msk.bf16.vlgmr.msra.gmra.mxu2 %vm2046_vm0, %v12142_v14  ;;  %v10019_v29 = vld [vmem:[%s13138_s23 + $0x318] sm:$0xf] }
 0x288   : > { %6122 = vmatpush.bf16.msrb.mxu2 %v9876_v23  ;;  %4510 = vmatmul.bf16.vlgmr.msra.gmra.mxu3 %v12167_v39  ;;  %v11596_v23 = vld [vmem:[%s13138_s23 + $0x79c] sm:$0xf] }
 0x289   : > { %6135 = vmatpush.bf16.msrb.mxu3 %v10164_v24  ;;  %6304 = vmatpush.bf16.msrb.mxu1 %v10464_v26  ;;  %v10597_v24 = vld [vmem:[%s13138_s23 + $0x7bc] sm:$0xf0]  ;;  %v10056_v26 = vor.u32 %v11465_v6, %v10055_v42  ;;  %v9659_v42 = vld [vmem:[%s13138_s23 + $0x48] sm:$0xf] }
 0x28a   : > { %6247 = vmatmul.bf16.vlgmr.msra.gmra.mxu1 %v12165_v38  ;;  %v10600_v43 = vor.u32 %v11596_v23, %v10597_v24  ;;  %v9947_v6 = vld [vmem:[%s13138_s23 + $0x288] sm:$0xf]  ;;  %v4277_v17 = vpop.f32.mrf.mxu2  ;;  %v11357_v23 = vld [vmem:[%s13138_s23 + $0x20] sm:$0xf0] }
 0x28b   : > { %6153 = vmatpush.bf16.msra.mxu0 %v10272_v58  ;;  %v9983_v58 = vld [vmem:[%s13138_s23 + $0x2d0] sm:$0xf]  ;;  %v4278_v24 = vadd.f32 %v4277_v17, %v13304_v54  ;;  %v11421_v54 = vld [vmem:[%s13138_s23 + $0x220] sm:$0xf0]  ;;  %v10575_v17 = vld [vmem:[%s13138_s23 + $0x760] sm:$0xf] }
 0x28c   : > { %6123 = vmatpush.bf16.msrb.mxu2 %v9840_v47  ;;  %v10561_v47 = vld [vmem:[%s13138_s23 + $0x774] sm:$0xf0]  ;;  %v9984_v16 = vor.u32 %v11447_v60, %v9983_v58  ;;  %v9884_v60 = vor.u32 %v11421_v54, %v9883_v40  ;;  %v11584_v54 = vld [vmem:[%s13138_s23 + $0x738] sm:$0xf0] }
 0x28d   : > { %6136 = vmatpush.bf16.msrb.mxu3 %v10128_v49  ;;  %6305 = vmatpush.bf16.msrb.mxu1 %v10428_v50  ;;  %v13383_v49 = vpop.f32.mrf.mxu0  ;;  %v10020_v50 = vor.u32 %v11456_v36, %v10019_v29  ;;  %v4292_v22 = vpop.f32.mrf.mxu3  ;;  %v10564_v31 = vor.u32 %v11587_v37, %v10561_v47  ;;  %v10248_v36 = vor.u32 %v11507_v9, %v10245_v15  ;;  %v10209_v37 = vld [vmem:[%s13138_s23 + $0x4ac] sm:$0xf0]  ;;  %v11488_v47 = vld [vmem:[%s13138_s23 + $0x43c] sm:$0xf]  ;;  %v10539_v40 = vld [vmem:[%s13138_s23 + $0x718] sm:$0xf] }
 0x28f   : > { %6154 = vmatpush.bf16.msra.mxu0 %v10236_v4  ;;  %v11366_v4 = vld [vmem:[%s13138_s23 + $0x68] sm:$0xf0] }
 0x290   : > { %6124 = vmatpush.bf16.msrb.mxu2 %v9804_v35  ;;  %v9696_v35 = vor.u32 %v11375_v57, %v9695_v27  ;;  %v11560_v27 = vld [vmem:[%s13138_s23 + $0x67c] sm:$0xf]  ;;  %v10453_v57 = vld [vmem:[%s13138_s23 + $0x69c] sm:$0xf0] }
 0x291   : > { %6137 = vmatpush.bf16.msrb.mxu3 %v10092_v0  ;;  %6306 = vmatpush.bf16.msrb.mxu1 %v10392_v7  ;;  %v11578_v0 = vld [vmem:[%s13138_s23 + $0x70c] sm:$0xf]  ;;  %v10525_v7 = vld [vmem:[%s13138_s23 + $0x72c] sm:$0xf0] }
 0x292   : > { %v10528_v19 = vor.u32 %v11578_v0, %v10525_v7  ;;  %v10456_v7 = vor.u32 %v11560_v27, %v10453_v57  ;;  %v11461_v27 = vld [vmem:[%s13138_s23 + $0x364] sm:$0xf] }
 0x293   : > { %6155 = vmatpush.bf16.msra.mxu0 %v10200_v33  ;;  %v9948_v33 = vor.u32 %v11438_v8, %v9947_v6  ;;  %v11551_v6 = vld [vmem:[%s13138_s23 + $0x634] sm:$0xf]  ;;  %v10417_v8 = vld [vmem:[%s13138_s23 + $0x654] sm:$0xf0] }
 0x294   : > { %6125 = vmatpush.bf16.msrb.mxu2 %v9768_v20  ;;  %v9623_v20 = vld [vmem:[%s13138_s23] sm:$0xf] }
 0x295   : > { %6138 = vmatpush.bf16.msrb.mxu3 %v10056_v26  ;;  %6307 = vmatpush.bf16.msrb.mxu1 %v10356_v28  ;;  %v9660_v26 = vor.u32 %v11366_v4, %v9659_v42  ;;  %v9911_v28 = vld [vmem:[%s13138_s23 + $0x240] sm:$0xf]  ;;  %v4318_v29 = vpop.f32.mrf.mxu0  ;;  %v9624_v58 = vor.u32 %v11357_v23, %v9623_v20  ;;  %v10129_v4 = vld [vmem:[%s13138_s23 + $0x414] sm:$0xf0]  ;;  %v9811_v20 = vld [vmem:[%s13138_s23 + $0x170] sm:$0xf] }
 0x296   : > { %6156 = vmatmul.bf16.vlgmr.msra.gmra.mxu0 %v12227_v2  ;;  %v9912_v63 = vor.u32 %v11429_v30, %v9911_v28  ;;  %v11403_v23 = vld [vmem:[%s13138_s23 + $0x190] sm:$0xf0]  ;;  %v11470_v28 = vld [vmem:[%s13138_s23 + $0x3ac] sm:$0xf] }
 0x297   : > { %6217 = vmatpush.bf16.msrb.mxu0 %v10600_v43  ;;  %v13410_v43 = vadd.f32 %v13369_v13, %v4278_v24  ;;  %v11602_v13 = vld [vmem:[%s13138_s23 + $0x7c8] sm:$0xf0]  ;;  %v13426_v9 = vpop.f32.mrf.mxu1  ;;  %v9812_v30 = vor.u32 %v11403_v23, %v9811_v20 }
 0x298   : > { %6126 = vmatpush.bf16.msrb.mxu2 %v9732_v45  ;;  %v11498_v45 = vld [vmem:[%s13138_s23 + $0x48c] sm:$0xf]  ;;  %v10612_v42 = vor.u32 %v11602_v13, %v10611_v32  ;;  %v10345_v32 = vld [vmem:[%s13138_s23 + $0x5c4] sm:$0xf0] }
 0x299   : > { %6139 = vmatpush.bf16.msrb.mxu3 %v10020_v50  ;;  %6308 = vmatpush.bf16.msrb.mxu1 %v10320_v52  ;;  %v10492_v50 = vor.u32 %v11569_v25, %v10489_v53  ;;  %v10165_v52 = vld [vmem:[%s13138_s23 + $0x45c] sm:$0xf0]  ;;  %v10212_v22 = vor.u32 %v11498_v45, %v10209_v37  ;;  %v10093_v53 = vld [vmem:[%s13138_s23 + $0x3cc] sm:$0xf0]  ;;  %v11542_v29 = vld [vmem:[%s13138_s23 + $0x5ec] sm:$0xf] }
 0x29a   : > { %v10168_v0 = vor.u32 %v11488_v47, %v10165_v52  ;;  %v9775_v37 = vld [vmem:[%s13138_s23 + $0x128] sm:$0xf]  ;;  %v11394_v47 = vld [vmem:[%s13138_s23 + $0x148] sm:$0xf0] }
 0x29b   : > { %6218 = vmatpush.bf16.msrb.mxu0 %v10564_v31  ;;  %v9847_v31 = vld [vmem:[%s13138_s23 + $0x1b8] sm:$0xf] }
 0x29c   : > { %6127 = vmatpush.bf16.msrb.mxu2 %v9696_v35  ;;  %v11412_v35 = vld [vmem:[%s13138_s23 + $0x1d8] sm:$0xf0] }
 0x29d   : > { %6140 = vmatpush.bf16.msrb.mxu3 %v9984_v16  ;;  %6309 = vmatpush.bf16.msrb.mxu1 %v10284_v3  ;;  %v11479_v16 = vld [vmem:[%s13138_s23 + $0x3f4] sm:$0xf]  ;;  %v4279_v3 = vpop.f32.mrf.mxu2  ;;  %v9848_v15 = vor.u32 %v11412_v35, %v9847_v31  ;;  %v10503_v31 = vld [vmem:[%s13138_s23 + $0x6d0] sm:$0xf] }
 0x29e   : > { %v10132_v24 = vor.u32 %v11479_v16, %v10129_v4  ;;  %v11575_v35 = vld [vmem:[%s13138_s23 + $0x6f0] sm:$0xf0]  ;;  %v9739_v16 = vld [vmem:[%s13138_s23 + $0xe0] sm:$0xf]  ;;  %v11385_v3 = vld [vmem:[%s13138_s23 + $0x100] sm:$0xf0] }
 0x29f   : > { %6219 = vmatpush.bf16.msrb.mxu0 %v10528_v19  ;;  %v11593_v19 = vld [vmem:[%s13138_s23 + $0x780] sm:$0xf0]  ;;  %v4474_v13 = vpop.f32.mrf.mxu1  ;;  %v9740_v23 = vor.u32 %v11385_v3, %v9739_v16  ;;  %v9631_v3 = vld [vmem:[%s13138_s23 + $0x8] sm:$0xf] }
 0x2a0   : > { %6128 = vmatpush.bf16.msrb.mxu2 %v9660_v26  ;;  %v10420_v26 = vor.u32 %v11551_v6, %v10417_v8  ;;  %v10576_v25 = vor.u32 %v11593_v19, %v10575_v17  ;;  %v11452_v6 = vld [vmem:[%s13138_s23 + $0x31c] sm:$0xf]  ;;  %v10504_v8 = vor.u32 %v11575_v35, %v10503_v31  ;;  %v10309_v19 = vld [vmem:[%s13138_s23 + $0x57c] sm:$0xf0]  ;;  %v9949_v13 = vld [vmem:[%s13138_s23 + $0x2ac] sm:$0xf0] }
 0x2a1   : > { %6141 = vmatpush.bf16.msrb.mxu3 %v9948_v33  ;;  %6310 = vmatpush.bf16.msrb.mxu1 %v10248_v36  ;;  %v10381_v33 = vld [vmem:[%s13138_s23 + $0x60c] sm:$0xf0]  ;;  %v4303_v36 = vpop.f32.mrf.mxu3  ;;  %v11524_v17 = vld [vmem:[%s13138_s23 + $0x55c] sm:$0xf]  ;;  %v11425_v16 = vld [vmem:[%s13138_s23 + $0x244] sm:$0xf] }
 0x2a2   : > { %v4317_v45 = vadd.f32 %v13383_v49, %v4303_v36  ;;  %v10384_v52 = vor.u32 %v11542_v29, %v10381_v33  ;;  %v10057_v49 = vld [vmem:[%s13138_s23 + $0x384] sm:$0xf0]  ;;  %v10312_v33 = vor.u32 %v11524_v17, %v10309_v19  ;;  %v11443_v36 = vld [vmem:[%s13138_s23 + $0x2d4] sm:$0xf] }
 0x2a3   : > { %6220 = vmatpush.bf16.msrb.mxu0 %v10492_v50  ;;  %v10096_v50 = vor.u32 %v11470_v28, %v10093_v53  ;;  %v9857_v28 = vld [vmem:[%s13138_s23 + $0x1e4] sm:$0xf0]  ;;  %v11376_v53 = vld [vmem:[%s13138_s23 + $0xb8] sm:$0xf0] }
 0x2a4   : > { %6129 = vmatpush.bf16.msrb.mxu2 %v9624_v58  ;;  %v4330_v57 = vadd.f32 %v13227_v51, %v4317_v45  ;;  %v10540_v58 = vor.u32 %v11584_v54, %v10539_v40  ;;  %v9985_v40 = vld [vmem:[%s13138_s23 + $0x2f4] sm:$0xf0]  ;;  %v11515_v54 = vld [vmem:[%s13138_s23 + $0x514] sm:$0xf]  ;;  %v10173_v17 = vld [vmem:[%s13138_s23 + $0x464] sm:$0xf0] }
 0x2a5   : > { %6142 = vmatpush.bf16.msrb.mxu3 %v9912_v63  ;;  %6311 = vmatpush.bf16.msrb.mxu1 %v10212_v22  ;;  %v4342_v63 = vpop.f32.mrf.mxu2  ;;  %v9776_v22 = vor.u32 %v11394_v47, %v9775_v37  ;;  %v10273_v45 = vld [vmem:[%s13138_s23 + $0x534] sm:$0xf0] }
 0x2a6   : > { %10630 = vmatmul.msk.bf16.vlgmr.msrb.gmra.mxu0 %vm2046_vm0, %v12142_v14  ;;  %v13454_v51 = vadd.f32 %v4342_v63, %v4330_v57  ;;  %v9667_v57 = vld [vmem:[%s13138_s23 + $0x50] sm:$0xf]  ;;  %v11506_v63 = vld [vmem:[%s13138_s23 + $0x4cc] sm:$0xf] }
 0x2a7   : > { %6226 = vmatpush.bf16.msra.mxu0 %v9884_v60  ;;  %6130 = vmatmul.bf16.vlgmr.msrb.gmra.mxu2 %v12167_v39  ;;  %v11533_v60 = vld [vmem:[%s13138_s23 + $0x5a4] sm:$0xf] }
 0x2a8   : > { %6187 = vmatpush.bf16.msra.mxu2 %v10168_v0  ;;  %6143 = vmatmul.bf16.vlgmr.msrb.gmra.mxu3 %v12165_v38  ;;  %v11418_v0 = vld [vmem:[%s13138_s23 + $0x20c] sm:$0xf]  ;;  %v10348_v4 = vor.u32 %v11533_v60, %v10345_v32  ;;  %v10276_v60 = vor.u32 %v11515_v54, %v10273_v45 }
 0x2a9   : > { %6200 = vmatpush.bf16.msra.mxu3 %v10456_v7  ;;  %6373 = vmatpush.bf16.msra.mxu1 %v10612_v42  ;;  %v9893_v7 = vld [vmem:[%s13138_s23 + $0x22c] sm:$0xf0]  ;;  %v10060_v42 = vor.u32 %v11461_v27, %v10057_v49  ;;  %v9821_v27 = vld [vmem:[%s13138_s23 + $0x19c] sm:$0xf0]  ;;  %v9988_v49 = vor.u32 %v11443_v36, %v9985_v40  ;;  %v11434_v32 = vld [vmem:[%s13138_s23 + $0x28c] sm:$0xf] }
 0x2aa   : > { %6312 = vmatmul.bf16.vlgmr.msrb.gmra.mxu1 %v12227_v2  ;;  %v9896_v20 = vor.u32 %v11418_v0, %v9893_v7  ;;  %v11391_v0 = vld [vmem:[%s13138_s23 + $0x134] sm:$0xf]  ;;  %v9785_v7 = vld [vmem:[%s13138_s23 + $0x154] sm:$0xf0]  ;;  %v11382_v36 = vld [vmem:[%s13138_s23 + $0xec] sm:$0xf] }
 0x2ab   : > { %6227 = vmatpush.bf16.msra.mxu0 %v9848_v15  ;;  %v10021_v15 = vld [vmem:[%s13138_s23 + $0x33c] sm:$0xf0]  ;;  %v9749_v40 = vld [vmem:[%s13138_s23 + $0x10c] sm:$0xf0] }
 0x2ac   : > { %6188 = vmatpush.bf16.msra.mxu2 %v10132_v24  ;;  %v11409_v24 = vld [vmem:[%s13138_s23 + $0x1c4] sm:$0xf]  ;;  %v10024_v29 = vor.u32 %v11452_v6, %v10021_v15 }
 0x2ad   : > { %6201 = vmatpush.bf16.msra.mxu3 %v10420_v26  ;;  %6374 = vmatpush.bf16.msra.mxu1 %v10576_v25  ;;  %v4305_v26 = vpop.f32.mrf.mxu3  ;;  %v9703_v25 = vld [vmem:[%s13138_s23 + $0x98] sm:$0xf]  ;;  %v9860_v37 = vor.u32 %v11409_v24, %v9857_v28  ;;  %v11489_v15 = vld [vmem:[%s13138_s23 + $0x444] sm:$0xf]  ;;  %v10459_v24 = vld [vmem:[%s13138_s23 + $0x680] sm:$0xf] }
 0x2ae   : > { %v9704_v47 = vor.u32 %v11376_v53, %v9703_v25  ;;  %v9788_v26 = vor.u32 %v11391_v0, %v9785_v7  ;;  %v11565_v25 = vld [vmem:[%s13138_s23 + $0x6a0] sm:$0xf0]  ;;  %v10603_v53 = vld [vmem:[%s13138_s23 + $0x7a0] sm:$0xf]  ;;  %v10387_v0 = vld [vmem:[%s13138_s23 + $0x5f0] sm:$0xf] }
 0x2af   : > { %6228 = vmatpush.bf16.msra.mxu0 %v9812_v30  ;;  %v13468_v30 = vpop.f32.mrf.mxu0  ;;  %v11471_v7 = vld [vmem:[%s13138_s23 + $0x3b4] sm:$0xf] }
 0x2b0   : > { %6189 = vmatpush.bf16.msra.mxu2 %v10096_v50  ;;  %v11400_v50 = vld [vmem:[%s13138_s23 + $0x17c] sm:$0xf] }
 0x2b1   : > { %6202 = vmatpush.bf16.msra.mxu3 %v10384_v52  ;;  %6375 = vmatpush.bf16.msra.mxu1 %v10540_v58  ;;  %v4344_v52 = vpop.f32.mrf.mxu2  ;;  %v11367_v58 = vld [vmem:[%s13138_s23 + $0x70] sm:$0xf0]  ;;  %v9824_v31 = vor.u32 %v11400_v50, %v9821_v27  ;;  %v10423_v50 = vld [vmem:[%s13138_s23 + $0x638] sm:$0xf]  ;;  %v10137_v27 = vld [vmem:[%s13138_s23 + $0x41c] sm:$0xf0] }
 0x2b2   : > { %v9668_v35 = vor.u32 %v11367_v58, %v9667_v57  ;;  %v11480_v52 = vld [vmem:[%s13138_s23 + $0x3fc] sm:$0xf]  ;;  %v9752_v57 = vor.u32 %v11382_v36, %v9749_v40  ;;  %v10495_v40 = vld [vmem:[%s13138_s23 + $0x6c8] sm:$0xf] }
 0x2b3   : > { %6229 = vmatpush.bf16.msra.mxu0 %v9776_v22  ;;  %v10237_v22 = vld [vmem:[%s13138_s23 + $0x4ec] sm:$0xf0]  ;;  %v11556_v58 = vld [vmem:[%s13138_s23 + $0x658] sm:$0xf0] }
 0x2b4   : > { %6190 = vmatpush.bf16.msra.mxu2 %v10060_v42  ;;  %v11358_v42 = vld [vmem:[%s13138_s23 + $0x28] sm:$0xf0]  ;;  %v10240_v6 = vor.u32 %v11506_v63, %v10237_v22  ;;  %v9713_v63 = vld [vmem:[%s13138_s23 + $0xc4] sm:$0xf0]  ;;  %v10140_v22 = vor.u32 %v11480_v52, %v10137_v27  ;;  %v11417_v52 = vld [vmem:[%s13138_s23 + $0x204] sm:$0xf] }
 0x2b5   : > { %6203 = vmatpush.bf16.msra.mxu3 %v10348_v4  ;;  %6376 = vmatpush.bf16.msra.mxu1 %v10504_v8  ;;  %v9952_v4 = vor.u32 %v11434_v32, %v9949_v13  ;;  %v9913_v8 = vld [vmem:[%s13138_s23 + $0x264] sm:$0xf0]  ;;  %v9632_v28 = vor.u32 %v11358_v42, %v9631_v3  ;;  %v11373_v13 = vld [vmem:[%s13138_s23 + $0xa4] sm:$0xf] }
 0x2b6   : > { %v9916_v54 = vor.u32 %v11425_v16, %v9913_v8  ;;  %v10101_v16 = vld [vmem:[%s13138_s23 + $0x3d4] sm:$0xf0]  ;;  %v9716_v42 = vor.u32 %v11373_v13, %v9713_v63  ;;  %v11583_v8 = vld [vmem:[%s13138_s23 + $0x730] sm:$0xf0]  ;;  %v9885_v27 = vld [vmem:[%s13138_s23 + $0x224] sm:$0xf0] }
 0x2b7   : > { %6230 = vmatpush.bf16.msra.mxu0 %v9740_v23  ;;  %v4383_v19 = vpop.f32.mrf.mxu0  ;;  %v10201_v23 = vld [vmem:[%s13138_s23 + $0x4a4] sm:$0xf0]  ;;  %v13505_v32 = vpop.f32.mrf.mxu1 }
 0x2b8   : > { %6191 = vmatpush.bf16.msra.mxu2 %v10024_v29  ;;  %v11601_v29 = vld [vmem:[%s13138_s23 + $0x7c0] sm:$0xf0]  ;;  %v9677_v19 = vld [vmem:[%s13138_s23 + $0x7c] sm:$0xf0]  ;;  %v10029_v63 = vld [vmem:[%s13138_s23 + $0x344] sm:$0xf0] }
 0x2b9   : > { %6382 = vmatpush.bf16.msrb.mxu1 %v9896_v20  ;;  %6204 = vmatpush.bf16.msra.mxu3 %v10312_v33  ;;  %v11497_v20 = vld [vmem:[%s13138_s23 + $0x484] sm:$0xf]  ;;  %v10176_v33 = vor.u32 %v11489_v15, %v10173_v17  ;;  %v11364_v17 = vld [vmem:[%s13138_s23 + $0x5c] sm:$0xf] }
 0x2ba   : > { %10633 = vmatmul.msk.bf16.vlgmr.msra.gmra.mxu1 %vm2046_vm0, %v12142_v14  ;;  %v10204_v45 = vor.u32 %v11497_v20, %v10201_v23  ;;  %v4355_v15 = vpop.f32.mrf.mxu2  ;;  %v10104_v23 = vor.u32 %v11471_v7, %v10101_v16  ;;  %v9680_v36 = vor.u32 %v11364_v17, %v9677_v19  ;;  %v11529_v7 = vld [vmem:[%s13138_s23 + $0x580] sm:$0xf0]  ;;  %v11486_v17 = vld [vmem:[%s13138_s23 + $0x428] sm:$0xf0] }
 0x2bb   : > { %6231 = vmatpush.bf16.msra.mxu0 %v9704_v47  ;;  %v10604_v47 = vor.u32 %v11601_v29, %v10603_v53  ;;  %v4368_v20 = vpop.f32.mrf.mxu3  ;;  %v11538_v53 = vld [vmem:[%s13138_s23 + $0x5c8] sm:$0xf0] }
 0x2bc   : > { %6192 = vmatpush.bf16.msra.mxu2 %v9988_v49  ;;  %v10567_v49 = vld [vmem:[%s13138_s23 + $0x758] sm:$0xf]  ;;  %v11462_v29 = vld [vmem:[%s13138_s23 + $0x36c] sm:$0xf] }
 0x2bd   : > { %6383 = vmatpush.bf16.msrb.mxu1 %v9860_v37  ;;  %6205 = vmatpush.bf16.msra.mxu3 %v10276_v60  ;;  %v10460_v37 = vor.u32 %v11565_v25, %v10459_v24  ;;  %v11592_v60 = vld [vmem:[%s13138_s23 + $0x778] sm:$0xf0]  ;;  %v10351_v24 = vld [vmem:[%s13138_s23 + $0x5a8] sm:$0xf] }
 0x2bf   : > { %6232 = vmatpush.bf16.msra.mxu0 %v9668_v35  ;;  %v10568_v35 = vor.u32 %v11592_v60, %v10567_v49  ;;  %v13512_v3 = vpop.f32.mrf.mxu0  ;;  %v11495_v49 = vld [vmem:[%s13138_s23 + $0x470] sm:$0xf0]  ;;  %v10352_v60 = vor.u32 %v11538_v53, %v10351_v24  ;;  %v9993_v24 = vld [vmem:[%s13138_s23 + $0x2fc] sm:$0xf0] }
 0x2c0   : > { %6193 = vmatpush.bf16.msra.mxu2 %v9952_v4  ;;  %v11547_v4 = vld [vmem:[%s13138_s23 + $0x610] sm:$0xf0] }
 0x2c1   : > { %6384 = vmatpush.bf16.msrb.mxu1 %v9824_v31  ;;  %6206 = vmatpush.bf16.msra.mxu3 %v10240_v6  ;;  %v10424_v31 = vor.u32 %v11556_v58, %v10423_v50  ;;  %v10531_v6 = vld [vmem:[%s13138_s23 + $0x710] sm:$0xf]  ;;  %v9641_v50 = vld [vmem:[%s13138_s23 + $0x34] sm:$0xf0] }
 0x2c2   : > { %v10532_v25 = vor.u32 %v11583_v8, %v10531_v6  ;;  %v10187_v58 = vld [vmem:[%s13138_s23 + $0x450] sm:$0xf]  ;;  %v4357_v6 = vpop.f32.mrf.mxu2 }
 0x2c3   : > { %6233 = vmatpush.bf16.msra.mxu0 %v9632_v28  ;;  %v10388_v28 = vor.u32 %v11547_v4, %v10387_v0  ;;  %v10315_v0 = vld [vmem:[%s13138_s23 + $0x560] sm:$0xf]  ;;  %v10188_v16 = vor.u32 %v11495_v49, %v10187_v58  ;;  %v4370_v19 = vpop.f32.mrf.mxu3  ;;  %v11511_v58 = vld [vmem:[%s13138_s23 + $0x4f0] sm:$0xf0]  ;;  %v10467_v6 = vld [vmem:[%s13138_s23 + $0x688] sm:$0xf] }
 0x2c4   : > { %6194 = vmatpush.bf16.msra.mxu2 %v9916_v54  ;;  %v11574_v54 = vld [vmem:[%s13138_s23 + $0x6e8] sm:$0xf0]  ;;  %v9849_v4 = vld [vmem:[%s13138_s23 + $0x1dc] sm:$0xf0]  ;;  %v11597_v19 = vld [vmem:[%s13138_s23 + $0x7a4] sm:$0xf] }
 0x2c5   : > { %6385 = vmatpush.bf16.msrb.mxu1 %v9788_v26  ;;  %6207 = vmatpush.bf16.msra.mxu3 %v10204_v45  ;;  %v4369_v26 = vadd.f32 %v4368_v20, %v4355_v15  ;;  %v11355_v45 = vld [vmem:[%s13138_s23 + $0x14] sm:$0xf]  ;;  %v10496_v13 = vor.u32 %v11574_v54, %v10495_v40  ;;  %v10151_v15 = vld [vmem:[%s13138_s23 + $0x408] sm:$0xf]  ;;  %v10316_v20 = vor.u32 %v11529_v7, %v10315_v0  ;;  %v10115_v54 = vld [vmem:[%s13138_s23 + $0x3c0] sm:$0xf] }
 0x2c6   : > { %6234 = vmatmul.bf16.vlgmr.msra.gmra.mxu0 %v12167_v39  ;;  %v10152_v53 = vor.u32 %v11486_v17, %v10151_v15  ;;  %v11502_v0 = vld [vmem:[%s13138_s23 + $0x4a8] sm:$0xf0]  ;;  %v9741_v17 = vld [vmem:[%s13138_s23 + $0x104] sm:$0xf0] }
 0x2c7   : > { %6291 = vmatpush.bf16.msrb.mxu0 %v10176_v33  ;;  %6195 = vmatmul.bf16.vlgmr.msra.gmra.mxu2 %v12165_v38  ;;  %v10065_v33 = vld [vmem:[%s13138_s23 + $0x38c] sm:$0xf0]  ;;  %v11426_v7 = vld [vmem:[%s13138_s23 + $0x24c] sm:$0xf] }
 0x2c8   : > { %6252 = vmatpush.bf16.msrb.mxu2 %v10460_v37  ;;  %6208 = vmatmul.bf16.vlgmr.msra.gmra.mxu3 %v12227_v2  ;;  %v13530_v37 = vadd.f32 %v13468_v30, %v4369_v26  ;;  %v11453_v30 = vld [vmem:[%s13138_s23 + $0x324] sm:$0xf] }
 0x2c9   : > { %6269 = vmatpush.bf16.msrb.mxu3 %v10604_v47  ;;  %6386 = vmatpush.bf16.msrb.mxu1 %v9752_v57  ;;  %v4539_v47 = vpop.f32.mrf.mxu1  ;;  %v10068_v57 = vor.u32 %v11462_v29, %v10065_v33  ;;  %v10032_v8 = vor.u32 %v11453_v30, %v10029_v63  ;;  %v11399_v29 = vld [vmem:[%s13138_s23 + $0x174] sm:$0xf]  ;;  %v9813_v33 = vld [vmem:[%s13138_s23 + $0x194] sm:$0xf0] }
 0x2ca   : > { %v10079_v63 = vld [vmem:[%s13138_s23 + $0x378] sm:$0xf] }
 0x2cb   : > { %6292 = vmatpush.bf16.msrb.mxu0 %v10140_v22  ;;  %v4448_v22 = vpop.f32.mrf.mxu0 }
 0x2cc   : > { %6253 = vmatpush.bf16.msrb.mxu2 %v10424_v31  ;;  %v9644_v31 = vor.u32 %v11355_v45, %v9641_v50  ;;  %v11477_v45 = vld [vmem:[%s13138_s23 + $0x3e0] sm:$0xf0]  ;;  %v11435_v50 = vld [vmem:[%s13138_s23 + $0x294] sm:$0xf]  ;;  %v11468_v22 = vld [vmem:[%s13138_s23 + $0x398] sm:$0xf0] }
 0x2cd   : > { %6270 = vmatpush.bf16.msrb.mxu3 %v10568_v35  ;;  %6387 = vmatpush.bf16.msrb.mxu1 %v9716_v42  ;;  %v9888_v35 = vor.u32 %v11417_v52, %v9885_v27  ;;  %v11408_v42 = vld [vmem:[%s13138_s23 + $0x1bc] sm:$0xf]  ;;  %v9957_v52 = vld [vmem:[%s13138_s23 + $0x2b4] sm:$0xf0]  ;;  %v9816_v27 = vor.u32 %v11399_v29, %v9813_v33  ;;  %v10116_v49 = vor.u32 %v11477_v45, %v10115_v54  ;;  %v10431_v45 = vld [vmem:[%s13138_s23 + $0x640] sm:$0xf] }
 0x2ce   : > { %v9852_v26 = vor.u32 %v11408_v42, %v9849_v4  ;;  %v9960_v30 = vor.u32 %v11435_v50, %v9957_v52  ;;  %v11381_v4 = vld [vmem:[%s13138_s23 + $0xe4] sm:$0xf]  ;;  %v10080_v15 = vor.u32 %v11468_v22, %v10079_v63  ;;  %v11372_v54 = vld [vmem:[%s13138_s23 + $0x9c] sm:$0xf]  ;;  %v11363_v63 = vld [vmem:[%s13138_s23 + $0x54] sm:$0xf] }
 0x2cf   : > { %6293 = vmatpush.bf16.msrb.mxu0 %v10104_v23  ;;  %v11444_v23 = vld [vmem:[%s13138_s23 + $0x2dc] sm:$0xf]  ;;  %v9744_v33 = vor.u32 %v11381_v4, %v9741_v17  ;;  %v10395_v22 = vld [vmem:[%s13138_s23 + $0x5f8] sm:$0xf]  ;;  %v11441_v4 = vld [vmem:[%s13138_s23 + $0x2c0] sm:$0xf0] }
 0x2d0   : > { %6254 = vmatpush.bf16.msrb.mxu2 %v10388_v28  ;;  %v10279_v28 = vld [vmem:[%s13138_s23 + $0x518] sm:$0xf]  ;;  %v9996_v40 = vor.u32 %v11444_v23, %v9993_v24  ;;  %v11354_v17 = vld [vmem:[%s13138_s23 + $0xc] sm:$0xf] }
 0x2d1   : > { %6271 = vmatpush.bf16.msrb.mxu3 %v10532_v25  ;;  %6388 = vmatpush.bf16.msrb.mxu1 %v9680_v36  ;;  %v11520_v25 = vld [vmem:[%s13138_s23 + $0x538] sm:$0xf0]  ;;  %v13551_v36 = vpop.f32.mrf.mxu1 }
 0x2d2   : > { %v10280_v47 = vor.u32 %v11520_v25, %v10279_v28  ;;  %v11459_v28 = vld [vmem:[%s13138_s23 + $0x350] sm:$0xf0] }
 0x2d3   : > { %6294 = vmatpush.bf16.msrb.mxu0 %v10068_v57  ;;  %v10243_v57 = vld [vmem:[%s13138_s23 + $0x4d0] sm:$0xf]  ;;  %v4459_v29 = vpop.f32.mrf.mxu0 }
 0x2d4   : > { %6255 = vmatpush.bf16.msrb.mxu2 %v10352_v60  ;;  %v11390_v60 = vld [vmem:[%s13138_s23 + $0x12c] sm:$0xf]  ;;  %v13582_v50 = vadd.f32 %v13426_v9, %v4459_v29 }
 0x2d5   : > { %6272 = vmatpush.bf16.msrb.mxu3 %v10496_v13  ;;  %6389 = vmatpush.bf16.msrb.mxu1 %v9644_v31  ;;  %v9777_v13 = vld [vmem:[%s13138_s23 + $0x14c] sm:$0xf0]  ;;  %v10207_v31 = vld [vmem:[%s13138_s23 + $0x488] sm:$0xf] }
 0x2d6   : > { %v9780_v42 = vor.u32 %v11390_v60, %v9777_v13  ;;  %v10208_v25 = vor.u32 %v11502_v0, %v10207_v31  ;;  %v11450_v60 = vld [vmem:[%s13138_s23 + $0x308] sm:$0xf0]  ;;  %v11548_v31 = vld [vmem:[%s13138_s23 + $0x618] sm:$0xf0]  ;;  %v9669_v0 = vld [vmem:[%s13138_s23 + $0x74] sm:$0xf0] }
 0x2d7   : > { %6295 = vmatpush.bf16.msrb.mxu0 %v10032_v8  ;;  %v11566_v8 = vld [vmem:[%s13138_s23 + $0x6a8] sm:$0xf0] }
 0x2d8   : > { %6256 = vmatpush.bf16.msrb.mxu2 %v10316_v20  ;;  %6390 = vmatmul.bf16.vlgmr.msrb.gmra.mxu1 %v12167_v39  ;;  %v10605_v20 = vld [vmem:[%s13138_s23 + $0x7c4] sm:$0xf0] }
 0x2d9   : > { %6278 = vmatpush.bf16.msra.mxu3 %v9888_v35  ;;  %6447 = vmatpush.bf16.msra.mxu1 %v10188_v16  ;;  %v10244_v35 = vor.u32 %v11511_v58, %v10243_v57  ;;  %v9921_v16 = vld [vmem:[%s13138_s23 + $0x26c] sm:$0xf0]  ;;  %v6172_v23 = vpop.f32.mrf.mxu1  ;;  %v11588_v57 = vld [vmem:[%s13138_s23 + $0x75c] sm:$0xf]  ;;  %v10569_v58 = vld [vmem:[%s13138_s23 + $0x77c] sm:$0xf0] }
 0x2da   : > { %10631 = vmatmul.msk.bf16.vlgmr.msrb.gmra.mxu3 %vm2046_vm0, %v12142_v14  ;;  %v9924_v24 = vor.u32 %v11426_v7, %v9921_v16  ;;  %v11579_v7 = vld [vmem:[%s13138_s23 + $0x714] sm:$0xf]  ;;  %v10533_v16 = vld [vmem:[%s13138_s23 + $0x734] sm:$0xf0]  ;;  %v9672_v23 = vor.u32 %v11363_v63, %v9669_v0  ;;  %v11530_v63 = vld [vmem:[%s13138_s23 + $0x588] sm:$0xf0] }
 0x2db   : > { %6296 = vmatpush.bf16.msrb.mxu0 %v9996_v40  ;;  %v10608_v40 = vor.u32 %v11597_v19, %v10605_v20  ;;  %v9633_v19 = vld [vmem:[%s13138_s23 + $0x2c] sm:$0xf0] }
 0x2dc   : > { %6257 = vmatpush.bf16.msrb.mxu2 %v10280_v47  ;;  %v11557_v47 = vld [vmem:[%s13138_s23 + $0x660] sm:$0xf0] }
 0x2dd   : > { %6279 = vmatpush.bf16.msra.mxu3 %v9852_v26  ;;  %6448 = vmatpush.bf16.msra.mxu1 %v10152_v53  ;;  %v10043_v26 = vld [vmem:[%s13138_s23 + $0x330] sm:$0xf]  ;;  %v10468_v53 = vor.u32 %v11566_v8, %v10467_v6  ;;  %v10432_v13 = vor.u32 %v11557_v47, %v10431_v45  ;;  %v4420_v6 = vpop.f32.mrf.mxu2  ;;  %v4433_v8 = vpop.f32.mrf.mxu3  ;;  %v9891_v45 = vld [vmem:[%s13138_s23 + $0x208] sm:$0xf]  ;;  %v11422_v47 = vld [vmem:[%s13138_s23 + $0x228] sm:$0xf0] }
 0x2de   : > { %v10044_v52 = vor.u32 %v11459_v28, %v10043_v26  ;;  %v4421_v20 = vadd.f32 %v4420_v6, %v13349_v46  ;;  %v11570_v26 = vld [vmem:[%s13138_s23 + $0x6cc] sm:$0xf]  ;;  %v10359_v28 = vld [vmem:[%s13138_s23 + $0x5b0] sm:$0xf] }
 0x2df   : > { %6297 = vmatpush.bf16.msrb.mxu0 %v9960_v30  ;;  %v10572_v30 = vor.u32 %v11588_v57, %v10569_v58  ;;  %v11494_v57 = vld [vmem:[%s13138_s23 + $0x468] sm:$0xf0]  ;;  %v11563_v58 = vld [vmem:[%s13138_s23 + $0x694] sm:$0xf] }
 0x2e0   : > { %6258 = vmatpush.bf16.msrb.mxu2 %v10244_v35  ;;  %v4434_v46 = vadd.f32 %v4433_v8, %v4421_v20  ;;  %v11554_v6 = vld [vmem:[%s13138_s23 + $0x64c] sm:$0xf]  ;;  %v10441_v8 = vld [vmem:[%s13138_s23 + $0x66c] sm:$0xf0]  ;;  %v11521_v20 = vld [vmem:[%s13138_s23 + $0x540] sm:$0xf0] }
 0x2e1   : > { %6280 = vmatpush.bf16.msra.mxu3 %v9816_v27  ;;  %6449 = vmatpush.bf16.msra.mxu1 %v10116_v49  ;;  %v9705_v27 = vld [vmem:[%s13138_s23 + $0xbc] sm:$0xf0]  ;;  %v10007_v49 = vld [vmem:[%s13138_s23 + $0x2e8] sm:$0xf] }
 0x2e2   : > { %v9708_v9 = vor.u32 %v11372_v54, %v9705_v27  ;;  %v10008_v35 = vor.u32 %v11450_v60, %v10007_v49  ;;  %v11432_v54 = vld [vmem:[%s13138_s23 + $0x278] sm:$0xf0]  ;;  %v10477_v49 = vld [vmem:[%s13138_s23 + $0x6b4] sm:$0xf0]  ;;  %v13615_v60 = vadd.f32 %v13512_v3, %v4434_v46  ;;  %v10143_v3 = vld [vmem:[%s13138_s23 + $0x400] sm:$0xf] }
 0x2e3   : > { %6298 = vmatpush.bf16.msrb.mxu0 %v9924_v24  ;;  %v10536_v24 = vor.u32 %v11579_v7, %v10533_v16  ;;  %v10480_v0 = vor.u32 %v11563_v58, %v10477_v49  ;;  %v9855_v7 = vld [vmem:[%s13138_s23 + $0x1c0] sm:$0xf]  ;;  %v11413_v16 = vld [vmem:[%s13138_s23 + $0x1e0] sm:$0xf0]  ;;  %v10405_v46 = vld [vmem:[%s13138_s23 + $0x624] sm:$0xf0] }
 0x2e4   : > { %6259 = vmatpush.bf16.msrb.mxu2 %v10208_v25  ;;  %v11539_v25 = vld [vmem:[%s13138_s23 + $0x5d0] sm:$0xf0]  ;;  %v9783_v58 = vld [vmem:[%s13138_s23 + $0x130] sm:$0xf] }
 0x2e5   : > { %6281 = vmatpush.bf16.msra.mxu3 %v9780_v42  ;;  %6450 = vmatpush.bf16.msra.mxu1 %v10080_v15  ;;  %v9971_v42 = vld [vmem:[%s13138_s23 + $0x2a0] sm:$0xf]  ;;  %v10396_v15 = vor.u32 %v11548_v31, %v10395_v22  ;;  %v10360_v27 = vor.u32 %v11539_v25, %v10359_v28  ;;  %v9892_v31 = vor.u32 %v11422_v47, %v9891_v45  ;;  %v9819_v25 = vld [vmem:[%s13138_s23 + $0x178] sm:$0xf]  ;;  %v11512_v47 = vld [vmem:[%s13138_s23 + $0x4f8] sm:$0xf0] }
 0x2e6   : > { %6299 = vmatmul.bf16.vlgmr.msrb.gmra.mxu0 %v12165_v38  ;;  %v9972_v29 = vor.u32 %v11441_v4, %v9971_v42  ;;  %v11485_v4 = vld [vmem:[%s13138_s23 + $0x420] sm:$0xf0]  ;;  %v10444_v28 = vor.u32 %v11554_v6, %v10441_v8  ;;  %v10251_v45 = vld [vmem:[%s13138_s23 + $0x4d8] sm:$0xf]  ;;  %v11395_v49 = vld [vmem:[%s13138_s23 + $0x150] sm:$0xf0] }
 0x2e7   : > { %6356 = vmatpush.bf16.msra.mxu0 %v10468_v53  ;;  %6260 = vmatmul.bf16.vlgmr.msrb.gmra.mxu2 %v12227_v2  ;;  %v4461_v53 = vpop.f32.mrf.mxu0  ;;  %v9747_v8 = vld [vmem:[%s13138_s23 + $0xe8] sm:$0xf] }
 0x2e8   : > { %6321 = vmatpush.bf16.msra.mxu2 %v10608_v40  ;;  %v9935_v40 = vld [vmem:[%s13138_s23 + $0x258] sm:$0xf]  ;;  %v11404_v53 = vld [vmem:[%s13138_s23 + $0x198] sm:$0xf0] }
 0x2e9   : > { %6282 = vmatpush.bf16.msra.mxu3 %v9744_v33  ;;  %6451 = vmatpush.bf16.msra.mxu1 %v10044_v52  ;;  %v10497_v33 = vld [vmem:[%s13138_s23 + $0x6ec] sm:$0xf0]  ;;  %v10179_v52 = vld [vmem:[%s13138_s23 + $0x448] sm:$0xf]  ;;  %v9936_v22 = vor.u32 %v11432_v54, %v9935_v40  ;;  %v11476_v40 = vld [vmem:[%s13138_s23 + $0x3d8] sm:$0xf0] }
 0x2ea   : > { %v11545_v54 = vld [vmem:[%s13138_s23 + $0x604] sm:$0xf] }
 0x2eb   : > { %6357 = vmatpush.bf16.msra.mxu0 %v10432_v13  ;;  %v9636_v13 = vor.u32 %v11354_v17, %v9633_v19  ;;  %v4422_v17 = vpop.f32.mrf.mxu2  ;;  %v10287_v19 = vld [vmem:[%s13138_s23 + $0x520] sm:$0xf] }
 0x2ec   : > { %6322 = vmatpush.bf16.msra.mxu2 %v10572_v30  ;;  %v10323_v30 = vld [vmem:[%s13138_s23 + $0x568] sm:$0xf] }
 0x2ed   : > { %6283 = vmatpush.bf16.msra.mxu3 %v9708_v9  ;;  %6452 = vmatpush.bf16.msra.mxu1 %v10008_v35  ;;  %v10500_v9 = vor.u32 %v11570_v26, %v10497_v33  ;;  %v10180_v35 = vor.u32 %v11494_v57, %v10179_v52  ;;  %v10324_v42 = vor.u32 %v11530_v63, %v10323_v30  ;;  %v11467_v30 = vld [vmem:[%s13138_s23 + $0x390] sm:$0xf0]  ;;  %v11536_v63 = vld [vmem:[%s13138_s23 + $0x5bc] sm:$0xf]  ;;  %v10035_v17 = vld [vmem:[%s13138_s23 + $0x328] sm:$0xf] }
 0x2ee   : > { %v10144_v26 = vor.u32 %v11485_v4, %v10143_v3  ;;  %v10288_v33 = vor.u32 %v11521_v20, %v10287_v19  ;;  %v9820_v52 = vor.u32 %v11404_v53, %v9819_v25  ;;  %v10408_v57 = vor.u32 %v11545_v54, %v10405_v46  ;;  %v11598_v3 = vld [vmem:[%s13138_s23 + $0x7ac] sm:$0xf]  ;;  %v11589_v53 = vld [vmem:[%s13138_s23 + $0x764] sm:$0xf]  ;;  %v9711_v46 = vld [vmem:[%s13138_s23 + $0xa0] sm:$0xf] }
 0x2ef   : > { %6358 = vmatpush.bf16.msra.mxu0 %v10396_v15  ;;  %v4435_v15 = vpop.f32.mrf.mxu3  ;;  %v11458_v20 = vld [vmem:[%s13138_s23 + $0x348] sm:$0xf0] }
 0x2f0   : > { %6323 = vmatpush.bf16.msra.mxu2 %v10536_v24  ;;  %v9856_v24 = vor.u32 %v11413_v16, %v9855_v7  ;;  %v9784_v16 = vor.u32 %v11395_v49, %v9783_v58  ;;  %v11386_v15 = vld [vmem:[%s13138_s23 + $0x108] sm:$0xf0] }
 0x2f1   : > { %6284 = vmatpush.bf16.msra.mxu3 %v9672_v23  ;;  %6453 = vmatpush.bf16.msra.mxu1 %v9972_v29  ;;  %v13627_v23 = vpop.f32.mrf.mxu1  ;;  %v10107_v29 = vld [vmem:[%s13138_s23 + $0x3b8] sm:$0xf]  ;;  %v9748_v25 = vor.u32 %v11386_v15, %v9747_v8  ;;  %v9639_v8 = vld [vmem:[%s13138_s23 + $0x10] sm:$0xf]  ;;  %v11359_v15 = vld [vmem:[%s13138_s23 + $0x30] sm:$0xf0] }
 0x2f3   : > { %6359 = vmatpush.bf16.msra.mxu0 %v10360_v27  ;;  %v10108_v27 = vor.u32 %v11476_v40, %v10107_v29  ;;  %v10577_v29 = vld [vmem:[%s13138_s23 + $0x784] sm:$0xf0]  ;;  %v10036_v40 = vor.u32 %v11458_v20, %v10035_v17  ;;  %v9927_v20 = vld [vmem:[%s13138_s23 + $0x250] sm:$0xf] }
 0x2f4   : > { %6324 = vmatpush.bf16.msra.mxu2 %v10500_v9  ;;  %v10252_v9 = vor.u32 %v11512_v47, %v10251_v45  ;;  %v11377_v45 = vld [vmem:[%s13138_s23 + $0xc0] sm:$0xf0]  ;;  %v9999_v47 = vld [vmem:[%s13138_s23 + $0x2e0] sm:$0xf]  ;;  %v10580_v49 = vor.u32 %v11589_v53, %v10577_v29  ;;  %v11431_v29 = vld [vmem:[%s13138_s23 + $0x270] sm:$0xf0] }
 0x2f5   : > { %6285 = vmatpush.bf16.msra.mxu3 %v9636_v13  ;;  %6454 = vmatpush.bf16.msra.mxu1 %v9936_v22  ;;  %v10071_v13 = vld [vmem:[%s13138_s23 + $0x370] sm:$0xf]  ;;  %v10369_v22 = vld [vmem:[%s13138_s23 + $0x5dc] sm:$0xf0] }
 0x2f6   : > { %v10072_v4 = vor.u32 %v11467_v30, %v10071_v13  ;;  %v10372_v6 = vor.u32 %v11536_v63, %v10369_v22  ;;  %v9712_v13 = vor.u32 %v11377_v45, %v9711_v46  ;;  %v10541_v30 = vld [vmem:[%s13138_s23 + $0x73c] sm:$0xf0]  ;;  %v11500_v46 = vld [vmem:[%s13138_s23 + $0x49c] sm:$0xf] }
 0x2f7   : > { %6360 = vmatpush.bf16.msra.mxu0 %v10324_v42  ;;  %10632 = vmatmul.msk.bf16.vlgmr.msra.gmra.mxu2 %vm2046_vm0, %v12142_v14  ;;  %v10613_v42 = vld [vmem:[%s13138_s23 + $0x7cc] sm:$0xf0]  ;;  %v10225_v45 = vld [vmem:[%s13138_s23 + $0x4bc] sm:$0xf0] }
 0x2f8   : > { %6330 = vmatpush.bf16.msrb.mxu2 %v9892_v31  ;;  %6286 = vmatmul.bf16.vlgmr.msra.gmra.mxu3 %v12167_v39  ;;  %v13647_v31 = vpop.f32.mrf.mxu3 }
 0x2f9   : > { %6343 = vmatpush.bf16.msrb.mxu3 %v10180_v35  ;;  %6512 = vmatpush.bf16.msrb.mxu1 %v10480_v0  ;;  %v10215_v35 = vld [vmem:[%s13138_s23 + $0x490] sm:$0xf]  ;;  %v11503_v0 = vld [vmem:[%s13138_s23 + $0x4b0] sm:$0xf0]  ;;  %v6185_v7 = vpop.f32.mrf.mxu1 }
 0x2fa   : > { %6455 = vmatmul.bf16.vlgmr.msra.gmra.mxu1 %v12165_v38  ;;  %v10216_v19 = vor.u32 %v11503_v0, %v10215_v35  ;;  %v9675_v35 = vld [vmem:[%s13138_s23 + $0x58] sm:$0xf]  ;;  %v11368_v0 = vld [vmem:[%s13138_s23 + $0x78] sm:$0xf0] }
 0x2fb   : > { %6361 = vmatpush.bf16.msra.mxu0 %v10288_v33  ;;  %v13661_v33 = vpop.f32.mrf.mxu0  ;;  %v9963_v7 = vld [vmem:[%s13138_s23 + $0x298] sm:$0xf] }
 0x2fc   : > { %6331 = vmatpush.bf16.msrb.mxu2 %v9856_v24  ;;  %v11527_v24 = vld [vmem:[%s13138_s23 + $0x574] sm:$0xf] }
 0x2fd   : > { %6344 = vmatpush.bf16.msrb.mxu3 %v10144_v26  ;;  %6513 = vmatpush.bf16.msrb.mxu1 %v10444_v28  ;;  %v10333_v26 = vld [vmem:[%s13138_s23 + $0x594] sm:$0xf0]  ;;  %v10616_v28 = vor.u32 %v11598_v3, %v10613_v42  ;;  %v11509_v3 = vld [vmem:[%s13138_s23 + $0x4e4] sm:$0xf]  ;;  %v10261_v42 = vld [vmem:[%s13138_s23 + $0x504] sm:$0xf0] }
 0x2fe   : > { %v10336_v54 = vor.u32 %v11527_v24, %v10333_v26  ;;  %v11571_v24 = vld [vmem:[%s13138_s23 + $0x6d4] sm:$0xf]  ;;  %v10505_v26 = vld [vmem:[%s13138_s23 + $0x6f4] sm:$0xf0]  ;;  %v10264_v53 = vor.u32 %v11509_v3, %v10261_v42 }
 0x2ff   : > { %6362 = vmatpush.bf16.msra.mxu0 %v10252_v9  ;;  %v11580_v9 = vld [vmem:[%s13138_s23 + $0x71c] sm:$0xf] }
 0x300   : > { %6332 = vmatpush.bf16.msrb.mxu2 %v9820_v52  ;;  %v11449_v52 = vld [vmem:[%s13138_s23 + $0x300] sm:$0xf0]  ;;  %v4500_v58 = vpop.f32.mrf.mxu3 }
 0x301   : > { %6345 = vmatpush.bf16.msrb.mxu3 %v10108_v27  ;;  %6514 = vmatpush.bf16.msrb.mxu1 %v10408_v57  ;;  %v11518_v27 = vld [vmem:[%s13138_s23 + $0x52c] sm:$0xf]  ;;  %v10297_v57 = vld [vmem:[%s13138_s23 + $0x54c] sm:$0xf0]  ;;  %v10000_v63 = vor.u32 %v11449_v52, %v9999_v47  ;;  %v10508_v52 = vor.u32 %v11571_v24, %v10505_v26 }
 0x302   : > { %v10300_v22 = vor.u32 %v11518_v27, %v10297_v57  ;;  %v11490_v47 = vld [vmem:[%s13138_s23 + $0x44c] sm:$0xf]  ;;  %v10181_v27 = vld [vmem:[%s13138_s23 + $0x46c] sm:$0xf0] }
 0x303   : > { %6363 = vmatpush.bf16.msra.mxu0 %v10216_v19  ;;  %v9676_v19 = vor.u32 %v11368_v0, %v9675_v35  ;;  %v11562_v57 = vld [vmem:[%s13138_s23 + $0x68c] sm:$0xf]  ;;  %v10469_v58 = vld [vmem:[%s13138_s23 + $0x6ac] sm:$0xf0]  ;;  %v11481_v0 = vld [vmem:[%s13138_s23 + $0x404] sm:$0xf] }
 0x304   : > { %6333 = vmatpush.bf16.msrb.mxu2 %v9784_v16  ;;  %v11440_v16 = vld [vmem:[%s13138_s23 + $0x2b8] sm:$0xf0]  ;;  %v10472_v35 = vor.u32 %v11562_v57, %v10469_v58 }
 0x305   : > { %6346 = vmatpush.bf16.msrb.mxu3 %v10072_v4  ;;  %6515 = vmatpush.bf16.msrb.mxu1 %v10372_v6  ;;  %v4485_v4 = vpop.f32.mrf.mxu2  ;;  %v10544_v6 = vor.u32 %v11580_v9, %v10541_v30  ;;  %v10627_v9 = vld [vmem:[%s13138_s23 + $0x7b8] sm:$0xf]  ;;  %v9928_v30 = vor.u32 %v11431_v29, %v9927_v20 }
 0x306   : > { %6364 = vmatmul.bf16.vlgmr.msra.gmra.mxu0 %v12227_v2  ;;  %v4486_v17 = vadd.f32 %v4485_v4, %v13582_v50  ;;  %v11423_v50 = vld [vmem:[%s13138_s23 + $0x230] sm:$0xf0]  ;;  %v10145_v4 = vld [vmem:[%s13138_s23 + $0x424] sm:$0xf0] }
 0x307   : > { %6425 = vmatpush.bf16.msrb.mxu0 %v10616_v28  ;;  %v4526_v28 = vpop.f32.mrf.mxu0  ;;  %v10148_v24 = vor.u32 %v11481_v0, %v10145_v4  ;;  %v10361_v0 = vld [vmem:[%s13138_s23 + $0x5d4] sm:$0xf0]  ;;  %v10736_v4 = vld [vmem:[%s13736_s18 + $0x90] sm:$0xf] }
 0x308   : > { %6334 = vmatpush.bf16.msrb.mxu2 %v9748_v25  ;;  %v9964_v25 = vor.u32 %v11440_v16, %v9963_v7  ;;  %v9863_v7 = vld [vmem:[%s13138_s23 + $0x1c8] sm:$0xf]  ;;  %v11414_v16 = vld [vmem:[%s13138_s23 + $0x1e8] sm:$0xf0]  ;;  %v11472_v28 = vld [vmem:[%s13138_s23 + $0x3bc] sm:$0xf] }
 0x309   : > { %6347 = vmatpush.bf16.msrb.mxu3 %v10036_v40  ;;  %6516 = vmatpush.bf16.msrb.mxu1 %v10336_v54  ;;  %v9899_v40 = vld [vmem:[%s13138_s23 + $0x210] sm:$0xf]  ;;  %v13688_v54 = vadd.f32 %v13647_v31, %v4486_v17  ;;  %v11604_v31 = vld [vmem:[%s13138_s23 + $0x7d8] sm:$0xf0]  ;;  %v9864_v20 = vor.u32 %v11414_v16, %v9863_v7  ;;  %v10519_v16 = vld [vmem:[%s13138_s23 + $0x6e0] sm:$0xf] }
 0x30a   : > { %v10628_v42 = vor.u32 %v11604_v31, %v10627_v9  ;;  %v10591_v17 = vld [vmem:[%s13138_s23 + $0x770] sm:$0xf]  ;;  %v9791_v9 = vld [vmem:[%s13138_s23 + $0x138] sm:$0xf]  ;;  %v11396_v31 = vld [vmem:[%s13138_s23 + $0x158] sm:$0xf0] }
 0x30b   : > { %6426 = vmatpush.bf16.msrb.mxu0 %v10580_v49  ;;  %v9640_v49 = vor.u32 %v11359_v15, %v9639_v8  ;;  %v10433_v8 = vld [vmem:[%s13138_s23 + $0x664] sm:$0xf0]  ;;  %v13704_v15 = vpop.f32.mrf.mxu1 }
 0x30c   : > { %6335 = vmatpush.bf16.msrb.mxu2 %v9712_v13  ;;  %v9900_v13 = vor.u32 %v11423_v50, %v9899_v40  ;;  %v10109_v40 = vld [vmem:[%s13138_s23 + $0x3dc] sm:$0xf0]  ;;  %v11544_v50 = vld [vmem:[%s13138_s23 + $0x5fc] sm:$0xf] }
 0x30d   : > { %6348 = vmatpush.bf16.msrb.mxu3 %v10000_v63  ;;  %6517 = vmatpush.bf16.msrb.mxu1 %v10300_v22  ;;  %v10228_v63 = vor.u32 %v11500_v46, %v10225_v45  ;;  %v10184_v22 = vor.u32 %v11490_v47, %v10181_v27  ;;  %v4487_v3 = vpop.f32.mrf.mxu2  ;;  %v10397_v46 = vld [vmem:[%s13138_s23 + $0x61c] sm:$0xf0]  ;;  %v4511_v45 = vpop.f32.mrf.mxu3  ;;  %v10555_v47 = vld [vmem:[%s13138_s23 + $0x728] sm:$0xf]  ;;  %v10112_v58 = vor.u32 %v11472_v28, %v10109_v40  ;;  %v10037_v28 = vld [vmem:[%s13138_s23 + $0x34c] sm:$0xf0] }
 0x30e   : > { %v4525_v27 = vadd.f32 %v13661_v33, %v4511_v45  ;;  %v11577_v3 = vld [vmem:[%s13138_s23 + $0x700] sm:$0xf0]  ;;  %v9719_v45 = vld [vmem:[%s13138_s23 + $0xa8] sm:$0xf] }
 0x30f   : > { %6427 = vmatpush.bf16.msrb.mxu0 %v10544_v6  ;;  %v11553_v6 = vld [vmem:[%s13138_s23 + $0x644] sm:$0xf] }
 0x310   : > { %6336 = vmatpush.bf16.msrb.mxu2 %v9676_v19  ;;  %v11595_v19 = vld [vmem:[%s13138_s23 + $0x790] sm:$0xf0]  ;;  %v10436_v26 = vor.u32 %v11553_v6, %v10433_v8 }
 0x311   : > { %6349 = vmatpush.bf16.msrb.mxu3 %v9964_v25  ;;  %6518 = vmatpush.bf16.msrb.mxu1 %v10264_v53  ;;  %v9827_v25 = vld [vmem:[%s13138_s23 + $0x180] sm:$0xf]  ;;  %v11405_v53 = vld [vmem:[%s13138_s23 + $0x1a0] sm:$0xf0]  ;;  %v10592_v29 = vor.u32 %v11595_v19, %v10591_v17  ;;  %v11633_v6 = vld [vmem:[%s13736_s18 + $0xb0] sm:$0xf0] }
 0x312   : > { %v9828_v57 = vor.u32 %v11405_v53, %v9827_v25  ;;  %v11454_v19 = vld [vmem:[%s13138_s23 + $0x32c] sm:$0xf]  ;;  %v10325_v53 = vld [vmem:[%s13138_s23 + $0x58c] sm:$0xf0] }
 0x313   : > { %6428 = vmatpush.bf16.msrb.mxu0 %v10508_v52  ;;  %v11586_v52 = vld [vmem:[%s13138_s23 + $0x748] sm:$0xf0]  ;;  %v6250_v33 = vpop.f32.mrf.mxu1 }
 0x314   : > { %6337 = vmatpush.bf16.msrb.mxu2 %v9640_v49  ;;  %v10400_v49 = vor.u32 %v11544_v50, %v10397_v46  ;;  %v11526_v25 = vld [vmem:[%s13138_s23 + $0x56c] sm:$0xf]  ;;  %v11445_v46 = vld [vmem:[%s13138_s23 + $0x2e4] sm:$0xf] }
 0x315   : > { %6350 = vmatpush.bf16.msrb.mxu3 %v9928_v30  ;;  %6519 = vmatpush.bf16.msrb.mxu1 %v10228_v63  ;;  %v4538_v30 = vadd.f32 %v13505_v32, %v4525_v27  ;;  %v10556_v63 = vor.u32 %v11586_v52, %v10555_v47  ;;  %v4550_v7 = vpop.f32.mrf.mxu2  ;;  %v9792_v32 = vor.u32 %v11396_v31, %v9791_v9  ;;  %v4513_v40 = vpop.f32.mrf.mxu3  ;;  %v11378_v27 = vld [vmem:[%s13138_s23 + $0xc8] sm:$0xf0]  ;;  %v11517_v9 = vld [vmem:[%s13138_s23 + $0x524] sm:$0xf]  ;;  %v10289_v31 = vld [vmem:[%s13138_s23 + $0x544] sm:$0xf0] }
 0x316   : > { %10634 = vmatmul.msk.bf16.vlgmr.msrb.gmra.mxu0 %vm2046_vm0, %v12142_v14  ;;  %v10040_v47 = vor.u32 %v11454_v19, %v10037_v28  ;;  %v10328_v52 = vor.u32 %v11526_v25, %v10325_v53  ;;  %v11635_v19 = vld [vmem:[%s13736_s18 + $0xc0] sm:$0xf0]  ;;  %v9929_v53 = vld [vmem:[%s13138_s23 + $0x274] sm:$0xf0] }
 0x317   : > { %6434 = vmatpush.bf16.msra.mxu0 %v9900_v13  ;;  %6338 = vmatmul.bf16.vlgmr.msrb.gmra.mxu2 %v12167_v39  ;;  %v11463_v13 = vld [vmem:[%s13138_s23 + $0x374] sm:$0xf]  ;;  %v11360_v40 = vld [vmem:[%s13138_s23 + $0x38] sm:$0xf0] }
 0x318   : > { %6395 = vmatpush.bf16.msra.mxu2 %v10184_v22  ;;  %6351 = vmatmul.bf16.vlgmr.msrb.gmra.mxu3 %v12165_v38  ;;  %v10073_v22 = vld [vmem:[%s13138_s23 + $0x394] sm:$0xf0] }
 0x319   : > { %6408 = vmatpush.bf16.msra.mxu3 %v10472_v35  ;;  %6581 = vmatpush.bf16.msra.mxu1 %v10628_v42  ;;  %v11535_v35 = vld [vmem:[%s13138_s23 + $0x5b4] sm:$0xf]  ;;  %v13732_v42 = vadd.f32 %v4550_v7, %v4538_v30  ;;  %v10076_v8 = vor.u32 %v11463_v13, %v10073_v22  ;;  %v10001_v13 = vld [vmem:[%s13138_s23 + $0x304] sm:$0xf0]  ;;  %v11436_v22 = vld [vmem:[%s13138_s23 + $0x29c] sm:$0xf]  ;;  %v10292_v7 = vor.u32 %v11517_v9, %v10289_v31 }
 0x31a   : > { %6520 = vmatmul.bf16.vlgmr.msrb.gmra.mxu1 %v12227_v2  ;;  %v10364_v17 = vor.u32 %v11535_v35, %v10361_v0  ;;  %v9683_v35 = vld [vmem:[%s13138_s23 + $0x60] sm:$0xf]  ;;  %v10004_v33 = vor.u32 %v11445_v46, %v10001_v13  ;;  %v11499_v46 = vld [vmem:[%s13138_s23 + $0x494] sm:$0xf]  ;;  %v10189_v31 = vld [vmem:[%s13138_s23 + $0x474] sm:$0xf0] }
 0x31b   : > { %6435 = vmatpush.bf16.msra.mxu0 %v9864_v20  ;;  %v9755_v20 = vld [vmem:[%s13138_s23 + $0xf0] sm:$0xf]  ;;  %v11491_v9 = vld [vmem:[%s13138_s23 + $0x454] sm:$0xf] }
 0x31c   : > { %6396 = vmatpush.bf16.msra.mxu2 %v10148_v24  ;;  %v11387_v24 = vld [vmem:[%s13138_s23 + $0x110] sm:$0xf0] }
 0x31d   : > { %6409 = vmatpush.bf16.msra.mxu3 %v10436_v26  ;;  %6582 = vmatpush.bf16.msra.mxu1 %v10592_v29  ;;  %v10520_v26 = vor.u32 %v11577_v3, %v10519_v16  ;;  %v10737_v29 = vor.u32 %v11633_v6, %v10736_v4  ;;  %v9756_v50 = vor.u32 %v11387_v24, %v9755_v20  ;;  %v4552_v30 = vpop.f32.mrf.mxu2  ;;  %v11369_v16 = vld [vmem:[%s13138_s23 + $0x80] sm:$0xf0]  ;;  %v10664_v3 = vld [vmem:[%s13736_s18] sm:$0xf]  ;;  %v11508_v6 = vld [vmem:[%s13138_s23 + $0x4dc] sm:$0xf] }
 0x31e   : > { %v9965_v4 = vld [vmem:[%s13138_s23 + $0x2bc] sm:$0xf0]  ;;  %v9684_v20 = vor.u32 %v11369_v16, %v9683_v35  ;;  %v11427_v24 = vld [vmem:[%s13138_s23 + $0x254] sm:$0xf]  ;;  %v10583_v16 = vld [vmem:[%s13138_s23 + $0x768] sm:$0xf] }
 0x31f   : > { %6436 = vmatpush.bf16.msra.mxu0 %v9828_v57  ;;  %v13749_v57 = vpop.f32.mrf.mxu0  ;;  %v9968_v28 = vor.u32 %v11436_v22, %v9965_v4  ;;  %v9932_v30 = vor.u32 %v11427_v24, %v9929_v53  ;;  %v11482_v4 = vld [vmem:[%s13138_s23 + $0x40c] sm:$0xf]  ;;  %v11585_v53 = vld [vmem:[%s13138_s23 + $0x740] sm:$0xf0] }
 0x320   : > { %6397 = vmatpush.bf16.msra.mxu2 %v10112_v58  ;;  %v10700_v58 = vld [vmem:[%s13736_s18 + $0x48] sm:$0xf] }
 0x321   : > { %6410 = vmatpush.bf16.msra.mxu3 %v10400_v49  ;;  %6583 = vmatpush.bf16.msra.mxu1 %v10556_v63  ;;  %v11624_v49 = vld [vmem:[%s13736_s18 + $0x68] sm:$0xf0]  ;;  %v9720_v63 = vor.u32 %v11378_v27, %v9719_v45  ;;  %v10217_v45 = vld [vmem:[%s13138_s23 + $0x4b4] sm:$0xf0]  ;;  %v11567_v27 = vld [vmem:[%s13138_s23 + $0x6b0] sm:$0xf0] }
 0x322   : > { %v10701_v0 = vor.u32 %v11624_v49, %v10700_v58  ;;  %v10619_v58 = vld [vmem:[%s13138_s23 + $0x7b0] sm:$0xf]  ;;  %v11603_v49 = vld [vmem:[%s13138_s23 + $0x7d0] sm:$0xf0] }
 0x323   : > { %6437 = vmatpush.bf16.msra.mxu0 %v9792_v32  ;;  %v11615_v32 = vld [vmem:[%s13736_s18 + $0x20] sm:$0xf0]  ;;  %v10620_v35 = vor.u32 %v11603_v49, %v10619_v58 }
 0x324   : > { %6398 = vmatpush.bf16.msra.mxu2 %v10076_v8  ;;  %v10253_v8 = vld [vmem:[%s13138_s23 + $0x4fc] sm:$0xf0]  ;;  %v11540_v58 = vld [vmem:[%s13138_s23 + $0x5d8] sm:$0xf0] }
 0x325   : > { %6411 = vmatpush.bf16.msra.mxu3 %v10364_v17  ;;  %6584 = vmatpush.bf16.msra.mxu1 %v10520_v26  ;;  %v10752_v17 = vld [vmem:[%s13736_s18 + $0xa0] sm:$0xf]  ;;  %v10665_v26 = vor.u32 %v11615_v32, %v10664_v3  ;;  %v10256_v25 = vor.u32 %v11508_v6, %v10253_v8  ;;  %v11594_v3 = vld [vmem:[%s13138_s23 + $0x788] sm:$0xf0]  ;;  %v10153_v6 = vld [vmem:[%s13138_s23 + $0x42c] sm:$0xf0] }
 0x327   : > { %6438 = vmatpush.bf16.msra.mxu0 %v9756_v50  ;;  %v6159_v50 = vpop.f32.mrf.mxu0  ;;  %v13784_v32 = vpop.f32.mrf.mxu1 }
 0x328   : > { %6399 = vmatpush.bf16.msra.mxu2 %v10040_v47  ;;  %v10475_v47 = vld [vmem:[%s13138_s23 + $0x690] sm:$0xf]  ;;  %v10117_v50 = vld [vmem:[%s13138_s23 + $0x3e4] sm:$0xf0] }
 0x329   : > { %6824 = vmatpush.bf16.msrb.mxu1 %v10737_v29  ;;  %6412 = vmatpush.bf16.msra.mxu3 %v10328_v52  ;;  %v9647_v29 = vld [vmem:[%s13138_s23 + $0x18] sm:$0xf]  ;;  %v10753_v52 = vor.u32 %v11635_v19, %v10752_v17  ;;  %v10476_v22 = vor.u32 %v11567_v27, %v10475_v47  ;;  %v10584_v17 = vor.u32 %v11594_v3, %v10583_v16  ;;  %v13791_v19 = vld [vmem:[%s14345_s1] sm:$0xff] }
 0x32a   : > { %10637 = vmatmul.msk.bf16.vlgmr.msra.gmra.mxu1 %vm2046_vm0, %v12142_v14  ;;  %v9648_v13 = vor.u32 %v11360_v40, %v9647_v29  ;;  %v6131_v29 = vpop.f32.mrf.mxu2  ;;  %v11473_v40 = vld [vmem:[%s13138_s23 + $0x3c4] sm:$0xf]  ;;  %v10367_v27 = vld [vmem:[%s13138_s23 + $0x5b8] sm:$0xf] }
 0x32b   : > { %6439 = vmatpush.bf16.msra.mxu0 %v9720_v63  ;;  %v10220_v63 = vor.u32 %v11499_v46, %v10217_v45  ;;  %v6144_v46 = vpop.f32.mrf.mxu3  ;;  %v10120_v49 = vor.u32 %v11473_v40, %v10117_v50  ;;  %v10368_v16 = vor.u32 %v11540_v58, %v10367_v27  ;;  %v11446_v27 = vld [vmem:[%s13138_s23 + $0x2ec] sm:$0xf]  ;;  %v10009_v58 = vld [vmem:[%s13138_s23 + $0x30c] sm:$0xf0] }
 0x32c   : > { %6400 = vmatpush.bf16.msra.mxu2 %v10004_v33  ;;  %v10192_v33 = vor.u32 %v11491_v9, %v10189_v31  ;;  %v6145_v45 = vadd.f32 %v6144_v46, %v6131_v29  ;;  %v11576_v9 = vld [vmem:[%s13138_s23 + $0x6f8] sm:$0xf0] }
 0x32d   : > { %6825 = vmatpush.bf16.msrb.mxu1 %v10701_v0  ;;  %6413 = vmatpush.bf16.msra.mxu3 %v10292_v7  ;;  %v10439_v0 = vld [vmem:[%s13138_s23 + $0x648] sm:$0xf]  ;;  %v11558_v7 = vld [vmem:[%s13138_s23 + $0x668] sm:$0xf0]  ;;  %v11464_v31 = vld [vmem:[%s13138_s23 + $0x37c] sm:$0xf] }
 0x32e   : > { %v10440_v8 = vor.u32 %v11558_v7, %v10439_v0  ;;  %v9901_v0 = vld [vmem:[%s13138_s23 + $0x234] sm:$0xf0]  ;;  %v11626_v7 = vld [vmem:[%s13736_s18 + $0x78] sm:$0xf0] }
 0x32f   : > { %6440 = vmatpush.bf16.msra.mxu0 %v9684_v20  ;;  %v10403_v20 = vld [vmem:[%s13138_s23 + $0x600] sm:$0xf]  ;;  %v13794_v24 = vpop.f32.mrf.mxu0 }
 0x330   : > { %6401 = vmatpush.bf16.msra.mxu2 %v9968_v28  ;;  %v11549_v28 = vld [vmem:[%s13138_s23 + $0x620] sm:$0xf0] }
 0x331   : > { %6826 = vmatpush.bf16.msrb.mxu1 %v10665_v26  ;;  %6414 = vmatpush.bf16.msra.mxu3 %v10256_v25  ;;  %v10156_v26 = vor.u32 %v11482_v4, %v10153_v6  ;;  %v10547_v25 = vld [vmem:[%s13138_s23 + $0x720] sm:$0xf]  ;;  %v10404_v47 = vor.u32 %v11549_v28, %v10403_v20  ;;  %v11531_v20 = vld [vmem:[%s13138_s23 + $0x590] sm:$0xf0]  ;;  %v10045_v28 = vld [vmem:[%s13138_s23 + $0x354] sm:$0xf0] }
 0x332   : > { %v6133_v29 = vpop.f32.mrf.mxu2 }
 0x333   : > { %6441 = vmatpush.bf16.msra.mxu0 %v9648_v13  ;;  %v10511_v13 = vld [vmem:[%s13138_s23 + $0x6d8] sm:$0xf]  ;;  %v6146_v40 = vpop.f32.mrf.mxu3  ;;  %v11599_v29 = vld [vmem:[%s13138_s23 + $0x7b4] sm:$0xf] }
 0x334   : > { %6402 = vmatpush.bf16.msra.mxu2 %v9932_v30  ;;  %v13812_v30 = vadd.f32 %v13749_v57, %v6145_v45  ;;  %v10512_v3 = vor.u32 %v11576_v9, %v10511_v13  ;;  %v9829_v13 = vld [vmem:[%s13138_s23 + $0x1a4] sm:$0xf0] }
 0x335   : > { %6980 = vmatpush.bf16.msra.mxu1 %v10753_v52  ;;  %6415 = vmatpush.bf16.msra.mxu3 %v10220_v63  ;;  %v10548_v52 = vor.u32 %v11585_v53, %v10547_v25  ;;  %v6315_v63 = vpop.f32.mrf.mxu1  ;;  %v11410_v25 = vld [vmem:[%s13138_s23 + $0x1cc] sm:$0xf]  ;;  %v9865_v53 = vld [vmem:[%s13138_s23 + $0x1ec] sm:$0xf0] }
 0x336   : > { %6442 = vmatmul.bf16.vlgmr.msra.gmra.mxu0 %v12167_v39  ;;  %v9868_v45 = vor.u32 %v11410_v25, %v9865_v53  ;;  %v13836_v63 = vld [vmem:[%s14345_s1 + $0x8] sm:$0xff]  ;;  %v11383_v25 = vld [vmem:[%s13138_s23 + $0xf4] sm:$0xf]  ;;  %v9757_v53 = vld [vmem:[%s13138_s23 + $0x114] sm:$0xf0] }
 0x337   : > { %6499 = vmatpush.bf16.msrb.mxu0 %v10192_v33  ;;  %6403 = vmatmul.bf16.vlgmr.msra.gmra.mxu2 %v12165_v38  ;;  %v10716_v33 = vld [vmem:[%s13736_s18 + $0x58] sm:$0xf]  ;;  %v6224_v4 = vpop.f32.mrf.mxu0 }
 0x338   : > { %6460 = vmatpush.bf16.msrb.mxu2 %v10476_v22  ;;  %6416 = vmatmul.bf16.vlgmr.msra.gmra.mxu3 %v12227_v2  ;;  %v10081_v22 = vld [vmem:[%s13138_s23 + $0x39c] sm:$0xf0]  ;;  %v10717_v6 = vor.u32 %v11626_v7, %v10716_v33  ;;  %v11513_v33 = vld [vmem:[%s13138_s23 + $0x500] sm:$0xf0] }
 0x339   : > { %6477 = vmatpush.bf16.msrb.mxu3 %v10620_v35  ;;  %v11419_v35 = vld [vmem:[%s13138_s23 + $0x214] sm:$0xf]  ;;  %v10084_v57 = vor.u32 %v11464_v31, %v10081_v22  ;;  %v10012_v22 = vor.u32 %v11446_v27, %v10009_v58  ;;  %v11437_v7 = vld [vmem:[%s13138_s23 + $0x2a4] sm:$0xf]  ;;  %v9793_v4 = vld [vmem:[%s13138_s23 + $0x15c] sm:$0xf0]  ;;  %v9760_v58 = vor.u32 %v11383_v25, %v9757_v53 }
 0x33a   : > { %10770 = vmatmul.msk.bf16.vlgmr.msrb.gmra.mxu1 %vm6800_vm1, %v13791_v19 }
 0x33b   : > { %6500 = vmatpush.bf16.msrb.mxu0 %v10156_v26  ;;  %v11455_v26 = vld [vmem:[%s13138_s23 + $0x334] sm:$0xf]  ;;  %6981 = vmatpush.bf16.msra.mxu1 %v10717_v6 }
 0x33c   : > { %6461 = vmatpush.bf16.msrb.mxu2 %v10440_v8  ;;  %v9904_v8 = vor.u32 %v11419_v35, %v9901_v0  ;;  %v10048_v46 = vor.u32 %v11455_v26, %v10045_v28  ;;  %v10259_v0 = vld [vmem:[%s13138_s23 + $0x4e0] sm:$0xf]  ;;  %v11428_v26 = vld [vmem:[%s13138_s23 + $0x25c] sm:$0xf] }
 0x33d   : > { %6478 = vmatpush.bf16.msrb.mxu3 %v10584_v17  ;;  %v10331_v17 = vld [vmem:[%s13138_s23 + $0x570] sm:$0xf]  ;;  %v13831_v9 = vpop.f32.mrf.mxu1  ;;  %v10260_v6 = vor.u32 %v11513_v33, %v10259_v0  ;;  %v9937_v28 = vld [vmem:[%s13138_s23 + $0x27c] sm:$0xf0]  ;;  %v11590_v0 = vld [vmem:[%s13138_s23 + $0x76c] sm:$0xf] }
 0x33e   : > { %v10332_v50 = vor.u32 %v11531_v20, %v10331_v17  ;;  %v11504_v20 = vld [vmem:[%s13138_s23 + $0x4b8] sm:$0xf0]  ;;  %v9940_v27 = vor.u32 %v11428_v26, %v9937_v28  ;;  %v10585_v33 = vld [vmem:[%s13138_s23 + $0x78c] sm:$0xf0]  ;;  %v11550_v26 = vld [vmem:[%s13138_s23 + $0x628] sm:$0xf0] }
 0x33f   : > { %6501 = vmatpush.bf16.msrb.mxu0 %v10120_v49  ;;  %v11401_v49 = vld [vmem:[%s13138_s23 + $0x184] sm:$0xf] }
 0x340   : > { %6462 = vmatpush.bf16.msrb.mxu2 %v10404_v47  ;;  %v10295_v47 = vld [vmem:[%s13138_s23 + $0x528] sm:$0xf]  ;;  %v9832_v35 = vor.u32 %v11401_v49, %v9829_v13 }
 0x341   : > { %6479 = vmatpush.bf16.msrb.mxu3 %v10548_v52  ;;  %v11522_v52 = vld [vmem:[%s13138_s23 + $0x548] sm:$0xf0] }
 0x342   : > { %v10296_v31 = vor.u32 %v11522_v52, %v10295_v47 }
 0x343   : > { %6502 = vmatpush.bf16.msrb.mxu0 %v10084_v57  ;;  %v10223_v57 = vld [vmem:[%s13138_s23 + $0x498] sm:$0xf]  ;;  %v6235_v52 = vpop.f32.mrf.mxu0 }
 0x344   : > { %6463 = vmatpush.bf16.msrb.mxu2 %v10368_v16  ;;  %v9973_v16 = vld [vmem:[%s13138_s23 + $0x2c4] sm:$0xf0]  ;;  %v10224_v47 = vor.u32 %v11504_v20, %v10223_v57  ;;  %v13859_v49 = vadd.f32 %v13704_v15, %v6235_v52  ;;  %v10588_v15 = vor.u32 %v11590_v0, %v10585_v33  ;;  %v9649_v52 = vld [vmem:[%s13138_s23 + $0x3c] sm:$0xf0]  ;;  %v10195_v0 = vld [vmem:[%s13138_s23 + $0x458] sm:$0xf] }
 0x345   : > { %6480 = vmatpush.bf16.msrb.mxu3 %v10512_v3  ;;  %v11392_v3 = vld [vmem:[%s13138_s23 + $0x13c] sm:$0xf]  ;;  %v6380_v40 = vpop.f32.mrf.mxu1  ;;  %v9685_v57 = vld [vmem:[%s13138_s23 + $0x84] sm:$0xf0] }
 0x346   : > { %v9796_v17 = vor.u32 %v11392_v3, %v9793_v4  ;;  %v10411_v20 = vld [vmem:[%s13138_s23 + $0x608] sm:$0xf]  ;;  %v13879_v40 = vld [vmem:[%s14345_s1 + $0x10] sm:$0xff]  ;;  %v11496_v33 = vld [vmem:[%s13138_s23 + $0x478] sm:$0xf0] }
 0x347   : > { %6503 = vmatpush.bf16.msrb.mxu0 %v10048_v46  ;;  %v10483_v46 = vld [vmem:[%s13138_s23 + $0x698] sm:$0xf] }
 0x348   : > { %6464 = vmatpush.bf16.msrb.mxu2 %v10332_v50  ;;  %10635 = vmatmul.msk.bf16.vlgmr.msrb.gmra.mxu3 %vm2046_vm0, %v12142_v14  ;;  %v10621_v50 = vld [vmem:[%s13138_s23 + $0x7d4] sm:$0xf0] }
 0x349   : > { %6486 = vmatpush.bf16.msra.mxu3 %v9904_v8  ;;  %v9976_v8 = vor.u32 %v11437_v7, %v9973_v16  ;;  %v10624_v13 = vor.u32 %v11599_v29, %v10621_v50  ;;  %v10447_v7 = vld [vmem:[%s13138_s23 + $0x650] sm:$0xf]  ;;  %v11559_v16 = vld [vmem:[%s13138_s23 + $0x670] sm:$0xf0]  ;;  %v11356_v50 = vld [vmem:[%s13138_s23 + $0x1c] sm:$0xf] }
 0x34a   : > { %10771 = vmatmul.msk.bf16.gmra.mxu1 %vm6800_vm1, %v13836_v63  ;;  %v10448_v4 = vor.u32 %v11559_v16, %v10447_v7  ;;  %v6196_v28 = vpop.f32.mrf.mxu2  ;;  %v9652_v16 = vor.u32 %v11356_v50, %v9649_v52 }
 0x34b   : > { %6504 = vmatpush.bf16.msrb.mxu0 %v10012_v22  ;;  %v11374_v22 = vld [vmem:[%s13138_s23 + $0xac] sm:$0xf]  ;;  %v6209_v25 = vpop.f32.mrf.mxu3  ;;  %v6197_v53 = vadd.f32 %v6196_v28, %v13627_v23  ;;  %v10513_v23 = vld [vmem:[%s13138_s23 + $0x6fc] sm:$0xf0]  ;;  %v10159_v28 = vld [vmem:[%s13138_s23 + $0x410] sm:$0xf] }
 0x34c   : > { %6465 = vmatpush.bf16.msrb.mxu2 %v10296_v31 }
 0x34d   : > { %6487 = vmatpush.bf16.msra.mxu3 %v9868_v45  ;;  %v11568_v45 = vld [vmem:[%s13138_s23 + $0x6b8] sm:$0xf0] }
 0x34e   : > { %v10484_v31 = vor.u32 %v11568_v45, %v10483_v46  ;;  %v6237_v46 = vpop.f32.mrf.mxu0 }
 0x34f   : > { %6505 = vmatpush.bf16.msrb.mxu0 %v9976_v8  ;;  %v11581_v8 = vld [vmem:[%s13138_s23 + $0x724] sm:$0xf] }
 0x350   : > { %6466 = vmatpush.bf16.msrb.mxu2 %v10260_v6  ;;  %v11365_v6 = vld [vmem:[%s13138_s23 + $0x64] sm:$0xf] }
 0x351   : > { %6488 = vmatpush.bf16.msra.mxu3 %v9832_v35  ;;  %v9721_v35 = vld [vmem:[%s13138_s23 + $0xcc] sm:$0xf0]  ;;  %v9688_v29 = vor.u32 %v11365_v6, %v9685_v57  ;;  %v11532_v6 = vld [vmem:[%s13138_s23 + $0x598] sm:$0xf0] }
 0x352   : > { %v9724_v3 = vor.u32 %v11374_v22, %v9721_v35  ;;  %v9907_v22 = vld [vmem:[%s13138_s23 + $0x218] sm:$0xf]  ;;  %v11424_v35 = vld [vmem:[%s13138_s23 + $0x238] sm:$0xf0] }
 0x353   : > { %6506 = vmatpush.bf16.msrb.mxu0 %v9940_v27  ;;  %v11572_v27 = vld [vmem:[%s13138_s23 + $0x6dc] sm:$0xf]  ;;  %v9908_v57 = vor.u32 %v11424_v35, %v9907_v22  ;;  %v11478_v22 = vld [vmem:[%s13138_s23 + $0x3e8] sm:$0xf0] }
 0x354   : > { %6467 = vmatpush.bf16.msrb.mxu2 %v10224_v47  ;;  %v10412_v47 = vor.u32 %v11550_v26, %v10411_v20  ;;  %v10680_v20 = vld [vmem:[%s13736_s18 + $0x10] sm:$0xf]  ;;  %v11617_v26 = vld [vmem:[%s13736_s18 + $0x30] sm:$0xf0] }
 0x355   : > { %6489 = vmatpush.bf16.msra.mxu3 %v9796_v17  ;;  %v10549_v17 = vld [vmem:[%s13138_s23 + $0x744] sm:$0xf0]  ;;  %v10681_v50 = vor.u32 %v11617_v26, %v10680_v20  ;;  %v13904_v46 = vpop.f32.mrf.mxu1  ;;  %v13924_v26 = vld [vmem:[%s14345_s1 + $0x18] sm:$0xff] }
 0x356   : > { %6507 = vmatmul.bf16.vlgmr.msrb.gmra.mxu0 %v12165_v38  ;;  %v10552_v45 = vor.u32 %v11581_v8, %v10549_v17  ;;  %v10196_v8 = vor.u32 %v11496_v33, %v10195_v0  ;;  %v9871_v17 = vld [vmem:[%s13138_s23 + $0x1d0] sm:$0xf] }
 0x357   : > { %6564 = vmatpush.bf16.msra.mxu0 %v10484_v31  ;;  %6468 = vmatmul.bf16.vlgmr.msrb.gmra.mxu2 %v12227_v2  ;;  %v11541_v31 = vld [vmem:[%s13138_s23 + $0x5e0] sm:$0xf0] }
 0x358   : > { %6529 = vmatpush.bf16.msra.mxu2 %v10624_v13  ;;  %v10375_v13 = vld [vmem:[%s13138_s23 + $0x5c0] sm:$0xf]  ;;  %6982 = vmatpush.bf16.msra.mxu1 %v10681_v50  ;;  %v11630_v50 = vld [vmem:[%s13736_s18 + $0x9c] sm:$0xf] }
 0x359   : > { %6490 = vmatpush.bf16.msra.mxu3 %v9760_v58  ;;  %v6210_v58 = vadd.f32 %v6209_v25, %v6197_v53  ;;  %v11487_v25 = vld [vmem:[%s13138_s23 + $0x430] sm:$0xf0]  ;;  %v6211_v53 = vpop.f32.mrf.mxu3 }
 0x35a   : > { %10772 = vmatmul.msk.bf16.gmra.mxu1 %vm6800_vm1, %v13879_v40  ;;  %v10160_v52 = vor.u32 %v11487_v25, %v10159_v28  ;;  %v11505_v28 = vld [vmem:[%s13138_s23 + $0x4c0] sm:$0xf0]  ;;  %v9763_v25 = vld [vmem:[%s13138_s23 + $0xf8] sm:$0xf] }
 0x35b   : > { %6565 = vmatpush.bf16.msra.mxu0 %v10448_v4  ;;  %v13892_v7 = vadd.f32 %v13794_v24, %v6210_v58  ;;  %v10339_v4 = vld [vmem:[%s13138_s23 + $0x578] sm:$0xf]  ;;  %v11415_v24 = vld [vmem:[%s13138_s23 + $0x1f0] sm:$0xf0]  ;;  %v9835_v58 = vld [vmem:[%s13138_s23 + $0x188] sm:$0xf] }
 0x35c   : > { %6530 = vmatpush.bf16.msra.mxu2 %v10588_v15  ;;  %v10376_v15 = vor.u32 %v11541_v31, %v10375_v13  ;;  %v11406_v13 = vld [vmem:[%s13138_s23 + $0x1a8] sm:$0xf0]  ;;  %v10123_v31 = vld [vmem:[%s13138_s23 + $0x3c8] sm:$0xf] }
 0x35d   : > { %6491 = vmatpush.bf16.msra.mxu3 %v9724_v3  ;;  %v10516_v3 = vor.u32 %v11572_v27, %v10513_v23  ;;  %v10303_v27 = vld [vmem:[%s13138_s23 + $0x530] sm:$0xf]  ;;  %v11523_v23 = vld [vmem:[%s13138_s23 + $0x550] sm:$0xf0]  ;;  %v9836_v0 = vor.u32 %v11406_v13, %v9835_v58  ;;  %v10124_v33 = vor.u32 %v11478_v22, %v10123_v31 }
 0x35e   : > { %v10304_v35 = vor.u32 %v11523_v23, %v10303_v27  ;;  %v9727_v13 = vld [vmem:[%s13138_s23 + $0xb0] sm:$0xf] }
 0x35f   : > { %6566 = vmatpush.bf16.msra.mxu0 %v10412_v47  ;;  %v9872_v47 = vor.u32 %v11415_v24, %v9871_v17  ;;  %v6393_v17 = vpop.f32.mrf.mxu1  ;;  %v10231_v24 = vld [vmem:[%s13138_s23 + $0x4a0] sm:$0xf] }
 0x360   : > { %6531 = vmatpush.bf16.msra.mxu2 %v10552_v45  ;;  %v10340_v45 = vor.u32 %v11532_v6, %v10339_v4  ;;  %v11397_v4 = vld [vmem:[%s13138_s23 + $0x160] sm:$0xf0]  ;;  %v10232_v27 = vor.u32 %v11505_v28, %v10231_v24  ;;  %v10674_v24 = vld [vmem:[%s13736_s18 + $0x2c] sm:$0xf0] }
 0x361   : > { %6492 = vmatpush.bf16.msra.mxu3 %v9688_v29  ;;  %v6198_v29 = vpop.f32.mrf.mxu2  ;;  %v6274_v6 = vpop.f32.mrf.mxu3 }
 0x362   : > { %v11388_v29 = vld [vmem:[%s13138_s23 + $0x118] sm:$0xf0] }
 0x363   : > { %6567 = vmatpush.bf16.msra.mxu0 %v10376_v15  ;;  %v9799_v15 = vld [vmem:[%s13138_s23 + $0x140] sm:$0xf]  ;;  %v13934_v23 = vpop.f32.mrf.mxu0  ;;  %v9764_v58 = vor.u32 %v11388_v29, %v9763_v25  ;;  %v9979_v25 = vld [vmem:[%s13138_s23 + $0x2a8] sm:$0xf] }
 0x364   : > { %6532 = vmatpush.bf16.msra.mxu2 %v10516_v3  ;;  %v11514_v3 = vld [vmem:[%s13138_s23 + $0x508] sm:$0xf0] }
 0x365   : > { %6493 = vmatpush.bf16.msra.mxu3 %v9652_v16  ;;  %v10267_v16 = vld [vmem:[%s13138_s23 + $0x4e8] sm:$0xf] }
 0x366   : > { %v10268_v20 = vor.u32 %v11514_v3, %v10267_v16  ;;  %v10710_v16 = vld [vmem:[%s13736_s18 + $0x74] sm:$0xf0] }
 0x367   : > { %6568 = vmatpush.bf16.msra.mxu0 %v10340_v45  ;;  %10636 = vmatmul.msk.bf16.vlgmr.msra.gmra.mxu2 %vm2046_vm0, %v12142_v14  ;;  %v9800_v14 = vor.u32 %v11397_v4, %v9799_v15  ;;  %v10746_v45 = vld [vmem:[%s13736_s18 + $0xbc] sm:$0xf0]  ;;  %v10015_v3 = vld [vmem:[%s13138_s23 + $0x2f0] sm:$0xf]  ;;  %v11451_v15 = vld [vmem:[%s13138_s23 + $0x310] sm:$0xf0] }
 0x368   : > { %6538 = vmatpush.bf16.msrb.mxu2 %v9908_v57  ;;  %6494 = vmatmul.bf16.vlgmr.msra.gmra.mxu3 %v12167_v39  ;;  %v10087_v57 = vld [vmem:[%s13138_s23 + $0x380] sm:$0xf]  ;;  %v10749_v31 = vor.u32 %v11630_v50, %v10746_v45  ;;  %v10016_v17 = vor.u32 %v11451_v15, %v10015_v3 }
 0x369   : > { %6551 = vmatpush.bf16.msrb.mxu3 %v10196_v8  ;;  %v11469_v8 = vld [vmem:[%s13138_s23 + $0x3a0] sm:$0xf0] }
 0x36a   : > { %v10088_v53 = vor.u32 %v11469_v8, %v10087_v57  ;;  %10773 = vmatmul.msk.bf16.gmra.mxu1 %vm6800_vm1, %v13924_v26  ;;  %v9691_v57 = vld [vmem:[%s13138_s23 + $0x68] sm:$0xf]  ;;  %v6261_v28 = vpop.f32.mrf.mxu2 }
 0x36b   : > { %6569 = vmatpush.bf16.msra.mxu0 %v10304_v35  ;;  %v11379_v35 = vld [vmem:[%s13138_s23 + $0xd0] sm:$0xf0]  ;;  %v6262_v29 = vadd.f32 %v6261_v28, %v13859_v49  ;;  %v6302_v50 = vpop.f32.mrf.mxu0  ;;  %v10744_v49 = vld [vmem:[%s13736_s18 + $0x98] sm:$0xf]  ;;  %v10762_v28 = vld [vmem:[%s13736_s18 + $0xcc] sm:$0xf0] }
 0x36c   : > { %6539 = vmatpush.bf16.msrb.mxu2 %v9872_v47  ;;  %v10051_v47 = vld [vmem:[%s13138_s23 + $0x338] sm:$0xf]  ;;  %v9728_v4 = vor.u32 %v11379_v35, %v9727_v13  ;;  %v9943_v13 = vld [vmem:[%s13138_s23 + $0x260] sm:$0xf]  ;;  %v11637_v50 = vld [vmem:[%s13736_s18 + $0xd0] sm:$0xf0] }
 0x36d   : > { %6552 = vmatpush.bf16.msrb.mxu3 %v10160_v52  ;;  %v11460_v52 = vld [vmem:[%s13138_s23 + $0x358] sm:$0xf0]  ;;  %v10738_v35 = vld [vmem:[%s13736_s18 + $0xb4] sm:$0xf0] }
 0x36e   : > { %v10052_v22 = vor.u32 %v11460_v52, %v10051_v47  ;;  %v13952_v52 = vadd.f32 %v6274_v6, %v6262_v29  ;;  %v13965_v6 = vld [vmem:[%s14345_s1 + $0x20] sm:$0xff] }
 0x36f   : > { %6570 = vmatpush.bf16.msra.mxu0 %v10268_v20  ;;  %v11370_v20 = vld [vmem:[%s13138_s23 + $0x88] sm:$0xf0] }
 0x370   : > { %6540 = vmatpush.bf16.msrb.mxu2 %v9836_v0  ;;  %v6276_v0 = vpop.f32.mrf.mxu3  ;;  %v9692_v45 = vor.u32 %v11370_v20, %v9691_v57  ;;  %v10708_v20 = vld [vmem:[%s13736_s18 + $0x50] sm:$0xf] }
 0x371   : > { %6553 = vmatpush.bf16.msrb.mxu3 %v10124_v33  ;;  %v11621_v33 = vld [vmem:[%s13736_s18 + $0x54] sm:$0xf]  ;;  %v11634_v0 = vld [vmem:[%s13736_s18 + $0xb8] sm:$0xf0] }
 0x372   : > { %v10713_v8 = vor.u32 %v11621_v33, %v10710_v16  ;;  %v6263_v15 = vpop.f32.mrf.mxu2  ;;  %v10745_v57 = vor.u32 %v11634_v0, %v10744_v49  ;;  %v10760_v0 = vld [vmem:[%s13736_s18 + $0xa8] sm:$0xf] }
 0x373   : > { %6571 = vmatpush.bf16.msra.mxu0 %v10232_v27 }
 0x374   : > { %6541 = vmatpush.bf16.msrb.mxu2 %v9800_v14  ;;  %v11612_v14 = vld [vmem:[%s13736_s18 + $0xc] sm:$0xf] }
 0x375   : > { %6554 = vmatpush.bf16.msrb.mxu3 %v10088_v53  ;;  %v11442_v53 = vld [vmem:[%s13138_s23 + $0x2c8] sm:$0xf0]  ;;  %v10677_v47 = vor.u32 %v11612_v14, %v10674_v24 }
 0x376   : > { %6572 = vmatmul.bf16.vlgmr.msra.gmra.mxu0 %v12227_v2  ;;  %v9980_v27 = vor.u32 %v11442_v53, %v9979_v25  ;;  %v9655_v2 = vld [vmem:[%s13138_s23 + $0x20] sm:$0xf]  ;;  %v11625_v14 = vld [vmem:[%s13736_s18 + $0x70] sm:$0xf0]  ;;  %v11632_v24 = vld [vmem:[%s13736_s18 + $0xac] sm:$0xf] }
 0x377   : > { %6941 = vmatpush.bf16.msrb.mxu0 %v10749_v31  ;;  %v11433_v31 = vld [vmem:[%s13138_s23 + $0x280] sm:$0xf0]  ;;  %v10768_v25 = vld [vmem:[%s13736_s18 + $0xb0] sm:$0xf]  ;;  %v10765_v29 = vor.u32 %v11632_v24, %v10762_v28  ;;  %v11622_v28 = vld [vmem:[%s13736_s18 + $0x5c] sm:$0xf] }
 0x378   : > { %6542 = vmatpush.bf16.msrb.mxu2 %v9764_v58  ;;  %v11361_v58 = vld [vmem:[%s13138_s23 + $0x40] sm:$0xf0]  ;;  %v9944_v16 = vor.u32 %v11433_v31, %v9943_v13 }
 0x379   : > { %6555 = vmatpush.bf16.msrb.mxu3 %v10052_v22  ;;  %v11629_v22 = vld [vmem:[%s13736_s18 + $0x94] sm:$0xf]  ;;  %v9656_v33 = vor.u32 %v11361_v58, %v9655_v2  ;;  %v10672_v2 = vld [vmem:[%s13736_s18 + $0x8] sm:$0xf]  ;;  %v10769_v58 = vor.u32 %v11637_v50, %v10768_v25  ;;  %v11616_v31 = vld [vmem:[%s13736_s18 + $0x28] sm:$0xf0] }
 0x37a   : > { %v10741_v3 = vor.u32 %v11629_v22, %v10738_v35  ;;  %10774 = vmatmul.msk.bf16.gmra.mxu1 %vm6800_vm1, %v13965_v6  ;;  %v11631_v22 = vld [vmem:[%s13736_s18 + $0xa4] sm:$0xf]  ;;  %v10754_v35 = vld [vmem:[%s13736_s18 + $0xc4] sm:$0xf0]  ;;  %v10673_v15 = vor.u32 %v11616_v31, %v10672_v2  ;;  %v10718_v25 = vld [vmem:[%s13736_s18 + $0x7c] sm:$0xf0] }
 0x37b   : > { %6942 = vmatpush.bf16.msrb.mxu0 %v10713_v8  ;;  %v11620_v8 = vld [vmem:[%s13736_s18 + $0x4c] sm:$0xf]  ;;  %v6287_v13 = vpop.f32.mrf.mxu3  ;;  %7136 = vmatpush.bf16.msrb.mxu1 %v10769_v58  ;;  %v11627_v50 = vld [vmem:[%s13736_s18 + $0x80] sm:$0xf0]  ;;  %v10732_v31 = vld [vmem:[%s13736_s18 + $0x68] sm:$0xf] }
 0x37c   : > { %6543 = vmatpush.bf16.msrb.mxu2 %v9728_v4  ;;  %v13967_v4 = vpop.f32.mrf.mxu1  ;;  %v6301_v49 = vadd.f32 %v13934_v23, %v6287_v13  ;;  %v11623_v58 = vld [vmem:[%s13736_s18 + $0x64] sm:$0xf]  ;;  %v10726_v13 = vld [vmem:[%s13736_s18 + $0x84] sm:$0xf0] }
 0x37d   : > { %6556 = vmatpush.bf16.msrb.mxu3 %v10016_v17  ;;  %v10702_v17 = vld [vmem:[%s13736_s18 + $0x6c] sm:$0xf0] }
 0x37e   : > { %v10705_v53 = vor.u32 %v11620_v8, %v10702_v17  ;;  %v6326_v8 = vpop.f32.mrf.mxu2 }
 0x37f   : > { %6943 = vmatpush.bf16.msrb.mxu0 %v10677_v47  ;;  %v11611_v47 = vld [vmem:[%s13736_s18 + $0x4] sm:$0xf] }
 0x380   : > { %6544 = vmatpush.bf16.msrb.mxu2 %v9692_v45  ;;  %v10709_v45 = vor.u32 %v11625_v14, %v10708_v20 }
 0x381   : > { %6557 = vmatpush.bf16.msrb.mxu3 %v9980_v27  ;;  %v10666_v27 = vld [vmem:[%s13736_s18 + $0x24] sm:$0xf0] }
 0x383   : > { %7097 = vmatpush.bf16.msra.mxu0 %v10765_v29  ;;  %v6289_v23 = vpop.f32.mrf.mxu3  ;;  %v6365_v20 = vpop.f32.mrf.mxu0  ;;  %v10721_v29 = vor.u32 %v11622_v28, %v10718_v25  ;;  %v11618_v25 = vld [vmem:[%s13736_s18 + $0x38] sm:$0xf0] }
 0x384   : > { %6545 = vmatpush.bf16.msrb.mxu2 %v9656_v33  ;;  %v11636_v33 = vld [vmem:[%s13736_s18 + $0xc8] sm:$0xf0]  ;;  %v11613_v23 = vld [vmem:[%s13736_s18 + $0x14] sm:$0xf] }
 0x385   : > { %6558 = vmatpush.bf16.msrb.mxu3 %v9944_v16  ;;  %v10669_v16 = vor.u32 %v11611_v47, %v10666_v27  ;;  %v10761_v17 = vor.u32 %v11636_v33, %v10760_v0 }
 0x386   : > { %10788 = vmatmul.msk.bf16.vlgmr.msrb.gmra.mxu0 %vm6800_vm1, %v13791_v19  ;;  %v6328_v14 = vpop.f32.mrf.mxu2 }
 0x387   : > { %6546 = vmatmul.bf16.vlgmr.msrb.gmra.mxu2 %v12167_v39  ;;  %v6458_v39 = vpop.f32.mrf.mxu1  ;;  %v10688_v14 = vld [vmem:[%s13736_s18 + $0x18] sm:$0xf] }
 0x388   : > { %6863 = vmatpush.bf16.msra.mxu2 %v10741_v3  ;;  %6559 = vmatmul.bf16.vlgmr.msrb.gmra.mxu3 %v12165_v38  ;;  %v6314_v3 = vadd.f32 %v13784_v32, %v6301_v49  ;;  %v13998_v32 = vld [vmem:[%s14345_s1 + $0x28] sm:$0xff] }
 0x389   : > { %6902 = vmatpush.bf16.msra.mxu3 %v10745_v57  ;;  %v10757_v57 = vor.u32 %v11631_v22, %v10754_v35  ;;  %v10729_v35 = vor.u32 %v11623_v58, %v10726_v13  ;;  %v11628_v49 = vld [vmem:[%s13736_s18 + $0x88] sm:$0xf0] }
 0x38a   : > { %v13993_v38 = vadd.f32 %v6326_v8, %v6314_v3  ;;  %10775 = vmatmul.msk.bf16.gmra.mxu1 %vm6800_vm1, %v13998_v32  ;;  %v10733_v33 = vor.u32 %v11628_v49, %v10732_v31  ;;  %v11614_v31 = vld [vmem:[%s13736_s18 + $0x1c] sm:$0xf] }
 0x38b   : > { %v6367_v24 = vpop.f32.mrf.mxu0  ;;  %7098 = vmatpush.bf16.msra.mxu0 %v10729_v35  ;;  %v10696_v35 = vld [vmem:[%s13736_s18 + $0x20] sm:$0xf] }
 0x38c   : > { %6864 = vmatpush.bf16.msra.mxu2 %v10705_v53  ;;  %v10724_v53 = vld [vmem:[%s13736_s18 + $0x60] sm:$0xf]  ;;  %7137 = vmatpush.bf16.msrb.mxu1 %v10733_v33  ;;  %v11619_v33 = vld [vmem:[%s13736_s18 + $0x40] sm:$0xf0] }
 0x38d   : > { %6903 = vmatpush.bf16.msra.mxu3 %v10709_v45  ;;  %v10725_v47 = vor.u32 %v11627_v50, %v10724_v53 }
 0x390   : > { %6865 = vmatpush.bf16.msra.mxu2 %v10669_v16 }
 0x391   : > { %6904 = vmatpush.bf16.msra.mxu3 %v10673_v15 }
 0x393   : > { %v6430_v27 = vpop.f32.mrf.mxu0 }
 0x394   : > { %7019 = vmatpush.bf16.msrb.mxu2 %v10757_v57 }
 0x395   : > { %7058 = vmatpush.bf16.msrb.mxu3 %v10761_v17 }
 0x396   : > { %10789 = vmatmul.msk.bf16.gmra.mxu0 %vm6800_vm1, %v13836_v63 }
 0x397   : > { %10776 = vmatmul.msk.bf16.vlgmr.msra.gmra.mxu2 %vm6800_vm1, %v13791_v19  ;;  %v14012_v45 = vpop.f32.mrf.mxu1 }
 0x398   : > { %10782 = vmatmul.msk.bf16.vlgmr.msra.gmra.mxu3 %vm6800_vm1, %v13791_v19  ;;  %7020 = vmatpush.bf16.msrb.mxu2 %v10721_v29  ;;  %v10689_v29 = vor.u32 %v11618_v25, %v10688_v14 }
 0x399   : > { %7059 = vmatpush.bf16.msrb.mxu3 %v10725_v47 }
 0x39a   : > { %10794 = vmatmul.msk.bf16.vlgmr.msra.gmra.mxu1 %vm6800_vm1, %v13791_v19  ;;  %v6339_v2 = vpop.f32.mrf.mxu2 }
 0x39b   : > { %v6352_v22 = vpop.f32.mrf.mxu3  ;;  %v6432_v39 = vpop.f32.mrf.mxu0 }
 0x39c   : > { %v6353_v0 = vadd.f32 %v6352_v22, %v6339_v2  ;;  %v10690_v22 = vld [vmem:[%s13736_s18 + $0x3c] sm:$0xf0] }
 0x39d   : > { %7060 = vmatpush.bf16.msrb.mxu3 %v10689_v29 }
 0x39e   : > { %v14022_v3 = vadd.f32 %v6365_v20, %v6353_v0  ;;  %v10682_v20 = vld [vmem:[%s13736_s18 + $0x34] sm:$0xf0]  ;;  %v10693_v0 = vor.u32 %v11614_v31, %v10690_v22 }
 0x39f   : > { %v6523_v16 = vpop.f32.mrf.mxu1  ;;  %v10685_v28 = vor.u32 %v11613_v23, %v10682_v20 }
 0x3a0   : > { %v10697_v16 = vor.u32 %v11619_v33, %v10696_v35  ;;  %7099 = vmatpush.bf16.msra.mxu0 %v10693_v0 }
 0x3a1   : > { %7021 = vmatpush.bf16.msrb.mxu2 %v10685_v28 }
 0x3a2   : > { %v6341_v15 = vpop.f32.mrf.mxu2  ;;  %7138 = vmatpush.bf16.msrb.mxu1 %v10697_v16 }
 0x3a3   : > { %v6354_v57 = vpop.f32.mrf.mxu3 }
 0x3a6   : > { %10790 = vmatmul.msk.bf16.gmra.mxu0 %vm6800_vm1, %v13879_v40 }
 0x3a7   : > { %10777 = vmatmul.msk.bf16.gmra.mxu2 %vm6800_vm1, %v13836_v63  ;;  %v14028_v8 = vpop.f32.mrf.mxu1 }
 0x3a8   : > { %10783 = vmatmul.msk.bf16.gmra.mxu3 %vm6800_vm1, %v13836_v63 }
 0x3aa   : > { %10795 = vmatmul.msk.bf16.gmra.mxu1 %vm6800_vm1, %v13836_v63 }
 0x3af   : > { %v6588_v17 = vpop.f32.mrf.mxu1 }
 0x3b3   : > { %v6443_v24 = vpop.f32.mrf.mxu0 }
 0x3b4   : > { %v6457_v53 = vadd.f32 %v13967_v4, %v6443_v24 }
 0x3b6   : > { %10791 = vmatmul.msk.bf16.gmra.mxu0 %vm6800_vm1, %v13924_v26 }
 0x3b7   : > { %10778 = vmatmul.msk.bf16.gmra.mxu2 %vm6800_vm1, %v13879_v40  ;;  %v6828_v50 = vpop.f32.mrf.mxu1 }
 0x3b8   : > { %10784 = vmatmul.msk.bf16.gmra.mxu3 %vm6800_vm1, %v13879_v40  ;;  %v7170_v23 = vmul.f32 %v6828_v50, %v12574_v62 }
 0x3ba   : > { %v6404_v47 = vpop.f32.mrf.mxu2  ;;  %10796 = vmatmul.msk.bf16.gmra.mxu1 %vm6800_vm1, %v13879_v40 }
 0x3bb   : > { %v6405_v2 = vadd.f32 %v6404_v47, %v13904_v46  ;;  %v6417_v58 = vpop.f32.mrf.mxu3  ;;  %v6445_v13 = vpop.f32.mrf.mxu0 }
 0x3bd   : > { %v6418_v49 = vadd.f32 %v6417_v58, %v6405_v2 }
 0x3bf   : > { %v14050_v4 = vadd.f32 %v6430_v27, %v6418_v49  ;;  %v6830_v39 = vpop.f32.mrf.mxu1  ;;  %v14060_v27 = vadd.f32 %v13551_v36, %v13812_v30 }
 0x3c0   : > { %v7179_v17 = vmul.f32 %v6830_v39, %v13176_v44 }
 0x3c2   : > { %v6406_v46 = vpop.f32.mrf.mxu2  ;;  %v7188_v24 = vadd.f32 %v7179_v17, %v7170_v23 }
 0x3c3   : > { %v6419_v15 = vpop.f32.mrf.mxu3 }
 0x3c6   : > { %10792 = vmatmul.msk.bf16.gmra.mxu0 %vm6800_vm1, %v13965_v6 }
 0x3c7   : > { %10779 = vmatmul.msk.bf16.gmra.mxu2 %vm6800_vm1, %v13924_v26  ;;  %v6833_v57 = vpop.f32.mrf.mxu1 }
 0x3c8   : > { %10785 = vmatmul.msk.bf16.gmra.mxu3 %vm6800_vm1, %v13924_v26  ;;  %v7197_v20 = vmul.f32 %v6833_v57, %v14060_v27 }
 0x3ca   : > { %10797 = vmatmul.msk.bf16.gmra.mxu1 %vm6800_vm1, %v13924_v26  ;;  %v7206_v28 = vadd.f32 %v7197_v20, %v7188_v24 }
 0x3cb   : > { %v6482_v14 = vpop.f32.mrf.mxu3 }
 0x3cf   : > { %v6835_v36 = vpop.f32.mrf.mxu1 }
 0x3d0   : > { %v7215_v30 = vadd.f32 %v7206_v28, %v6835_v36 }
 0x3d2   : > { %7224 = vst [vmem:[%s14075_s24] sm:$0xff] %v7215_v30 }
 0x3d3   : > { %v6508_v25 = vpop.f32.mrf.mxu0  ;;  %v6484_v29 = vpop.f32.mrf.mxu3 }
 0x3d6   : > { %10793 = vmatmul.msk.bf16.gmra.mxu0 %vm6800_vm1, %v13998_v32 }
 0x3d7   : > { %10780 = vmatmul.msk.bf16.gmra.mxu2 %vm6800_vm1, %v13965_v6  ;;  %v6838_v2 = vpop.f32.mrf.mxu1 }
 0x3d8   : > { %10786 = vmatmul.msk.bf16.gmra.mxu3 %vm6800_vm1, %v13965_v6  ;;  %v7233_v46 = vmul.f32 %v6838_v2, %v12574_v62 }
 0x3da   : > { %v6469_v50 = vpop.f32.mrf.mxu2  ;;  %10798 = vmatmul.msk.bf16.gmra.mxu1 %vm6800_vm1, %v13965_v6 }
 0x3db   : > { %v6470_v47 = vadd.f32 %v6469_v50, %v6457_v53  ;;  %v6510_v13 = vpop.f32.mrf.mxu0 }
 0x3dd   : > { %v14078_v58 = vadd.f32 %v6482_v14, %v6470_v47 }
 0x3df   : > { %v6840_v22 = vpop.f32.mrf.mxu1 }
 0x3e0   : > { %v7242_v39 = vmul.f32 %v6840_v22, %v13176_v44 }
 0x3e2   : > { %v6471_v31 = vpop.f32.mrf.mxu2  ;;  %v7251_v17 = vadd.f32 %v7242_v39, %v7233_v46 }
 0x3e6   : > { %10812 = vmatmul.msk.bf16.vlgmr.msra.gmra.mxu0 %vm6800_vm1, %v13791_v19 }
 0x3e7   : > { %10781 = vmatmul.msk.bf16.gmra.mxu2 %vm6800_vm1, %v13998_v32  ;;  %v6843_v33 = vpop.f32.mrf.mxu1 }
 0x3e8   : > { %10787 = vmatmul.msk.bf16.gmra.mxu3 %vm6800_vm1, %v13998_v32  ;;  %v7260_v15 = vmul.f32 %v6843_v33, %v14060_v27 }
 0x3ea   : > { %v6534_v0 = vpop.f32.mrf.mxu2  ;;  %10799 = vmatmul.msk.bf16.gmra.mxu1 %vm6800_vm1, %v13998_v32 }
 0x3eb   : > { %v6495_v35 = vpop.f32.mrf.mxu3 }
 0x3ec   : > { %v6509_v53 = vadd.f32 %v6508_v25, %v6495_v35 }
 0x3ee   : > { %v6522_v49 = vadd.f32 %v14012_v45, %v6509_v53  ;;  %v7269_v45 = vadd.f32 %v7260_v15, %v7251_v17 }
 0x3ef   : > { %v6845_v14 = vpop.f32.mrf.mxu1 }
 0x3f0   : > { %v14089_v16 = vadd.f32 %v6534_v0, %v6522_v49  ;;  %v7278_v24 = vadd.f32 %v7269_v45, %v6845_v14  ;;  %v14130_v14 = vadd.f32 %v12992_v61, %v13252_v41 }
 0x3f2   : > { %v6536_v20 = vpop.f32.mrf.mxu2  ;;  %10824 = vst [vmem:[%s14075_s24 + $0x48] sm:$0xff] %v7278_v24 }
 0x3f3   : > { %v6497_v57 = vpop.f32.mrf.mxu3  ;;  %v6573_v23 = vpop.f32.mrf.mxu0 }
 0x3f6   : > { %10813 = vmatmul.msk.bf16.gmra.mxu0 %vm6800_vm1, %v13836_v63 }
 0x3f7   : > { %10800 = vmatmul.msk.bf16.vlgmr.msrb.gmra.mxu2 %vm6800_vm1, %v13791_v19  ;;  %v6848_v36 = vpop.f32.mrf.mxu1 }
 0x3f8   : > { %10806 = vmatmul.msk.bf16.vlgmr.msrb.gmra.mxu3 %vm6800_vm1, %v13791_v19  ;;  %v7297_v33 = vmul.f32 %v6848_v36, %v12574_v62 }
 0x3fa   : > { %10818 = vmatmul.msk.bf16.vlgmr.msrb.gmra.mxu1 %vm6800_vm1, %v13791_v19 }
 0x3fb   : > { %v6575_v28 = vpop.f32.mrf.mxu0 }
 0x3fc   : > { %v14134_v28 = vadd.f32 %v12465_v21, %v12693_v56 }
 0x3ff   : > { %v6850_v25 = vpop.f32.mrf.mxu1 }
 0x400   : > { %v7306_v35 = vmul.f32 %v6850_v25, %v13176_v44 }
 0x402   : > { %v7315_v46 = vadd.f32 %v7306_v35, %v7297_v33 }
 0x403   : > { %v6945_v30 = vpop.f32.mrf.mxu0 }
 0x404   : > { %v7173_v31 = vmul.f32 %v6945_v30, %v12778_v5 }
 0x406   : > { %10814 = vmatmul.msk.bf16.gmra.mxu0 %vm6800_vm1, %v13879_v40 }
 0x407   : > { %10801 = vmatmul.msk.bf16.gmra.mxu2 %vm6800_vm1, %v13836_v63  ;;  %v6853_v22 = vpop.f32.mrf.mxu1 }
 0x408   : > { %10807 = vmatmul.msk.bf16.gmra.mxu3 %vm6800_vm1, %v13836_v63  ;;  %v7324_v39 = vmul.f32 %v6853_v22, %v14060_v27 }
 0x40a   : > { %v6547_v29 = vpop.f32.mrf.mxu2  ;;  %10819 = vmatmul.msk.bf16.gmra.mxu1 %vm6800_vm1, %v13836_v63  ;;  %v7333_v57 = vadd.f32 %v7324_v39, %v7315_v46  ;;  %v14155_v39 = vadd.f32 %v13831_v9, %v14022_v3 }
 0x40b   : > { %v6560_v50 = vpop.f32.mrf.mxu3  ;;  %v6947_v13 = vpop.f32.mrf.mxu0 }
 0x40c   : > { %v6561_v47 = vadd.f32 %v6560_v50, %v6547_v29  ;;  %v7182_v19 = vmul.f32 %v6947_v13, %v13410_v43 }
 0x40e   : > { %v14111_v2 = vadd.f32 %v6573_v23, %v6561_v47  ;;  %v7191_v53 = vadd.f32 %v7182_v19, %v7173_v31 }
 0x40f   : > { %v6855_v17 = vpop.f32.mrf.mxu1 }
 0x410   : > { %v7342_v23 = vadd.f32 %v7333_v57, %v6855_v17 }
 0x412   : > { %v6549_v49 = vpop.f32.mrf.mxu2  ;;  %10833 = vst [vmem:[%s14075_s24 + $0x90] sm:$0xff] %v7342_v23 }
 0x413   : > { %v6562_v0 = vpop.f32.mrf.mxu3  ;;  %v6950_v15 = vpop.f32.mrf.mxu0 }
 0x414   : > { %v7200_v44 = vmul.f32 %v6950_v15, %v13993_v38 }
 0x416   : > { %10815 = vmatmul.msk.bf16.gmra.mxu0 %vm6800_vm1, %v13924_v26  ;;  %v7209_v27 = vadd.f32 %v7200_v44, %v7191_v53 }
 0x417   : > { %10802 = vmatmul.msk.bf16.gmra.mxu2 %vm6800_vm1, %v13879_v40  ;;  %v6984_v24 = vpop.f32.mrf.mxu1 }
 0x418   : > { %10808 = vmatmul.msk.bf16.gmra.mxu3 %vm6800_vm1, %v13879_v40  ;;  %v7174_v56 = vmul.f32 %v6984_v24, %v12851_v1 }
 0x41a   : > { %v6867_v62 = vpop.f32.mrf.mxu2  ;;  %10820 = vmatmul.msk.bf16.gmra.mxu1 %vm6800_vm1, %v13879_v40 }
 0x41b   : > { %v6906_v63 = vpop.f32.mrf.mxu3  ;;  %v6952_v45 = vpop.f32.mrf.mxu0  ;;  %v7171_v30 = vmul.f32 %v6867_v62, %v12617_v12 }
 0x41c   : > { %v7218_v20 = vadd.f32 %v7209_v27, %v6952_v45  ;;  %v7172_v50 = vmul.f32 %v6906_v63, %v14134_v28 }
 0x41e   : > { %7227 = vst [vmem:[%s14075_s24 + $0x18] sm:$0xff] %v7218_v20 }
 0x41f   : > { %v6986_v21 = vpop.f32.mrf.mxu1 }
 0x420   : > { %v7183_v31 = vmul.f32 %v6986_v21, %v13454_v51 }
 0x422   : > { %v6869_v36 = vpop.f32.mrf.mxu2  ;;  %v7192_v35 = vadd.f32 %v7183_v31, %v7174_v56 }
 0x423   : > { %v7180_v25 = vmul.f32 %v6869_v36, %v14130_v14  ;;  %v6908_v29 = vpop.f32.mrf.mxu3  ;;  %v6955_v13 = vpop.f32.mrf.mxu0 }
 0x424   : > { %v7181_v47 = vmul.f32 %v6908_v29, %v13337_v59  ;;  %v7236_v46 = vmul.f32 %v6955_v13, %v12778_v5 }
 0x425   : > { %v7189_v61 = vadd.f32 %v7180_v25, %v7171_v30 }
 0x426   : > { %v7190_v41 = vadd.f32 %v7181_v47, %v7172_v50  ;;  %10816 = vmatmul.msk.bf16.gmra.mxu0 %vm6800_vm1, %v13965_v6 }
 0x427   : > { %10803 = vmatmul.msk.bf16.gmra.mxu2 %vm6800_vm1, %v13924_v26  ;;  %v6989_v57 = vpop.f32.mrf.mxu1 }
 0x428   : > { %10809 = vmatmul.msk.bf16.gmra.mxu3 %vm6800_vm1, %v13924_v26  ;;  %v7201_v17 = vmul.f32 %v6989_v57, %v14155_v39 }
 0x42a   : > { %v6872_v19 = vpop.f32.mrf.mxu2  ;;  %10821 = vmatmul.msk.bf16.gmra.mxu1 %vm6800_vm1, %v13924_v26  ;;  %v7210_v45 = vadd.f32 %v7201_v17, %v7192_v35 }
 0x42b   : > { %v7198_v40 = vmul.f32 %v6872_v19, %v13892_v7  ;;  %v6911_v22 = vpop.f32.mrf.mxu3  ;;  %v6957_v33 = vpop.f32.mrf.mxu0 }
 0x42c   : > { %v7199_v53 = vmul.f32 %v6911_v22, %v13952_v52  ;;  %v7245_v15 = vmul.f32 %v6957_v33, %v13410_v43 }
 0x42d   : > { %v7207_v49 = vadd.f32 %v7198_v40, %v7189_v61 }
 0x42e   : > { %v7208_v0 = vadd.f32 %v7199_v53, %v7190_v41  ;;  %v7254_v44 = vadd.f32 %v7245_v15, %v7236_v46 }
 0x42f   : > { %v6991_v20 = vpop.f32.mrf.mxu1 }
 0x430   : > { %v7219_v24 = vadd.f32 %v7210_v45, %v6991_v20 }
 0x432   : > { %v6874_v23 = vpop.f32.mrf.mxu2  ;;  %7228 = vst [vmem:[%s14075_s24 + $0x20] sm:$0xff] %v7219_v24 }
 0x433   : > { %v7216_v62 = vadd.f32 %v7207_v49, %v6874_v23  ;;  %v6913_v27 = vpop.f32.mrf.mxu3  ;;  %v6960_v9 = vpop.f32.mrf.mxu0 }
 0x434   : > { %v7217_v63 = vadd.f32 %v7208_v0, %v6913_v27  ;;  %v7263_v3 = vmul.f32 %v6960_v9, %v13993_v38 }
 0x435   : > { %7225 = vst [vmem:[%s14075_s24 + $0x8] sm:$0xff] %v7216_v62 }
 0x436   : > { %7226 = vst [vmem:[%s14075_s24 + $0x10] sm:$0xff] %v7217_v63  ;;  %10817 = vmatmul.msk.bf16.gmra.mxu0 %vm6800_vm1, %v13998_v32  ;;  %v7272_v26 = vadd.f32 %v7263_v3, %v7254_v44 }
 0x437   : > { %10804 = vmatmul.msk.bf16.gmra.mxu2 %vm6800_vm1, %v13965_v6  ;;  %v6994_v50 = vpop.f32.mrf.mxu1 }
 0x438   : > { %10810 = vmatmul.msk.bf16.gmra.mxu3 %vm6800_vm1, %v13965_v6  ;;  %v7237_v35 = vmul.f32 %v6994_v50, %v12851_v1 }
 0x43a   : > { %v6877_v36 = vpop.f32.mrf.mxu2  ;;  %10822 = vmatmul.msk.bf16.gmra.mxu1 %vm6800_vm1, %v13965_v6 }
 0x43b   : > { %v6916_v30 = vpop.f32.mrf.mxu3  ;;  %v6962_v25 = vpop.f32.mrf.mxu0  ;;  %v7234_v61 = vmul.f32 %v6877_v36, %v12617_v12 }
 0x43c   : > { %v7281_v29 = vadd.f32 %v7272_v26, %v6962_v25  ;;  %v7235_v21 = vmul.f32 %v6916_v30, %v14134_v28 }
 0x43e   : > { %10827 = vst [vmem:[%s14075_s24 + $0x60] sm:$0xff] %v7281_v29 }
 0x43f   : > { %v6996_v22 = vpop.f32.mrf.mxu1 }
 0x440   : > { %v7246_v53 = vmul.f32 %v6996_v22, %v13454_v51 }
 0x442   : > { %v6879_v47 = vpop.f32.mrf.mxu2  ;;  %v7255_v46 = vadd.f32 %v7246_v53, %v7237_v35 }
 0x443   : > { %v7243_v41 = vmul.f32 %v6879_v47, %v14130_v14  ;;  %v6918_v13 = vpop.f32.mrf.mxu3  ;;  %v6965_v40 = vpop.f32.mrf.mxu0 }
 0x444   : > { %v7244_v56 = vmul.f32 %v6918_v13, %v13337_v59  ;;  %v7300_v17 = vmul.f32 %v6965_v40, %v12778_v5 }
 0x445   : > { %v7252_v31 = vadd.f32 %v7243_v41, %v7234_v61 }
 0x446   : > { %v7253_v19 = vadd.f32 %v7244_v56, %v7235_v21 }
 0x447   : > { %10805 = vmatmul.msk.bf16.gmra.mxu2 %vm6800_vm1, %v13998_v32  ;;  %v6999_v62 = vpop.f32.mrf.mxu1 }
 0x448   : > { %10811 = vmatmul.msk.bf16.gmra.mxu3 %vm6800_vm1, %v13998_v32  ;;  %v7264_v63 = vmul.f32 %v6999_v62, %v14155_v39 }
 0x44a   : > { %v6882_v49 = vpop.f32.mrf.mxu2  ;;  %10823 = vmatmul.msk.bf16.gmra.mxu1 %vm6800_vm1, %v13998_v32  ;;  %v7273_v24 = vadd.f32 %v7264_v63, %v7255_v46 }
 0x44b   : > { %v7261_v0 = vmul.f32 %v6882_v49, %v13892_v7  ;;  %v6921_v33 = vpop.f32.mrf.mxu3  ;;  %v6967_v44 = vpop.f32.mrf.mxu0 }
 0x44c   : > { %v7262_v6 = vmul.f32 %v6921_v33, %v13952_v52  ;;  %v7309_v23 = vmul.f32 %v6967_v44, %v13410_v43 }
 0x44d   : > { %v7270_v15 = vadd.f32 %v7261_v0, %v7252_v31 }
 0x44e   : > { %v7271_v57 = vadd.f32 %v7262_v6, %v7253_v19  ;;  %v7318_v27 = vadd.f32 %v7309_v23, %v7300_v17 }
 0x44f   : > { %v7001_v43 = vpop.f32.mrf.mxu1 }
 0x450   : > { %v7282_v26 = vadd.f32 %v7273_v24, %v7001_v43  ;;  %v14218_v43 = vadd.f32 %v12714_v34, %v12971_v11 }
 0x452   : > { %v6884_v45 = vpop.f32.mrf.mxu2  ;;  %10828 = vst [vmem:[%s14075_s24 + $0x68] sm:$0xff] %v7282_v26 }
 0x453   : > { %v7279_v9 = vadd.f32 %v7270_v15, %v6884_v45  ;;  %v6923_v3 = vpop.f32.mrf.mxu3  ;;  %v6970_v36 = vpop.f32.mrf.mxu0 }
 0x454   : > { %v7280_v20 = vadd.f32 %v7271_v57, %v6923_v3  ;;  %v7327_v5 = vmul.f32 %v6970_v36, %v13993_v38 }
 0x455   : > { %10825 = vst [vmem:[%s14075_s24 + $0x50] sm:$0xff] %v7279_v9 }
 0x456   : > { %10826 = vst [vmem:[%s14075_s24 + $0x58] sm:$0xff] %v7280_v20  ;;  %v7336_v25 = vadd.f32 %v7327_v5, %v7318_v27 }
 0x457   : > { %v7004_v61 = vpop.f32.mrf.mxu1 }
 0x458   : > { %v7301_v35 = vmul.f32 %v7004_v61, %v12851_v1 }
 0x45a   : > { %v6887_v30 = vpop.f32.mrf.mxu2 }
 0x45b   : > { %v6926_v29 = vpop.f32.mrf.mxu3  ;;  %v6972_v50 = vpop.f32.mrf.mxu0  ;;  %v7298_v13 = vmul.f32 %v6887_v30, %v12617_v12 }
 0x45c   : > { %v7345_v47 = vadd.f32 %v7336_v25, %v6972_v50  ;;  %v7299_v56 = vmul.f32 %v6926_v29, %v14134_v28 }
 0x45e   : > { %10836 = vst [vmem:[%s14075_s24 + $0xa8] sm:$0xff] %v7345_v47 }
 0x45f   : > { %v7006_v22 = vpop.f32.mrf.mxu1 }
 0x460   : > { %v7310_v53 = vmul.f32 %v7006_v22, %v13454_v51  ;;  %v14231_v22 = vadd.f32 %v14028_v8, %v14111_v2 }
 0x462   : > { %v6889_v41 = vpop.f32.mrf.mxu2  ;;  %v7319_v12 = vadd.f32 %v7310_v53, %v7301_v35 }
 0x463   : > { %v7307_v32 = vmul.f32 %v6889_v41, %v14130_v14  ;;  %v6928_v21 = vpop.f32.mrf.mxu3  ;;  %v7101_v40 = vpop.f32.mrf.mxu0 }
 0x464   : > { %v7308_v38 = vmul.f32 %v6928_v21, %v13337_v59  ;;  %v7177_v6 = vmul.f32 %v7101_v40, %v13056_v48 }
 0x465   : > { %v7316_v31 = vadd.f32 %v7307_v32, %v7298_v13 }
 0x466   : > { %v7317_v19 = vadd.f32 %v7308_v38, %v7299_v56 }
 0x467   : > { %v7009_v57 = vpop.f32.mrf.mxu1 }
 0x468   : > { %v7328_v51 = vmul.f32 %v7009_v57, %v14155_v39  ;;  %v14214_v39 = vadd.f32 %v13273_v10, %v13530_v37 }
 0x46a   : > { %v6892_v49 = vpop.f32.mrf.mxu2  ;;  %v7337_v62 = vadd.f32 %v7328_v51, %v7319_v12 }
 0x46b   : > { %v7325_v0 = vmul.f32 %v6892_v49, %v13892_v7  ;;  %v6931_v33 = vpop.f32.mrf.mxu3  ;;  %v7103_v59 = vpop.f32.mrf.mxu0 }
 0x46c   : > { %v7326_v14 = vmul.f32 %v6931_v33, %v13952_v52  ;;  %v7186_v15 = vmul.f32 %v7103_v59, %v13688_v54 }
 0x46d   : > { %v7334_v28 = vadd.f32 %v7325_v0, %v7316_v31 }
 0x46e   : > { %v7335_v46 = vadd.f32 %v7326_v14, %v7317_v19  ;;  %v7195_v1 = vadd.f32 %v7186_v15, %v7177_v6 }
 0x46f   : > { %v7011_v63 = vpop.f32.mrf.mxu1 }
 0x470   : > { %v7346_v45 = vadd.f32 %v7337_v62, %v7011_v63 }
 0x472   : > { %v6894_v44 = vpop.f32.mrf.mxu2  ;;  %10837 = vst [vmem:[%s14075_s24 + $0xb0] sm:$0xff] %v7346_v45 }
 0x473   : > { %v7343_v7 = vadd.f32 %v7334_v28, %v6894_v44  ;;  %v6933_v17 = vpop.f32.mrf.mxu3  ;;  %v7106_v52 = vpop.f32.mrf.mxu0 }
 0x474   : > { %v7344_v23 = vadd.f32 %v7335_v46, %v6933_v17  ;;  %v7204_v27 = vmul.f32 %v7106_v52, %v14089_v16 }
 0x475   : > { %10834 = vst [vmem:[%s14075_s24 + $0x98] sm:$0xff] %v7343_v7 }
 0x476   : > { %10835 = vst [vmem:[%s14075_s24 + $0xa0] sm:$0xff] %v7344_v23  ;;  %v7213_v3 = vadd.f32 %v7204_v27, %v7195_v1 }
 0x477   : > { %v7140_v5 = vpop.f32.mrf.mxu1 }
 0x478   : > { %v7178_v13 = vmul.f32 %v7140_v5, %v13129_v55 }
 0x47a   : > { %v7023_v9 = vpop.f32.mrf.mxu2 }
 0x47b   : > { %v7062_v20 = vpop.f32.mrf.mxu3  ;;  %v7108_v24 = vpop.f32.mrf.mxu0  ;;  %v7175_v30 = vmul.f32 %v7023_v9, %v12895_v18 }
 0x47c   : > { %v7222_v36 = vadd.f32 %v7213_v3, %v7108_v24  ;;  %v7176_v50 = vmul.f32 %v7062_v20, %v14218_v43 }
 0x47e   : > { %7231 = vst [vmem:[%s14075_s24 + $0x38] sm:$0xff] %v7222_v36 }
 0x47f   : > { %v7142_v37 = vpop.f32.mrf.mxu1 }
 0x480   : > { %v7187_v34 = vmul.f32 %v7142_v37, %v13732_v42 }
 0x482   : > { %v7025_v26 = vpop.f32.mrf.mxu2  ;;  %v7196_v56 = vadd.f32 %v7187_v34, %v7178_v13 }
 0x483   : > { %v7184_v25 = vmul.f32 %v7025_v26, %v14214_v39  ;;  %v7064_v29 = vpop.f32.mrf.mxu3  ;;  %v7111_v10 = vpop.f32.mrf.mxu0 }
 0x484   : > { %v7185_v47 = vmul.f32 %v7064_v29, %v13615_v60  ;;  %v7240_v35 = vmul.f32 %v7111_v10, %v13056_v48 }
 0x485   : > { %v7193_v61 = vadd.f32 %v7184_v25, %v7175_v30 }
 0x486   : > { %v7194_v41 = vadd.f32 %v7185_v47, %v7176_v50 }
 0x487   : > { %v7145_v49 = vpop.f32.mrf.mxu1 }
 0x488   : > { %v7205_v33 = vmul.f32 %v7145_v49, %v14231_v22 }
 0x48a   : > { %v7028_v11 = vpop.f32.mrf.mxu2  ;;  %v7214_v59 = vadd.f32 %v7205_v33, %v7196_v56 }
 0x48b   : > { %v7202_v32 = vmul.f32 %v7028_v11, %v14050_v4  ;;  %v7067_v21 = vpop.f32.mrf.mxu3  ;;  %v7113_v40 = vpop.f32.mrf.mxu0 }
 0x48c   : > { %v7203_v38 = vmul.f32 %v7067_v21, %v14078_v58  ;;  %v7249_v53 = vmul.f32 %v7113_v40, %v13688_v54 }
 0x48d   : > { %v7211_v31 = vadd.f32 %v7202_v32, %v7193_v61 }
 0x48e   : > { %v7212_v19 = vadd.f32 %v7203_v38, %v7194_v41  ;;  %v7258_v0 = vadd.f32 %v7249_v53, %v7240_v35 }
 0x48f   : > { %v7147_v2 = vpop.f32.mrf.mxu1 }
 0x490   : > { %v7223_v15 = vadd.f32 %v7214_v59, %v7147_v2 }
 0x492   : > { %v7030_v12 = vpop.f32.mrf.mxu2  ;;  %7232 = vst [vmem:[%s14075_s24 + $0x40] sm:$0xff] %v7223_v15 }
 0x493   : > { %v7220_v14 = vadd.f32 %v7211_v31, %v7030_v12  ;;  %v7069_v28 = vpop.f32.mrf.mxu3  ;;  %v7116_v6 = vpop.f32.mrf.mxu0 }
 0x494   : > { %v7221_v46 = vadd.f32 %v7212_v19, %v7069_v28  ;;  %v7267_v8 = vmul.f32 %v7116_v6, %v14089_v16 }
 0x495   : > { %7229 = vst [vmem:[%s14075_s24 + $0x28] sm:$0xff] %v7220_v14 }
 0x496   : > { %7230 = vst [vmem:[%s14075_s24 + $0x30] sm:$0xff] %v7221_v46  ;;  %v7276_v1 = vadd.f32 %v7267_v8, %v7258_v0 }
 0x497   : > { %v7150_v17 = vpop.f32.mrf.mxu1 }
 0x498   : > { %v7241_v36 = vmul.f32 %v7150_v17, %v13129_v55 }
 0x49a   : > { %v7033_v57 = vpop.f32.mrf.mxu2 }
 0x49b   : > { %v7072_v51 = vpop.f32.mrf.mxu3  ;;  %v7118_v44 = vpop.f32.mrf.mxu0  ;;  %v7238_v62 = vmul.f32 %v7033_v57, %v12895_v18 }
 0x49c   : > { %v7285_v7 = vadd.f32 %v7276_v1, %v7118_v44  ;;  %v7239_v63 = vmul.f32 %v7072_v51, %v14218_v43 }
 0x49e   : > { %10831 = vst [vmem:[%s14075_s24 + $0x80] sm:$0xff] %v7285_v7 }
 0x49f   : > { %v7152_v24 = vpop.f32.mrf.mxu1 }
 0x4a0   : > { %v7250_v5 = vmul.f32 %v7152_v24, %v13732_v42  ;;  %v7395_v24 = vld [vmem:[%s14075_s24 + $0x30] sm:$0xff] (%p11892_p8) }
 0x4a1   : > { %7396 = vst [vmem:[%s14277_s29 + $0x30] sm:$0xff] (%p11892_p8), %v7395_v24 }
 0x4a2   : > { %v7035_v23 = vpop.f32.mrf.mxu2  ;;  %v7259_v29 = vadd.f32 %v7250_v5, %v7241_v36  ;;  %v7397_v36 = vld [vmem:[%s14075_s24 + $0x38] sm:$0xff] (%p11892_p8)  ;;  %v7399_v5 = vld [vmem:[%s14075_s24 + $0x40] sm:$0xff] (%p11892_p8) }
 0x4a3   : > { %v7247_v52 = vmul.f32 %v7035_v23, %v14214_v39  ;;  %v7074_v27 = vpop.f32.mrf.mxu3  ;;  %v7121_v20 = vpop.f32.mrf.mxu0  ;;  %7398 = vst [vmem:[%s14277_s29 + $0x38] sm:$0xff] (%p11892_p8), %v7397_v36 }
 0x4a4   : > { %v7248_v45 = vmul.f32 %v7074_v27, %v13615_v60  ;;  %v7304_v10 = vmul.f32 %v7121_v20, %v13056_v48  ;;  %v7393_v20 = vld [vmem:[%s14075_s24 + $0x28] sm:$0xff] (%p11892_p8)  ;;  %7400 = vst [vmem:[%s14277_s29 + $0x40] sm:$0xff] (%p11892_p8), %v7399_v5 }
 0x4a5   : > { %v7256_v9 = vadd.f32 %v7247_v52, %v7238_v62  ;;  %7394 = vst [vmem:[%s14277_s29 + $0x28] sm:$0xff] (%p11892_p8), %v7393_v20 }
 0x4a6   : > { %v7257_v3 = vadd.f32 %v7248_v45, %v7239_v63 }
 0x4a7   : > { %v7155_v13 = vpop.f32.mrf.mxu1 }
 0x4a8   : > { %v7268_v11 = vmul.f32 %v7155_v13, %v14231_v22  ;;  %v7421_v13 = vld [vmem:[%s14075_s24 + $0x98] sm:$0xff] (%p11892_p8) }
 0x4a9   : > { %7422 = vst [vmem:[%s14277_s29 + $0x368] sm:$0xff] (%p11892_p8), %v7421_v13 }
 0x4aa   : > { %v7038_v26 = vpop.f32.mrf.mxu2  ;;  %v7277_v31 = vadd.f32 %v7268_v11, %v7259_v29  ;;  %v7407_v29 = vld [vmem:[%s14075_s24 + $0x60] sm:$0xff] (%p11892_p8)  ;;  %v7425_v11 = vld [vmem:[%s14075_s24 + $0xa8] sm:$0xff] (%p11892_p8) }
 0x4ab   : > { %v7265_v30 = vmul.f32 %v7038_v26, %v14050_v4  ;;  %v7077_v25 = vpop.f32.mrf.mxu3  ;;  %v7123_v41 = vpop.f32.mrf.mxu0  ;;  %v7401_v26 = vld [vmem:[%s14075_s24 + $0x48] sm:$0xff] (%p11892_p8)  ;;  %7408 = vst [vmem:[%s14277_s29 + $0x1c8] sm:$0xff] (%p11892_p8), %v7407_v29 }
 0x4ac   : > { %v7266_v50 = vmul.f32 %v7077_v25, %v14078_v58  ;;  %v7313_v37 = vmul.f32 %v7123_v41, %v13688_v54  ;;  %v7405_v25 = vld [vmem:[%s14075_s24 + $0x58] sm:$0xff] (%p11892_p8)  ;;  %7402 = vst [vmem:[%s14277_s29 + $0x1b0] sm:$0xff] (%p11892_p8), %v7401_v26  ;;  %v7415_v41 = vld [vmem:[%s14075_s24 + $0x80] sm:$0xff] (%p11892_p8) }
 0x4ad   : > { %v7274_v47 = vadd.f32 %v7265_v30, %v7256_v9  ;;  %v7389_v9 = vld [vmem:[%s14075_s24 + $0x18] sm:$0xff] (%p11892_p8)  ;;  %v7403_v30 = vld [vmem:[%s14075_s24 + $0x50] sm:$0xff] (%p11892_p8)  ;;  %7406 = vst [vmem:[%s14277_s29 + $0x1c0] sm:$0xff] (%p11892_p8), %v7405_v25 }
 0x4ae   : > { %v7275_v61 = vadd.f32 %v7266_v50, %v7257_v3  ;;  %v7322_v34 = vadd.f32 %v7313_v37, %v7304_v10  ;;  %v7391_v3 = vld [vmem:[%s14075_s24 + $0x20] sm:$0xff] (%p11892_p8)  ;;  %7390 = vst [vmem:[%s14277_s29 + $0x18] sm:$0xff] (%p11892_p8), %v7389_v9  ;;  %v7409_v50 = vld [vmem:[%s14075_s24 + $0x68] sm:$0xff] (%p11892_p8)  ;;  %v7419_v37 = vld [vmem:[%s14075_s24 + $0x90] sm:$0xff] (%p11892_p8) }
 0x4af   : > { %v7157_v35 = vpop.f32.mrf.mxu1  ;;  %7392 = vst [vmem:[%s14277_s29 + $0x20] sm:$0xff] (%p11892_p8), %v7391_v3 }
 0x4b0   : > { %v7286_v48 = vadd.f32 %v7277_v31, %v7157_v35  ;;  %7404 = vst [vmem:[%s14277_s29 + $0x1b8] sm:$0xff] (%p11892_p8), %v7403_v30 }
 0x4b1   : > { %7410 = vst [vmem:[%s14277_s29 + $0x1d0] sm:$0xff] (%p11892_p8), %v7409_v50 }
 0x4b2   : > { %v7040_v32 = vpop.f32.mrf.mxu2  ;;  %10832 = vst [vmem:[%s14075_s24 + $0x88] sm:$0xff] %v7286_v48 }
 0x4b3   : > { %v7283_v21 = vadd.f32 %v7274_v47, %v7040_v32  ;;  %v7079_v56 = vpop.f32.mrf.mxu3  ;;  %v7126_v19 = vpop.f32.mrf.mxu0  ;;  %7416 = vst [vmem:[%s14277_s29 + $0x1e8] sm:$0xff] (%p11892_p8), %v7415_v41  ;;  %v7427_v32 = vld [vmem:[%s14075_s24 + $0xb0] sm:$0xff] (%p11892_p8) }
 0x4b4   : > { %v7284_v38 = vadd.f32 %v7275_v61, %v7079_v56  ;;  %v7331_v40 = vmul.f32 %v7126_v19, %v14089_v16  ;;  %7420 = vst [vmem:[%s14277_s29 + $0x360] sm:$0xff] (%p11892_p8), %v7419_v37 }
 0x4b5   : > { %10829 = vst [vmem:[%s14075_s24 + $0x70] sm:$0xff] %v7283_v21 }
 0x4b6   : > { %10830 = vst [vmem:[%s14075_s24 + $0x78] sm:$0xff] %v7284_v38  ;;  %v7340_v54 = vadd.f32 %v7331_v40, %v7322_v34  ;;  %v7423_v34 = vld [vmem:[%s14075_s24 + $0xa0] sm:$0xff] (%p11892_p8) }
 0x4b7   : > { %v7160_v12 = vpop.f32.mrf.mxu1  ;;  %7424 = vst [vmem:[%s14277_s29 + $0x370] sm:$0xff] (%p11892_p8), %v7423_v34 }
 0x4b8   : > { %v7305_v57 = vmul.f32 %v7160_v12, %v13129_v55  ;;  %7426 = vst [vmem:[%s14277_s29 + $0x378] sm:$0xff] (%p11892_p8), %v7425_v11 }
 0x4b9   : > { %v7417_v10 = vld [vmem:[%s14075_s24 + $0x88] sm:$0xff] (%p11892_p8)  ;;  %7428 = vst [vmem:[%s14277_s29 + $0x380] sm:$0xff] (%p11892_p8), %v7427_v32 }
 0x4ba   : > { %v7043_v53 = vpop.f32.mrf.mxu2  ;;  %7418 = vst [vmem:[%s14277_s29 + $0x1f0] sm:$0xff] (%p11892_p8), %v7417_v10 }
 0x4bb   : > { %v7082_v49 = vpop.f32.mrf.mxu3  ;;  %v7128_v0 = vpop.f32.mrf.mxu0  ;;  %v7302_v28 = vmul.f32 %v7043_v53, %v12895_v18 }
 0x4bc   : > { %v7349_v33 = vadd.f32 %v7340_v54, %v7128_v0  ;;  %v7303_v6 = vmul.f32 %v7082_v49, %v14218_v43  ;;  %v7411_v47 = vld [vmem:[%s14075_s24 + $0x70] sm:$0xff] (%p11892_p8) }
 0x4bd   : > { %v7413_v61 = vld [vmem:[%s14075_s24 + $0x78] sm:$0xff] (%p11892_p8)  ;;  %7412 = vst [vmem:[%s14277_s29 + $0x1d8] sm:$0xff] (%p11892_p8), %v7411_v47 }
 0x4be   : > { %10840 = vst [vmem:[%s14075_s24 + $0xc8] sm:$0xff] %v7349_v33 }
 0x4bf   : > { %v7162_v15 = vpop.f32.mrf.mxu1  ;;  %7414 = vst [vmem:[%s14277_s29 + $0x1e0] sm:$0xff] (%p11892_p8), %v7413_v61 }
 0x4c0   : > { %v7314_v1 = vmul.f32 %v7162_v15, %v13732_v42 }
 0x4c2   : > { %v7045_v14 = vpop.f32.mrf.mxu2 }
 0x4c3   : > { %v7311_v46 = vmul.f32 %v7045_v14, %v14214_v39  ;;  %v7084_v59 = vpop.f32.mrf.mxu3  ;;  %v7323_v39 = vadd.f32 %v7314_v1, %v7305_v57 }
 0x4c4   : > { %v7312_v16 = vmul.f32 %v7084_v59, %v13615_v60 }
 0x4c5   : > { %v7320_v8 = vadd.f32 %v7311_v46, %v7302_v28  ;;  %v7433_v38 = vld [vmem:[%s14075_s24 + $0xc8] sm:$0xff] (%p11892_p8) }
 0x4c6   : > { %v7321_v2 = vadd.f32 %v7312_v16, %v7303_v6  ;;  %7434 = vst [vmem:[%s14277_s29 + $0x398] sm:$0xff] (%p11892_p8), %v7433_v38 }
 0x4c7   : > { %v7165_v60 = vpop.f32.mrf.mxu1 }
 0x4c8   : > { %v7332_v23 = vmul.f32 %v7165_v60, %v14231_v22  ;;  %v7387_v22 = vld [vmem:[%s14075_s24 + $0x10] sm:$0xff] (%p11892_p8) }
 0x4c9   : > { %7388 = vst [vmem:[%s14277_s29 + $0x10] sm:$0xff] (%p11892_p8), %v7387_v22 }
 0x4ca   : > { %v7048_v51 = vpop.f32.mrf.mxu2  ;;  %v7341_v63 = vadd.f32 %v7332_v23, %v7323_v39 }
 0x4cb   : > { %v7329_v44 = vmul.f32 %v7048_v51, %v14050_v4  ;;  %v7087_v18 = vpop.f32.mrf.mxu3  ;;  %v7383_v4 = vld [vmem:[%s14075_s24] sm:$0xff] (%p11892_p8) }
 0x4cc   : > { %v7330_v7 = vmul.f32 %v7087_v18, %v14078_v58  ;;  %v7385_v58 = vld [vmem:[%s14075_s24 + $0x8] sm:$0xff] (%p11892_p8)  ;;  %7384 = vst [vmem:[%s14277_s29] sm:$0xff] (%p11892_p8), %v7383_v4 }
 0x4cd   : > { %v7338_v43 = vadd.f32 %v7329_v44, %v7320_v8  ;;  %7386 = vst [vmem:[%s14277_s29 + $0x8] sm:$0xff] (%p11892_p8), %v7385_v58 }
 0x4ce   : > { %v7339_v17 = vadd.f32 %v7330_v7, %v7321_v2 }
 0x4cf   : > { %v7167_v42 = vpop.f32.mrf.mxu1 }
 0x4d0   : > { %v7350_v45 = vadd.f32 %v7341_v63, %v7167_v42 }
 0x4d2   : > { %v7050_v62 = vpop.f32.mrf.mxu2  ;;  %10841 = vst [vmem:[%s14075_s24 + $0xd0] sm:$0xff] %v7350_v45  ;;  %7367 = sbr.rel (!%p11892_p8) target bundleno = 1247 (0x4df), region = 86 }
 0x4d3   : > { %v7347_v52 = vadd.f32 %v7338_v43, %v7050_v62  ;;  %v7089_v55 = vpop.f32.mrf.mxu3 }
 0x4d4   : > { %v7348_v27 = vadd.f32 %v7339_v17, %v7089_v55 }
 0x4d5   : > { %10838 = vst [vmem:[%s14075_s24 + $0xb8] sm:$0xff] %v7347_v52 }
 0x4d6   : > { %10839 = vst [vmem:[%s14075_s24 + $0xc0] sm:$0xff] %v7348_v27 }
 0x4d9   : > { %v7435_v31 = vld [vmem:[%s14075_s24 + $0xd0] sm:$0xff] }
 0x4da   : > { %7436 = vst [vmem:[%s14277_s29 + $0x3a0] sm:$0xff] %v7435_v31 }
 0x4dc   : > { %v7429_v21 = vld [vmem:[%s14075_s24 + $0xb8] sm:$0xff] }
 0x4dd   : > { %v7431_v56 = vld [vmem:[%s14075_s24 + $0xc0] sm:$0xff]  ;;  %7430 = vst [vmem:[%s14277_s29 + $0x388] sm:$0xff] %v7429_v21 }
 0x4de   : > { %7432 = vst [vmem:[%s14277_s29 + $0x390] sm:$0xff] %v7431_v56 }
 0x4df PF: > { %s14364_s24 = sld [smem:[#allocation12_spill]]  ;;  %s14367_s21 = smov %s11800_s22 }
 0x4e0   : > { %s14365_s25 = sld [smem:[#allocation11_spill]] }
 0x4e1   : > { %s14366_s23 = sld [smem:[#allocation13_spill]] }
 0x4e5   : > { %p19_p7 = scmp.ge.s32.totalorder %s14364_s24, 8  }
 0x4e6   : > { %s14368_s22 = smov %s14365_s25 }
 0x4e7   :  { %21 = sbr.rel (!%p19_p7) target bundleno = 8 (0x8), region = 173 }
 0x4ec   :  { %7452 = vsyncpa [#allocation3], 1 }
 0x4ed   :  { %7454 = vsyncpa [#allocation3 + $0x1], 1 }
 0x4ee   :  { %7455 = vsyncpa [#allocation5], 1 }
 0x4ef   :  { %7457 = vsyncpa [#allocation5 + $0x1], 1 }

</bundles_post_ra>
